<compile_context>
chip_gen: v7x
topology: tpu7x:2x2x1
jax: 0.10.0
libtpu: 0.0.40
codegen_flags: <defaults>
</compile_context>

<pallas_src>
import math

import jax
import jax.numpy as jnp
from jax.experimental import pallas as pl
from jax.experimental.pallas import tpu as pltpu


# ------------------------------ fast bounded sin -----------------------------

_TWO_PI = 2.0 * math.pi
_INV_TWO_PI = 1.0 / _TWO_PI
_TWO_PI_HI = 6.28125                    # exact in f32 (201 / 32)
_TWO_PI_LO = _TWO_PI - _TWO_PI_HI       # ~1.9353072e-3

# Odd Taylor coefficients for r^3 .. r^15 (truncation error < 8e-7 on [-pi, pi]).
_SIN_COEFFS = (
    -1.0 / 6.0,
    1.0 / 120.0,
    -1.0 / 5040.0,
    1.0 / 362880.0,
    -1.0 / 39916800.0,
    1.0 / 6227020800.0,
    -1.0 / 1307674368000.0,
)


def _fast_sin(z):
    """sin(z) for bounded |z| (<~ 50 after w0 folding), ~20 VPU ops.

    Two-constant Cody-Waite reduction to r in ~[-pi, pi] followed by a
    degree-15 odd polynomial.  Per-element error ~1e-6, which stays well inside
    the 1e-3 reference tolerance even after propagation through later layers.
    """
    k = jnp.floor(z * _INV_TWO_PI + 0.5)
    r = (z - k * _TWO_PI_HI) - k * _TWO_PI_LO
    r2 = r * r
    p = jnp.float32(_SIN_COEFFS[-1])
    for c in reversed(_SIN_COEFFS[:-1]):
        p = p * r2 + c
    return r + (r * r2) * p


# --------------------------------- kernel ------------------------------------

def _make_siren_kernel(sine_flags):
    """sine_flags: tuple of bool, one per layer. True => sin(z), False => identity."""

    def kernel(x_ref, *refs):
        # refs = (W_0, b_0, W_1, b_1, ..., W_L, b_L, o_ref)
        o_ref = refs[-1]
        param_refs = refs[:-1]
        h = x_ref[...]                                # (dim_in, tile_n) f32
        for li, is_sine in enumerate(sine_flags):
            w = param_refs[2 * li][...]               # (dout, din) -- w0 folded in
            b = param_refs[2 * li + 1][...]           # (dout, 1)
            z = jnp.dot(w, h, preferred_element_type=jnp.float32) + b
            h = _fast_sin(z) if is_sine else z
        o_ref[...] = h.astype(o_ref.dtype)

    return kernel


def _choose_tiling(n, tile_n_req):
    """Pick (tile_n, grid_n).

    tile_n is rounded up to a multiple of 128.  When there is more than one
    128-lane chunk of work we keep >= 2 grid steps (and round the step count up
    to an even number when possible) so v7x's two TensorCores both get a share
    under dimension_semantics=("parallel",).
    """
    n128 = pl.cdiv(n, 128)                               # 128-lane chunks of work
    tb = max(1, min(pl.cdiv(tile_n_req, 128), n128))     # tile size in chunks
    grid = pl.cdiv(n128, tb)
    if n128 >= 2:
        grid = max(2, grid)
        if grid % 2:
            grid += 1                                    # prefer even step count
        grid = min(grid, n128)
        tb = pl.cdiv(n128, grid)
        grid = pl.cdiv(n128, tb)
    return tb * 128, grid


def siren_forward_fm(x_fm, folded_params, sine_flags, *, tile_n=8192):
    """Feature-major forward.

    x_fm: (dim_in, N) f32 (samples on the lane axis).  Returns (dim_out, N) f32.
    No transposes, no host-side padding: a ragged final block is handled by
    Pallas block padding (garbage lanes stay column-local and OOB output writes
    are dropped).
    """
    dim_in, n = x_fm.shape
    dim_out = folded_params[-1][0].shape[0]

    tile_n, grid_n = _choose_tiling(n, tile_n)

    kernel = _make_siren_kernel(tuple(sine_flags))

    in_specs = [pl.BlockSpec((dim_in, tile_n), lambda i: (0, i))]
    flat_params = []
    for (w, b) in folded_params:
        in_specs.append(pl.BlockSpec(w.shape, lambda i: (0, 0)))
        in_specs.append(pl.BlockSpec(b.shape, lambda i: (0, 0)))
        flat_params.extend([w, b])

    return pl.pallas_call(
        kernel,
        out_shape=jax.ShapeDtypeStruct((dim_out, n), jnp.float32),
        grid=(grid_n,),
        in_specs=in_specs,
        out_specs=pl.BlockSpec((dim_out, tile_n), lambda i: (0, i)),
        compiler_params=pltpu.CompilerParams(
            dimension_semantics=("parallel",),
        ),
    )(x_fm, *flat_params)


def siren_forward(x, folded_params, sine_flags, *, tile_n=8192):
    """Sample-major convenience wrapper: (N, dim_in) -> (N, dim_out).

    Prefer siren_forward_fm with feature-major data: each transpose here is an
    extra HBM round trip outside the kernel.
    """
    return siren_forward_fm(x.T, folded_params, sine_flags, tile_n=tile_n).T


# ------------------------- init / pure-JAX reference -------------------------

def init_siren_params(key, dim_in, dim_hidden, dim_out, num_layers,
                      w0=30.0, w0_initial=30.0, c=6.0, use_bias=True):
    """SIREN init with the same distributions as the PyTorch module.

    Returns:
      raw_params:    list of (W (dout,din), b (dout,), layer_w0, has_sine) for
                     the pure-JAX reference (exact PyTorch semantics).
      folded_params: list of (W', b') with w0 folded into Sine layers, laid out
                     for the feature-major kernel (b' is (dout, 1)).
      sine_flags:    list of bool per layer.
    """
    layer_cfg = []
    for ind in range(num_layers):
        is_first = ind == 0
        layer_cfg.append((dim_in if is_first else dim_hidden, dim_hidden,
                          w0_initial if is_first else w0, is_first, True))
    # last layer: Identity activation
    layer_cfg.append((dim_hidden, dim_out, w0, False, False))

    raw_params, folded_params, sine_flags = [], [], []
    for (din, dout, layer_w0, is_first, has_sine) in layer_cfg:
        w_std = (1.0 / din) if is_first else (math.sqrt(c / din) / layer_w0)
        key, kw, kb = jax.random.split(key, 3)
        W = jax.random.uniform(kw, (dout, din), jnp.float32, -w_std, w_std)
        if use_bias:
            b = jax.random.uniform(kb, (dout,), jnp.float32, -w_std, w_std)
        else:
            b = jnp.zeros((dout,), jnp.float32)
        raw_params.append((W, b, layer_w0, has_sine))
        scale = jnp.float32(layer_w0) if has_sine else jnp.float32(1.0)
        folded_params.append((scale * W, (scale * b).reshape(dout, 1)))
        sine_flags.append(has_sine)
    return raw_params, folded_params, sine_flags


def siren_reference(x, raw_params):
    """Pure-JAX reference matching the PyTorch forward exactly (no folding)."""
    h = x
    for (W, b, layer_w0, has_sine) in raw_params:
        z = h @ W.T + b
        h = jnp.sin(layer_w0 * z) if has_sine else z
    return h


# ----------------------------------- test ------------------------------------

if __name__ == "__main__":
    # Coordinate-MLP shapes consistent with the module (video coords -> RGB).
    dim_in, dim_hidden, dim_out, num_layers = 3, 32, 3, 3

    key = jax.random.PRNGKey(0)
    key, kp = jax.random.split(key)
    raw_params, folded_params, sine_flags = init_siren_params(
        kp, dim_in, dim_hidden, dim_out, num_layers,
        w0=30.0, w0_initial=30.0, use_bias=True)

    # Case 1: feature-major, lane-aligned N, even multi-step grid (2 x 2048).
    key, kx1 = jax.random.split(key)
    N1 = 4096
    x1_fm = jax.random.uniform(kx1, (dim_in, N1), jnp.float32, -1.0, 1.0)
    out1 = jax.block_until_ready(
        siren_forward_fm(x1_fm, folded_params, sine_flags, tile_n=2048))
    ref1 = siren_reference(x1_fm.T, raw_params).T
    assert out1.shape == (dim_out, N1)
    assert jnp.allclose(out1, ref1, atol=1e-3, rtol=1e-3), "mismatch vs reference (N1)"

    # Case 2: ragged N exercising the partial final block (no host-side pad).
    key, kx2 = jax.random.split(key)
    N2 = 777
    x2_fm = jax.random.uniform(kx2, (dim_in, N2), jnp.float32, -1.0, 1.0)
    out2 = jax.block_until_ready(
        siren_forward_fm(x2_fm, folded_params, sine_flags, tile_n=2048))
    ref2 = siren_reference(x2_fm.T, raw_params).T
    assert out2.shape == (dim_out, N2)
    assert jnp.allclose(out2, ref2, atol=1e-3, rtol=1e-3), "mismatch vs reference (N2)"

    # Case 3: sample-major convenience path (nn.Module calling convention).
    key, kx3 = jax.random.split(key)
    N3 = 512
    x3 = jax.random.uniform(kx3, (N3, dim_in), jnp.float32, -1.0, 1.0)
    out3 = jax.block_until_ready(siren_forward(x3, folded_params, sine_flags))
    ref3 = siren_reference(x3, raw_params)
    assert out3.shape == (N3, dim_out)
    assert jnp.allclose(out3, ref3, atol=1e-3, rtol=1e-3), "mismatch vs reference (N3)"

    print("KERNEL_OK")
</pallas_src>

<mosaic_0001>
module attributes {stable_mosaic.version = 11 : i64} {
  func.func @kernel(%arg0: i32, %arg1: memref<3x2048xf32, #tpu.memory_space<vmem>>, %arg2: memref<32x3xf32, #tpu.memory_space<vmem>>, %arg3: memref<32x1xf32, #tpu.memory_space<vmem>>, %arg4: memref<32x32xf32, #tpu.memory_space<vmem>>, %arg5: memref<32x1xf32, #tpu.memory_space<vmem>>, %arg6: memref<32x32xf32, #tpu.memory_space<vmem>>, %arg7: memref<32x1xf32, #tpu.memory_space<vmem>>, %arg8: memref<3x32xf32, #tpu.memory_space<vmem>>, %arg9: memref<3x1xf32, #tpu.memory_space<vmem>>, %arg10: memref<3x2048xf32, #tpu.memory_space<vmem>>) attributes {dimension_semantics = [#tpu.dimension_semantics<parallel>], iteration_bounds = array<i64: 2>, scalar_prefetch = 0 : i64, scratch_operands = 0 : i64, tpu.core_type = #tpu.core_type<tc>, window_params = [{transform_indices = @transform_0, window_bounds = array<i64: 3, 2048>}, {pipeline_mode = #tpu.pipeline_mode<synchronous>, transform_indices = @transform_1, window_bounds = array<i64: 32, 3>}, {pipeline_mode = #tpu.pipeline_mode<synchronous>, transform_indices = @transform_2, window_bounds = array<i64: 32, 1>}, {pipeline_mode = #tpu.pipeline_mode<synchronous>, transform_indices = @transform_3, window_bounds = array<i64: 32, 32>}, {pipeline_mode = #tpu.pipeline_mode<synchronous>, transform_indices = @transform_4, window_bounds = array<i64: 32, 1>}, {pipeline_mode = #tpu.pipeline_mode<synchronous>, transform_indices = @transform_5, window_bounds = array<i64: 32, 32>}, {pipeline_mode = #tpu.pipeline_mode<synchronous>, transform_indices = @transform_6, window_bounds = array<i64: 32, 1>}, {pipeline_mode = #tpu.pipeline_mode<synchronous>, transform_indices = @transform_7, window_bounds = array<i64: 3, 32>}, {pipeline_mode = #tpu.pipeline_mode<synchronous>, transform_indices = @transform_8, window_bounds = array<i64: 3, 1>}, {transform_indices = @transform_9, window_bounds = array<i64: 3, 2048>}]} {
    %c0 = arith.constant 0 : index
    %c0_0 = arith.constant 0 : index
    %0 = vector.load %arg1[%c0, %c0_0] : memref<3x2048xf32, #tpu.memory_space<vmem>>, vector<3x2048xf32>
    %c0_1 = arith.constant 0 : index
    %c0_2 = arith.constant 0 : index
    %1 = vector.load %arg2[%c0_1, %c0_2] : memref<32x3xf32, #tpu.memory_space<vmem>>, vector<32x3xf32>
    %c0_3 = arith.constant 0 : index
    %c0_4 = arith.constant 0 : index
    %2 = vector.load %arg3[%c0_3, %c0_4] : memref<32x1xf32, #tpu.memory_space<vmem>>, vector<32x1xf32>
    %cst = arith.constant dense<0.000000e+00> : vector<32x2048xf32>
    %3 = tpu.matmul %1, %0, %cst {dimension_numbers = #tpu.dot_dimension_numbers<[1], [0], [0], [1], [0, 0, 1, 1], [], []>} : vector<32x3xf32>, vector<3x2048xf32>, vector<32x2048xf32> -> vector<32x2048xf32>
    %4 = vector.broadcast %2 : vector<32x1xf32> to vector<32x2048xf32>
    %5 = arith.addf %3, %4 : vector<32x2048xf32>
    %cst_5 = arith.constant 0.159154937 : f32
    %6 = vector.broadcast %cst_5 : f32 to vector<32x2048xf32>
    %7 = arith.mulf %5, %6 : vector<32x2048xf32>
    %cst_6 = arith.constant 5.000000e-01 : f32
    %8 = vector.broadcast %cst_6 : f32 to vector<32x2048xf32>
    %9 = arith.addf %7, %8 : vector<32x2048xf32>
    %10 = math.floor %9 : vector<32x2048xf32>
    %cst_7 = arith.constant 6.281250e+00 : f32
    %11 = vector.broadcast %cst_7 : f32 to vector<32x2048xf32>
    %12 = arith.mulf %10, %11 : vector<32x2048xf32>
    %13 = arith.subf %5, %12 : vector<32x2048xf32>
    %cst_8 = arith.constant 0.00193530717 : f32
    %14 = vector.broadcast %cst_8 : f32 to vector<32x2048xf32>
    %15 = arith.mulf %10, %14 : vector<32x2048xf32>
    %16 = arith.subf %13, %15 : vector<32x2048xf32>
    %17 = arith.mulf %16, %16 : vector<32x2048xf32>
    %cst_9 = arith.constant -7.6471636E-13 : f32
    %18 = vector.broadcast %cst_9 : f32 to vector<32x2048xf32>
    %19 = arith.mulf %18, %17 : vector<32x2048xf32>
    %cst_10 = arith.constant 1.60590444E-10 : f32
    %20 = vector.broadcast %cst_10 : f32 to vector<32x2048xf32>
    %21 = arith.addf %19, %20 : vector<32x2048xf32>
    %22 = arith.mulf %21, %17 : vector<32x2048xf32>
    %cst_11 = arith.constant -2.50521079E-8 : f32
    %23 = vector.broadcast %cst_11 : f32 to vector<32x2048xf32>
    %24 = arith.addf %22, %23 : vector<32x2048xf32>
    %25 = arith.mulf %24, %17 : vector<32x2048xf32>
    %cst_12 = arith.constant 2.75573188E-6 : f32
    %26 = vector.broadcast %cst_12 : f32 to vector<32x2048xf32>
    %27 = arith.addf %25, %26 : vector<32x2048xf32>
    %28 = arith.mulf %27, %17 : vector<32x2048xf32>
    %cst_13 = arith.constant -1.98412701E-4 : f32
    %29 = vector.broadcast %cst_13 : f32 to vector<32x2048xf32>
    %30 = arith.addf %28, %29 : vector<32x2048xf32>
    %31 = arith.mulf %30, %17 : vector<32x2048xf32>
    %cst_14 = arith.constant 0.00833333377 : f32
    %32 = vector.broadcast %cst_14 : f32 to vector<32x2048xf32>
    %33 = arith.addf %31, %32 : vector<32x2048xf32>
    %34 = arith.mulf %33, %17 : vector<32x2048xf32>
    %cst_15 = arith.constant -0.166666672 : f32
    %35 = vector.broadcast %cst_15 : f32 to vector<32x2048xf32>
    %36 = arith.addf %34, %35 : vector<32x2048xf32>
    %37 = arith.mulf %16, %17 : vector<32x2048xf32>
    %38 = arith.mulf %37, %36 : vector<32x2048xf32>
    %39 = arith.addf %16, %38 : vector<32x2048xf32>
    %c0_16 = arith.constant 0 : index
    %c0_17 = arith.constant 0 : index
    %40 = vector.load %arg4[%c0_16, %c0_17] : memref<32x32xf32, #tpu.memory_space<vmem>>, vector<32x32xf32>
    %c0_18 = arith.constant 0 : index
    %c0_19 = arith.constant 0 : index
    %41 = vector.load %arg5[%c0_18, %c0_19] : memref<32x1xf32, #tpu.memory_space<vmem>>, vector<32x1xf32>
    %cst_20 = arith.constant dense<0.000000e+00> : vector<32x2048xf32>
    %42 = tpu.matmul %40, %39, %cst_20 {dimension_numbers = #tpu.dot_dimension_numbers<[1], [0], [0], [1], [0, 0, 1, 1], [], []>} : vector<32x32xf32>, vector<32x2048xf32>, vector<32x2048xf32> -> vector<32x2048xf32>
    %43 = vector.broadcast %41 : vector<32x1xf32> to vector<32x2048xf32>
    %44 = arith.addf %42, %43 : vector<32x2048xf32>
    %cst_21 = arith.constant 0.159154937 : f32
    %45 = vector.broadcast %cst_21 : f32 to vector<32x2048xf32>
    %46 = arith.mulf %44, %45 : vector<32x2048xf32>
    %cst_22 = arith.constant 5.000000e-01 : f32
    %47 = vector.broadcast %cst_22 : f32 to vector<32x2048xf32>
    %48 = arith.addf %46, %47 : vector<32x2048xf32>
    %49 = math.floor %48 : vector<32x2048xf32>
    %cst_23 = arith.constant 6.281250e+00 : f32
    %50 = vector.broadcast %cst_23 : f32 to vector<32x2048xf32>
    %51 = arith.mulf %49, %50 : vector<32x2048xf32>
    %52 = arith.subf %44, %51 : vector<32x2048xf32>
    %cst_24 = arith.constant 0.00193530717 : f32
    %53 = vector.broadcast %cst_24 : f32 to vector<32x2048xf32>
    %54 = arith.mulf %49, %53 : vector<32x2048xf32>
    %55 = arith.subf %52, %54 : vector<32x2048xf32>
    %56 = arith.mulf %55, %55 : vector<32x2048xf32>
    %cst_25 = arith.constant -7.6471636E-13 : f32
    %57 = vector.broadcast %cst_25 : f32 to vector<32x2048xf32>
    %58 = arith.mulf %57, %56 : vector<32x2048xf32>
    %cst_26 = arith.constant 1.60590444E-10 : f32
    %59 = vector.broadcast %cst_26 : f32 to vector<32x2048xf32>
    %60 = arith.addf %58, %59 : vector<32x2048xf32>
    %61 = arith.mulf %60, %56 : vector<32x2048xf32>
    %cst_27 = arith.constant -2.50521079E-8 : f32
    %62 = vector.broadcast %cst_27 : f32 to vector<32x2048xf32>
    %63 = arith.addf %61, %62 : vector<32x2048xf32>
    %64 = arith.mulf %63, %56 : vector<32x2048xf32>
    %cst_28 = arith.constant 2.75573188E-6 : f32
    %65 = vector.broadcast %cst_28 : f32 to vector<32x2048xf32>
    %66 = arith.addf %64, %65 : vector<32x2048xf32>
    %67 = arith.mulf %66, %56 : vector<32x2048xf32>
    %cst_29 = arith.constant -1.98412701E-4 : f32
    %68 = vector.broadcast %cst_29 : f32 to vector<32x2048xf32>
    %69 = arith.addf %67, %68 : vector<32x2048xf32>
    %70 = arith.mulf %69, %56 : vector<32x2048xf32>
    %cst_30 = arith.constant 0.00833333377 : f32
    %71 = vector.broadcast %cst_30 : f32 to vector<32x2048xf32>
    %72 = arith.addf %70, %71 : vector<32x2048xf32>
    %73 = arith.mulf %72, %56 : vector<32x2048xf32>
    %cst_31 = arith.constant -0.166666672 : f32
    %74 = vector.broadcast %cst_31 : f32 to vector<32x2048xf32>
    %75 = arith.addf %73, %74 : vector<32x2048xf32>
    %76 = arith.mulf %55, %56 : vector<32x2048xf32>
    %77 = arith.mulf %76, %75 : vector<32x2048xf32>
    %78 = arith.addf %55, %77 : vector<32x2048xf32>
    %c0_32 = arith.constant 0 : index
    %c0_33 = arith.constant 0 : index
    %79 = vector.load %arg6[%c0_32, %c0_33] : memref<32x32xf32, #tpu.memory_space<vmem>>, vector<32x32xf32>
    %c0_34 = arith.constant 0 : index
    %c0_35 = arith.constant 0 : index
    %80 = vector.load %arg7[%c0_34, %c0_35] : memref<32x1xf32, #tpu.memory_space<vmem>>, vector<32x1xf32>
    %cst_36 = arith.constant dense<0.000000e+00> : vector<32x2048xf32>
    %81 = tpu.matmul %79, %78, %cst_36 {dimension_numbers = #tpu.dot_dimension_numbers<[1], [0], [0], [1], [0, 0, 1, 1], [], []>} : vector<32x32xf32>, vector<32x2048xf32>, vector<32x2048xf32> -> vector<32x2048xf32>
    %82 = vector.broadcast %80 : vector<32x1xf32> to vector<32x2048xf32>
    %83 = arith.addf %81, %82 : vector<32x2048xf32>
    %cst_37 = arith.constant 0.159154937 : f32
    %84 = vector.broadcast %cst_37 : f32 to vector<32x2048xf32>
    %85 = arith.mulf %83, %84 : vector<32x2048xf32>
    %cst_38 = arith.constant 5.000000e-01 : f32
    %86 = vector.broadcast %cst_38 : f32 to vector<32x2048xf32>
    %87 = arith.addf %85, %86 : vector<32x2048xf32>
    %88 = math.floor %87 : vector<32x2048xf32>
    %cst_39 = arith.constant 6.281250e+00 : f32
    %89 = vector.broadcast %cst_39 : f32 to vector<32x2048xf32>
    %90 = arith.mulf %88, %89 : vector<32x2048xf32>
    %91 = arith.subf %83, %90 : vector<32x2048xf32>
    %cst_40 = arith.constant 0.00193530717 : f32
    %92 = vector.broadcast %cst_40 : f32 to vector<32x2048xf32>
    %93 = arith.mulf %88, %92 : vector<32x2048xf32>
    %94 = arith.subf %91, %93 : vector<32x2048xf32>
    %95 = arith.mulf %94, %94 : vector<32x2048xf32>
    %cst_41 = arith.constant -7.6471636E-13 : f32
    %96 = vector.broadcast %cst_41 : f32 to vector<32x2048xf32>
    %97 = arith.mulf %96, %95 : vector<32x2048xf32>
    %cst_42 = arith.constant 1.60590444E-10 : f32
    %98 = vector.broadcast %cst_42 : f32 to vector<32x2048xf32>
    %99 = arith.addf %97, %98 : vector<32x2048xf32>
    %100 = arith.mulf %99, %95 : vector<32x2048xf32>
    %cst_43 = arith.constant -2.50521079E-8 : f32
    %101 = vector.broadcast %cst_43 : f32 to vector<32x2048xf32>
    %102 = arith.addf %100, %101 : vector<32x2048xf32>
    %103 = arith.mulf %102, %95 : vector<32x2048xf32>
    %cst_44 = arith.constant 2.75573188E-6 : f32
    %104 = vector.broadcast %cst_44 : f32 to vector<32x2048xf32>
    %105 = arith.addf %103, %104 : vector<32x2048xf32>
    %106 = arith.mulf %105, %95 : vector<32x2048xf32>
    %cst_45 = arith.constant -1.98412701E-4 : f32
    %107 = vector.broadcast %cst_45 : f32 to vector<32x2048xf32>
    %108 = arith.addf %106, %107 : vector<32x2048xf32>
    %109 = arith.mulf %108, %95 : vector<32x2048xf32>
    %cst_46 = arith.constant 0.00833333377 : f32
    %110 = vector.broadcast %cst_46 : f32 to vector<32x2048xf32>
    %111 = arith.addf %109, %110 : vector<32x2048xf32>
    %112 = arith.mulf %111, %95 : vector<32x2048xf32>
    %cst_47 = arith.constant -0.166666672 : f32
    %113 = vector.broadcast %cst_47 : f32 to vector<32x2048xf32>
    %114 = arith.addf %112, %113 : vector<32x2048xf32>
    %115 = arith.mulf %94, %95 : vector<32x2048xf32>
    %116 = arith.mulf %115, %114 : vector<32x2048xf32>
    %117 = arith.addf %94, %116 : vector<32x2048xf32>
    %c0_48 = arith.constant 0 : index
    %c0_49 = arith.constant 0 : index
    %118 = vector.load %arg8[%c0_48, %c0_49] : memref<3x32xf32, #tpu.memory_space<vmem>>, vector<3x32xf32>
    %c0_50 = arith.constant 0 : index
    %c0_51 = arith.constant 0 : index
    %119 = vector.load %arg9[%c0_50, %c0_51] : memref<3x1xf32, #tpu.memory_space<vmem>>, vector<3x1xf32>
    %cst_52 = arith.constant dense<0.000000e+00> : vector<3x2048xf32>
    %120 = tpu.matmul %118, %117, %cst_52 {dimension_numbers = #tpu.dot_dimension_numbers<[1], [0], [0], [1], [0, 0, 1, 1], [], []>} : vector<3x32xf32>, vector<32x2048xf32>, vector<3x2048xf32> -> vector<3x2048xf32>
    %121 = vector.broadcast %119 : vector<3x1xf32> to vector<3x2048xf32>
    %122 = arith.addf %120, %121 : vector<3x2048xf32>
    %c0_53 = arith.constant 0 : index
    %c0_54 = arith.constant 0 : index
    %123 = vector.load %arg10[%c0_53, %c0_54] : memref<3x2048xf32, #tpu.memory_space<vmem>>, vector<3x2048xf32>
    tpu.vector_store %arg10[%c0_53, %c0_54], %122 {strides = array<i32>} : memref<3x2048xf32, #tpu.memory_space<vmem>>, vector<3x2048xf32>,
    return
  }
  func.func @transform_0(%arg0: i32) -> (i32, i32) {
    %c0_i32 = arith.constant 0 : i32
    %c0_i32_0 = arith.constant 0 : i32
    return %c0_i32, %arg0 : i32, i32
  }
  func.func @transform_1(%arg0: i32) -> (i32, i32) {
    %c0_i32 = arith.constant 0 : i32
    %c0_i32_0 = arith.constant 0 : i32
    %c0_i32_1 = arith.constant 0 : i32
    return %c0_i32, %c0_i32_0 : i32, i32
  }
  func.func @transform_2(%arg0: i32) -> (i32, i32) {
    %c0_i32 = arith.constant 0 : i32
    %c0_i32_0 = arith.constant 0 : i32
    %c0_i32_1 = arith.constant 0 : i32
    return %c0_i32, %c0_i32_0 : i32, i32
  }
  func.func @transform_3(%arg0: i32) -> (i32, i32) {
    %c0_i32 = arith.constant 0 : i32
    %c0_i32_0 = arith.constant 0 : i32
    %c0_i32_1 = arith.constant 0 : i32
    return %c0_i32, %c0_i32_0 : i32, i32
  }
  func.func @transform_4(%arg0: i32) -> (i32, i32) {
    %c0_i32 = arith.constant 0 : i32
    %c0_i32_0 = arith.constant 0 : i32
    %c0_i32_1 = arith.constant 0 : i32
    return %c0_i32, %c0_i32_0 : i32, i32
  }
  func.func @transform_5(%arg0: i32) -> (i32, i32) {
    %c0_i32 = arith.constant 0 : i32
    %c0_i32_0 = arith.constant 0 : i32
    %c0_i32_1 = arith.constant 0 : i32
    return %c0_i32, %c0_i32_0 : i32, i32
  }
  func.func @transform_6(%arg0: i32) -> (i32, i32) {
    %c0_i32 = arith.constant 0 : i32
    %c0_i32_0 = arith.constant 0 : i32
    %c0_i32_1 = arith.constant 0 : i32
    return %c0_i32, %c0_i32_0 : i32, i32
  }
  func.func @transform_7(%arg0: i32) -> (i32, i32) {
    %c0_i32 = arith.constant 0 : i32
    %c0_i32_0 = arith.constant 0 : i32
    %c0_i32_1 = arith.constant 0 : i32
    return %c0_i32, %c0_i32_0 : i32, i32
  }
  func.func @transform_8(%arg0: i32) -> (i32, i32) {
    %c0_i32 = arith.constant 0 : i32
    %c0_i32_0 = arith.constant 0 : i32
    %c0_i32_1 = arith.constant 0 : i32
    return %c0_i32, %c0_i32_0 : i32, i32
  }
  func.func @transform_9(%arg0: i32) -> (i32, i32) {
    %c0_i32 = arith.constant 0 : i32
    %c0_i32_0 = arith.constant 0 : i32
    return %c0_i32, %arg0 : i32, i32
  }
}

</mosaic_0001>

<bundles_post_ra>
// kernel: tpu_custom_call.1
= control target key start
LH: loop header
LB: loop body
LE: loop exit
PB: predicated region body
PF: predicated region fallthrough
CT: control target
= control target key end

     0   :  { %14 = vsyncpa [#allocation3], 0  ;;  %s13722_s0 = inlined_call_operand.vmem [shape: f32[3,4096], index: 0, kind: input, shape index: {}]   ;;  %s13723_s1 = inlined_call_operand.vmem [shape: f32[32,3], index: 1, kind: input, shape index: {}]   ;;  %s13724_s2 = inlined_call_operand.vmem [shape: f32[32,1], index: 2, kind: input, shape index: {}]   ;;  %s13725_s3 = inlined_call_operand.hbm [shape: f32[32,32], index: 3, kind: input, shape index: {}]   ;;  %s13726_s4 = inlined_call_operand.vmem [shape: f32[32,1], index: 4, kind: input, shape index: {}]   ;;  %s13727_s5 = inlined_call_operand.hbm [shape: f32[32,32], index: 5, kind: input, shape index: {}]   ;;  %s13728_s6 = inlined_call_operand.vmem [shape: f32[32,1], index: 6, kind: input, shape index: {}]   ;;  %s13729_s7 = inlined_call_operand.vmem [shape: f32[3,32], index: 7, kind: input, shape index: {}]   ;;  %s13730_s8 = inlined_call_operand.vmem [shape: f32[3,1], index: 8, kind: input, shape index: {}]   ;;  %s13731_s9 = inlined_call_operand.hbm [shape: f32[3,4096], index: 9, kind: output, shape index: {}]  }
   0x1   :  { %15 = vsyncpa [#allocation6], 0 }
   0x2   :  { %16 = vsyncpa [#allocation4], 0 }
   0x3   :  { %18 = vsyncpa [#allocation4 + $0x1], 0  ;;  %s8397_s30 = smov 0   ;;  %s8399_s10 = smov 0  }
   0x4   :  { %s8401_s11 = smov 0   ;;  %s8403_s12 = smov 0  }
   0x5 LB: > { %13972 = sst [smem:[#allocation11_spill]] %s8334_s11  ;;  %s8418_s13 = sadd.s32 4294967295, %s8338_s12   ;;  %s8338_s12 = sphi %s8403_s12, %s14613_s12   ;;  %s8334_s11 = sphi %s8401_s11, %s14615_s11   ;;  %s8330_s10 = sphi %s8399_s10, %s14617_s10   ;;  %s8326_s30 = sphi %s8397_s30, %s14616_s30  }
   0x6   : > { %s7809_s14 = sadd.s32 4294967294, %s8338_s12   ;;  %s8422_s15 = sadd.s32 1, %s8338_s12  }
   0x7   : > { %13973 = sst [smem:[#allocation12_spill]] %s8422_s15  ;;  %s225_s16 = sadd.s32 1, %s8334_s11 }
   0x8   : > { %s222_s17 = ssub.s32 %s8338_s12, %s8422_s15  ;;  %p235_p0 = scmp.ne.s32.totalorder %s8334_s11, %s8330_s10 }
   0x9   : > { %p223_p1 = scmp.eq.s32.totalorder %s222_s17, 0  ;;  %p236_p2 = scmp.eq.s32.totalorder %s8418_s13, 1 }
   0xa   : > { %p241_p3 = scmp.ne.s32.totalorder %s8330_s10, %s8326_s30  ;;  %p242_p4 = scmp.eq.s32.totalorder %s7809_s14, 1 }
   0xb   : > { %s8433_s18 = scalar_select %p223_p1, %s8334_s11, %s225_s16  }
   0xc   : > { %p8435_p5 = por %p236_p2, %p235_p0  ;;  %p8439_p6 = por %p242_p4, %p241_p3 }
   0xd   : > { %13974 = sst [smem:[#allocation13_spill]] %s8433_s18  ;;  %p7810_p7 = scmp.ge.s32.totalorder %s8338_s12, 1 }
   0xe   : > { %s13975_s19 = scalar_select %p8435_p5, 1, 0 }
   0xf   : > { %s13976_s20 = scalar_select %p8439_p6, 1, 0 }
  0x10   : > { %p249_p8 = scmp.lt.s32.totalorder %s8338_s12, 3  ;;  %p13732_p9 = scmp.eq.s32.totalorder %s8418_s13, 0 }
  0x11   : > { %s8340_s22 = smov [#allocation2]   ;;  %s8341_s25 = smov [#allocation5]  }
  0x12   : > { %p8446_p10 = pnand %p7810_p7, %p249_p8  ;;  %s267_s23 = sshll.u32 %s8340_s22, 4  ;;  %s268_s23 = int_to_ptr.vmem [resolvable:$true] %s267_s23 }
  0x13   : > { %s283_s26 = sshll.u32 %s8341_s25, 4  ;;  %s8212_s29 = scalar_lea.hbm %s13725_s3, 512  ;;  %s8458_s26 = int_to_ptr.vmem [resolvable:$true] %s283_s26 }
  0x14   : > { %s13977_s21 = scalar_select %p8446_p10, 1, 0 }
  0x15   : > { %p8148_p11 = pneg %p8446_p10  ;;  %p8213_p13 = scmp.ne.s32.totalorder %s13725_s3, %s8212_s29 }
  0x16   : > { %p8219_p3 = scmp.lt.u32.totalorder %s8212_s29, %s13725_s3 }
  0x17   : > { %p8454_p12 = pnand %p13732_p9, %p8148_p11 }
  0x19   : > { %p8214_p0 = pneg %p8454_p12 }
  0x1b   : > { %p8215_p1 = pnand %p8214_p0, %p8213_p13 }
  0x1d   : > { %p8216_p2 = pneg %p8215_p1 }
  0x1f   : > { %p8221_p4 = pnand %p8219_p3, %p8216_p2 }
  0x21   : > { %8224 = shalt.err (!%p8221_p4)
}
  0x22   : > { %s8225_s25 = scalar_lea.vmem %s268_s23, 512  ;;  %p8233_p9 = scmp.lt.s32.totalorder %s268_s23, %s268_s23 }
  0x23   : > { %p8226_p7 = scmp.ne.s32.totalorder %s268_s23, %s8225_s25  ;;  %p8234_p6 = scmp.lt.s32.totalorder %s8225_s25, %s8225_s25 }
  0x25   : > { %p8228_p8 = pnand %p8226_p7, %p8214_p0  ;;  %p8235_p5 = por %p8234_p6, %p8233_p9 }
  0x27   : > { %p8229_p11 = pneg %p8228_p8 }
  0x29   : > { %p8236_p10 = pnand %p8235_p5, %p8229_p11 }
  0x2b   : > { %8239 = shalt.err (!%p8236_p10)
}
  0x2c   : > { %s8342_s27 = smov 128   ;;  %s8343_s28 = smov 8  }
  0x2d   : > { %8151 = dma.hbm_to_vmem [thread:$0]  (!%p8454_p12), %s13725_s3, 512, %s268_s23, [#allocation3], %s8342_s27, %s8342_s27, %s8343_s28  }
  0x2e   : > { %s8240_s22 = scalar_lea.hbm %s13727_s5, 512 }
  0x2f   : > { %p8241_p13 = scmp.ne.s32.totalorder %s13727_s5, %s8240_s22  ;;  %p8247_p9 = scmp.lt.u32.totalorder %s8240_s22, %s13727_s5 }
  0x31   : > { %p8243_p5 = pnand %p8241_p13, %p8214_p0 }
  0x33   : > { %p8244_p6 = pneg %p8243_p5 }
  0x35   : > { %p8249_p10 = pnand %p8247_p9, %p8244_p6 }
  0x37   : > { %8252 = shalt.err (!%p8249_p10)
}
  0x38   : > { %s8253_s23 = scalar_lea.vmem %s8458_s26, 512  ;;  %p8261_p4 = scmp.lt.s32.totalorder %s8458_s26, %s8458_s26 }
  0x39   : > { %p8254_p1 = scmp.ne.s32.totalorder %s8458_s26, %s8253_s23  ;;  %p8262_p7 = scmp.lt.s32.totalorder %s8253_s23, %s8253_s23 }
  0x3b   : > { %p8256_p2 = pnand %p8254_p1, %p8214_p0  ;;  %p8263_p8 = por %p8262_p7, %p8261_p4 }
  0x3d   : > { %p8257_p3 = pneg %p8256_p2 }
  0x3f   : > { %p8264_p11 = pnand %p8263_p8, %p8257_p3 }
  0x41   : > { %8267 = shalt.err (!%p8264_p11)
}
  0x42   : > { %8154 = dma.hbm_to_vmem [thread:$0]  (!%p8454_p12), %s13727_s5, 512, %s8458_s26, [#allocation6], %s8342_s27, %s8342_s27, %s8343_s28  }
  0x43   : > { %p13979_p13 = scmp.ne.s32.totalorder %s13977_s21, 0 }
  0x45   : > { %317 = sbr.rel (%p13979_p13) target bundleno = 1977 (0x7b9), region = 56 }
  0x4c   : > { %p13980_p5 = scmp.eq.s32.totalorder %s8418_s13, 0 }
  0x4e   : > { %8313 = dma.done.wait (%p13980_p5), [#allocation3], 512   ;;  %p13981_p0 = pmov %p13980_p5 }
  0x50   : > { %8315 = vsyncadd (%p13981_p0), [#allocation3], 4294966784  ;;  %p13982_p6 = pmov %p13981_p0 }
  0x51   : > { %p13983_p9 = pmov %p13981_p0 }
  0x52   : > { %8317 = dma.done.wait (%p13982_p6), [#allocation6], 512  }
  0x53   : > { %8319 = vsyncadd (%p13983_p9), [#allocation6], 4294966784  ;;  %s7818_s18 = sshll.u32 %s8418_s13, 4  ;;  %v13738_v0 = vmov 0.0   ;;  %v8345_v1 = vmov 0   ;;  %vm429_vm0 = vcmask 1042432  }
  0x54   : > { %p358_p10 = scmp.lt.s32.totalorder %s7818_s18, 31  ;;  %526 = vmatprep.mubr.f32.mxu0 %v13738_v0  ;;  %615 = vmatprep.mubr.f32.mxu1 %v13738_v0  ;;  %v8532_v8 = vld [vmem:[%s13723_s1] sm:$0xff]  ;;  %vm416_vm1 = vcmask 23552   ;;  %v8549_v13 = vld [vmem:[%s13723_s1 + $0x8] sm:$0xff]  ;;  %v378_v17 = vld [vmem:[%s13724_s2 + $0x10] sm:$0xff]  ;;  %vm2674_vm2 = vcmask 261120  }
  0x55   : > { %8202 = vset.pattern.permute.xlu0 %v8345_v1  ;;  %8203 = vset.pattern.permute.xlu1 %v8345_v1  ;;  %v376_v16 = vld [vmem:[%s13724_s2] sm:$0xff]  ;;  %v8570_v18 = vld [vmem:[%s13723_s1 + $0x10] sm:$0xff]  ;;  %v377_v19 = vld [vmem:[%s13724_s2 + $0x8] sm:$0xff]  ;;  %s354_s25 = sand.u32 1, %s8330_s10   ;;  %s7945_s15 = sshll.u32 %s8418_s13, 10 }
  0x56   : > { %s14619_s18 = smov (!%p358_p10, %s7818_s18), 31  ;;  %382 = vperm.xlu0 %8202, %v376_v16   ;;  %392 = vperm.xlu1 %8203, %v378_v17   ;;  %v379_v20 = vld [vmem:[%s13724_s2 + $0x18] sm:$0xff]  ;;  %v2650_v24 = vld [vmem:[%s13726_s4] sm:$0xff]  ;;  %v2651_v25 = vld [vmem:[%s13726_s4 + $0x8] sm:$0xff]  ;;  %s7817_s23 = sshll.u32 %s354_s25, 6 }
  0x57   : > { %s7819_s21 = sshll.u32 %s14619_s18, 2  ;;  %v8589_v21 = vld [vmem:[%s13723_s1 + $0x18] sm:$0xff]  ;;  %v2652_v28 = vld [vmem:[%s13726_s4 + $0x10] sm:$0xff]  ;;  %v4875_v30 = vld [vmem:[%s13728_s6] sm:$0xff]  ;;  %s13663_s11 = scalar_lea.vmem [#allocation7], %s7817_s23 }
  0x58   : > { %s8523_s27 = scalar_lea.vmem %s13722_s0, %s7819_s21  ;;  %v2653_v29 = vld [vmem:[%s13726_s4 + $0x18] sm:$0xff]  ;;  %v4876_v31 = vld [vmem:[%s13728_s6 + $0x8] sm:$0xff]  ;;  %v4877_v32 = vld [vmem:[%s13728_s6 + $0x10] sm:$0xff]  ;;  %s7728_s18 = sshll.u32 %s13663_s11, 4  ;;  %s13679_s18 = int_to_ptr.vmem [resolvable:$true] %s7728_s18 }
  0x59   : > { %v364_v2 = vld [vmem:[%s8523_s27] sm:$0x77]  ;;  %v365_v3 = vld [vmem:[%s8523_s27 + $0x8] sm:$0x77]  ;;  %v366_v6 = vld [vmem:[%s8523_s27 + $0x10] sm:$0x77]  ;;  %s13677_s26 = scalar_lea.hbm %s13731_s9, %s7945_s15 }
  0x5a   : > { %v408_v4 = vcombine.high %v364_v2, %v364_v2  ;;  %v409_v5 = vcombine.high %v365_v3, %v365_v3  ;;  %v367_v7 = vld [vmem:[%s8523_s27 + $0x18] sm:$0x77]  ;;  %v410_v9 = vcombine.high %v366_v6, %v366_v6  ;;  %v368_v11 = vld [vmem:[%s8523_s27 + $0x20] sm:$0x77]  ;;  %v369_v12 = vld [vmem:[%s8523_s27 + $0x28] sm:$0x77]  ;;  %387 = vperm.xlu0 %8202, %v377_v19   ;;  %397 = vperm.xlu1 %8203, %v379_v20  }
  0x5b   : > { %v411_v10 = vcombine.high %v367_v7, %v367_v7  ;;  %v412_v14 = vcombine.high %v368_v11, %v368_v11  ;;  %v413_v15 = vcombine.high %v369_v12, %v369_v12  ;;  %v370_v22 = vld [vmem:[%s8523_s27 + $0x30] sm:$0x77]  ;;  %v371_v23 = vld [vmem:[%s8523_s27 + $0x38] sm:$0x77]  ;;  %v7096_v34 = vld [vmem:[%s13730_s8] sm:$0x7] }
  0x5c   : > { %7820 = vmatprep.subr.msk.mxu0 %vm429_vm0, %v408_v4  ;;  %7826 = vmatprep.subr.msk.mxu1 %vm429_vm0, %v409_v5  ;;  %v414_v26 = vcombine.high %v370_v22, %v370_v22  ;;  %v415_v27 = vcombine.high %v371_v23, %v371_v23  ;;  %v4878_v33 = vld [vmem:[%s13728_s6 + $0x18] sm:$0xff]  ;;  %s7714_s28 = scalar_lea.sflag [#allocation4], %s354_s25  ;;  %s8268_s29 = scalar_lea.vmem %s13679_s18, 1024 }
  0x5d   : > { %7821 = vmatpush1.msk.msra.mxu0 %vm429_vm0, %v364_v2  ;;  %7827 = vmatpush1.msk.msra.mxu1 %vm429_vm0, %v365_v3  ;;  %p8269_p12 = scmp.ne.s32.totalorder %s13679_s18, %s8268_s29  ;;  %p14611_p1 = scmp.ne.s32.totalorder %s13975_s19, 0 }
  0x5e   : > { %7822 = vmatmul.mubr.msk.f32.vlgmr.msra.gmra.mrb[0].mxu0 %vm416_vm1, %v8532_v8  ;;  %7828 = vmatmul.mubr.msk.f32.vlgmr.msra.gmra.mrb[0].mxu1 %vm416_vm1, %v8532_v8  ;;  %s8346_s13 = smov [#allocation7]  }
  0x5f   : > { %532 = vmatprep.mubr.f32.mxu0 %v13738_v0  ;;  %621 = vmatprep.mubr.f32.mxu1 %v13738_v0  ;;  %p8270_p2 = pnand %p8269_p12, %p14611_p1  ;;  %s8272_s14 = sshll.u32 %s8346_s13, 4  ;;  %s8273_s14 = int_to_ptr.vmem [resolvable:$false] %s8272_s14 }
  0x60   : > { %7832 = vmatprep.subr.msk.mxu0 %vm429_vm0, %v410_v9  ;;  %7838 = vmatprep.subr.msk.mxu1 %vm429_vm0, %v411_v10  ;;  %s8274_s16 = scalar_lea.vmem %s8273_s14, 2048  ;;  %p8275_p4 = scmp.lt.s32.totalorder %s13679_s18, %s8273_s14 }
  0x61   : > { %7833 = vmatpush1.msk.msra.mxu0 %vm429_vm0, %v366_v6  ;;  %7839 = vmatpush1.msk.msra.mxu1 %vm429_vm0, %v367_v7  ;;  %p8271_p3 = pneg %p8270_p2  ;;  %p8276_p7 = scmp.lt.s32.totalorder %s8274_s16, %s8268_s29 }
  0x62   : > { %7823 = vmatmul.mubr.msk.f32.gmra.mrb[2].mxu0 %vm416_vm1, %v8549_v13  ;;  %7829 = vmatmul.mubr.msk.f32.gmra.mrb[2].mxu1 %vm416_vm1, %v8549_v13 }
  0x63   : > { %538 = vmatprep.mubr.f32.mxu0 %v13738_v0  ;;  %627 = vmatprep.mubr.f32.mxu1 %v13738_v0  ;;  %p8277_p8 = por %p8276_p7, %p8275_p4 }
  0x64   : > { %7844 = vmatprep.subr.msk.mxu0 %vm429_vm0, %v412_v14  ;;  %7850 = vmatprep.subr.msk.mxu1 %vm429_vm0, %v413_v15 }
  0x65   : > { %2656 = vperm.xlu0 %8202, %v2650_v24   ;;  %2661 = vperm.xlu1 %8203, %v2651_v25   ;;  %p8278_p11 = pnand %p8277_p8, %p8271_p3 }
  0x66   : > { %7824 = vmatmul.mubr.msk.f32.gmra.mrb[4].mxu0 %vm416_vm1, %v8570_v18  ;;  %7830 = vmatmul.mubr.msk.f32.gmra.mrb[4].mxu1 %vm416_vm1, %v8570_v18 }
  0x67   : > { %544 = vmatprep.mubr.f32.mxu0 %v13738_v0  ;;  %633 = vmatprep.mubr.f32.mxu1 %v13738_v0 }
  0x69   : > { %2666 = vperm.xlu0 %8202, %v2652_v28   ;;  %2671 = vperm.xlu1 %8203, %v2653_v29  }
  0x6a   : > { %7825 = vmatmul.mubr.msk.f32.gmra.mrb[6].mxu0 %vm416_vm1, %v8589_v21  ;;  %7831 = vmatmul.mubr.msk.f32.gmra.mrb[6].mxu1 %vm416_vm1, %v8589_v21 }
  0x6b   : > { %704 = vmatprep.mubr.f32.mxu0 %v13738_v0  ;;  %793 = vmatprep.mubr.f32.mxu1 %v13738_v0 }
  0x6d   : > { %4881 = vperm.xlu0 %8202, %v4875_v30   ;;  %4886 = vperm.xlu1 %8203, %v4876_v31  }
  0x6e   : > { %7834 = vmatmul.mubr.msk.f32.vlgmr.msra.gmra.mrb[8].mxu0 %vm416_vm1, %v8532_v8  ;;  %7840 = vmatmul.mubr.msk.f32.vlgmr.msra.gmra.mrb[8].mxu1 %vm416_vm1, %v8532_v8 }
  0x6f   : > { %710 = vmatprep.mubr.f32.mxu0 %v13738_v0  ;;  %799 = vmatprep.mubr.f32.mxu1 %v13738_v0 }
  0x70   : > { %7845 = vmatpush1.msk.msra.mxu0 %vm429_vm0, %v368_v11  ;;  %7851 = vmatpush1.msk.msra.mxu1 %vm429_vm0, %v369_v12 }
  0x71   : > { %7856 = vmatprep.subr.msk.mxu0 %vm429_vm0, %v414_v26  ;;  %7862 = vmatprep.subr.msk.mxu1 %vm429_vm0, %v415_v27 }
  0x72   : > { %7835 = vmatmul.mubr.msk.f32.gmra.mrb[10].mxu0 %vm416_vm1, %v8549_v13  ;;  %7841 = vmatmul.mubr.msk.f32.gmra.mrb[10].mxu1 %vm416_vm1, %v8549_v13 }
  0x73   : > { %716 = vmatprep.mubr.f32.mxu0 %v13738_v0  ;;  %805 = vmatprep.mubr.f32.mxu1 %v13738_v0 }
  0x74   : > { %4891 = vperm.xlu0 %8202, %v4877_v32   ;;  %4896 = vperm.xlu1 %8203, %v4878_v33  }
  0x76   : > { %7836 = vmatmul.mubr.msk.f32.gmra.mrb[12].mxu0 %vm416_vm1, %v8570_v18  ;;  %7842 = vmatmul.mubr.msk.f32.gmra.mrb[12].mxu1 %vm416_vm1, %v8570_v18 }
  0x77   : > { %722 = vmatprep.mubr.f32.mxu0 %v13738_v0  ;;  %811 = vmatprep.mubr.f32.mxu1 %v13738_v0 }
  0x78   : > { %7099 = vperm.xlu0 %8202, %v7096_v34  }
  0x7a   : > { %7837 = vmatmul.mubr.msk.f32.gmra.mrb[14].mxu0 %vm416_vm1, %v8589_v21  ;;  %7843 = vmatmul.mubr.msk.f32.gmra.mrb[14].mxu1 %vm416_vm1, %v8589_v21 }
  0x7b   : > { %882 = vmatprep.mubr.f32.mxu0 %v13738_v0  ;;  %971 = vmatprep.mubr.f32.mxu1 %v13738_v0 }
  0x7e   : > { %7846 = vmatmul.mubr.msk.f32.vlgmr.msra.gmra.mrb[16].mxu0 %vm416_vm1, %v8532_v8  ;;  %7852 = vmatmul.mubr.msk.f32.vlgmr.msra.gmra.mrb[16].mxu1 %vm416_vm1, %v8532_v8 }
  0x7f   : > { %888 = vmatprep.mubr.f32.mxu0 %v13738_v0  ;;  %977 = vmatprep.mubr.f32.mxu1 %v13738_v0 }
  0x80   : > { %7857 = vmatpush1.msk.msra.mxu0 %vm429_vm0, %v370_v22  ;;  %7863 = vmatpush1.msk.msra.mxu1 %vm429_vm0, %v371_v23 }
  0x82   : > { %7847 = vmatmul.mubr.msk.f32.gmra.mrb[18].mxu0 %vm416_vm1, %v8549_v13  ;;  %7853 = vmatmul.mubr.msk.f32.gmra.mrb[18].mxu1 %vm416_vm1, %v8549_v13 }
  0x83   : > { %894 = vmatprep.mubr.f32.mxu0 %v13738_v0  ;;  %983 = vmatprep.mubr.f32.mxu1 %v13738_v0 }
  0x86   : > { %7848 = vmatmul.mubr.msk.f32.gmra.mrb[20].mxu0 %vm416_vm1, %v8570_v18  ;;  %7854 = vmatmul.mubr.msk.f32.gmra.mrb[20].mxu1 %vm416_vm1, %v8570_v18 }
  0x87   : > { %900 = vmatprep.mubr.f32.mxu0 %v13738_v0  ;;  %989 = vmatprep.mubr.f32.mxu1 %v13738_v0 }
  0x8a   : > { %7849 = vmatmul.mubr.msk.f32.gmra.mrb[22].mxu0 %vm416_vm1, %v8589_v21  ;;  %7855 = vmatmul.mubr.msk.f32.gmra.mrb[22].mxu1 %vm416_vm1, %v8589_v21 }
  0x8b   : > { %1060 = vmatprep.mubr.f32.mxu0 %v13738_v0  ;;  %1149 = vmatprep.mubr.f32.mxu1 %v13738_v0 }
  0x8e   : > { %7858 = vmatmul.mubr.msk.f32.vlgmr.msra.gmra.mrb[24].mxu0 %vm416_vm1, %v8532_v8  ;;  %7864 = vmatmul.mubr.msk.f32.vlgmr.msra.gmra.mrb[24].mxu1 %vm416_vm1, %v8532_v8 }
  0x8f   : > { %1066 = vmatprep.mubr.f32.mxu0 %v13738_v0  ;;  %1155 = vmatprep.mubr.f32.mxu1 %v13738_v0 }
  0x92   : > { %7859 = vmatmul.mubr.msk.f32.gmra.mrb[26].mxu0 %vm416_vm1, %v8549_v13  ;;  %7865 = vmatmul.mubr.msk.f32.gmra.mrb[26].mxu1 %vm416_vm1, %v8549_v13 }
  0x93   : > { %1072 = vmatprep.mubr.f32.mxu0 %v13738_v0  ;;  %1161 = vmatprep.mubr.f32.mxu1 %v13738_v0 }
  0x96   : > { %7860 = vmatmul.mubr.msk.f32.gmra.mrb[28].mxu0 %vm416_vm1, %v8570_v18  ;;  %7866 = vmatmul.mubr.msk.f32.gmra.mrb[28].mxu1 %vm416_vm1, %v8570_v18 }
  0x97   : > { %1078 = vmatprep.mubr.f32.mxu0 %v13738_v0  ;;  %1167 = vmatprep.mubr.f32.mxu1 %v13738_v0 }
  0x9a   : > { %7861 = vmatmul.mubr.msk.f32.gmra.mrb[30].mxu0 %vm416_vm1, %v8589_v21  ;;  %7867 = vmatmul.mubr.msk.f32.gmra.mrb[30].mxu1 %vm416_vm1, %v8589_v21 }
  0x9b   : > { %2751 = vmatprep.mubr.f32.mxu0 %v13738_v0  ;;  %2840 = vmatprep.mubr.f32.mxu1 %v13738_v0 }
  0xd5   : > { %v8704_v35 = vpop.permute.xlu0 %382 }
  0xd9   : > { %v8710_v44 = vpop.permute.xlu0 %387 }
 0x131   : > { %v528_v36 = vpop.f32.mrb[0].mxu0  ;;  %v617_v37 = vpop.f32.mrb[0].mxu1 }
 0x132   : > { %v529_v38 = vadd.f32 %v528_v36, %v8704_v35  ;;  %v618_v39 = vadd.f32 %v617_v37, %v8704_v35  ;;  %v530_v40 = vpop.f32.mrb[1].mxu0  ;;  %v619_v41 = vpop.f32.mrb[1].mxu1 }
 0x133   : > { %v531_v42 = vadd.f32 %v530_v40, %v8704_v35  ;;  %v620_v43 = vadd.f32 %v619_v41, %v8704_v35 }
 0x134   : > { %v1174_v45 = vmul.f32 0.15915494, %v529_v38  ;;  %v1176_v46 = vmul.f32 0.15915494, %v618_v39 }
 0x135   : > { %v1175_v47 = vmul.f32 0.15915494, %v531_v42  ;;  %v1177_v48 = vmul.f32 0.15915494, %v620_v43  ;;  %v534_v49 = vpop.f32.mrb[2].mxu0  ;;  %v623_v50 = vpop.f32.mrb[2].mxu1 }
 0x136   : > { %v1238_v51 = vadd.f32 0.5, %v1174_v45  ;;  %v1240_v52 = vadd.f32 0.5, %v1176_v46  ;;  %v8713_v53 = vadd.f32 %v534_v49, %v8710_v44  ;;  %v8716_v54 = vadd.f32 %v623_v50, %v8710_v44  ;;  %v536_v55 = vpop.f32.mrb[3].mxu0  ;;  %v625_v56 = vpop.f32.mrb[3].mxu1 }
 0x137   : > { %v1239_v57 = vadd.f32 0.5, %v1175_v47  ;;  %v1241_v58 = vadd.f32 0.5, %v1177_v48  ;;  %v8719_v59 = vadd.f32 %v536_v55, %v8710_v44  ;;  %v8722_v60 = vadd.f32 %v625_v56, %v8710_v44 }
 0x138   : > { %v1302_v61 = vfloor.f32 %v1238_v51  ;;  %v1304_v62 = vfloor.f32 %v1240_v52  ;;  %v1190_v63 = vmul.f32 0.15915494, %v8713_v53  ;;  %v1192_v1 = vmul.f32 0.15915494, %v8716_v54 }
 0x139   : > { %v1303_v2 = vfloor.f32 %v1239_v57  ;;  %v1305_v3 = vfloor.f32 %v1241_v58  ;;  %v1191_v4 = vmul.f32 0.15915494, %v8719_v59  ;;  %v1193_v5 = vmul.f32 0.15915494, %v8722_v60  ;;  %v8728_v6 = vpop.f32.mrb[4].mxu0  ;;  %v8730_v7 = vpop.f32.mrb[4].mxu1 }
 0x13a   : > { %v1366_v8 = vmul.f32 6.28125, %v1302_v61  ;;  %v1494_v9 = vmul.f32 0.0019353072, %v1302_v61  ;;  %v1368_v10 = vmul.f32 6.28125, %v1304_v62  ;;  %v1496_v11 = vmul.f32 0.0019353072, %v1304_v62  ;;  %v8784_v61 = vpop.permute.xlu1 %392 }
 0x13b   : > { %v1367_v12 = vmul.f32 6.28125, %v1303_v2  ;;  %v1495_v13 = vmul.f32 0.0019353072, %v1303_v2  ;;  %v1369_v14 = vmul.f32 6.28125, %v1305_v3  ;;  %v1497_v15 = vmul.f32 0.0019353072, %v1305_v3 }
 0x13c   : > { %v1430_v16 = vsub.f32 %v529_v38, %v1366_v8  ;;  %v1432_v17 = vsub.f32 %v618_v39, %v1368_v10  ;;  %v1254_v18 = vadd.f32 0.5, %v1190_v63  ;;  %v1256_v19 = vadd.f32 0.5, %v1192_v1  ;;  %v8732_v20 = vpop.f32.mrb[5].mxu0  ;;  %v8734_v21 = vpop.f32.mrb[5].mxu1 }
 0x13d   : > { %v1431_v22 = vsub.f32 %v531_v42, %v1367_v12  ;;  %v1433_v23 = vsub.f32 %v620_v43, %v1369_v14  ;;  %v1255_v24 = vadd.f32 0.5, %v1191_v4  ;;  %v1257_v25 = vadd.f32 0.5, %v1193_v5  ;;  %v8736_v26 = vpop.f32.mrb[6].mxu0  ;;  %v8738_v27 = vpop.f32.mrb[6].mxu1 }
 0x13e   : > { %v8740_v28 = vsub.f32 %v1430_v16, %v1494_v9  ;;  %v8742_v29 = vsub.f32 %v1432_v17, %v1496_v11  ;;  %v1318_v30 = vfloor.f32 %v1254_v18  ;;  %v1320_v31 = vfloor.f32 %v1256_v19  ;;  %v8744_v32 = vpop.f32.mrb[7].mxu0  ;;  %v8746_v33 = vpop.f32.mrb[7].mxu1 }
 0x13f   : > { %v8748_v34 = vsub.f32 %v1431_v22, %v1495_v13  ;;  %v8750_v36 = vsub.f32 %v1433_v23, %v1497_v15  ;;  %v1319_v37 = vfloor.f32 %v1255_v24  ;;  %v1321_v41 = vfloor.f32 %v1257_v25 }
 0x140   : > { %v8754_v38 = vmul.f32 %v8740_v28, %v8740_v28  ;;  %v8758_v39 = vmul.f32 %v8742_v29, %v8742_v29  ;;  %v1382_v40 = vmul.f32 6.28125, %v1318_v30  ;;  %v1510_v42 = vmul.f32 0.0019353072, %v1318_v30 }
 0x141   : > { %13984 = vst [vmem:[#allocation14_spill] sm:$0xff] %v8748_v34  ;;  %13985 = vst [vmem:[#allocation15_spill] sm:$0xff] %v8750_v36  ;;  %v1384_v43 = vmul.f32 6.28125, %v1320_v31  ;;  %v8760_v45 = vpop.f32.mrb[8].mxu0  ;;  %v8762_v46 = vpop.f32.mrb[8].mxu1  ;;  %v8768_v49 = vmul.f32 %v8748_v34, %v8748_v34  ;;  %v8772_v50 = vmul.f32 %v8750_v36, %v8750_v36  ;;  %v1383_v1 = vmul.f32 6.28125, %v1319_v37 }
 0x142   : > { %v1686_v47 = vmul.f32 -7.6471636e-13, %v8754_v38  ;;  %v1688_v48 = vmul.f32 -7.6471636e-13, %v8758_v39  ;;  %v8774_v51 = vpop.f32.mrb[9].mxu0  ;;  %v8776_v52 = vpop.f32.mrb[9].mxu1  ;;  %v8780_v55 = vmul.f32 %v8754_v38, %v8740_v28  ;;  %v1446_v56 = vsub.f32 %v8713_v53, %v1382_v40 }
 0x143   : > { %13986 = vst [vmem:[#allocation16_spill] sm:$0xff] %v8768_v49  ;;  %13987 = vst [vmem:[#allocation17_spill] sm:$0xff] %v8772_v50  ;;  %v1448_v57 = vsub.f32 %v8716_v54, %v1384_v43  ;;  %v1512_v58 = vmul.f32 0.0019353072, %v1320_v31  ;;  %v1385_v2 = vmul.f32 6.28125, %v1321_v41  ;;  %v8788_v3 = vmul.f32 %v8758_v39, %v8742_v29 }
 0x144   : > { %v1750_v62 = vadd.f32 1.6059044e-10, %v1686_v47  ;;  %v1752_v63 = vadd.f32 1.6059044e-10, %v1688_v48  ;;  %v8790_v4 = vsub.f32 %v1446_v56, %v1510_v42  ;;  %v1511_v8 = vmul.f32 0.0019353072, %v1319_v37 }
 0x145   : > { %v8792_v5 = vsub.f32 %v1448_v57, %v1512_v58  ;;  %v8794_v9 = vpop.f32.mrb[10].mxu0  ;;  %v8796_v53 = vpop.f32.mrb[10].mxu1  ;;  %v1447_v11 = vsub.f32 %v8719_v59, %v1383_v1  ;;  %v1449_v12 = vsub.f32 %v8722_v60, %v1385_v2  ;;  %v8808_v15 = vmul.f32 %v8768_v49, %v8748_v34 }
 0x146   : > { %v1814_v54 = vmul.f32 %v1750_v62, %v8754_v38  ;;  %v1816_v10 = vmul.f32 %v1752_v63, %v8758_v39  ;;  %v8802_v13 = vpop.f32.mrb[11].mxu0  ;;  %v8804_v14 = vpop.f32.mrb[11].mxu1  ;;  %v8812_v16 = vmul.f32 %v8790_v4, %v8790_v4  ;;  %v8820_v59 = vadd.f32 %v8728_v6, %v8784_v61 }
 0x147   : > { %13988 = vst [vmem:[#allocation18_spill] sm:$0xff] %v8808_v15  ;;  %v8816_v17 = vmul.f32 %v8792_v5, %v8792_v5  ;;  %v8822_v19 = vsub.f32 %v1447_v11, %v1511_v8  ;;  %v1513_v22 = vmul.f32 0.0019353072, %v1321_v41  ;;  %v8826_v23 = vmul.f32 %v8772_v50, %v8750_v36 }
 0x148   : > { %v1878_v60 = vadd.f32 -2.5052108e-08, %v1814_v54  ;;  %v1880_v18 = vadd.f32 -2.5052108e-08, %v1816_v10  ;;  %v1702_v24 = vmul.f32 -7.6471636e-13, %v8812_v16  ;;  %v8832_v30 = vadd.f32 %v8730_v7, %v8784_v61 }
 0x149   : > { %13989 = vst [vmem:[#allocation19_spill] sm:$0xff] %v8822_v19  ;;  %13990 = vst [vmem:[#allocation20_spill] sm:$0xff] %v8826_v23  ;;  %v1704_v25 = vmul.f32 -7.6471636e-13, %v8816_v17  ;;  %v8834_v31 = vpop.f32.mrb[12].mxu0  ;;  %v8836_v6 = vpop.f32.mrb[12].mxu1  ;;  %v8842_v41 = vmul.f32 %v8812_v16, %v8790_v4  ;;  %v8844_v42 = vsub.f32 %v1449_v12, %v1513_v22  ;;  %v8853_v57 = vadd.f32 %v8732_v20, %v8784_v61 }
 0x14a   : > { %v1942_v37 = vmul.f32 %v1878_v60, %v8754_v38  ;;  %v1944_v40 = vmul.f32 %v1880_v18, %v8758_v39  ;;  %v8846_v43 = vpop.f32.mrb[13].mxu0  ;;  %v8848_v47 = vpop.f32.mrb[13].mxu1  ;;  %v1766_v7 = vadd.f32 1.6059044e-10, %v1702_v24  ;;  %v1206_v56 = vmul.f32 0.15915494, %v8820_v59 }
 0x14b   : > { %13991 = vst [vmem:[#allocation21_spill] sm:$0xff] %v8844_v42  ;;  %v1768_v48 = vadd.f32 1.6059044e-10, %v1704_v25  ;;  %v8857_v63 = vmul.f32 %v8816_v17, %v8792_v5  ;;  %v8861_v1 = vmul.f32 %v8822_v19, %v8822_v19  ;;  %v1208_v10 = vmul.f32 0.15915494, %v8832_v30 }
 0x14c   : > { %v2006_v58 = vadd.f32 2.7557319e-06, %v1942_v37  ;;  %v2008_v62 = vadd.f32 2.7557319e-06, %v1944_v40  ;;  %v1830_v2 = vmul.f32 %v1766_v7, %v8812_v16  ;;  %v1270_v54 = vadd.f32 0.5, %v1206_v56 }
 0x14d   : > { %13992 = vst [vmem:[#allocation22_spill] sm:$0xff] %v8861_v1  ;;  %v1832_v8 = vmul.f32 %v1768_v48, %v8816_v17  ;;  %v8866_v11 = vpop.f32.mrb[14].mxu0  ;;  %v8868_v20 = vpop.f32.mrb[14].mxu1  ;;  %v1207_v18 = vmul.f32 0.15915494, %v8853_v57  ;;  %v8875_v22 = vadd.f32 %v8734_v21, %v8784_v61  ;;  %v1272_v48 = vadd.f32 0.5, %v1208_v10 }
 0x14e   : > { %v2070_v12 = vmul.f32 %v2006_v58, %v8754_v38  ;;  %v2072_v60 = vmul.f32 %v2008_v62, %v8758_v39  ;;  %v8877_v24 = vpop.f32.mrb[15].mxu0  ;;  %v8879_v25 = vpop.f32.mrb[15].mxu1  ;;  %v1894_v37 = vadd.f32 -2.5052108e-08, %v1830_v2  ;;  %v1334_v7 = vfloor.f32 %v1270_v54 }
 0x14f   : > { %13993 = vst [vmem:[#allocation23_spill] sm:$0xff] %v8879_v25  ;;  %v1896_v40 = vadd.f32 -2.5052108e-08, %v1832_v8  ;;  %v8883_v58 = vmul.f32 %v8844_v42, %v8844_v42  ;;  %v1271_v62 = vadd.f32 0.5, %v1207_v18  ;;  %v1336_v54 = vfloor.f32 %v1272_v48 }
 0x150   : > { %v2134_v56 = vadd.f32 -0.0001984127, %v2070_v12  ;;  %v2136_v0 = vadd.f32 -0.0001984127, %v2072_v60  ;;  %v1958_v36 = vmul.f32 %v1894_v37, %v8812_v16  ;;  %v1398_v23 = vmul.f32 6.28125, %v1334_v7 }
 0x151   : > { %13994 = vst [vmem:[#allocation24_spill] sm:$0xff] %v8883_v58  ;;  %v1960_v21 = vmul.f32 %v1896_v40, %v8816_v17  ;;  %v1526_v34 = vmul.f32 0.0019353072, %v1334_v7  ;;  %v8887_v15 = vpop.f32.mrb[16].mxu0  ;;  %v8889_v50 = vpop.f32.mrb[16].mxu1  ;;  %v1335_v10 = vfloor.f32 %v1271_v62  ;;  %v1400_v25 = vmul.f32 6.28125, %v1336_v54 }
 0x152   : > { %13995 = vst [vmem:[#allocation25_spill] sm:$0xff] %v8887_v15  ;;  %13996 = vst [vmem:[#allocation26_spill] sm:$0xff] %v8889_v50  ;;  %v2198_v2 = vmul.f32 %v2134_v56, %v8754_v38  ;;  %v2200_v8 = vmul.f32 %v2136_v0, %v8758_v39  ;;  %v8893_v12 = vpop.f32.mrb[17].mxu0  ;;  %v8895_v60 = vpop.f32.mrb[17].mxu1  ;;  %v2022_v18 = vadd.f32 2.7557319e-06, %v1958_v36  ;;  %v1462_v40 = vsub.f32 %v8820_v59, %v1398_v23 }
 0x153   : > { %13997 = vst [vmem:[#allocation27_spill] sm:$0xff] %v8893_v12  ;;  %13998 = vst [vmem:[#allocation28_spill] sm:$0xff] %v8895_v60  ;;  %v2024_v37 = vadd.f32 2.7557319e-06, %v1960_v21  ;;  %v1209_v7 = vmul.f32 0.15915494, %v8875_v22  ;;  %v1464_v23 = vsub.f32 %v8832_v30, %v1400_v25 }
 0x154   : > { %v2262_v49 = vadd.f32 0.008333334, %v2198_v2  ;;  %v2264_v15 = vadd.f32 0.008333334, %v2200_v8  ;;  %v1399_v50 = vmul.f32 6.28125, %v1335_v10  ;;  %v2086_v56 = vmul.f32 %v2022_v18, %v8812_v16 }
 0x155   : > { %v2088_v0 = vmul.f32 %v2024_v37, %v8816_v17  ;;  %v8901_v48 = vsub.f32 %v1462_v40, %v1526_v34  ;;  %v1528_v62 = vmul.f32 0.0019353072, %v1336_v54  ;;  %v8903_v12 = vpop.f32.mrb[18].mxu0  ;;  %v8905_v60 = vpop.f32.mrb[18].mxu1  ;;  %v1527_v37 = vmul.f32 0.0019353072, %v1335_v10 }
 0x156   : > { %13999 = vst [vmem:[#allocation29_spill] sm:$0xff] %v8905_v60  ;;  %v2326_v36 = vmul.f32 %v2262_v49, %v8754_v38  ;;  %v2328_v59 = vmul.f32 %v2264_v15, %v8758_v39  ;;  %v1463_v21 = vsub.f32 %v8853_v57, %v1399_v50  ;;  %v8911_v2 = vpop.f32.mrb[19].mxu0  ;;  %v8913_v8 = vpop.f32.mrb[19].mxu1  ;;  %v2150_v18 = vadd.f32 -0.0001984127, %v2086_v56 }
 0x157   : > { %v2152_v34 = vadd.f32 -0.0001984127, %v2088_v0  ;;  %v8917_v54 = vmul.f32 %v8901_v48, %v8901_v48  ;;  %v8919_v38 = vsub.f32 %v1464_v23, %v1528_v62  ;;  %v1273_v39 = vadd.f32 0.5, %v1209_v7 }
 0x158   : > { %v2390_v40 = vadd.f32 -0.16666667, %v2326_v36  ;;  %v2392_v60 = vadd.f32 -0.16666667, %v2328_v59  ;;  %v2214_v49 = vmul.f32 %v2150_v18, %v8812_v16  ;;  %v8925_v15 = vmul.f32 %v8861_v1, %v8822_v19  ;;  %v8942_v36 = vpop.permute.xlu1 %397 }
 0x159   : > { %v2216_v50 = vmul.f32 %v2152_v34, %v8816_v17  ;;  %v1718_v30 = vmul.f32 -7.6471636e-13, %v8917_v54  ;;  %v8928_v57 = vpop.f32.mrb[20].mxu0  ;;  %v8930_v25 = vpop.f32.mrb[20].mxu1  ;;  %v8936_v7 = vmul.f32 %v8919_v38, %v8919_v38  ;;  %v8938_v0 = vsub.f32 %v1463_v21, %v1527_v37 }
 0x15a   : > { %14000 = vst [vmem:[#allocation30_spill] sm:$0xff] %v8925_v15  ;;  %v2518_v10 = vmul.f32 %v8780_v55, %v2390_v40  ;;  %v2520_v56 = vmul.f32 %v8788_v3, %v2392_v60  ;;  %v8940_v62 = vpop.f32.mrb[21].mxu0  ;;  %v2278_v59 = vadd.f32 0.008333334, %v2214_v49  ;;  %v1337_v34 = vfloor.f32 %v1273_v39  ;;  %v8955_v21 = vpop.f32.mrb[21].mxu1 }
 0x15b   : > { %14001 = vst [vmem:[#allocation31_spill] sm:$0xff] %v8938_v0  ;;  %v2280_v23 = vadd.f32 0.008333334, %v2216_v50  ;;  %v1782_v18 = vadd.f32 1.6059044e-10, %v1718_v30  ;;  %v8946_v19 = vmul.f32 %v8883_v58, %v8844_v42  ;;  %v8950_v55 = vmul.f32 %v8917_v54, %v8901_v48 }
 0x15c   : > { %v1720_v3 = vmul.f32 -7.6471636e-13, %v8936_v7  ;;  %v547_v60 = vadd.f32 %v8736_v26, %v8942_v36  ;;  %v8958_v37 = vadd.f32 %v2518_v10, %v8740_v28  ;;  %v2342_v40 = vmul.f32 %v2278_v59, %v8812_v16 }
 0x15d   : > { %14002 = vst [vmem:[#allocation32_spill] sm:$0xff] %v8946_v19  ;;  %v2344_v39 = vmul.f32 %v2280_v23, %v8816_v17  ;;  %v1846_v49 = vmul.f32 %v1782_v18, %v8917_v54  ;;  %v8964_v50 = vadd.f32 %v2520_v56, %v8742_v29  ;;  %v1401_v42 = vmul.f32 6.28125, %v1337_v34  ;;  %v8974_v29 = vpop.f32.mrb[22].mxu0 }
 0x15e   : > { %14003 = vst [vmem:[#allocation33_spill] sm:$0xff] %v8958_v37  ;;  %v1784_v30 = vadd.f32 1.6059044e-10, %v1720_v3  ;;  %v636_v19 = vadd.f32 %v8738_v27, %v8942_v36  ;;  %v2406_v26 = vadd.f32 -0.16666667, %v2342_v40  ;;  %v8970_v28 = vmul.f32 %v8938_v0, %v8938_v0  ;;  %v8983_v3 = vpop.f32.mrb[22].mxu1 }
 0x15f   : > { %14004 = vst [vmem:[#allocation34_spill] sm:$0xff] %v8964_v50  ;;  %v2408_v15 = vadd.f32 -0.16666667, %v2344_v39  ;;  %v1910_v58 = vadd.f32 -2.5052108e-08, %v1846_v49  ;;  %v1465_v17 = vsub.f32 %v8875_v22, %v1401_v42  ;;  %v8979_v27 = vmul.f32 %v8936_v7, %v8919_v38  ;;  %14006 = vst [vmem:[#allocation36_spill] sm:$0xff] %v8983_v3 }
 0x160   : > { %14005 = vst [vmem:[#allocation35_spill] sm:$0xff] %v8970_v28  ;;  %v1848_v16 = vmul.f32 %v1784_v30, %v8936_v7  ;;  %v1222_v10 = vmul.f32 0.15915494, %v547_v60  ;;  %v1224_v59 = vmul.f32 0.15915494, %v636_v19  ;;  %v549_v18 = vadd.f32 %v8744_v32, %v8942_v36 }
 0x161   : > { %v1974_v56 = vmul.f32 %v1910_v58, %v8917_v54  ;;  %v1529_v23 = vmul.f32 0.0019353072, %v1337_v34  ;;  %v2534_v40 = vmul.f32 %v8842_v41, %v2406_v26  ;;  %v2536_v49 = vmul.f32 %v8857_v63, %v2408_v15 }
 0x162   : > { %v1912_v39 = vadd.f32 -2.5052108e-08, %v1848_v16  ;;  %v1286_v42 = vadd.f32 0.5, %v1222_v10  ;;  %v1288_v22 = vadd.f32 0.5, %v1224_v59  ;;  %v8989_v58 = vmul.f32 %v8970_v28, %v8938_v0 }
 0x163   : > { %v2038_v30 = vadd.f32 2.7557319e-06, %v1974_v56  ;;  %v1223_v50 = vmul.f32 0.15915494, %v549_v18  ;;  %v8992_v37 = vsub.f32 %v1465_v17, %v1529_v23  ;;  %v638_v26 = vadd.f32 %v8746_v33, %v8942_v36 }
 0x164   : > { %14007 = vst [vmem:[#allocation37_spill] sm:$0xff] %v8989_v58  ;;  %v1976_v34 = vmul.f32 %v1912_v39, %v8936_v7  ;;  %v1350_v32 = vfloor.f32 %v1286_v42  ;;  %v1352_v1 = vfloor.f32 %v1288_v22  ;;  %v8999_v63 = vadd.f32 %v8760_v45, %v8704_v35  ;;  %v9004_v42 = vpop.f32.mrb[23].mxu0 }
 0x165   : > { %14008 = vst [vmem:[#allocation38_spill] sm:$0xff] %v8992_v37  ;;  %v2102_v3 = vmul.f32 %v2038_v30, %v8917_v54  ;;  %v1287_v41 = vadd.f32 0.5, %v1223_v50  ;;  %v9002_v15 = vadd.f32 %v2534_v40, %v8790_v4  ;;  %v1225_v33 = vmul.f32 0.15915494, %v638_v26 }
 0x166   : > { %v2040_v16 = vadd.f32 2.7557319e-06, %v1976_v34  ;;  %v1414_v10 = vmul.f32 6.28125, %v1350_v32  ;;  %v1542_v59 = vmul.f32 0.0019353072, %v1350_v32  ;;  %v1416_v56 = vmul.f32 6.28125, %v1352_v1 }
 0x167   : > { %14009 = vst [vmem:[#allocation39_spill] sm:$0xff] %v9002_v15  ;;  %v2166_v17 = vadd.f32 -0.0001984127, %v2102_v3  ;;  %v1544_v23 = vmul.f32 0.0019353072, %v1352_v1  ;;  %v1351_v39 = vfloor.f32 %v1287_v41  ;;  %v1289_v3 = vadd.f32 0.5, %v1225_v33 }
 0x168   : > { %v2104_v50 = vmul.f32 %v2040_v16, %v8936_v7  ;;  %v1478_v22 = vsub.f32 %v547_v60, %v1414_v10  ;;  %v1178_v30 = vmul.f32 0.15915494, %v8999_v63  ;;  %v1480_v0 = vsub.f32 %v636_v19, %v1416_v56  ;;  %v9017_v16 = vpop.f32.mrb[23].mxu1 }
 0x169   : > { %v2230_v45 = vmul.f32 %v2166_v17, %v8917_v54  ;;  %v1415_v4 = vmul.f32 6.28125, %v1351_v39  ;;  %v1543_v40 = vmul.f32 0.0019353072, %v1351_v39  ;;  %v9015_v60 = vadd.f32 %v8762_v46, %v8704_v35 }
 0x16a   : > { %v2168_v34 = vadd.f32 -0.0001984127, %v2104_v50  ;;  %v9009_v58 = vsub.f32 %v1478_v22, %v1542_v59  ;;  %v1242_v32 = vadd.f32 0.5, %v1178_v30  ;;  %v9011_v41 = vsub.f32 %v1480_v0, %v1544_v23 }
 0x16b   : > { %v2294_v1 = vadd.f32 0.008333334, %v2230_v45  ;;  %v1479_v28 = vsub.f32 %v549_v18, %v1415_v4  ;;  %v9022_v19 = vmul.f32 %v8992_v37, %v8992_v37  ;;  %v1353_v17 = vfloor.f32 %v1289_v3 }
 0x16c   : > { %v2232_v10 = vmul.f32 %v2168_v34, %v8936_v7  ;;  %v9026_v59 = vmul.f32 %v9009_v58, %v9009_v58  ;;  %v9031_v18 = vmul.f32 %v9011_v41, %v9011_v41  ;;  %v1306_v56 = vfloor.f32 %v1242_v32 }
 0x16d   : > { %14010 = vst [vmem:[#allocation40_spill] sm:$0xff] %v9022_v19  ;;  %v2358_v0 = vmul.f32 %v2294_v1, %v8917_v54  ;;  %v9033_v46 = vsub.f32 %v1479_v28, %v1543_v40  ;;  %v9036_v23 = vadd.f32 %v2536_v49, %v8792_v5  ;;  %v1417_v22 = vmul.f32 6.28125, %v1353_v17  ;;  %v9046_v5 = vpop.f32.mrb[24].mxu0 }
 0x16e   : > { %v2296_v39 = vadd.f32 0.008333334, %v2232_v10  ;;  %v1734_v50 = vmul.f32 -7.6471636e-13, %v9026_v59  ;;  %v1736_v30 = vmul.f32 -7.6471636e-13, %v9031_v18  ;;  %v9050_v49 = vmul.f32 %v9022_v19, %v8992_v37 }
 0x16f   : > { %14011 = vst [vmem:[#allocation41_spill] sm:$0xff] %v9033_v46  ;;  %14012 = vst [vmem:[#allocation42_spill] sm:$0xff] %v9036_v23  ;;  %v2422_v33 = vadd.f32 -0.16666667, %v2358_v0  ;;  %v9042_v54 = vmul.f32 %v9033_v46, %v9033_v46  ;;  %v1180_v45 = vmul.f32 0.15915494, %v9015_v60  ;;  %v1481_v40 = vsub.f32 %v638_v26, %v1417_v22 }
 0x170   : > { %v2360_v28 = vmul.f32 %v2296_v39, %v8936_v7  ;;  %v1798_v4 = vadd.f32 1.6059044e-10, %v1734_v50  ;;  %v1545_v34 = vmul.f32 0.0019353072, %v1353_v17  ;;  %14014 = vst [vmem:[#allocation44_spill] sm:$0xff] %v9050_v49  ;;  %v9054_v3 = vmul.f32 %v9026_v59, %v9009_v58  ;;  %v9060_v26 = vpop.f32.mrb[24].mxu1 }
 0x171   : > { %14013 = vst [vmem:[#allocation43_spill] sm:$0xff] %v9042_v54  ;;  %v1800_v32 = vadd.f32 1.6059044e-10, %v1736_v30  ;;  %v1370_v1 = vmul.f32 6.28125, %v1306_v56  ;;  %v2550_v10 = vmul.f32 %v8950_v55, %v2422_v33  ;;  %v1498_v22 = vmul.f32 0.0019353072, %v1306_v56 }
 0x172   : > { %v2424_v0 = vadd.f32 -0.16666667, %v2360_v28  ;;  %v1862_v7 = vmul.f32 %v1798_v4, %v9026_v59  ;;  %v9058_v39 = vsub.f32 %v1481_v40, %v1545_v34  ;;  %v1244_v37 = vadd.f32 0.5, %v1180_v45 }
 0x173   : > { %v1864_v17 = vmul.f32 %v1800_v32, %v9031_v18  ;;  %v1434_v50 = vsub.f32 %v8999_v63, %v1370_v1  ;;  %v9066_v30 = vmul.f32 %v9031_v18, %v9011_v41  ;;  %v9070_v55 = vmul.f32 %v9042_v54, %v9033_v46 }
 0x174   : > { %14015 = vst [vmem:[#allocation45_spill] sm:$0xff] %v9058_v39  ;;  %v1926_v49 = vadd.f32 -2.5052108e-08, %v1862_v7  ;;  %v709_v33 = vadd.f32 %v8774_v51, %v8704_v35  ;;  %v1308_v40 = vfloor.f32 %v1244_v37  ;;  %v798_v63 = vadd.f32 %v8776_v52, %v8704_v35 }
 0x175   : > { %14016 = vst [vmem:[#allocation46_spill] sm:$0xff] %v9070_v55  ;;  %v1928_v28 = vadd.f32 -2.5052108e-08, %v1864_v17  ;;  %v9074_v4 = vsub.f32 %v1434_v50, %v1498_v22  ;;  %v9079_v56 = vadd.f32 %v2550_v10, %v8901_v48  ;;  %v2552_v45 = vmul.f32 %v8979_v27, %v2424_v0  ;;  %v9094_v10 = vpop.f32.mrb[25].mxu0 }
 0x176   : > { %v1990_v34 = vmul.f32 %v1926_v49, %v9026_v59  ;;  %v1179_v32 = vmul.f32 0.15915494, %v709_v33  ;;  %v9086_v51 = vmul.f32 %v9058_v39, %v9058_v39  ;;  %v1372_v7 = vmul.f32 6.28125, %v1308_v40  ;;  %v9121_v15 = vpop.f32.mrb[26].mxu0 }
 0x177   : > { %14017 = vst [vmem:[#allocation47_spill] sm:$0xff] %v9079_v56  ;;  %v1992_v1 = vmul.f32 %v1928_v28, %v9031_v18  ;;  %v9090_v37 = vmul.f32 %v9074_v4, %v9074_v4  ;;  %v1181_v48 = vmul.f32 0.15915494, %v798_v63  ;;  %v713_v27 = vadd.f32 %v8794_v9, %v8710_v44 }
 0x178   : > { %14018 = vst [vmem:[#allocation48_spill] sm:$0xff] %v9086_v51  ;;  %v2054_v52 = vadd.f32 2.7557319e-06, %v1990_v34  ;;  %v1243_v17 = vadd.f32 0.5, %v1179_v32  ;;  %v1436_v50 = vsub.f32 %v9015_v60, %v1372_v7  ;;  %v1500_v22 = vmul.f32 0.0019353072, %v1308_v40 }
 0x179   : > { %v2056_v49 = vadd.f32 2.7557319e-06, %v1992_v1  ;;  %v1690_v0 = vmul.f32 -7.6471636e-13, %v9090_v37  ;;  %v1245_v46 = vadd.f32 0.5, %v1181_v48  ;;  %v9100_v34 = vadd.f32 %v2552_v45, %v8919_v38  ;;  %v9109_v40 = vpop.f32.mrb[25].mxu1 }
 0x17a   : > { %v2118_v28 = vmul.f32 %v2054_v52, %v9026_v59  ;;  %v1307_v56 = vfloor.f32 %v1243_v17  ;;  %v1194_v55 = vmul.f32 0.15915494, %v713_v27  ;;  %v9103_v9 = vsub.f32 %v1436_v50, %v1500_v22  ;;  %14020 = vst [vmem:[#allocation50_spill] sm:$0xff] %v9109_v40 }
 0x17b   : > { %14019 = vst [vmem:[#allocation49_spill] sm:$0xff] %v9100_v34  ;;  %v2120_v32 = vmul.f32 %v2056_v49, %v9031_v18  ;;  %v1754_v19 = vadd.f32 1.6059044e-10, %v1690_v0  ;;  %v1309_v23 = vfloor.f32 %v1245_v46  ;;  %v9107_v60 = vadd.f32 %v8796_v53, %v8710_v44 }
 0x17c   : > { %v2182_v54 = vadd.f32 -0.0001984127, %v2118_v28  ;;  %v1371_v1 = vmul.f32 6.28125, %v1307_v56  ;;  %v9114_v38 = vmul.f32 %v9103_v9, %v9103_v9  ;;  %v1258_v45 = vadd.f32 0.5, %v1194_v55 }
 0x17d   : > { %v2184_v7 = vadd.f32 -0.0001984127, %v2120_v32  ;;  %v1818_v52 = vmul.f32 %v1754_v19, %v9090_v37  ;;  %v1499_v49 = vmul.f32 0.0019353072, %v1307_v56  ;;  %v1373_v0 = vmul.f32 6.28125, %v1309_v23 }
 0x17e   : > { %v2246_v17 = vmul.f32 %v2182_v54, %v9026_v59  ;;  %v1435_v48 = vsub.f32 %v709_v33, %v1371_v1  ;;  %v1692_v53 = vmul.f32 -7.6471636e-13, %v9114_v38  ;;  %v1501_v22 = vmul.f32 0.0019353072, %v1309_v23 }
 0x17f   : > { %v2248_v46 = vmul.f32 %v2184_v7, %v9031_v18  ;;  %v1882_v50 = vadd.f32 -2.5052108e-08, %v1818_v52  ;;  %v1437_v19 = vsub.f32 %v798_v63, %v1373_v0  ;;  %v1322_v34 = vfloor.f32 %v1258_v45 }
 0x180   : > { %v2310_v28 = vadd.f32 0.008333334, %v2246_v17  ;;  %v9119_v32 = vsub.f32 %v1435_v48, %v1499_v49  ;;  %v1756_v54 = vadd.f32 1.6059044e-10, %v1692_v53  ;;  %v1196_v33 = vmul.f32 0.15915494, %v9107_v60 }
 0x181   : > { %v2312_v40 = vadd.f32 0.008333334, %v2248_v46  ;;  %v1946_v55 = vmul.f32 %v1882_v50, %v9090_v37  ;;  %v9128_v1 = vmul.f32 %v9086_v51, %v9058_v39  ;;  %v9130_v23 = vsub.f32 %v1437_v19, %v1501_v22  ;;  %v9138_v48 = vpop.f32.mrb[26].mxu1 }
 0x182   : > { %14021 = vst [vmem:[#allocation51_spill] sm:$0xff] %v9119_v32  ;;  %v2374_v56 = vmul.f32 %v2310_v28, %v9026_v59  ;;  %v1386_v7 = vmul.f32 6.28125, %v1322_v34  ;;  %v1820_v45 = vmul.f32 %v1756_v54, %v9114_v38  ;;  %v9136_v17 = vmul.f32 %v9119_v32, %v9119_v32 }
 0x183   : > { %14022 = vst [vmem:[#allocation52_spill] sm:$0xff] %v9128_v1  ;;  %14023 = vst [vmem:[#allocation53_spill] sm:$0xff] %v9130_v23  ;;  %v2376_v63 = vmul.f32 %v2312_v40, %v9031_v18  ;;  %v2010_v52 = vadd.f32 2.7557319e-06, %v1946_v55  ;;  %v2458_v59 = vmul.f32 %v9090_v37, %v9074_v4  ;;  %v1514_v46 = vmul.f32 0.0019353072, %v1322_v34 }
 0x184   : > { %14024 = vst [vmem:[#allocation54_spill] sm:$0xff] %v9136_v17  ;;  %v2438_v49 = vadd.f32 -0.16666667, %v2374_v56  ;;  %v1450_v0 = vsub.f32 %v713_v27, %v1386_v7  ;;  %v1884_v53 = vadd.f32 -2.5052108e-08, %v1820_v45  ;;  %v9145_v18 = vmul.f32 %v9130_v23, %v9130_v23 }
 0x185   : > { %v2074_v50 = vmul.f32 %v2010_v52, %v9090_v37  ;;  %v1260_v40 = vadd.f32 0.5, %v1196_v33  ;;  %v2440_v22 = vadd.f32 -0.16666667, %v2376_v63  ;;  %v9149_v28 = vmul.f32 %v9114_v38, %v9103_v9 }
 0x186   : > { %14025 = vst [vmem:[#allocation55_spill] sm:$0xff] %v9145_v18  ;;  %v9151_v19 = vsub.f32 %v1450_v0, %v1514_v46  ;;  %v715_v55 = vadd.f32 %v8802_v13, %v8710_v44  ;;  %v1948_v34 = vmul.f32 %v1884_v53, %v9114_v38  ;;  %v9158_v54 = vmul.f32 %v9136_v17, %v9119_v32 }
 0x187   : > { %v2138_v27 = vadd.f32 -0.0001984127, %v2074_v50  ;;  %v1324_v56 = vfloor.f32 %v1260_v40  ;;  %v2566_v33 = vmul.f32 %v9054_v3, %v2438_v49  ;;  %v9167_v52 = vadd.f32 %v8804_v14, %v8710_v44 }
 0x188   : > { %14026 = vst [vmem:[#allocation56_spill] sm:$0xff] %v9158_v54  ;;  %v9163_v7 = vmul.f32 %v9151_v19, %v9151_v19  ;;  %v1195_v63 = vmul.f32 0.15915494, %v715_v55  ;;  %v2012_v45 = vadd.f32 2.7557319e-06, %v1948_v34  ;;  %v9172_v0 = vmul.f32 %v9145_v18, %v9130_v23 }
 0x189   : > { %v2202_v13 = vmul.f32 %v2138_v27, %v9090_v37  ;;  %v1388_v46 = vmul.f32 6.28125, %v1324_v56  ;;  %v2568_v50 = vmul.f32 %v9066_v30, %v2440_v22  ;;  %v1516_v49 = vmul.f32 0.0019353072, %v1324_v56 }
 0x18a   : > { %14027 = vst [vmem:[#allocation57_spill] sm:$0xff] %v9172_v0  ;;  %v1706_v3 = vmul.f32 -7.6471636e-13, %v9163_v7  ;;  %v1259_v53 = vadd.f32 0.5, %v1195_v63  ;;  %v2076_v32 = vmul.f32 %v2012_v45, %v9114_v38  ;;  %v1197_v54 = vmul.f32 0.15915494, %v9167_v52 }
 0x18b   : > { %v2266_v40 = vadd.f32 0.008333334, %v2202_v13  ;;  %v1452_v14 = vsub.f32 %v9107_v60, %v1388_v46  ;;  %v719_v23 = vadd.f32 %v8834_v31, %v8784_v61  ;;  %v9183_v0 = vadd.f32 %v8836_v6, %v8784_v61 }
 0x18c   : > { %v1770_v27 = vadd.f32 1.6059044e-10, %v1706_v3  ;;  %v1323_v34 = vfloor.f32 %v1259_v53  ;;  %v2140_v22 = vadd.f32 -0.0001984127, %v2076_v32  ;;  %v1261_v63 = vadd.f32 0.5, %v1197_v54 }
 0x18d   : > { %v2330_v30 = vmul.f32 %v2266_v40, %v9090_v37  ;;  %v9186_v56 = vsub.f32 %v1452_v14, %v1516_v49  ;;  %v1210_v46 = vmul.f32 0.15915494, %v719_v23  ;;  %v1212_v32 = vmul.f32 0.15915494, %v9183_v0 }
 0x18e   : > { %v1834_v13 = vmul.f32 %v1770_v27, %v9163_v7  ;;  %v1387_v60 = vmul.f32 6.28125, %v1323_v34  ;;  %v1515_v45 = vmul.f32 0.0019353072, %v1323_v34  ;;  %v2204_v53 = vmul.f32 %v2140_v22, %v9114_v38 }
 0x18f   : > { %v2394_v3 = vadd.f32 -0.16666667, %v2330_v30  ;;  %v9192_v31 = vmul.f32 %v9186_v56, %v9186_v56  ;;  %v1325_v6 = vfloor.f32 %v1261_v63  ;;  %v1274_v37 = vadd.f32 0.5, %v1210_v46 }
 0x190   : > { %v1898_v18 = vadd.f32 -2.5052108e-08, %v1834_v13  ;;  %v1451_v39 = vsub.f32 %v715_v55, %v1387_v60  ;;  %v9196_v54 = vadd.f32 %v2566_v33, %v9009_v58  ;;  %v9199_v49 = vadd.f32 %v2568_v50, %v9011_v41 }
 0x191   : > { %v2268_v40 = vadd.f32 0.008333334, %v2204_v53  ;;  %v1708_v14 = vmul.f32 -7.6471636e-13, %v9192_v31  ;;  %v2522_v27 = vmul.f32 %v2458_v59, %v2394_v3  ;;  %v1389_v22 = vmul.f32 6.28125, %v1325_v6 }
 0x192   : > { %14028 = vst [vmem:[#allocation58_spill] sm:$0xff] %v9196_v54  ;;  %14029 = vst [vmem:[#allocation59_spill] sm:$0xff] %v9199_v49  ;;  %v1962_v34 = vmul.f32 %v1898_v18, %v9163_v7  ;;  %v9203_v30 = vsub.f32 %v1451_v39, %v1515_v45  ;;  %v9208_v63 = vmul.f32 %v9163_v7, %v9151_v19  ;;  %v1338_v33 = vfloor.f32 %v1274_v37 }
 0x193   : > { %v2332_v55 = vmul.f32 %v2268_v40, %v9114_v38  ;;  %v1772_v58 = vadd.f32 1.6059044e-10, %v1708_v14  ;;  %v1453_v59 = vsub.f32 %v9167_v52, %v1389_v22  ;;  %v1276_v50 = vadd.f32 0.5, %v1212_v32 }
 0x194   : > { %14030 = vst [vmem:[#allocation60_spill] sm:$0xff] %v9203_v30  ;;  %v2026_v13 = vadd.f32 2.7557319e-06, %v1962_v34  ;;  %v9212_v41 = vmul.f32 %v9203_v30, %v9203_v30  ;;  %v9218_v38 = vmul.f32 %v9192_v31, %v9186_v56  ;;  %v1402_v60 = vmul.f32 6.28125, %v1338_v33 }
 0x195   : > { %v2396_v18 = vadd.f32 -0.16666667, %v2332_v55  ;;  %v1836_v39 = vmul.f32 %v1772_v58, %v9192_v31  ;;  %v9221_v45 = vadd.f32 %v2522_v27, %v9074_v4  ;;  %v1517_v3 = vmul.f32 0.0019353072, %v1325_v6 }
 0x196   : > { %14031 = vst [vmem:[#allocation61_spill] sm:$0xff] %v9212_v41  ;;  %v2090_v46 = vmul.f32 %v2026_v13, %v9163_v7  ;;  %v1340_v53 = vfloor.f32 %v1276_v50  ;;  %v1466_v40 = vsub.f32 %v719_v23, %v1402_v60  ;;  %v1530_v14 = vmul.f32 0.0019353072, %v1338_v33 }
 0x197   : > { %14032 = vst [vmem:[#allocation62_spill] sm:$0xff] %v9221_v45  ;;  %v1900_v37 = vadd.f32 -2.5052108e-08, %v1836_v39  ;;  %v721_v52 = vadd.f32 %v8846_v43, %v8784_v61  ;;  %v9228_v34 = vmul.f32 %v9212_v41, %v9203_v30  ;;  %v9230_v22 = vsub.f32 %v1453_v59, %v1517_v3 }
 0x198   : > { %v2154_v32 = vadd.f32 -0.0001984127, %v2090_v46  ;;  %v1404_v55 = vmul.f32 6.28125, %v1340_v53  ;;  %v2524_v4 = vmul.f32 %v9149_v28, %v2396_v18  ;;  %v9234_v6 = vsub.f32 %v1466_v40, %v1530_v14 }
 0x199   : > { %14033 = vst [vmem:[#allocation63_spill] sm:$0xff] %v9228_v34  ;;  %14034 = vst [vmem:[#allocation64_spill] sm:$0xff] %v9230_v22  ;;  %v1964_v27 = vmul.f32 %v1900_v37, %v9192_v31  ;;  %v1211_v58 = vmul.f32 0.15915494, %v721_v52  ;;  %v1532_v43 = vmul.f32 0.0019353072, %v1340_v53  ;;  %v9240_v13 = vadd.f32 %v8848_v47, %v8784_v61 }
 0x19a   : > { %v2218_v23 = vmul.f32 %v2154_v32, %v9163_v7  ;;  %v1468_v33 = vsub.f32 %v9183_v0, %v1404_v55  ;;  %v9244_v59 = vmul.f32 %v9234_v6, %v9234_v6  ;;  %v725_v18 = vadd.f32 %v8866_v11, %v8942_v36 }
 0x19b   : > { %v2028_v50 = vadd.f32 2.7557319e-06, %v1964_v27  ;;  %v1275_v28 = vadd.f32 0.5, %v1211_v58  ;;  %v9250_v60 = vmul.f32 %v9230_v22, %v9230_v22  ;;  %v1213_v46 = vmul.f32 0.15915494, %v9240_v13 }
 0x19c   : > { %v2282_v39 = vadd.f32 0.008333334, %v2218_v23  ;;  %v9252_v0 = vsub.f32 %v1468_v33, %v1532_v43  ;;  %v1722_v3 = vmul.f32 -7.6471636e-13, %v9244_v59  ;;  %v9259_v37 = vadd.f32 %v8868_v20, %v8942_v36 }
 0x19d   : > { %14035 = vst [vmem:[#allocation65_spill] sm:$0xff] %v9250_v60  ;;  %v2092_v47 = vmul.f32 %v2028_v50, %v9192_v31  ;;  %v1339_v53 = vfloor.f32 %v1275_v28  ;;  %v1277_v14 = vadd.f32 0.5, %v1213_v46  ;;  %v1226_v32 = vmul.f32 0.15915494, %v725_v18 }
 0x19e   : > { %v2346_v11 = vmul.f32 %v2282_v39, %v9163_v7  ;;  %v9264_v40 = vmul.f32 %v9252_v0, %v9252_v0  ;;  %v9267_v55 = vadd.f32 %v2524_v4, %v9103_v9  ;;  %v1786_v58 = vadd.f32 1.6059044e-10, %v1722_v3 }
 0x19f   : > { %v2156_v27 = vadd.f32 -0.0001984127, %v2092_v47  ;;  %v1403_v23 = vmul.f32 6.28125, %v1339_v53  ;;  %v9271_v43 = vmul.f32 %v9250_v60, %v9230_v22  ;;  %v1531_v7 = vmul.f32 0.0019353072, %v1339_v53 }
 0x1a0   : > { %14036 = vst [vmem:[#allocation66_spill] sm:$0xff] %v9267_v55  ;;  %v2410_v33 = vadd.f32 -0.16666667, %v2346_v11  ;;  %v1724_v20 = vmul.f32 -7.6471636e-13, %v9264_v40  ;;  %v1850_v28 = vmul.f32 %v1786_v58, %v9244_v59  ;;  %v1341_v46 = vfloor.f32 %v1277_v14 }
 0x1a1   : > { %14037 = vst [vmem:[#allocation67_spill] sm:$0xff] %v9271_v43  ;;  %v2220_v50 = vmul.f32 %v2156_v27, %v9192_v31  ;;  %v1467_v39 = vsub.f32 %v721_v52, %v1403_v23  ;;  %v9278_v9 = vmul.f32 %v9244_v59, %v9234_v6  ;;  %v1290_v47 = vadd.f32 0.5, %v1226_v32 }
 0x1a2   : > { %v1788_v4 = vadd.f32 1.6059044e-10, %v1724_v20  ;;  %v1228_v3 = vmul.f32 0.15915494, %v9259_v37  ;;  %v1914_v22 = vadd.f32 -2.5052108e-08, %v1850_v28  ;;  %v2538_v53 = vmul.f32 %v9208_v63, %v2410_v33 }
 0x1a3   : > { %v2284_v11 = vadd.f32 0.008333334, %v2220_v50  ;;  %v9281_v30 = vsub.f32 %v1467_v39, %v1531_v7  ;;  %v1405_v43 = vmul.f32 6.28125, %v1341_v46  ;;  %v1354_v58 = vfloor.f32 %v1290_v47 }
 0x1a4   : > { %v1852_v27 = vmul.f32 %v1788_v4, %v9264_v40  ;;  %v727_v52 = vadd.f32 %v8877_v24, %v8942_v36  ;;  %v1978_v23 = vmul.f32 %v1914_v22, %v9244_v59  ;;  %v1533_v20 = vmul.f32 0.0019353072, %v1341_v46 }
 0x1a5   : > { %14038 = vst [vmem:[#allocation68_spill] sm:$0xff] %v9281_v30  ;;  %v2348_v14 = vmul.f32 %v2284_v11, %v9192_v31  ;;  %v9291_v32 = vmul.f32 %v9281_v30, %v9281_v30  ;;  %v1469_v50 = vsub.f32 %v9240_v13, %v1405_v43  ;;  %v1418_v28 = vmul.f32 6.28125, %v1354_v58  ;;  %v14042_v43 = vld [vmem:[#allocation23_spill] sm:$0xff] }
 0x1a6   : > { %v1916_v7 = vadd.f32 -2.5052108e-08, %v1852_v27  ;;  %v1292_v63 = vadd.f32 0.5, %v1228_v3  ;;  %v2042_v39 = vadd.f32 2.7557319e-06, %v1978_v23  ;;  %v9296_v4 = vmul.f32 %v9264_v40, %v9252_v0 }
 0x1a7   : > { %14039 = vst [vmem:[#allocation69_spill] sm:$0xff] %v9291_v32  ;;  %v2412_v33 = vadd.f32 -0.16666667, %v2348_v14  ;;  %v1546_v24 = vmul.f32 0.0019353072, %v1354_v58  ;;  %v1482_v22 = vsub.f32 %v725_v18, %v1418_v28  ;;  %v9300_v34 = vadd.f32 %v2538_v53, %v9151_v19 }
 0x1a8   : > { %v1980_v31 = vmul.f32 %v1916_v7, %v9264_v40  ;;  %v1356_v47 = vfloor.f32 %v1292_v63  ;;  %v1227_v11 = vmul.f32 0.15915494, %v727_v52  ;;  %v2106_v46 = vmul.f32 %v2042_v39, %v9244_v59 }
 0x1a9   : > { %14040 = vst [vmem:[#allocation70_spill] sm:$0xff] %v9300_v34  ;;  %v9305_v13 = vmul.f32 %v9291_v32, %v9281_v30  ;;  %v9309_v3 = vadd.f32 %v14042_v43, %v8942_v36  ;;  %v9311_v58 = vsub.f32 %v1469_v50, %v1533_v20  ;;  %v9313_v14 = vsub.f32 %v1482_v22, %v1546_v24  ;;  %v14044_v24 = vld [vmem:[#allocation25_spill] sm:$0xff] }
 0x1aa   : > { %v2044_v27 = vadd.f32 2.7557319e-06, %v1980_v31  ;;  %v1420_v18 = vmul.f32 6.28125, %v1356_v47  ;;  %v2540_v23 = vmul.f32 %v9218_v38, %v2412_v33  ;;  %v2170_v19 = vadd.f32 -0.0001984127, %v2106_v46  ;;  %v14045_v38 = vld [vmem:[#allocation26_spill] sm:$0xff] }
 0x1ab   : > { %14041 = vst [vmem:[#allocation71_spill] sm:$0xff] %v9305_v13  ;;  %14043 = vst [vmem:[#allocation23_spill] sm:$0xff] %v9311_v58  ;;  %v1548_v53 = vmul.f32 0.0019353072, %v1356_v47  ;;  %v1291_v7 = vadd.f32 0.5, %v1227_v11  ;;  %v9319_v63 = vmul.f32 %v9313_v14, %v9313_v14  ;;  %v9326_v22 = vadd.f32 %v14044_v24, %v8704_v35 }
 0x1ac   : > { %v2108_v28 = vmul.f32 %v2044_v27, %v9264_v40  ;;  %v1484_v39 = vsub.f32 %v9259_v37, %v1420_v18  ;;  %v1229_v31 = vmul.f32 0.15915494, %v9309_v3  ;;  %v2234_v20 = vmul.f32 %v2170_v19, %v9244_v59 }
 0x1ad   : > { %v1355_v50 = vfloor.f32 %v1291_v7  ;;  %v9330_v33 = vadd.f32 %v14045_v38, %v8704_v35  ;;  %v9334_v11 = vmul.f32 %v9311_v58, %v9311_v58  ;;  %v1738_v37 = vmul.f32 -7.6471636e-13, %v9319_v63 }
 0x1ae   : > { %v2172_v47 = vadd.f32 -0.0001984127, %v2108_v28  ;;  %v9337_v46 = vsub.f32 %v1484_v39, %v1548_v53  ;;  %v2298_v43 = vadd.f32 0.008333334, %v2234_v20  ;;  %v1293_v19 = vadd.f32 0.5, %v1229_v31 }
 0x1af   : > { %14046 = vst [vmem:[#allocation25_spill] sm:$0xff] %v9334_v11  ;;  %v1419_v27 = vmul.f32 6.28125, %v1355_v50  ;;  %v1547_v18 = vmul.f32 0.0019353072, %v1355_v50  ;;  %v1802_v24 = vadd.f32 1.6059044e-10, %v1738_v37  ;;  %v9348_v39 = vadd.f32 %v2540_v23, %v9186_v56 }
 0x1b0   : > { %v2236_v7 = vmul.f32 %v2172_v47, %v9264_v40  ;;  %v9342_v38 = vmul.f32 %v9337_v46, %v9337_v46  ;;  %v1182_v28 = vmul.f32 0.15915494, %v9326_v22  ;;  %v2362_v30 = vmul.f32 %v2298_v43, %v9244_v59 }
 0x1b1   : > { %v1483_v13 = vsub.f32 %v727_v52, %v1419_v27  ;;  %v1357_v32 = vfloor.f32 %v1293_v19  ;;  %v1184_v53 = vmul.f32 0.15915494, %v9330_v33  ;;  %14047 = vst [vmem:[#allocation26_spill] sm:$0xff] %v9348_v39  ;;  %v1866_v31 = vmul.f32 %v1802_v24, %v9319_v63  ;;  %v9358_v52 = vpop.f32.mrb[27].mxu0  ;;  %v9361_v19 = vpop.f32.mrb[27].mxu1 }
 0x1b2   : > { %v2300_v20 = vadd.f32 0.008333334, %v2236_v7  ;;  %v1740_v50 = vmul.f32 -7.6471636e-13, %v9342_v38  ;;  %v2426_v47 = vadd.f32 -0.16666667, %v2362_v30  ;;  %v9354_v37 = vmul.f32 %v9334_v11, %v9311_v58 }
 0x1b3   : > { %v9356_v55 = vsub.f32 %v1483_v13, %v1547_v18  ;;  %v1421_v59 = vmul.f32 6.28125, %v1357_v32  ;;  %v1930_v27 = vadd.f32 -2.5052108e-08, %v1866_v31  ;;  %v1246_v23 = vadd.f32 0.5, %v1182_v28  ;;  %v9391_v11 = vpop.f32.mrb[28].mxu1 }
 0x1b4   : > { %14048 = vst [vmem:[#allocation72_spill] sm:$0xff] %v9354_v37  ;;  %v2364_v43 = vmul.f32 %v2300_v20, %v9264_v40  ;;  %v1804_v56 = vadd.f32 1.6059044e-10, %v1740_v50  ;;  %v2554_v7 = vmul.f32 %v9278_v9, %v2426_v47  ;;  %v1248_v13 = vadd.f32 0.5, %v1184_v53  ;;  %v9371_v20 = vpop.f32.mrb[28].mxu0 }
 0x1b5   : > { %14049 = vst [vmem:[#allocation73_spill] sm:$0xff] %v9356_v55  ;;  %v9366_v30 = vmul.f32 %v9356_v55, %v9356_v55  ;;  %v1485_v24 = vsub.f32 %v9309_v3, %v1421_v59  ;;  %v1994_v58 = vmul.f32 %v1930_v27, %v9319_v63  ;;  %v1310_v40 = vfloor.f32 %v1246_v23 }
 0x1b6   : > { %v2428_v18 = vadd.f32 -0.16666667, %v2364_v43  ;;  %v1868_v37 = vmul.f32 %v1804_v56, %v9342_v38  ;;  %v9375_v28 = vmul.f32 %v9319_v63, %v9313_v14  ;;  %v9379_v9 = vmul.f32 %v9342_v38, %v9337_v46 }
 0x1b7   : > { %14050 = vst [vmem:[#allocation74_spill] sm:$0xff] %v9366_v30  ;;  %v1549_v31 = vmul.f32 0.0019353072, %v1357_v32  ;;  %v1312_v50 = vfloor.f32 %v1248_v13  ;;  %v9382_v3 = vadd.f32 %v2554_v7, %v9234_v6  ;;  %v2058_v53 = vadd.f32 2.7557319e-06, %v1994_v58  ;;  %v9398_v7 = vpop.f32.mrb[29].mxu1 }
 0x1b8   : > { %v1932_v47 = vadd.f32 -2.5052108e-08, %v1868_v37  ;;  %v1374_v59 = vmul.f32 6.28125, %v1310_v40  ;;  %v2556_v43 = vmul.f32 %v9296_v4, %v2428_v18  ;;  %v9387_v27 = vmul.f32 %v9366_v30, %v9356_v55  ;;  %v9396_v37 = vpop.f32.mrb[29].mxu0  ;;  %v14055_v55 = vld [vmem:[#allocation28_spill] sm:$0xff] }
 0x1b9   : > { %14051 = vst [vmem:[#allocation75_spill] sm:$0xff] %v9382_v3  ;;  %v9389_v56 = vsub.f32 %v1485_v24, %v1549_v31  ;;  %v1376_v23 = vmul.f32 6.28125, %v1312_v50  ;;  %v2122_v32 = vmul.f32 %v2058_v53, %v9319_v63  ;;  %v1502_v58 = vmul.f32 0.0019353072, %v1310_v40  ;;  %v14054_v24 = vld [vmem:[#allocation27_spill] sm:$0xff] }
 0x1ba   : > { %14052 = vst [vmem:[#allocation76_spill] sm:$0xff] %v9387_v27  ;;  %v1996_v13 = vmul.f32 %v1932_v47, %v9342_v38  ;;  %v1438_v6 = vsub.f32 %v9326_v22, %v1374_v59  ;;  %v1504_v18 = vmul.f32 0.0019353072, %v1312_v50  ;;  %v887_v31 = vadd.f32 %v14054_v24, %v8704_v35  ;;  %v9419_v24 = vpop.f32.mrb[30].mxu1 }
 0x1bb   : > { %14053 = vst [vmem:[#allocation77_spill] sm:$0xff] %v9389_v56  ;;  %v1440_v4 = vsub.f32 %v9330_v33, %v1376_v23  ;;  %v976_v27 = vadd.f32 %v14055_v55, %v8704_v35  ;;  %v2186_v3 = vadd.f32 -0.0001984127, %v2122_v32  ;;  %v9409_v22 = vadd.f32 %v8903_v12, %v8710_v44  ;;  %v14056_v33 = vld [vmem:[#allocation29_spill] sm:$0xff]  ;;  %v9417_v23 = vpop.f32.mrb[30].mxu0  ;;  %14058 = vst [vmem:[#allocation28_spill] sm:$0xff] %v9419_v24 }
 0x1bc   : > { %v2060_v53 = vadd.f32 2.7557319e-06, %v1996_v13  ;;  %v9405_v30 = vsub.f32 %v1438_v6, %v1502_v58  ;;  %v1183_v47 = vmul.f32 0.15915494, %v887_v31  ;;  %v9415_v50 = vadd.f32 %v14056_v33, %v8710_v44  ;;  %14057 = vst [vmem:[#allocation27_spill] sm:$0xff] %v9417_v23 }
 0x1bd   : > { %v9411_v40 = vsub.f32 %v1440_v4, %v1504_v18  ;;  %v1185_v59 = vmul.f32 0.15915494, %v976_v27  ;;  %v2250_v55 = vmul.f32 %v2186_v3, %v9319_v63  ;;  %v1198_v13 = vmul.f32 0.15915494, %v9409_v22 }
 0x1be   : > { %v2124_v32 = vmul.f32 %v2060_v53, %v9342_v38  ;;  %v9425_v12 = vmul.f32 %v9405_v30, %v9405_v30  ;;  %v9430_v6 = vmul.f32 %v9389_v56, %v9389_v56  ;;  %v1247_v4 = vadd.f32 0.5, %v1183_v47 }
 0x1bf   : > { %v9434_v58 = vmul.f32 %v9411_v40, %v9411_v40  ;;  %v1249_v18 = vadd.f32 0.5, %v1185_v59  ;;  %v9437_v3 = vadd.f32 %v2556_v43, %v9252_v0  ;;  %v2314_v53 = vadd.f32 0.008333334, %v2250_v55 }
 0x1c0   : > { %v2188_v33 = vadd.f32 -0.0001984127, %v2124_v32  ;;  %v1694_v39 = vmul.f32 -7.6471636e-13, %v9425_v12  ;;  %v1311_v45 = vfloor.f32 %v1247_v4  ;;  %v1200_v41 = vmul.f32 0.15915494, %v9415_v50 }
 0x1c1   : > { %14059 = vst [vmem:[#allocation29_spill] sm:$0xff] %v9437_v3  ;;  %v1696_v34 = vmul.f32 -7.6471636e-13, %v9434_v58  ;;  %v1313_v60 = vfloor.f32 %v1249_v18  ;;  %v2378_v17 = vmul.f32 %v2314_v53, %v9319_v63  ;;  %v1262_v47 = vadd.f32 0.5, %v1198_v13 }
 0x1c2   : > { %v2252_v1 = vmul.f32 %v2188_v33, %v9342_v38  ;;  %v1758_v49 = vadd.f32 1.6059044e-10, %v1694_v39  ;;  %v1375_v54 = vmul.f32 6.28125, %v1311_v45  ;;  %v1503_v0 = vmul.f32 0.0019353072, %v1311_v45 }
 0x1c3   : > { %v1760_v59 = vadd.f32 1.6059044e-10, %v1696_v34  ;;  %v1377_v43 = vmul.f32 6.28125, %v1313_v60  ;;  %v2442_v55 = vadd.f32 -0.16666667, %v2378_v17  ;;  %v1326_v23 = vfloor.f32 %v1262_v47 }
 0x1c4   : > { %v2316_v32 = vadd.f32 0.008333334, %v2252_v1  ;;  %v1822_v3 = vmul.f32 %v1758_v49, %v9425_v12  ;;  %v1505_v51 = vmul.f32 0.0019353072, %v1313_v60  ;;  %v1439_v18 = vsub.f32 %v887_v31, %v1375_v54 }
 0x1c5   : > { %v1824_v4 = vmul.f32 %v1760_v59, %v9434_v58  ;;  %v1441_v24 = vsub.f32 %v976_v27, %v1377_v43  ;;  %v2570_v63 = vmul.f32 %v9375_v28, %v2442_v55  ;;  %v1264_v13 = vadd.f32 0.5, %v1200_v41 }
 0x1c6   : > { %v2380_v53 = vmul.f32 %v2316_v32, %v9342_v38  ;;  %v1886_v39 = vadd.f32 -2.5052108e-08, %v1822_v3  ;;  %v9448_v33 = vsub.f32 %v1439_v18, %v1503_v0  ;;  %v1390_v1 = vmul.f32 6.28125, %v1326_v23 }
 0x1c7   : > { %v1888_v34 = vadd.f32 -2.5052108e-08, %v1824_v4  ;;  %v9450_v45 = vsub.f32 %v1441_v24, %v1505_v51  ;;  %v9454_v49 = vmul.f32 %v9430_v6, %v9389_v56  ;;  %v2462_v60 = vmul.f32 %v9425_v12, %v9405_v30 }
 0x1c8   : > { %14060 = vst [vmem:[#allocation78_spill] sm:$0xff] %v9448_v33  ;;  %v2444_v17 = vadd.f32 -0.16666667, %v2380_v53  ;;  %v1950_v54 = vmul.f32 %v1886_v39, %v9425_v12  ;;  %v9462_v41 = vmul.f32 %v9448_v33, %v9448_v33  ;;  %v1454_v51 = vsub.f32 %v9409_v22, %v1390_v1 }
 0x1c9   : > { %14061 = vst [vmem:[#allocation79_spill] sm:$0xff] %v9450_v45  ;;  %14062 = vst [vmem:[#allocation80_spill] sm:$0xff] %v9454_v49  ;;  %v1952_v38 = vmul.f32 %v1888_v34, %v9434_v58  ;;  %v1518_v28 = vmul.f32 0.0019353072, %v1326_v23  ;;  %v2464_v31 = vmul.f32 %v9434_v58, %v9411_v40  ;;  %v1328_v24 = vfloor.f32 %v1264_v13 }
 0x1ca   : > { %v2014_v27 = vadd.f32 2.7557319e-06, %v1950_v54  ;;  %v893_v3 = vadd.f32 %v8911_v2, %v8710_v44  ;;  %v9470_v47 = vadd.f32 %v2570_v63, %v9313_v14  ;;  %v9474_v0 = vmul.f32 %v9450_v45, %v9450_v45 }
 0x1cb   : > { %v2016_v59 = vadd.f32 2.7557319e-06, %v1952_v38  ;;  %v9476_v43 = vsub.f32 %v1454_v51, %v1518_v28  ;;  %v2572_v22 = vmul.f32 %v9379_v9, %v2444_v17  ;;  %v9482_v55 = vmul.f32 %v9462_v41, %v9448_v33 }
 0x1cc   : > { %v2078_v23 = vmul.f32 %v2014_v27, %v9425_v12  ;;  %v1392_v32 = vmul.f32 6.28125, %v1328_v24  ;;  %v1199_v4 = vmul.f32 0.15915494, %v893_v3  ;;  %v982_v18 = vadd.f32 %v8913_v8, %v8710_v44 }
 0x1cd   : > { %14063 = vst [vmem:[#allocation81_spill] sm:$0xff] %v9482_v55  ;;  %v2080_v2 = vmul.f32 %v2016_v59, %v9434_v58  ;;  %v9487_v14 = vmul.f32 %v9476_v43, %v9476_v43  ;;  %v1520_v53 = vmul.f32 0.0019353072, %v1328_v24  ;;  %v897_v39 = vadd.f32 %v8928_v57, %v8784_v61 }
 0x1ce   : > { %v2142_v63 = vadd.f32 -0.0001984127, %v2078_v23  ;;  %v1456_v9 = vsub.f32 %v9415_v50, %v1392_v32  ;;  %v1263_v1 = vadd.f32 0.5, %v1199_v4  ;;  %v9497_v17 = vadd.f32 %v8930_v25, %v8784_v61 }
 0x1cf   : > { %v2144_v13 = vadd.f32 -0.0001984127, %v2080_v2  ;;  %v1710_v34 = vmul.f32 -7.6471636e-13, %v9487_v14  ;;  %v1201_v8 = vmul.f32 0.15915494, %v982_v18  ;;  %v9505_v28 = vmul.f32 %v9474_v0, %v9450_v45 }
 0x1d0   : > { %v2206_v54 = vmul.f32 %v2142_v63, %v9425_v12  ;;  %v9500_v38 = vsub.f32 %v1456_v9, %v1520_v53  ;;  %v1214_v51 = vmul.f32 0.15915494, %v897_v39  ;;  %v1327_v27 = vfloor.f32 %v1263_v1 }
 0x1d1   : > { %v2208_v50 = vmul.f32 %v2144_v13, %v9434_v58  ;;  %14064 = vst [vmem:[#allocation82_spill] sm:$0xff] %v9505_v28  ;;  %v1774_v57 = vadd.f32 1.6059044e-10, %v1710_v34  ;;  %v1265_v25 = vadd.f32 0.5, %v1201_v8  ;;  %v1216_v63 = vmul.f32 0.15915494, %v9497_v17 }
 0x1d2   : > { %v2270_v24 = vadd.f32 0.008333334, %v2206_v54  ;;  %v9509_v59 = vmul.f32 %v9500_v38, %v9500_v38  ;;  %v1278_v23 = vadd.f32 0.5, %v1214_v51  ;;  %v1391_v4 = vmul.f32 6.28125, %v1327_v27 }
 0x1d3   : > { %v2272_v32 = vadd.f32 0.008333334, %v2208_v50  ;;  %v1838_v2 = vmul.f32 %v1774_v57, %v9487_v14  ;;  %v1519_v13 = vmul.f32 0.0019353072, %v1327_v27  ;;  %v1329_v34 = vfloor.f32 %v1265_v25 }
 0x1d4   : > { %v2334_v9 = vmul.f32 %v2270_v24, %v9425_v12  ;;  %v1712_v53 = vmul.f32 -7.6471636e-13, %v9509_v59  ;;  %v1455_v45 = vsub.f32 %v893_v3, %v1391_v4  ;;  %v1342_v28 = vfloor.f32 %v1278_v23 }
 0x1d5   : > { %v2336_v1 = vmul.f32 %v2272_v32, %v9434_v58  ;;  %v1902_v54 = vadd.f32 -2.5052108e-08, %v1838_v2  ;;  %v9517_v8 = vadd.f32 %v2572_v22, %v9337_v46  ;;  %v1393_v57 = vmul.f32 6.28125, %v1329_v34 }
 0x1d6   : > { %v2398_v51 = vadd.f32 -0.16666667, %v2334_v9  ;;  %v1776_v50 = vadd.f32 1.6059044e-10, %v1712_v53  ;;  %v9520_v56 = vsub.f32 %v1455_v45, %v1519_v13  ;;  %v1280_v12 = vadd.f32 0.5, %v1216_v63 }
 0x1d7   : > { %v2400_v33 = vadd.f32 -0.16666667, %v2336_v1  ;;  %v1966_v55 = vmul.f32 %v1902_v54, %v9487_v14  ;;  %v1457_v25 = vsub.f32 %v982_v18, %v1393_v57  ;;  %v1406_v58 = vmul.f32 6.28125, %v1342_v28 }
 0x1d8   : > { %14065 = vst [vmem:[#allocation83_spill] sm:$0xff] %v9520_v56  ;;  %v2526_v24 = vmul.f32 %v2462_v60, %v2398_v51  ;;  %v1840_v27 = vmul.f32 %v1776_v50, %v9509_v59  ;;  %v2478_v46 = vmul.f32 %v9487_v14, %v9476_v43  ;;  %v9527_v22 = vmul.f32 %v9509_v59, %v9500_v38 }
 0x1d9   : > { %v2528_v32 = vmul.f32 %v2464_v31, %v2400_v33  ;;  %v2030_v3 = vadd.f32 2.7557319e-06, %v1966_v55  ;;  %v1521_v2 = vmul.f32 0.0019353072, %v1329_v34  ;;  %v1470_v4 = vsub.f32 %v897_v39, %v1406_v58 }
 0x1da   : > { %v1904_v23 = vadd.f32 -2.5052108e-08, %v1840_v27  ;;  %v1534_v45 = vmul.f32 0.0019353072, %v1342_v28  ;;  %v9530_v63 = vadd.f32 %v2526_v24, %v9405_v30  ;;  %v9535_v33 = vmul.f32 %v9520_v56, %v9520_v56 }
 0x1db   : > { %v2094_v60 = vmul.f32 %v2030_v3, %v9487_v14  ;;  %v1344_v31 = vfloor.f32 %v1280_v12  ;;  %v9538_v18 = vsub.f32 %v1457_v25, %v1521_v2  ;;  %v899_v39 = vadd.f32 %v8940_v62, %v8784_v61 }
 0x1dc   : > { %v1968_v55 = vmul.f32 %v1904_v23, %v9509_v59  ;;  %v9540_v9 = vsub.f32 %v1470_v4, %v1534_v45  ;;  %v9545_v28 = vadd.f32 %v2528_v32, %v9411_v40  ;;  %v988_v13 = vadd.f32 %v8955_v21, %v8784_v61  ;;  %v14068_v4 = vld [vmem:[#allocation36_spill] sm:$0xff]  ;;  %v9569_v45 = vpop.f32.mrb[31].mxu0 }
 0x1dd   : > { %14066 = vst [vmem:[#allocation84_spill] sm:$0xff] %v9538_v18  ;;  %v2158_v30 = vadd.f32 -0.0001984127, %v2094_v60  ;;  %v1408_v53 = vmul.f32 6.28125, %v1344_v31  ;;  %v1536_v54 = vmul.f32 0.0019353072, %v1344_v31  ;;  %v903_v40 = vadd.f32 %v8974_v29, %v8942_v36 }
 0x1de   : > { %v2032_v34 = vadd.f32 2.7557319e-06, %v1968_v55  ;;  %v9551_v1 = vmul.f32 %v9540_v9, %v9540_v9  ;;  %v1215_v51 = vmul.f32 0.15915494, %v899_v39  ;;  %v1217_v62 = vmul.f32 0.15915494, %v988_v13 }
 0x1df   : > { %v2222_v50 = vmul.f32 %v2158_v30, %v9487_v14  ;;  %v1472_v57 = vsub.f32 %v9497_v17, %v1408_v53  ;;  %v9560_v21 = vmul.f32 %v9535_v33, %v9520_v56  ;;  %v1230_v3 = vmul.f32 0.15915494, %v903_v40  ;;  %v9583_v56 = vpop.f32.mrb[31].mxu1 }
 0x1e0   : > { %v2096_v12 = vmul.f32 %v2032_v34, %v9509_v59  ;;  %v1726_v24 = vmul.f32 -7.6471636e-13, %v9551_v1  ;;  %v1279_v27 = vadd.f32 0.5, %v1215_v51  ;;  %v1281_v32 = vadd.f32 0.5, %v1217_v62 }
 0x1e1   : > { %14067 = vst [vmem:[#allocation85_spill] sm:$0xff] %v9560_v21  ;;  %v2286_v25 = vadd.f32 0.008333334, %v2222_v50  ;;  %v9563_v58 = vsub.f32 %v1472_v57, %v1536_v54  ;;  %v9567_v29 = vadd.f32 %v14068_v4, %v8942_v36  ;;  %v1294_v30 = vadd.f32 0.5, %v1230_v3 }
 0x1e2   : > { %v2160_v23 = vadd.f32 -0.0001984127, %v2096_v12  ;;  %v1790_v17 = vadd.f32 1.6059044e-10, %v1726_v24  ;;  %v1343_v2 = vfloor.f32 %v1279_v27  ;;  %v1345_v55 = vfloor.f32 %v1281_v32 }
 0x1e3   : > { %v2350_v60 = vmul.f32 %v2286_v25, %v9487_v14  ;;  %v9574_v31 = vmul.f32 %v9563_v58, %v9563_v58  ;;  %v9580_v57 = vmul.f32 %v9538_v18, %v9538_v18  ;;  %v1232_v21 = vmul.f32 0.15915494, %v9567_v29 }
 0x1e4   : > { %v2224_v53 = vmul.f32 %v2160_v23, %v9509_v59  ;;  %v1854_v34 = vmul.f32 %v1790_v17, %v9551_v1  ;;  %v1407_v54 = vmul.f32 6.28125, %v1343_v2  ;;  %v1535_v51 = vmul.f32 0.0019353072, %v1343_v2 }
 0x1e5   : > { %v2414_v50 = vadd.f32 -0.16666667, %v2350_v60  ;;  %v1728_v62 = vmul.f32 -7.6471636e-13, %v9574_v31  ;;  %v1409_v14 = vmul.f32 6.28125, %v1345_v55  ;;  %v1358_v23 = vfloor.f32 %v1294_v30 }
 0x1e6   : > { %v2288_v12 = vadd.f32 0.008333334, %v2224_v53  ;;  %v1918_v24 = vadd.f32 -2.5052108e-08, %v1854_v34  ;;  %v1471_v27 = vsub.f32 %v899_v39, %v1407_v54  ;;  %v1537_v25 = vmul.f32 0.0019353072, %v1345_v55 }
 0x1e7   : > { %v2542_v32 = vmul.f32 %v2478_v46, %v2414_v50  ;;  %v1792_v3 = vadd.f32 1.6059044e-10, %v1728_v62  ;;  %v1473_v4 = vsub.f32 %v988_v13, %v1409_v14  ;;  %v9592_v53 = vmul.f32 %v9580_v57, %v9538_v18 }
 0x1e8   : > { %v2352_v17 = vmul.f32 %v2288_v12, %v9509_v59  ;;  %v1982_v2 = vmul.f32 %v1918_v24, %v9551_v1  ;;  %v9587_v60 = vsub.f32 %v1471_v27, %v1535_v51  ;;  %v1422_v13 = vmul.f32 6.28125, %v1358_v23 }
 0x1e9   : > { %14070 = vst [vmem:[#allocation86_spill] sm:$0xff] %v9592_v53  ;;  %v1856_v39 = vmul.f32 %v1792_v3, %v9574_v31  ;;  %v9595_v46 = vsub.f32 %v1473_v4, %v1537_v25  ;;  %v2494_v59 = vmul.f32 %v9551_v1, %v9540_v9  ;;  %v1550_v50 = vmul.f32 0.0019353072, %v1358_v23 }
 0x1ea   : > { %14069 = vst [vmem:[#allocation36_spill] sm:$0xff] %v9587_v60  ;;  %v2416_v55 = vadd.f32 -0.16666667, %v2352_v17  ;;  %v2046_v30 = vadd.f32 2.7557319e-06, %v1982_v2  ;;  %v9601_v34 = vmul.f32 %v9587_v60, %v9587_v60  ;;  %v1486_v51 = vsub.f32 %v903_v40, %v1422_v13 }
 0x1eb   : > { %14071 = vst [vmem:[#allocation87_spill] sm:$0xff] %v9595_v46  ;;  %v1920_v54 = vadd.f32 -2.5052108e-08, %v1856_v39  ;;  %v1296_v62 = vadd.f32 0.5, %v1232_v21  ;;  %v9604_v14 = vadd.f32 %v2542_v32, %v9476_v43  ;;  %v9609_v24 = vmul.f32 %v9574_v31, %v9563_v58 }
 0x1ec   : > { %v2110_v12 = vmul.f32 %v2046_v30, %v9551_v1  ;;  %v905_v27 = vadd.f32 %v9004_v42, %v8942_v36  ;;  %v9616_v3 = vmul.f32 %v9595_v46, %v9595_v46  ;;  %v9618_v40 = vsub.f32 %v1486_v51, %v1550_v50 }
 0x1ed   : > { %v1984_v25 = vmul.f32 %v1920_v54, %v9574_v31  ;;  %v1360_v21 = vfloor.f32 %v1296_v62  ;;  %v2544_v43 = vmul.f32 %v9527_v22, %v2416_v55  ;;  %v994_v23 = vadd.f32 %v9017_v16, %v8942_v36 }
 0x1ee   : > { %v2174_v32 = vadd.f32 -0.0001984127, %v2110_v12  ;;  %v1231_v4 = vmul.f32 0.15915494, %v905_v27  ;;  %v9625_v42 = vmul.f32 %v9601_v34, %v9587_v60  ;;  %v9629_v2 = vmul.f32 %v9618_v40, %v9618_v40 }
 0x1ef   : > { %v2048_v17 = vadd.f32 2.7557319e-06, %v1984_v25  ;;  %v1424_v39 = vmul.f32 6.28125, %v1360_v21  ;;  %v1233_v54 = vmul.f32 0.15915494, %v994_v23  ;;  %v1063_v22 = vadd.f32 %v9046_v5, %v8704_v35 }
 0x1f0   : > { %14072 = vst [vmem:[#allocation88_spill] sm:$0xff] %v9625_v42  ;;  %v2238_v13 = vmul.f32 %v2174_v32, %v9551_v1  ;;  %v1295_v30 = vadd.f32 0.5, %v1231_v4  ;;  %v1742_v16 = vmul.f32 -7.6471636e-13, %v9629_v2  ;;  %v1552_v50 = vmul.f32 0.0019353072, %v1360_v21 }
 0x1f1   : > { %v2112_v55 = vmul.f32 %v2048_v17, %v9574_v31  ;;  %v1488_v51 = vsub.f32 %v9567_v29, %v1424_v39  ;;  %v1297_v25 = vadd.f32 0.5, %v1233_v54  ;;  %v1186_v60 = vmul.f32 0.15915494, %v1063_v22 }
 0x1f2   : > { %v2302_v62 = vadd.f32 0.008333334, %v2238_v13  ;;  %v1359_v12 = vfloor.f32 %v1295_v30  ;;  %v1806_v18 = vadd.f32 1.6059044e-10, %v1742_v16  ;;  %v9641_v32 = vadd.f32 %v9060_v26, %v8704_v35 }
 0x1f3   : > { %v2176_v42 = vadd.f32 -0.0001984127, %v2112_v55  ;;  %v9637_v53 = vsub.f32 %v1488_v51, %v1552_v50  ;;  %v1361_v49 = vfloor.f32 %v1297_v25  ;;  %v1250_v13 = vadd.f32 0.5, %v1186_v60 }
 0x1f4   : > { %v2366_v5 = vmul.f32 %v2302_v62, %v9551_v1  ;;  %v1423_v4 = vmul.f32 6.28125, %v1359_v12  ;;  %v1551_v17 = vmul.f32 0.0019353072, %v1359_v12  ;;  %v1870_v21 = vmul.f32 %v1806_v18, %v9629_v2 }
 0x1f5   : > { %v2240_v29 = vmul.f32 %v2176_v42, %v9574_v31  ;;  %v9648_v39 = vmul.f32 %v9637_v53, %v9637_v53  ;;  %v1425_v55 = vmul.f32 6.28125, %v1361_v49  ;;  %v1553_v16 = vmul.f32 0.0019353072, %v1361_v49 }
 0x1f6   : > { %v2430_v30 = vadd.f32 -0.16666667, %v2366_v5  ;;  %v1487_v54 = vsub.f32 %v905_v27, %v1423_v4  ;;  %v9652_v1 = vmul.f32 %v9616_v3, %v9595_v46  ;;  %v1934_v51 = vadd.f32 -2.5052108e-08, %v1870_v21 }
 0x1f7   : > { %v2304_v26 = vadd.f32 0.008333334, %v2240_v29  ;;  %v1744_v50 = vmul.f32 -7.6471636e-13, %v9648_v39  ;;  %v1489_v18 = vsub.f32 %v994_v23, %v1425_v55  ;;  %v1314_v12 = vfloor.f32 %v1250_v13 }
 0x1f8   : > { %14073 = vst [vmem:[#allocation89_spill] sm:$0xff] %v9652_v1  ;;  %v2558_v42 = vmul.f32 %v2494_v59, %v2430_v30  ;;  %v9655_v62 = vsub.f32 %v1487_v54, %v1551_v17  ;;  %v1998_v60 = vmul.f32 %v1934_v51, %v9629_v2  ;;  %v1188_v49 = vmul.f32 0.15915494, %v9641_v32 }
 0x1f9   : > { %v2368_v25 = vmul.f32 %v2304_v26, %v9574_v31  ;;  %v1808_v27 = vadd.f32 1.6059044e-10, %v1744_v50  ;;  %v9661_v5 = vadd.f32 %v2544_v43, %v9500_v38  ;;  %v9665_v4 = vmul.f32 %v9629_v2, %v9618_v40 }
 0x1fa   : > { %14074 = vst [vmem:[#allocation90_spill] sm:$0xff] %v9655_v62  ;;  %v9669_v59 = vmul.f32 %v9655_v62, %v9655_v62  ;;  %v1378_v23 = vmul.f32 6.28125, %v1314_v12  ;;  %v2062_v17 = vadd.f32 2.7557319e-06, %v1998_v60  ;;  %v9674_v29 = vmul.f32 %v9648_v39, %v9637_v53 }
 0x1fb   : > { %v1872_v31 = vmul.f32 %v1808_v27, %v9648_v39  ;;  %v9676_v21 = vsub.f32 %v1489_v18, %v1553_v16  ;;  %v2432_v38 = vadd.f32 -0.16666667, %v2368_v25  ;;  %v1506_v13 = vmul.f32 0.0019353072, %v1314_v12 }
 0x1fc   : > { %v1442_v43 = vsub.f32 %v1063_v22, %v1378_v23  ;;  %v1252_v30 = vadd.f32 0.5, %v1188_v49  ;;  %v9679_v54 = vadd.f32 %v2558_v42, %v9540_v9  ;;  %v2126_v55 = vmul.f32 %v2062_v17, %v9629_v2  ;;  %v14078_v22 = vld [vmem:[#allocation50_spill] sm:$0xff] }
 0x1fd   : > { %14075 = vst [vmem:[#allocation91_spill] sm:$0xff] %v9676_v21  ;;  %v1936_v26 = vadd.f32 -2.5052108e-08, %v1872_v31  ;;  %v1065_v51 = vadd.f32 %v9094_v10, %v8704_v35  ;;  %v9686_v50 = vmul.f32 %v9669_v59, %v9655_v62  ;;  %v1154_v18 = vadd.f32 %v14078_v22, %v8704_v35 }
 0x1fe   : > { %14076 = vst [vmem:[#allocation92_spill] sm:$0xff] %v9679_v54  ;;  %v9688_v60 = vsub.f32 %v1442_v43, %v1506_v13  ;;  %v1316_v16 = vfloor.f32 %v1252_v30  ;;  %v2190_v12 = vadd.f32 -0.0001984127, %v2126_v55  ;;  %v9695_v42 = vmul.f32 %v9676_v21, %v9676_v21 }
 0x1ff   : > { %14077 = vst [vmem:[#allocation93_spill] sm:$0xff] %v9686_v50  ;;  %v2000_v9 = vmul.f32 %v1936_v26, %v9648_v39  ;;  %v1187_v25 = vmul.f32 0.15915494, %v1065_v51  ;;  %v2560_v10 = vmul.f32 %v9609_v24, %v2432_v38  ;;  %v1189_v23 = vmul.f32 0.15915494, %v1154_v18 }
 0x200   : > { %v9700_v27 = vmul.f32 %v9688_v60, %v9688_v60  ;;  %v1380_v49 = vmul.f32 6.28125, %v1316_v16  ;;  %v2254_v17 = vmul.f32 %v2190_v12, %v9629_v2  ;;  %v1069_v43 = vadd.f32 %v9121_v15, %v8710_v44 }
 0x201   : > { %v2064_v31 = vadd.f32 2.7557319e-06, %v2000_v9  ;;  %v1251_v35 = vadd.f32 0.5, %v1187_v25  ;;  %v1508_v55 = vmul.f32 0.0019353072, %v1316_v16  ;;  %v1253_v26 = vadd.f32 0.5, %v1189_v23 }
 0x202   : > { %v1698_v13 = vmul.f32 -7.6471636e-13, %v9700_v27  ;;  %v1444_v30 = vsub.f32 %v9641_v32, %v1380_v49  ;;  %v2318_v24 = vadd.f32 0.008333334, %v2254_v17  ;;  %v1202_v46 = vmul.f32 0.15915494, %v1069_v43 }
 0x203   : > { %v2128_v38 = vmul.f32 %v2064_v31, %v9648_v39  ;;  %v1315_v22 = vfloor.f32 %v1251_v35  ;;  %v9710_v1 = vmul.f32 %v9695_v42, %v9676_v21  ;;  %v1317_v25 = vfloor.f32 %v1253_v26 }
 0x204   : > { %v1762_v12 = vadd.f32 1.6059044e-10, %v1698_v13  ;;  %v9712_v9 = vsub.f32 %v1444_v30, %v1508_v55  ;;  %v2382_v15 = vmul.f32 %v2318_v24, %v9629_v2  ;;  %v9717_v32 = vadd.f32 %v9138_v48, %v8710_v44 }
 0x205   : > { %14079 = vst [vmem:[#allocation50_spill] sm:$0xff] %v9710_v1  ;;  %v2192_v62 = vadd.f32 -0.0001984127, %v2128_v38  ;;  %v1379_v50 = vmul.f32 6.28125, %v1315_v22  ;;  %v1507_v23 = vmul.f32 0.0019353072, %v1315_v22  ;;  %v9726_v2 = vadd.f32 %v2560_v10, %v9563_v58 }
 0x206   : > { %v1826_v16 = vmul.f32 %v1762_v12, %v9700_v27  ;;  %v9722_v49 = vmul.f32 %v9712_v9, %v9712_v9  ;;  %v1381_v17 = vmul.f32 6.28125, %v1317_v25  ;;  %v2446_v31 = vadd.f32 -0.16666667, %v2382_v15 }
 0x207   : > { %v2256_v35 = vmul.f32 %v2192_v62, %v9648_v39  ;;  %v1443_v13 = vsub.f32 %v1065_v51, %v1379_v50  ;;  %v1266_v30 = vadd.f32 0.5, %v1202_v46  ;;  %14080 = vst [vmem:[#allocation94_spill] sm:$0xff] %v9726_v2  ;;  %v1509_v12 = vmul.f32 0.0019353072, %v1317_v25 }
 0x208   : > { %v1890_v55 = vadd.f32 -2.5052108e-08, %v1826_v16  ;;  %v1700_v48 = vmul.f32 -7.6471636e-13, %v9722_v49  ;;  %v1445_v26 = vsub.f32 %v1154_v18, %v1381_v17  ;;  %v2574_v22 = vmul.f32 %v9665_v4, %v2446_v31 }
 0x209   : > { %v2320_v24 = vadd.f32 0.008333334, %v2256_v35  ;;  %v9729_v38 = vsub.f32 %v1443_v13, %v1507_v23  ;;  %v1330_v21 = vfloor.f32 %v1266_v30  ;;  %v1204_v62 = vmul.f32 0.15915494, %v9717_v32  ;;  %v14085_v30 = vld [vmem:[#allocation16_spill] sm:$0xff] }
 0x20a   : > { %v1954_v15 = vmul.f32 %v1890_v55, %v9700_v27  ;;  %v1764_v1 = vadd.f32 1.6059044e-10, %v1700_v48  ;;  %v9737_v58 = vmul.f32 %v9700_v27, %v9688_v60  ;;  %v9739_v51 = vsub.f32 %v1445_v26, %v1509_v12 }
 0x20b   : > { %14081 = vst [vmem:[#allocation95_spill] sm:$0xff] %v9729_v38  ;;  %v2384_v46 = vmul.f32 %v2320_v24, %v9648_v39  ;;  %v1394_v50 = vmul.f32 6.28125, %v1330_v21  ;;  %v9744_v4 = vmul.f32 %v9722_v49, %v9712_v9  ;;  %v9748_v25 = vmul.f32 %v9729_v38, %v9729_v38  ;;  %v14086_v24 = vld [vmem:[#allocation22_spill] sm:$0xff] }
 0x20c   : > { %14082 = vst [vmem:[#allocation96_spill] sm:$0xff] %v9739_v51  ;;  %v2018_v18 = vadd.f32 2.7557319e-06, %v1954_v15  ;;  %v1828_v10 = vmul.f32 %v1764_v1, %v9722_v49  ;;  %v1522_v23 = vmul.f32 0.0019353072, %v1330_v21  ;;  %v1268_v17 = vadd.f32 0.5, %v1204_v62 }
 0x20d   : > { %14083 = vst [vmem:[#allocation97_spill] sm:$0xff] %v9748_v25  ;;  %v2448_v16 = vadd.f32 -0.16666667, %v2384_v46  ;;  %v1458_v39 = vsub.f32 %v1069_v43, %v1394_v50  ;;  %v9751_v31 = vadd.f32 %v2574_v22, %v9618_v40  ;;  %v1687_v1 = vmul.f32 -7.6471636e-13, %v14085_v30  ;;  %v14088_v50 = vld [vmem:[#allocation17_spill] sm:$0xff] }
 0x20e   : > { %v2082_v35 = vmul.f32 %v2018_v18, %v9700_v27  ;;  %v1892_v13 = vadd.f32 -2.5052108e-08, %v1828_v10  ;;  %v9757_v55 = vmul.f32 %v9739_v51, %v9739_v51  ;;  %v1332_v26 = vfloor.f32 %v1268_v17 }
 0x20f   : > { %14084 = vst [vmem:[#allocation98_spill] sm:$0xff] %v9751_v31  ;;  %v9759_v48 = vsub.f32 %v1458_v39, %v1522_v23  ;;  %v1703_v12 = vmul.f32 -7.6471636e-13, %v14086_v24  ;;  %v9765_v40 = vmul.f32 %v9748_v25, %v9729_v38  ;;  %v1751_v22 = vadd.f32 1.6059044e-10, %v1687_v1  ;;  %v14089_v38 = vld [vmem:[#allocation24_spill] sm:$0xff] }
 0x210   : > { %v2146_v43 = vadd.f32 -0.0001984127, %v2082_v35  ;;  %v1956_v21 = vmul.f32 %v1892_v13, %v9722_v49  ;;  %v2576_v15 = vmul.f32 %v9674_v29, %v2448_v16  ;;  %v1396_v46 = vmul.f32 6.28125, %v1332_v26 }
 0x211   : > { %14087 = vst [vmem:[#allocation16_spill] sm:$0xff] %v9765_v40  ;;  %v9770_v62 = vmul.f32 %v9759_v48, %v9759_v48  ;;  %v1689_v18 = vmul.f32 -7.6471636e-13, %v14088_v50  ;;  %v1767_v23 = vadd.f32 1.6059044e-10, %v1703_v12  ;;  %v1815_v17 = vmul.f32 %v1751_v22, %v14085_v30 }
 0x212   : > { %v2210_v10 = vmul.f32 %v2146_v43, %v9700_v27  ;;  %v2020_v39 = vadd.f32 2.7557319e-06, %v1956_v21  ;;  %v1460_v13 = vsub.f32 %v9717_v32, %v1396_v46  ;;  %v1524_v1 = vmul.f32 0.0019353072, %v1332_v26 }
 0x213   : > { %v1714_v35 = vmul.f32 -7.6471636e-13, %v9770_v62  ;;  %v1705_v29 = vmul.f32 -7.6471636e-13, %v14089_v38  ;;  %v1831_v25 = vmul.f32 %v1767_v23, %v14086_v24  ;;  %v1879_v2 = vadd.f32 -2.5052108e-08, %v1815_v17 }
 0x214   : > { %v2274_v16 = vadd.f32 0.008333334, %v2210_v10  ;;  %v2084_v40 = vmul.f32 %v2020_v39, %v9722_v49  ;;  %v9780_v54 = vsub.f32 %v1460_v13, %v1524_v1  ;;  %v1753_v43 = vadd.f32 1.6059044e-10, %v1689_v18 }
 0x215   : > { %v1778_v31 = vadd.f32 1.6059044e-10, %v1714_v35  ;;  %v1769_v12 = vadd.f32 1.6059044e-10, %v1705_v29  ;;  %v9784_v22 = vmul.f32 %v9757_v55, %v9739_v51  ;;  %v1895_v32 = vadd.f32 -2.5052108e-08, %v1831_v25 }
 0x216   : > { %v2148_v21 = vadd.f32 -0.0001984127, %v2084_v40  ;;  %v1943_v26 = vmul.f32 %v1879_v2, %v14085_v30  ;;  %v9790_v10 = vmul.f32 %v9780_v54, %v9780_v54  ;;  %v1817_v39 = vmul.f32 %v1753_v43, %v14088_v50 }
 0x217   : > { %14090 = vst [vmem:[#allocation22_spill] sm:$0xff] %v9784_v22  ;;  %v1842_v46 = vmul.f32 %v1778_v31, %v9770_v62  ;;  %v1833_v23 = vmul.f32 %v1769_v12, %v14089_v38  ;;  %v2338_v18 = vmul.f32 %v2274_v16, %v9700_v27  ;;  %v1959_v17 = vmul.f32 %v1895_v32, %v14086_v24 }
 0x218   : > { %v2212_v40 = vmul.f32 %v2148_v21, %v9722_v49  ;;  %v2007_v35 = vadd.f32 2.7557319e-06, %v1943_v26  ;;  %v9798_v25 = vadd.f32 %v2576_v15, %v9637_v53  ;;  %v1716_v31 = vmul.f32 -7.6471636e-13, %v9790_v10 }
 0x219   : > { %v1906_v2 = vadd.f32 -2.5052108e-08, %v1842_v46  ;;  %v1881_v13 = vadd.f32 -2.5052108e-08, %v1817_v39  ;;  %v9803_v29 = vmul.f32 %v9770_v62, %v9759_v48  ;;  %v2023_v43 = vadd.f32 2.7557319e-06, %v1959_v17 }
 0x21a   : > { %v2276_v1 = vadd.f32 0.008333334, %v2212_v40  ;;  %v2071_v27 = vmul.f32 %v2007_v35, %v14085_v30  ;;  %v1780_v12 = vadd.f32 1.6059044e-10, %v1716_v31  ;;  %v1897_v21 = vadd.f32 -2.5052108e-08, %v1833_v23 }
 0x21b   : > { %v1970_v16 = vmul.f32 %v1906_v2, %v9770_v62  ;;  %v1945_v32 = vmul.f32 %v1881_v13, %v14088_v50  ;;  %v2402_v53 = vadd.f32 -0.16666667, %v2338_v18  ;;  %v2087_v26 = vmul.f32 %v2023_v43, %v14086_v24 }
 0x21c   : > { %v2340_v15 = vmul.f32 %v2276_v1, %v9722_v49  ;;  %v2135_v46 = vadd.f32 -0.0001984127, %v2071_v27  ;;  %v1844_v40 = vmul.f32 %v1780_v12, %v9790_v10  ;;  %v1961_v51 = vmul.f32 %v1897_v21, %v14089_v38 }
 0x21d   : > { %v2034_v39 = vadd.f32 2.7557319e-06, %v1970_v16  ;;  %v2009_v17 = vadd.f32 2.7557319e-06, %v1945_v32  ;;  %v2151_v35 = vadd.f32 -0.0001984127, %v2087_v26  ;;  %v1071_v23 = vadd.f32 %v9358_v52, %v8710_v44 }
 0x21e   : > { %v2404_v22 = vadd.f32 -0.16666667, %v2340_v15  ;;  %v2199_v2 = vmul.f32 %v2135_v46, %v14085_v30  ;;  %v1908_v31 = vadd.f32 -2.5052108e-08, %v1844_v40  ;;  %v2025_v49 = vadd.f32 2.7557319e-06, %v1961_v51 }
 0x21f   : > { %v2098_v18 = vmul.f32 %v2034_v39, %v9770_v62  ;;  %v2073_v13 = vmul.f32 %v2009_v17, %v14088_v50  ;;  %v2530_v1 = vmul.f32 %v9737_v58, %v2402_v53  ;;  %v2215_v43 = vmul.f32 %v2151_v35, %v14086_v24 }
 0x220   : > { %v2263_v27 = vadd.f32 0.008333334, %v2199_v2  ;;  %v1203_v16 = vmul.f32 0.15915494, %v1071_v23  ;;  %v1972_v21 = vmul.f32 %v1908_v31, %v9790_v10  ;;  %v2089_v32 = vmul.f32 %v2025_v49, %v14089_v38 }
 0x221   : > { %v2162_v12 = vadd.f32 -0.0001984127, %v2098_v18  ;;  %v2137_v15 = vadd.f32 -0.0001984127, %v2073_v13  ;;  %v2532_v52 = vmul.f32 %v9744_v4, %v2404_v22  ;;  %v2279_v26 = vadd.f32 0.008333334, %v2215_v43 }
 0x222   : > { %v2327_v46 = vmul.f32 %v2263_v27, %v14085_v30  ;;  %v1267_v51 = vadd.f32 0.5, %v1203_v16  ;;  %v2036_v40 = vadd.f32 2.7557319e-06, %v1972_v21  ;;  %v2153_v58 = vadd.f32 -0.0001984127, %v2089_v32  ;;  %v14091_v13 = vld [vmem:[#allocation18_spill] sm:$0xff] }
 0x223   : > { %v2226_v39 = vmul.f32 %v2162_v12, %v9770_v62  ;;  %v2201_v53 = vmul.f32 %v2137_v15, %v14088_v50  ;;  %v2343_v17 = vmul.f32 %v2279_v26, %v14086_v24  ;;  %v1160_v18 = vadd.f32 %v9361_v19, %v8710_v44  ;;  %v14092_v15 = vld [vmem:[#allocation30_spill] sm:$0xff] }
 0x224   : > { %v2391_v35 = vadd.f32 -0.16666667, %v2327_v46  ;;  %v1331_v2 = vfloor.f32 %v1267_v51  ;;  %v2100_v4 = vmul.f32 %v2036_v40, %v9790_v10  ;;  %v2217_v22 = vmul.f32 %v2153_v58, %v14089_v38  ;;  %v14093_v44 = vld [vmem:[#allocation14_spill] sm:$0xff] }
 0x225   : > { %v2290_v31 = vadd.f32 0.008333334, %v2226_v39  ;;  %v2265_v30 = vadd.f32 0.008333334, %v2201_v53  ;;  %v2407_v49 = vadd.f32 -0.16666667, %v2343_v17 }
 0x226   : > { %v2519_v43 = vmul.f32 %v14091_v13, %v2391_v35  ;;  %v1395_v27 = vmul.f32 6.28125, %v1331_v2  ;;  %v1523_v16 = vmul.f32 0.0019353072, %v1331_v2  ;;  %v2164_v21 = vadd.f32 -0.0001984127, %v2100_v4  ;;  %v14094_v17 = vld [vmem:[#allocation19_spill] sm:$0xff] }
 0x227   : > { %v2354_v12 = vmul.f32 %v2290_v31, %v9770_v62  ;;  %v2281_v24 = vadd.f32 0.008333334, %v2217_v22  ;;  %v2329_v32 = vmul.f32 %v2265_v30, %v14088_v50  ;;  %v2535_v26 = vmul.f32 %v14092_v15, %v2407_v49  ;;  %v14096_v31 = vld [vmem:[#allocation33_spill] sm:$0xff]  ;;  %v14097_v4 = vld [vmem:[#allocation39_spill] sm:$0xff]  ;;  %v14098_v49 = vld [vmem:[#allocation20_spill] sm:$0xff] }
 0x228   : > { %v2583_v19 = vadd.f32 %v2519_v43, %v14093_v44  ;;  %v1459_v46 = vsub.f32 %v1071_v23, %v1395_v27  ;;  %v1205_v51 = vmul.f32 0.15915494, %v1160_v18  ;;  %v2228_v40 = vmul.f32 %v2164_v21, %v9790_v10  ;;  %v14100_v21 = vld [vmem:[#allocation42_spill] sm:$0xff] }
 0x229   : > { %v2418_v39 = vadd.f32 -0.16666667, %v2354_v12  ;;  %v2345_v58 = vmul.f32 %v2281_v24, %v14089_v38  ;;  %v2393_v53 = vadd.f32 -0.16666667, %v2329_v32  ;;  %v2599_v35 = vadd.f32 %v2535_v26, %v14094_v17  ;;  %v14099_v12 = vld [vmem:[#allocation34_spill] sm:$0xff]  ;;  %v14101_v26 = vld [vmem:[#allocation32_spill] sm:$0xff] }
 0x22a   : > { %v9838_v2 = vsub.f32 %v1459_v46, %v1523_v16  ;;  %v1269_v62 = vadd.f32 0.5, %v1205_v51  ;;  %v7948_v50 = vpack.c.bf16 %v14097_v4, %v14096_v31  ;;  %v2292_v22 = vadd.f32 0.008333334, %v2228_v40  ;;  %v14102_v46 = vld [vmem:[#allocation15_spill] sm:$0xff]  ;;  %v14103_v40 = vld [vmem:[#allocation21_spill] sm:$0xff] }
 0x22b   : > { %v2484_v30 = vmul.f32 %v9790_v10, %v9780_v54  ;;  %v2409_v23 = vadd.f32 -0.16666667, %v2345_v58  ;;  %v2521_v13 = vmul.f32 %v14098_v49, %v2393_v53  ;;  %v9846_v43 = vadd.f32 %v2530_v1, %v9688_v60  ;;  %v14104_v17 = vld [vmem:[#allocation27_spill] sm:$0xff] }
 0x22c   : > { %14095 = vst [vmem:[#allocation17_spill] sm:$0xff] %v9838_v2  ;;  %v7946_v38 = vpack.c.bf16 %v2599_v35, %v2583_v19  ;;  %v1333_v27 = vfloor.f32 %v1269_v62  ;;  %v7956_v16 = vpack.c.bf16 %v14100_v21, %v14099_v12  ;;  %v9851_v24 = vadd.f32 %v2532_v52, %v9712_v9 }
 0x22d   : > { %v2546_v32 = vmul.f32 %v9803_v29, %v2418_v39  ;;  %v2356_v15 = vmul.f32 %v2292_v22, %v9790_v10  ;;  %v2537_v44 = vmul.f32 %v14101_v26, %v2409_v23  ;;  %v2585_v51 = vadd.f32 %v2521_v13, %v14102_v46 }
 0x22e   : > { %7947 = vmatprep.subr.bf16.mxu0 %v7946_v38  ;;  %v9859_v60 = vmul.f32 %v9838_v2, %v9838_v2  ;;  %v1397_v1 = vmul.f32 6.28125, %v1333_v27  ;;  %v1075_v19 = vadd.f32 %v9371_v20, %v8784_v61  ;;  %v1525_v52 = vmul.f32 0.0019353072, %v1333_v27 }
 0x22f   : > { %v2601_v9 = vadd.f32 %v2537_v44, %v14103_v40  ;;  %7949 = vmatpush1.bf16.msra.mxu0 %v7948_v50  ;;  %v1164_v10 = vadd.f32 %v9391_v11, %v8784_v61  ;;  %v1077_v29 = vadd.f32 %v9396_v37, %v8784_v61  ;;  %v1166_v53 = vadd.f32 %v9398_v7, %v8784_v61  ;;  %v14106_v61 = vld [vmem:[#allocation28_spill] sm:$0xff] }
 0x230   : > { %v1461_v39 = vsub.f32 %v1160_v18, %v1397_v1  ;;  %v1218_v58 = vmul.f32 0.15915494, %v1075_v19  ;;  %v1081_v35 = vadd.f32 %v14104_v17, %v8942_v36  ;;  %v2420_v62 = vadd.f32 -0.16666667, %v2356_v15 }
 0x231   : > { %v7954_v20 = vpack.c.bf16 %v2601_v9, %v2585_v51  ;;  %v1220_v31 = vmul.f32 0.15915494, %v1164_v10  ;;  %v1219_v4 = vmul.f32 0.15915494, %v1077_v29  ;;  %v1221_v23 = vmul.f32 0.15915494, %v1166_v53 }
 0x232   : > { %v9872_v22 = vsub.f32 %v1461_v39, %v1525_v52  ;;  %v1282_v50 = vadd.f32 0.5, %v1218_v58  ;;  %v1234_v11 = vmul.f32 0.15915494, %v1081_v35  ;;  %v9875_v49 = vadd.f32 %v2546_v32, %v9759_v48  ;;  %v14108_v51 = vld [vmem:[#allocation35_spill] sm:$0xff] }
 0x233   : > { %7955 = vmatprep.subr.bf16.mxu1 %v7954_v20  ;;  %v1284_v37 = vadd.f32 0.5, %v1220_v31  ;;  %v1283_v18 = vadd.f32 0.5, %v1219_v4  ;;  %v1170_v7 = vadd.f32 %v14106_v61, %v8942_v36  ;;  %v9881_v13 = vmul.f32 %v9859_v60, %v9838_v2  ;;  %v14109_v4 = vld [vmem:[#allocation43_spill] sm:$0xff] }
 0x234   : > { %14105 = vst [vmem:[#allocation24_spill] sm:$0xff] %v9872_v22  ;;  %7957 = vmatpush1.bf16.msra.mxu1 %v7956_v16  ;;  %v1346_v38 = vfloor.f32 %v1282_v50  ;;  %v1285_v27 = vadd.f32 0.5, %v1221_v23  ;;  %v1298_v12 = vadd.f32 0.5, %v1234_v11  ;;  %v2548_v21 = vmul.f32 %v2484_v30, %v2420_v62 }
 0x235   : > { %14107 = vst [vmem:[#allocation18_spill] sm:$0xff] %v9881_v13  ;;  %v1348_v15 = vfloor.f32 %v1284_v37  ;;  %v1347_v26 = vfloor.f32 %v1283_v18  ;;  %v1236_v44 = vmul.f32 0.15915494, %v1170_v7  ;;  %v9885_v48 = vmul.f32 %v9872_v22, %v9872_v22 }
 0x236   : > { %v1410_v32 = vmul.f32 6.28125, %v1346_v38  ;;  %v1349_v46 = vfloor.f32 %v1285_v27  ;;  %v1719_v1 = vmul.f32 -7.6471636e-13, %v14108_v51  ;;  %v1538_v40 = vmul.f32 0.0019353072, %v1346_v38 }
 0x237   : > { %v1412_v9 = vmul.f32 6.28125, %v1348_v15  ;;  %v1540_v52 = vmul.f32 0.0019353072, %v1348_v15  ;;  %v1411_v39 = vmul.f32 6.28125, %v1347_v26  ;;  %v1539_v58 = vmul.f32 0.0019353072, %v1347_v26 }
 0x238   : > { %v1474_v16 = vsub.f32 %v1075_v19, %v1410_v32  ;;  %v1413_v17 = vmul.f32 6.28125, %v1349_v46  ;;  %v1362_v20 = vfloor.f32 %v1298_v12  ;;  %v1300_v31 = vadd.f32 0.5, %v1236_v44 }
 0x239   : > { %v1476_v30 = vsub.f32 %v1164_v10, %v1412_v9  ;;  %v1475_v62 = vsub.f32 %v1077_v29, %v1411_v39  ;;  %v1735_v50 = vmul.f32 -7.6471636e-13, %v14109_v4  ;;  %v1541_v37 = vmul.f32 0.0019353072, %v1349_v46 }
 0x23a   : > { %v9889_v23 = vsub.f32 %v1474_v16, %v1538_v40  ;;  %v1477_v11 = vsub.f32 %v1166_v53, %v1413_v17  ;;  %v1426_v18 = vmul.f32 6.28125, %v1362_v20  ;;  %v1554_v27 = vmul.f32 0.0019353072, %v1362_v20 }
 0x23b   : > { %v9891_v61 = vsub.f32 %v1476_v30, %v1540_v52  ;;  %v9893_v38 = vsub.f32 %v1475_v62, %v1539_v58  ;;  %v1364_v15 = vfloor.f32 %v1300_v31  ;;  %v1783_v12 = vadd.f32 1.6059044e-10, %v1719_v1  ;;  %v14114_v31 = vld [vmem:[#allocation40_spill] sm:$0xff] }
 0x23c   : > { %v9897_v19 = vmul.f32 %v9889_v23, %v9889_v23  ;;  %v9899_v10 = vsub.f32 %v1477_v11, %v1541_v37  ;;  %v1490_v29 = vsub.f32 %v1081_v35, %v1426_v18  ;;  %v9902_v26 = vadd.f32 %v2548_v21, %v9780_v54 }
 0x23d   : > { %14110 = vst [vmem:[#allocation30_spill] sm:$0xff] %v9893_v38  ;;  %v9906_v53 = vmul.f32 %v9891_v61, %v9891_v61  ;;  %v1428_v44 = vmul.f32 6.28125, %v1364_v15  ;;  %v1799_v32 = vadd.f32 1.6059044e-10, %v1735_v50  ;;  %v9910_v46 = vmul.f32 %v9885_v48, %v9872_v22 }
 0x23e   : > { %14111 = vst [vmem:[#allocation14_spill] sm:$0xff] %v9899_v10  ;;  %v1730_v40 = vmul.f32 -7.6471636e-13, %v9897_v19  ;;  %v9915_v9 = vmul.f32 %v9893_v38, %v9893_v38  ;;  %v9917_v35 = vsub.f32 %v1490_v29, %v1554_v27  ;;  %v9921_v54 = vmul.f32 %v9897_v19, %v9889_v23 }
 0x23f   : > { %14112 = vst [vmem:[#allocation19_spill] sm:$0xff] %v9910_v46  ;;  %v1732_v21 = vmul.f32 -7.6471636e-13, %v9906_v53  ;;  %v1492_v1 = vsub.f32 %v1170_v7, %v1428_v44  ;;  %v1556_v52 = vmul.f32 0.0019353072, %v1364_v15  ;;  %v9926_v16 = vmul.f32 %v9899_v10, %v9899_v10 }
 0x240   : > { %v1794_v39 = vadd.f32 1.6059044e-10, %v1730_v40  ;;  %v9930_v58 = vmul.f32 %v9917_v35, %v9917_v35  ;;  %v1847_v17 = vmul.f32 %v1783_v12, %v14108_v51  ;;  %v1863_v62 = vmul.f32 %v1799_v32, %v14109_v4  ;;  %v14115_v12 = vld [vmem:[#allocation48_spill] sm:$0xff] }
 0x241   : > { %14113 = vst [vmem:[#allocation33_spill] sm:$0xff] %v9926_v16  ;;  %v1796_v20 = vadd.f32 1.6059044e-10, %v1732_v21  ;;  %v9933_v30 = vsub.f32 %v1492_v1, %v1556_v52  ;;  %v1721_v50 = vmul.f32 -7.6471636e-13, %v14114_v31  ;;  %v9940_v11 = vmul.f32 %v9906_v53, %v9891_v61  ;;  %v14156_v16 = vld [vmem:[#allocation75_spill] sm:$0xff] }
 0x242   : > { %v1858_v7 = vmul.f32 %v1794_v39, %v9897_v19  ;;  %v1746_v37 = vmul.f32 -7.6471636e-13, %v9930_v58  ;;  %v1911_v18 = vadd.f32 -2.5052108e-08, %v1847_v17  ;;  %v1927_v29 = vadd.f32 -2.5052108e-08, %v1863_v62 }
 0x243   : > { %v1860_v27 = vmul.f32 %v1796_v20, %v9906_v53  ;;  %v9946_v15 = vmul.f32 %v9933_v30, %v9933_v30  ;;  %v1737_v44 = vmul.f32 -7.6471636e-13, %v14115_v12  ;;  %v1785_v1 = vadd.f32 1.6059044e-10, %v1721_v50 }
 0x244   : > { %v1922_v32 = vadd.f32 -2.5052108e-08, %v1858_v7  ;;  %v1810_v40 = vadd.f32 1.6059044e-10, %v1746_v37  ;;  %v1975_v21 = vmul.f32 %v1911_v18, %v14108_v51  ;;  %v9952_v39 = vmul.f32 %v9915_v9, %v9893_v38 }
 0x245   : > { %v1924_v52 = vadd.f32 -2.5052108e-08, %v1860_v27  ;;  %v1748_v17 = vmul.f32 -7.6471636e-13, %v9946_v15  ;;  %v1991_v20 = vmul.f32 %v1927_v29, %v14109_v4  ;;  %v1801_v46 = vadd.f32 1.6059044e-10, %v1737_v44 }
 0x246   : > { %14116 = vst [vmem:[#allocation39_spill] sm:$0xff] %v9952_v39  ;;  %v1986_v10 = vmul.f32 %v1922_v32, %v9897_v19  ;;  %v1874_v62 = vmul.f32 %v1810_v40, %v9930_v58  ;;  %v2039_v22 = vadd.f32 2.7557319e-06, %v1975_v21  ;;  %v1849_v50 = vmul.f32 %v1785_v1, %v14114_v31 }
 0x247   : > { %v1988_v7 = vmul.f32 %v1924_v52, %v9906_v53  ;;  %v1812_v37 = vadd.f32 1.6059044e-10, %v1748_v17  ;;  %v2055_v18 = vadd.f32 2.7557319e-06, %v1991_v20  ;;  %v1865_v39 = vmul.f32 %v1801_v46, %v14115_v12 }
 0x248   : > { %v2050_v27 = vadd.f32 2.7557319e-06, %v1986_v10  ;;  %v1938_v2 = vadd.f32 -2.5052108e-08, %v1874_v62  ;;  %v2103_v38 = vmul.f32 %v2039_v22, %v14108_v51  ;;  %v1913_v40 = vadd.f32 -2.5052108e-08, %v1849_v50 }
 0x249   : > { %v2052_v13 = vadd.f32 2.7557319e-06, %v1988_v7  ;;  %v1876_v29 = vmul.f32 %v1812_v37, %v9946_v15  ;;  %v2119_v32 = vmul.f32 %v2055_v18, %v14109_v4  ;;  %v1929_v17 = vadd.f32 -2.5052108e-08, %v1865_v39 }
 0x24a   : > { %v2114_v44 = vmul.f32 %v2050_v27, %v9897_v19  ;;  %v2002_v21 = vmul.f32 %v1938_v2, %v9930_v58  ;;  %v2167_v52 = vadd.f32 -0.0001984127, %v2103_v38  ;;  %v1977_v22 = vmul.f32 %v1913_v40, %v14114_v31 }
 0x24b   : > { %v2116_v1 = vmul.f32 %v2052_v13, %v9906_v53  ;;  %v1940_v10 = vadd.f32 -2.5052108e-08, %v1876_v29  ;;  %v2183_v20 = vadd.f32 -0.0001984127, %v2119_v32  ;;  %v1993_v37 = vmul.f32 %v1929_v17, %v14115_v12 }
 0x24c   : > { %v2178_v62 = vadd.f32 -0.0001984127, %v2114_v44  ;;  %v2066_v46 = vadd.f32 2.7557319e-06, %v2002_v21  ;;  %v2231_v7 = vmul.f32 %v2167_v52, %v14108_v51  ;;  %v2041_v2 = vadd.f32 2.7557319e-06, %v1977_v22 }
 0x24d   : > { %v2180_v18 = vadd.f32 -0.0001984127, %v2116_v1  ;;  %v2004_v50 = vmul.f32 %v1940_v10, %v9946_v15  ;;  %v2247_v27 = vmul.f32 %v2183_v20, %v14109_v4  ;;  %v2057_v29 = vadd.f32 2.7557319e-06, %v1993_v37 }
 0x24e   : > { %v2242_v38 = vmul.f32 %v2178_v62, %v9897_v19  ;;  %v2130_v13 = vmul.f32 %v2066_v46, %v9930_v58  ;;  %v2295_v39 = vadd.f32 0.008333334, %v2231_v7  ;;  %v2105_v21 = vmul.f32 %v2041_v2, %v14114_v31 }
 0x24f   : > { %v2244_v32 = vmul.f32 %v2180_v18, %v9906_v53  ;;  %v2068_v40 = vadd.f32 2.7557319e-06, %v2004_v50  ;;  %v2311_v44 = vadd.f32 0.008333334, %v2247_v27  ;;  %v2121_v10 = vmul.f32 %v2057_v29, %v14115_v12  ;;  %v14117_v29 = vld [vmem:[#allocation37_spill] sm:$0xff] }
 0x250   : > { %v2306_v52 = vadd.f32 0.008333334, %v2242_v38  ;;  %v2194_v17 = vadd.f32 -0.0001984127, %v2130_v13  ;;  %v2359_v1 = vmul.f32 %v2295_v39, %v14108_v51  ;;  %v2169_v46 = vadd.f32 -0.0001984127, %v2105_v21 }
 0x251   : > { %v2308_v20 = vadd.f32 0.008333334, %v2244_v32  ;;  %v2132_v22 = vmul.f32 %v2068_v40, %v9946_v15  ;;  %v2375_v62 = vmul.f32 %v2311_v44, %v14109_v4  ;;  %v2185_v50 = vadd.f32 -0.0001984127, %v2121_v10 }
 0x252   : > { %v2370_v7 = vmul.f32 %v2306_v52, %v9897_v19  ;;  %v2258_v37 = vmul.f32 %v2194_v17, %v9930_v58  ;;  %v2423_v18 = vadd.f32 -0.16666667, %v2359_v1  ;;  %v2233_v51 = vmul.f32 %v2169_v46, %v14114_v31  ;;  %v14118_v19 = vld [vmem:[#allocation46_spill] sm:$0xff]  ;;  %v14120_v46 = vld [vmem:[#allocation41_spill] sm:$0xff] }
 0x253   : > { %v2372_v27 = vmul.f32 %v2308_v20, %v9906_v53  ;;  %v2196_v2 = vadd.f32 -0.0001984127, %v2132_v22  ;;  %v2439_v38 = vadd.f32 -0.16666667, %v2375_v62  ;;  %v2249_v40 = vmul.f32 %v2185_v50, %v14115_v12  ;;  %v14119_v22 = vld [vmem:[#allocation31_spill] sm:$0xff] }
 0x254   : > { %v2434_v13 = vadd.f32 -0.16666667, %v2370_v7  ;;  %v2322_v39 = vadd.f32 0.008333334, %v2258_v37  ;;  %v2551_v32 = vmul.f32 %v14117_v29, %v2423_v18  ;;  %v2297_v52 = vadd.f32 0.008333334, %v2233_v51 }
 0x255   : > { %v2436_v4 = vadd.f32 -0.16666667, %v2372_v27  ;;  %v2260_v44 = vmul.f32 %v2196_v2, %v9946_v15  ;;  %v2567_v21 = vmul.f32 %v14118_v19, %v2439_v38  ;;  %v2514_v1 = vmul.f32 %v9930_v58, %v9917_v35  ;;  %v14126_v19 = vld [vmem:[#allocation59_spill] sm:$0xff] }
 0x256   : > { %v2562_v17 = vmul.f32 %v9921_v54, %v2434_v13  ;;  %v2386_v53 = vmul.f32 %v2322_v39, %v9930_v58  ;;  %v2313_v10 = vadd.f32 0.008333334, %v2249_v40  ;;  %v2615_v62 = vadd.f32 %v2551_v32, %v14119_v22  ;;  %v14122_v32 = vld [vmem:[#allocation44_spill] sm:$0xff]  ;;  %v14123_v40 = vld [vmem:[#allocation47_spill] sm:$0xff]  ;;  %v14130_v22 = vld [vmem:[#allocation54_spill] sm:$0xff] }
 0x257   : > { %v2324_v20 = vadd.f32 0.008333334, %v2260_v44  ;;  %v2631_v7 = vadd.f32 %v2567_v21, %v14120_v46  ;;  %v2361_v37 = vmul.f32 %v2297_v52, %v14114_v31  ;;  %v2564_v18 = vmul.f32 %v9940_v11, %v2436_v4  ;;  %v14124_v4 = vld [vmem:[#allocation58_spill] sm:$0xff]  ;;  %v14125_v44 = vld [vmem:[#allocation49_spill] sm:$0xff] }
 0x258   : > { %v2516_v50 = vmul.f32 %v9946_v15, %v9933_v30  ;;  %v2377_v54 = vmul.f32 %v2313_v10, %v14115_v12  ;;  %v1083_v27 = vadd.f32 %v9569_v45, %v8942_v36  ;;  %v2450_v2 = vadd.f32 -0.16666667, %v2386_v53  ;;  %v14131_v46 = vld [vmem:[#allocation45_spill] sm:$0xff] }
 0x259   : > { %v2388_v58 = vmul.f32 %v2324_v20, %v9946_v15  ;;  %v7950_v38 = vpack.c.bf16 %v2631_v7, %v2615_v62  ;;  %v2425_v51 = vadd.f32 -0.16666667, %v2361_v37  ;;  %v10003_v13 = vadd.f32 %v2562_v17, %v9889_v23  ;;  %v14128_v23 = vld [vmem:[#allocation52_spill] sm:$0xff]  ;;  %v14129_v20 = vld [vmem:[#allocation38_spill] sm:$0xff] }
 0x25a   : > { %v2441_v39 = vadd.f32 -0.16666667, %v2377_v54  ;;  %v1235_v31 = vmul.f32 0.15915494, %v1083_v27  ;;  %v1172_v11 = vadd.f32 %v9583_v56, %v8942_v36  ;;  %v7952_v45 = vpack.c.bf16 %v14124_v4, %v14123_v40  ;;  %v10017_v56 = vld [vmem:[#allocation2] sm:$0xff]  ;;  %v10026_v4 = vld [vmem:[#allocation2 + $0x8] sm:$0xff] }
 0x25b   : > { %14121 = vst [vmem:[#allocation20_spill] sm:$0xff] %v10003_v13  ;;  %v2452_v29 = vadd.f32 -0.16666667, %v2388_v58  ;;  %7951 = vmatprep.subr.bf16.mxu0 %v7950_v38  ;;  %v2553_v12 = vmul.f32 %v14122_v32, %v2425_v51  ;;  %v7960_v15 = vpack.c.bf16 %v14126_v19, %v14125_v44  ;;  %v10013_v21 = vadd.f32 %v2564_v18, %v9891_v61  ;;  %v14132_v58 = vld [vmem:[#allocation61_spill] sm:$0xff]  ;;  %v14133_v51 = vld [vmem:[#allocation55_spill] sm:$0xff] }
 0x25c   : > { %v2569_v52 = vmul.f32 %v14128_v23, %v2441_v39  ;;  %v1299_v17 = vadd.f32 0.5, %v1235_v31  ;;  %v1237_v53 = vmul.f32 0.15915494, %v1172_v11  ;;  %v2578_v10 = vmul.f32 %v2514_v1, %v2450_v2  ;;  %7953 = vmatpush1.bf16.msra.mxu0 %v7952_v45  ;;  %v14134_v31 = vld [vmem:[#allocation65_spill] sm:$0xff] }
 0x25d   : > { %14127 = vst [vmem:[#allocation34_spill] sm:$0xff] %v10013_v21  ;;  %v2617_v36 = vadd.f32 %v2553_v12, %v14129_v20  ;;  %v1691_v62 = vmul.f32 -7.6471636e-13, %v14130_v22  ;;  %v1707_v61 = vmul.f32 -7.6471636e-13, %v14132_v58  ;;  %v2580_v18 = vmul.f32 %v2516_v50, %v2452_v29  ;;  %v14137_v20 = vld [vmem:[#allocation70_spill] sm:$0xff] }
 0x25e   : > { %v2633_v7 = vadd.f32 %v2569_v52, %v14131_v46  ;;  %v1363_v37 = vfloor.f32 %v1299_v17  ;;  %v1301_v54 = vadd.f32 0.5, %v1237_v53  ;;  %v1693_v39 = vmul.f32 -7.6471636e-13, %v14133_v51  ;;  %v14136_v53 = vld [vmem:[#allocation62_spill] sm:$0xff] }
 0x25f   : > { %v1755_v38 = vadd.f32 1.6059044e-10, %v1691_v62  ;;  %v1709_v1 = vmul.f32 -7.6471636e-13, %v14134_v31  ;;  %7868 = vmatmul.mubr.msk.f32.vlgmr.msra.gmra.mrb[32].mxu0 %vm2674_vm2, %v10017_v56  ;;  %v14135_v45 = vmov 0.0  }
 0x260   : > { %v7958_v2 = vpack.c.bf16 %v2633_v7, %v2617_v36  ;;  %v1427_v32 = vmul.f32 6.28125, %v1363_v37  ;;  %v1555_v12 = vmul.f32 0.0019353072, %v1363_v37  ;;  %v1365_v40 = vfloor.f32 %v1301_v54  ;;  %2757 = vmatprep.mubr.f32.mxu0 %v14135_v45 }
 0x261   : > { %v1771_v44 = vadd.f32 1.6059044e-10, %v1707_v61  ;;  %v1819_v19 = vmul.f32 %v1755_v38, %v14130_v22  ;;  %v1757_v50 = vadd.f32 1.6059044e-10, %v1693_v39  ;;  %v1773_v29 = vadd.f32 1.6059044e-10, %v1709_v1 }
 0x262   : > { %7959 = vmatprep.subr.bf16.mxu1 %v7958_v2  ;;  %v1491_v23 = vsub.f32 %v1083_v27, %v1427_v32  ;;  %v1429_v52 = vmul.f32 6.28125, %v1365_v40  ;;  %v1557_v17 = vmul.f32 0.0019353072, %v1365_v40  ;;  %v14139_v27 = vld [vmem:[#allocation66_spill] sm:$0xff]  ;;  %v10041_v1 = vld [vmem:[#allocation2 + $0x10] sm:$0xff]  ;;  %v14141_v2 = vld [vmem:[#allocation69_spill] sm:$0xff] }
 0x263   : > { %7961 = vmatpush1.bf16.msra.mxu1 %v7960_v15  ;;  %v1835_v62 = vmul.f32 %v1771_v44, %v14132_v58  ;;  %v1883_v46 = vadd.f32 -2.5052108e-08, %v1819_v19  ;;  %v1821_v7 = vmul.f32 %v1757_v50, %v14133_v51  ;;  %v1837_v37 = vmul.f32 %v1773_v29, %v14134_v31  ;;  %7869 = vmatmul.mubr.msk.f32.gmra.mrb[34].mxu0 %vm2674_vm2, %v10026_v4  ;;  %v14140_v38 = vld [vmem:[#allocation26_spill] sm:$0xff] }
 0x264   : > { %v10035_v54 = vsub.f32 %v1491_v23, %v1555_v12  ;;  %v1493_v61 = vsub.f32 %v1172_v11, %v1429_v52  ;;  %v1723_v15 = vmul.f32 -7.6471636e-13, %v14141_v2  ;;  %2763 = vmatprep.mubr.f32.mxu0 %v14135_v45  ;;  %v10047_v12 = vadd.f32 %v2578_v10, %v9917_v35  ;;  %v14144_v50 = vld [vmem:[#allocation74_spill] sm:$0xff] }
 0x265   : > { %v1899_v32 = vadd.f32 -2.5052108e-08, %v1835_v62  ;;  %v1947_v40 = vmul.f32 %v1883_v46, %v14130_v22  ;;  %v1885_v44 = vadd.f32 -2.5052108e-08, %v1821_v7  ;;  %v1901_v19 = vadd.f32 -2.5052108e-08, %v1837_v37 }
 0x266   : > { %14138 = vst [vmem:[#allocation42_spill] sm:$0xff] %v10035_v54  ;;  %14142 = vst [vmem:[#allocation32_spill] sm:$0xff] %v10047_v12  ;;  %v10049_v11 = vsub.f32 %v1493_v61, %v1557_v17  ;;  %7872 = vmatmul.mubr.msk.f32.vlgmr.msra.gmra.mrb[32].mxu1 %vm2674_vm2, %v10017_v56  ;;  %v1739_v29 = vmul.f32 -7.6471636e-13, %v14144_v50  ;;  %v1787_v23 = vadd.f32 1.6059044e-10, %v1723_v15  ;;  %v10059_v35 = vadd.f32 %v2580_v18, %v9933_v30 }
 0x267   : > { %2846 = vmatprep.mubr.f32.mxu1 %v14135_v45  ;;  %v1963_v52 = vmul.f32 %v1899_v32, %v14132_v58  ;;  %v2011_v62 = vadd.f32 2.7557319e-06, %v1947_v40  ;;  %v1949_v46 = vmul.f32 %v1885_v44, %v14133_v51  ;;  %v1965_v7 = vmul.f32 %v1901_v19, %v14134_v31  ;;  %7870 = vmatmul.mubr.msk.f32.gmra.mrb[36].mxu0 %vm2674_vm2, %v10041_v1  ;;  %v10067_v17 = vld [vmem:[#allocation2 + $0x18] sm:$0xff] }
 0x268   : > { %14143 = vst [vmem:[#allocation15_spill] sm:$0xff] %v10049_v11  ;;  %14145 = vst [vmem:[#allocation21_spill] sm:$0xff] %v10059_v35  ;;  %v10063_v10 = vmul.f32 %v10035_v54, %v10035_v54  ;;  %v1803_v37 = vadd.f32 1.6059044e-10, %v1739_v29  ;;  %v1851_v61 = vmul.f32 %v1787_v23, %v14141_v2  ;;  %2769 = vmatprep.mubr.f32.mxu0 %v14135_v45  ;;  %v14147_v29 = vld [vmem:[#allocation25_spill] sm:$0xff] }
 0x269   : > { %v2027_v15 = vadd.f32 2.7557319e-06, %v1963_v52  ;;  %v2075_v32 = vmul.f32 %v2011_v62, %v14130_v22  ;;  %v2013_v40 = vadd.f32 2.7557319e-06, %v1949_v46  ;;  %v2029_v44 = vadd.f32 2.7557319e-06, %v1965_v7 }
 0x26a   : > { %v10074_v30 = vmul.f32 %v10049_v11, %v10049_v11  ;;  %7873 = vmatmul.mubr.msk.f32.gmra.mrb[34].mxu1 %vm2674_vm2, %v10026_v4  ;;  %v1867_v18 = vmul.f32 %v1803_v37, %v14144_v50  ;;  %v1915_v19 = vadd.f32 -2.5052108e-08, %v1851_v61  ;;  %v1725_v39 = vmul.f32 -7.6471636e-13, %v14147_v29  ;;  %v14151_v54 = vld [vmem:[#allocation57_spill] sm:$0xff] }
 0x26b   : > { %v2091_v23 = vmul.f32 %v2027_v15, %v14132_v58  ;;  %v2139_v52 = vadd.f32 -0.0001984127, %v2075_v32  ;;  %v2077_v62 = vmul.f32 %v2013_v40, %v14133_v51  ;;  %v2093_v46 = vmul.f32 %v2029_v44, %v14134_v31  ;;  %2852 = vmatprep.mubr.f32.mxu1 %v14135_v45  ;;  %7871 = vmatmul.mubr.msk.f32.gmra.mrb[38].mxu0 %vm2674_vm2, %v10067_v17 }
 0x26c   : > { %14146 = vst [vmem:[#allocation27_spill] sm:$0xff] %v10074_v30  ;;  %v1931_v7 = vadd.f32 -2.5052108e-08, %v1867_v18  ;;  %v1979_v36 = vmul.f32 %v1915_v19, %v14141_v2  ;;  %v1741_v37 = vmul.f32 -7.6471636e-13, %v9430_v6  ;;  %2929 = vmatprep.mubr.f32.mxu0 %v14135_v45  ;;  %v14152_v30 = vld [vmem:[#allocation67_spill] sm:$0xff] }
 0x26d   : > { %v1789_v61 = vadd.f32 1.6059044e-10, %v1725_v39  ;;  %v2155_v11 = vadd.f32 -0.0001984127, %v2091_v23  ;;  %v2203_v35 = vmul.f32 %v2139_v52, %v14130_v22  ;;  %v2141_v15 = vadd.f32 -0.0001984127, %v2077_v62 }
 0x26e   : > { %v2157_v32 = vadd.f32 -0.0001984127, %v2093_v46  ;;  %7874 = vmatmul.mubr.msk.f32.gmra.mrb[36].mxu1 %vm2674_vm2, %v10041_v1  ;;  %v1995_v40 = vmul.f32 %v1931_v7, %v14144_v50  ;;  %v2043_v44 = vadd.f32 2.7557319e-06, %v1979_v36  ;;  %v1805_v21 = vadd.f32 1.6059044e-10, %v1741_v37 }
 0x26f   : > { %v1853_v18 = vmul.f32 %v1789_v61, %v14147_v29  ;;  %v2219_v19 = vmul.f32 %v2155_v11, %v14132_v58  ;;  %v2267_v12 = vadd.f32 0.008333334, %v2203_v35  ;;  %v2205_v39 = vmul.f32 %v2141_v15, %v14133_v51  ;;  %2858 = vmatprep.mubr.f32.mxu1 %v14135_v45 }
 0x270   : > { %v2221_v23 = vmul.f32 %v2157_v32, %v14134_v31  ;;  %v2059_v52 = vadd.f32 2.7557319e-06, %v1995_v40  ;;  %v2107_v62 = vmul.f32 %v2043_v44, %v14141_v2  ;;  %v1869_v46 = vmul.f32 %v1805_v21, %v9430_v6 }
 0x271   : > { %v1917_v13 = vadd.f32 -2.5052108e-08, %v1853_v18  ;;  %v2283_v7 = vadd.f32 0.008333334, %v2219_v19  ;;  %v2331_v36 = vmul.f32 %v2267_v12, %v14130_v22  ;;  %v2269_v37 = vadd.f32 0.008333334, %v2205_v39 }
 0x272   : > { %v2285_v61 = vadd.f32 0.008333334, %v2221_v23  ;;  %7875 = vmatmul.mubr.msk.f32.gmra.mrb[38].mxu1 %vm2674_vm2, %v10067_v17  ;;  %v2123_v11 = vmul.f32 %v2059_v52, %v14144_v50  ;;  %v2171_v35 = vadd.f32 -0.0001984127, %v2107_v62  ;;  %v1933_v15 = vadd.f32 -2.5052108e-08, %v1869_v46 }
 0x273   : > { %v1981_v32 = vmul.f32 %v1917_v13, %v14147_v29  ;;  %v2347_v40 = vmul.f32 %v2283_v7, %v14132_v58  ;;  %v2395_v44 = vadd.f32 -0.16666667, %v2331_v36  ;;  %v2333_v21 = vmul.f32 %v2269_v37, %v14133_v51  ;;  %3018 = vmatprep.mubr.f32.mxu1 %v14135_v45  ;;  %v14148_v52 = vld [vmem:[#allocation56_spill] sm:$0xff] }
 0x274   : > { %v2349_v18 = vmul.f32 %v2285_v61, %v14134_v31  ;;  %v2187_v22 = vadd.f32 -0.0001984127, %v2123_v11  ;;  %v2235_v12 = vmul.f32 %v2171_v35, %v14141_v2  ;;  %v1997_v19 = vmul.f32 %v1933_v15, %v9430_v6  ;;  %v14149_v31 = vld [vmem:[#allocation63_spill] sm:$0xff] }
 0x275   : > { %v2045_v39 = vadd.f32 2.7557319e-06, %v1981_v32  ;;  %v2411_v23 = vadd.f32 -0.16666667, %v2347_v40  ;;  %v2523_v62 = vmul.f32 %v14148_v52, %v2395_v44  ;;  %v2397_v46 = vadd.f32 -0.16666667, %v2333_v21 }
 0x276   : > { %v2413_v13 = vadd.f32 -0.16666667, %v2349_v18  ;;  %v2251_v58 = vmul.f32 %v2187_v22, %v14144_v50  ;;  %v2299_v7 = vadd.f32 0.008333334, %v2235_v12  ;;  %v2061_v36 = vadd.f32 2.7557319e-06, %v1997_v19 }
 0x277   : > { %v2109_v51 = vmul.f32 %v2045_v39, %v14147_v29  ;;  %v2539_v37 = vmul.f32 %v14149_v31, %v2411_v23  ;;  %v14150_v61 = vld [vmem:[#allocation51_spill] sm:$0xff]  ;;  %v2525_v35 = vmul.f32 %v14151_v54, %v2397_v46  ;;  %v14153_v18 = vld [vmem:[#allocation60_spill] sm:$0xff]  ;;  %v14154_v12 = vld [vmem:[#allocation53_spill] sm:$0xff]  ;;  %v7968_v23 = vpack.c.bf16 %v9470_v47, %v14156_v16 }
 0x278   : > { %v2587_v11 = vadd.f32 %v2523_v62, %v14150_v61  ;;  %v2541_v15 = vmul.f32 %v14152_v30, %v2413_v13  ;;  %v2315_v32 = vadd.f32 0.008333334, %v2251_v58  ;;  %v2363_v40 = vmul.f32 %v2299_v7, %v14141_v2  ;;  %v14155_v52 = vld [vmem:[#allocation64_spill] sm:$0xff]  ;;  %v14157_v58 = vld [vmem:[#allocation29_spill] sm:$0xff]  ;;  %v14158_v31 = vld [vmem:[#allocation71_spill] sm:$0xff] }
 0x279   : > { %v2125_v44 = vmul.f32 %v2061_v36, %v9430_v6  ;;  %v2173_v21 = vadd.f32 -0.0001984127, %v2109_v51  ;;  %v2603_v22 = vadd.f32 %v2539_v37, %v14153_v18  ;;  %v2589_v19 = vadd.f32 %v2525_v35, %v14154_v12 }
 0x27a   : > { %v2605_v39 = vadd.f32 %v2541_v15, %v14155_v52  ;;  %v2379_v62 = vmul.f32 %v2315_v32, %v14144_v50  ;;  %v2427_v54 = vadd.f32 -0.16666667, %v2363_v40  ;;  %v7976_v7 = vpack.c.bf16 %v9517_v8, %v14157_v58  ;;  %v14161_v40 = vld [vmem:[#allocation76_spill] sm:$0xff] }
 0x27b   : > { %v2189_v46 = vadd.f32 -0.0001984127, %v2125_v44  ;;  %v2237_v30 = vmul.f32 %v2173_v21, %v14147_v29  ;;  %v7962_v13 = vpack.c.bf16 %v2603_v22, %v2587_v11  ;;  %v1695_v36 = vmul.f32 -7.6471636e-13, %v9462_v41  ;;  %v14162_v21 = vld [vmem:[#allocation68_spill] sm:$0xff] }
 0x27c   : > { %v7970_v2 = vpack.c.bf16 %v2605_v39, %v2589_v19  ;;  %v2443_v51 = vadd.f32 -0.16666667, %v2379_v62  ;;  %v2555_v37 = vmul.f32 %v14158_v31, %v2427_v54  ;;  %v1711_v47 = vmul.f32 -7.6471636e-13, %v9535_v33  ;;  %v14163_v54 = vld [vmem:[#allocation73_spill] sm:$0xff] }
 0x27d   : > { %v2253_v61 = vmul.f32 %v2189_v46, %v9430_v6  ;;  %v2301_v35 = vadd.f32 0.008333334, %v2237_v30  ;;  %7963 = vmatprep.subr.bf16.mxu0 %v7962_v13  ;;  %v1759_v16 = vadd.f32 1.6059044e-10, %v1695_v36  ;;  %v1697_v50 = vmul.f32 -7.6471636e-13, %v9474_v0 }
 0x27e   : > { %7971 = vmatprep.subr.bf16.mxu1 %v7970_v2  ;;  %v7980_v11 = vpack.c.bf16 %v9604_v14, %v9530_v63  ;;  %v14159_v15 = vpack.c.bf16 %v14137_v20, %v14136_v53  ;;  %v14160_v32 = vpack.c.bf16 %v14140_v38, %v14139_v27  ;;  %v2571_v44 = vmul.f32 %v14161_v40, %v2443_v51  ;;  %v14164_v51 = vld [vmem:[#allocation72_spill] sm:$0xff]  ;;  %v14183_v63 = vld [vmem:[#allocation90_spill] sm:$0xff] }
 0x27f   : > { %v2619_v18 = vadd.f32 %v2555_v37, %v14162_v21  ;;  %v2317_v22 = vadd.f32 0.008333334, %v2253_v61  ;;  %v2365_v12 = vmul.f32 %v2301_v35, %v14147_v29  ;;  %v1775_v19 = vadd.f32 1.6059044e-10, %v1711_v47 }
 0x280   : > { %7965 = vmatpush1.bf16.msra.mxu0 %v14159_v15  ;;  %7973 = vmatpush1.bf16.msra.mxu1 %v14160_v32  ;;  %v1823_v52 = vmul.f32 %v1759_v16, %v9462_v41  ;;  %v1713_v39 = vmul.f32 -7.6471636e-13, %v9580_v57  ;;  %v1761_v62 = vadd.f32 1.6059044e-10, %v1697_v50  ;;  %v2635_v53 = vadd.f32 %v2571_v44, %v14163_v54  ;;  %v14165_v16 = vld [vmem:[#allocation80_spill] sm:$0xff]  ;;  %v14166_v15 = vld [vmem:[#allocation23_spill] sm:$0xff] }
 0x281   : > { %v2381_v20 = vmul.f32 %v2317_v22, %v9430_v6  ;;  %v2429_v46 = vadd.f32 -0.16666667, %v2365_v12  ;;  %v7988_v27 = vpack.c.bf16 %v9661_v5, %v9545_v28  ;;  %v1839_v38 = vmul.f32 %v1775_v19, %v9535_v33  ;;  %v14167_v19 = vld [vmem:[#allocation77_spill] sm:$0xff] }
 0x282   : > { %v1887_v30 = vadd.f32 -2.5052108e-08, %v1823_v52  ;;  %v1777_v13 = vadd.f32 1.6059044e-10, %v1713_v39  ;;  %v1825_v29 = vmul.f32 %v1761_v62, %v9474_v0  ;;  %v7966_v2 = vpack.c.bf16 %v2635_v53, %v2619_v18 }
 0x283   : > { %v2445_v36 = vadd.f32 -0.16666667, %v2381_v20  ;;  %v2557_v31 = vmul.f32 %v14164_v51, %v2429_v46  ;;  %v1727_v37 = vmul.f32 -7.6471636e-13, %v9601_v34  ;;  %v1903_v61 = vadd.f32 -2.5052108e-08, %v1839_v38 }
 0x284   : > { %v1951_v35 = vmul.f32 %v1887_v30, %v9462_v41  ;;  %v1841_v6 = vmul.f32 %v1777_v13, %v9580_v57  ;;  %v1889_v47 = vadd.f32 -2.5052108e-08, %v1825_v29  ;;  %7967 = vmatprep.subr.bf16.mxu0 %v7966_v2  ;;  %v1743_v40 = vmul.f32 -7.6471636e-13, %v9669_v59 }
 0x285   : > { %v2573_v50 = vmul.f32 %v14165_v16, %v2445_v36  ;;  %v2621_v32 = vadd.f32 %v2557_v31, %v14166_v15  ;;  %v1791_v44 = vadd.f32 1.6059044e-10, %v1727_v37  ;;  %7969 = vmatpush1.bf16.msra.mxu0 %v7968_v23  ;;  %v1967_v21 = vmul.f32 %v1903_v61, %v9535_v33 }
 0x286   : > { %v2015_v18 = vadd.f32 2.7557319e-06, %v1951_v35  ;;  %v1905_v22 = vadd.f32 -2.5052108e-08, %v1841_v6  ;;  %v1953_v12 = vmul.f32 %v1889_v47, %v9474_v0  ;;  %v1807_v39 = vadd.f32 1.6059044e-10, %v1743_v40 }
 0x287   : > { %v2637_v52 = vadd.f32 %v2573_v50, %v14167_v19  ;;  %v1855_v62 = vmul.f32 %v1791_v44, %v9601_v34  ;;  %v1729_v54 = vmul.f32 -7.6471636e-13, %v9616_v3  ;;  %v2031_v53 = vadd.f32 2.7557319e-06, %v1967_v21 }
 0x288   : > { %v2079_v20 = vmul.f32 %v2015_v18, %v9462_v41  ;;  %v1969_v46 = vmul.f32 %v1905_v22, %v9580_v57  ;;  %v2017_v38 = vadd.f32 2.7557319e-06, %v1953_v12  ;;  %7876 = vmatmul.mubr.msk.f32.vlgmr.msra.gmra.mrb[40].mxu0 %vm2674_vm2, %v10017_v56  ;;  %v1871_v30 = vmul.f32 %v1807_v39, %v9669_v59 }
 0x289   : > { %v7974_v23 = vpack.c.bf16 %v2637_v52, %v2621_v32  ;;  %v1919_v13 = vadd.f32 -2.5052108e-08, %v1855_v62  ;;  %v1745_v29 = vmul.f32 -7.6471636e-13, %v9695_v42  ;;  %2935 = vmatprep.mubr.f32.mxu0 %v14135_v45  ;;  %v2095_v2 = vmul.f32 %v2031_v53, %v9535_v33 }
 0x28a   : > { %v2143_v36 = vadd.f32 -0.0001984127, %v2079_v20  ;;  %v2033_v51 = vadd.f32 2.7557319e-06, %v1969_v46  ;;  %v2081_v31 = vmul.f32 %v2017_v38, %v9474_v0  ;;  %v1935_v37 = vadd.f32 -2.5052108e-08, %v1871_v30 }
 0x28b   : > { %7975 = vmatprep.subr.bf16.mxu1 %v7974_v23  ;;  %v1983_v61 = vmul.f32 %v1919_v13, %v9601_v34  ;;  %v1793_v35 = vadd.f32 1.6059044e-10, %v1729_v54  ;;  %v1809_v6 = vadd.f32 1.6059044e-10, %v1745_v29  ;;  %v2159_v47 = vadd.f32 -0.0001984127, %v2095_v2 }
 0x28c   : > { %7977 = vmatpush1.bf16.msra.mxu1 %v7976_v7  ;;  %v2207_v16 = vmul.f32 %v2143_v36, %v9462_v41  ;;  %v2097_v50 = vmul.f32 %v2033_v51, %v9580_v57  ;;  %v2145_v15 = vadd.f32 -0.0001984127, %v2081_v31  ;;  %7877 = vmatmul.mubr.msk.f32.gmra.mrb[42].mxu0 %vm2674_vm2, %v10026_v4  ;;  %v1999_v32 = vmul.f32 %v1935_v37, %v9669_v59 }
 0x28d   : > { %v2047_v40 = vadd.f32 2.7557319e-06, %v1983_v61  ;;  %v1857_v44 = vmul.f32 %v1793_v35, %v9616_v3  ;;  %v1873_v21 = vmul.f32 %v1809_v6, %v9695_v42  ;;  %v2223_v18 = vmul.f32 %v2159_v47, %v9535_v33  ;;  %2941 = vmatprep.mubr.f32.mxu0 %v14135_v45  ;;  %v14168_v61 = vld [vmem:[#allocation81_spill] sm:$0xff] }
 0x28e   : > { %v2271_v8 = vadd.f32 0.008333334, %v2207_v16  ;;  %v2161_v58 = vadd.f32 -0.0001984127, %v2097_v50  ;;  %v2209_v7 = vmul.f32 %v2145_v15, %v9474_v0  ;;  %v2063_v22 = vadd.f32 2.7557319e-06, %v1999_v32 }
 0x28f   : > { %7880 = vmatmul.mubr.msk.f32.vlgmr.msra.gmra.mrb[40].mxu1 %vm2674_vm2, %v10017_v56  ;;  %v2111_v12 = vmul.f32 %v2047_v40, %v9601_v34  ;;  %v1921_v19 = vadd.f32 -2.5052108e-08, %v1857_v44  ;;  %v1937_v52 = vadd.f32 -2.5052108e-08, %v1873_v21  ;;  %v2287_v39 = vadd.f32 0.008333334, %v2223_v18 }
 0x290   : > { %3024 = vmatprep.mubr.f32.mxu1 %v14135_v45  ;;  %v2335_v62 = vmul.f32 %v2271_v8, %v9462_v41  ;;  %v2225_v54 = vmul.f32 %v2161_v58, %v9580_v57  ;;  %v2273_v53 = vadd.f32 0.008333334, %v2209_v7  ;;  %7878 = vmatmul.mubr.msk.f32.gmra.mrb[44].mxu0 %vm2674_vm2, %v10041_v1  ;;  %v2127_v20 = vmul.f32 %v2063_v22, %v9669_v59  ;;  %v14169_v15 = vld [vmem:[#allocation85_spill] sm:$0xff]  ;;  %v14170_v40 = vld [vmem:[#allocation78_spill] sm:$0xff] }
 0x291   : > { %v2175_v46 = vadd.f32 -0.0001984127, %v2111_v12  ;;  %v1985_v38 = vmul.f32 %v1921_v19, %v9616_v3  ;;  %v2001_v23 = vmul.f32 %v1937_v52, %v9695_v42  ;;  %v2351_v30 = vmul.f32 %v2287_v39, %v9535_v33  ;;  %2947 = vmatprep.mubr.f32.mxu0 %v14135_v45  ;;  %v14171_v18 = vld [vmem:[#allocation82_spill] sm:$0xff]  ;;  %v14172_v12 = vld [vmem:[#allocation83_spill] sm:$0xff] }
 0x292   : > { %v2399_v13 = vadd.f32 -0.16666667, %v2335_v62  ;;  %v2289_v29 = vadd.f32 0.008333334, %v2225_v54  ;;  %v2337_v2 = vmul.f32 %v2273_v53, %v9474_v0  ;;  %v2191_v41 = vadd.f32 -0.0001984127, %v2127_v20 }
 0x293   : > { %7881 = vmatmul.mubr.msk.f32.gmra.mrb[42].mxu1 %vm2674_vm2, %v10026_v4  ;;  %v2239_v36 = vmul.f32 %v2175_v46, %v9601_v34  ;;  %v2049_v51 = vadd.f32 2.7557319e-06, %v1985_v38  ;;  %v2065_v31 = vadd.f32 2.7557319e-06, %v2001_v23  ;;  %v2415_v37 = vadd.f32 -0.16666667, %v2351_v30 }
 0x294   : > { %v2527_v35 = vmul.f32 %v14168_v61, %v2399_v13  ;;  %v2353_v6 = vmul.f32 %v2289_v29, %v9580_v57  ;;  %v2401_v33 = vadd.f32 -0.16666667, %v2337_v2  ;;  %3030 = vmatprep.mubr.f32.mxu1 %v14135_v45  ;;  %7879 = vmatmul.mubr.msk.f32.gmra.mrb[46].mxu0 %vm2674_vm2, %v10067_v17  ;;  %v2255_v0 = vmul.f32 %v2191_v41, %v9669_v59  ;;  %v14173_v52 = vld [vmem:[#allocation86_spill] sm:$0xff]  ;;  %v14174_v62 = vld [vmem:[#allocation79_spill] sm:$0xff]  ;;  %v14175_v53 = vld [vmem:[#allocation92_spill] sm:$0xff] }
 0x295   : > { %v2303_v47 = vadd.f32 0.008333334, %v2239_v36  ;;  %v2113_v16 = vmul.f32 %v2049_v51, %v9616_v3  ;;  %v2129_v50 = vmul.f32 %v2065_v31, %v9695_v42  ;;  %v2543_v32 = vmul.f32 %v14169_v15, %v2415_v37  ;;  %3107 = vmatprep.mubr.f32.mxu0 %v14135_v45  ;;  %v14176_v20 = vld [vmem:[#allocation98_spill] sm:$0xff]  ;;  %v14177_v29 = vld [vmem:[#allocation84_spill] sm:$0xff]  ;;  %v14179_v51 = vld [vmem:[#allocation97_spill] sm:$0xff] }
 0x296   : > { %v2591_v44 = vadd.f32 %v2527_v35, %v14170_v40  ;;  %v2417_v21 = vadd.f32 -0.16666667, %v2353_v6  ;;  %v2529_v57 = vmul.f32 %v14171_v18, %v2401_v33  ;;  %v2319_v8 = vadd.f32 0.008333334, %v2255_v0  ;;  %v14178_v41 = vld [vmem:[#allocation94_spill] sm:$0xff]  ;;  %v14180_v61 = vld [vmem:[#allocation88_spill] sm:$0xff] }
 0x297   : > { %7882 = vmatmul.mubr.msk.f32.gmra.mrb[44].mxu1 %vm2674_vm2, %v10041_v1  ;;  %v2367_v58 = vmul.f32 %v2303_v47, %v9601_v34  ;;  %v2177_v7 = vadd.f32 -0.0001984127, %v2113_v16  ;;  %v2193_v22 = vadd.f32 -0.0001984127, %v2129_v50  ;;  %v2607_v19 = vadd.f32 %v2543_v32, %v14172_v12  ;;  %v14181_v50 = vld [vmem:[#allocation93_spill] sm:$0xff]  ;;  %v14182_v32 = vld [vmem:[#allocation36_spill] sm:$0xff] }
 0x298   : > { %v2545_v39 = vmul.f32 %v14173_v52, %v2417_v21  ;;  %v2593_v54 = vadd.f32 %v2529_v57, %v14174_v62  ;;  %3036 = vmatprep.mubr.f32.mxu1 %v14135_v45  ;;  %v7984_v46 = vpack.c.bf16 %v14176_v20, %v14175_v53  ;;  %v2383_v38 = vmul.f32 %v2319_v8, %v9669_v59 }
 0x299   : > { %v2431_v23 = vadd.f32 -0.16666667, %v2367_v58  ;;  %v2241_v30 = vmul.f32 %v2177_v7, %v9616_v3  ;;  %v2257_v34 = vmul.f32 %v2193_v22, %v9695_v42  ;;  %v7978_v13 = vpack.c.bf16 %v2607_v19, %v2591_v44 }
 0x29a   : > { %v2609_v2 = vadd.f32 %v2545_v39, %v14177_v29  ;;  %v7992_v36 = vpack.c.bf16 %v9798_v25, %v14178_v41  ;;  %v1699_v31 = vmul.f32 -7.6471636e-13, %v14179_v51  ;;  %v2447_v37 = vadd.f32 -0.16666667, %v2383_v38  ;;  %v14184_v39 = vld [vmem:[#allocation89_spill] sm:$0xff] }
 0x29b   : > { %7883 = vmatmul.mubr.msk.f32.gmra.mrb[46].mxu1 %vm2674_vm2, %v10067_v17  ;;  %v2559_v35 = vmul.f32 %v14180_v61, %v2431_v23  ;;  %v2305_v59 = vadd.f32 0.008333334, %v2241_v30  ;;  %v2321_v6 = vadd.f32 0.008333334, %v2257_v34  ;;  %7979 = vmatprep.subr.bf16.mxu0 %v7978_v13  ;;  %v1715_v0 = vmul.f32 -7.6471636e-13, %v9859_v60 }
 0x29c   : > { %v7986_v33 = vpack.c.bf16 %v2609_v2, %v2593_v54  ;;  %3196 = vmatprep.mubr.f32.mxu1 %v14135_v45  ;;  %v1763_v47 = vadd.f32 1.6059044e-10, %v1699_v31  ;;  %v1701_v16 = vmul.f32 -7.6471636e-13, %v9757_v55  ;;  %7981 = vmatpush1.bf16.msra.mxu0 %v7980_v11  ;;  %v2575_v15 = vmul.f32 %v14181_v50, %v2447_v37  ;;  %v14185_v54 = vld [vmem:[#allocation50_spill] sm:$0xff]  ;;  %v14186_v23 = vld [vmem:[#allocation87_spill] sm:$0xff] }
 0x29d   : > { %v2623_v40 = vadd.f32 %v2559_v35, %v14182_v32  ;;  %v2369_v44 = vmul.f32 %v2305_v59, %v9616_v3  ;;  %v2385_v21 = vmul.f32 %v2321_v6, %v9695_v42  ;;  %v1779_v18 = vadd.f32 1.6059044e-10, %v1715_v0  ;;  %v14187_v34 = vld [vmem:[#allocation91_spill] sm:$0xff]  ;;  %v14188_v0 = vld [vmem:[#allocation33_spill] sm:$0xff] }
 0x29e   : > { %7987 = vmatprep.subr.bf16.mxu1 %v7986_v33  ;;  %v1827_v57 = vmul.f32 %v1763_v47, %v14179_v51  ;;  %v1717_v8 = vmul.f32 -7.6471636e-13, %v9885_v48  ;;  %v1765_v58 = vadd.f32 1.6059044e-10, %v1701_v16  ;;  %v2639_v14 = vadd.f32 %v2575_v15, %v14183_v63 }
 0x29f   : > { %7989 = vmatpush1.bf16.msra.mxu1 %v7988_v27  ;;  %v2433_v11 = vadd.f32 -0.16666667, %v2369_v44  ;;  %v2449_v7 = vadd.f32 -0.16666667, %v2385_v21  ;;  %v7996_v3 = vpack.c.bf16 %v9875_v49, %v9846_v43  ;;  %v1843_v42 = vmul.f32 %v1779_v18, %v9859_v60  ;;  %v14189_v44 = vld [vmem:[#allocation27_spill] sm:$0xff] }
 0x2a0   : > { %v1891_v22 = vadd.f32 -2.5052108e-08, %v1827_v57  ;;  %v1781_v12 = vadd.f32 1.6059044e-10, %v1717_v8  ;;  %v1829_v19 = vmul.f32 %v1765_v58, %v9757_v55  ;;  %v7982_v52 = vpack.c.bf16 %v2639_v14, %v2623_v40 }
 0x2a1   : > { %v2561_v62 = vmul.f32 %v14184_v39, %v2433_v11  ;;  %v2577_v53 = vmul.f32 %v14185_v54, %v2449_v7  ;;  %v8004_v28 = vpack.c.bf16 %v9902_v26, %v9851_v24  ;;  %v1907_v5 = vadd.f32 -2.5052108e-08, %v1843_v42  ;;  %v10383_v24 = vpop.permute.xlu0 %2656 }
 0x2a2   : > { %v1955_v27 = vmul.f32 %v1891_v22, %v14179_v51  ;;  %v1845_v20 = vmul.f32 %v1781_v12, %v9885_v48  ;;  %v1893_v38 = vadd.f32 -2.5052108e-08, %v1829_v19  ;;  %7983 = vmatprep.subr.bf16.mxu0 %v7982_v52  ;;  %v1731_v29 = vmul.f32 -7.6471636e-13, %v9915_v9 }
 0x2a3   : > { %v2625_v30 = vadd.f32 %v2561_v62, %v14186_v23  ;;  %v2641_v13 = vadd.f32 %v2577_v53, %v14187_v34  ;;  %v1747_v2 = vmul.f32 -7.6471636e-13, %v10063_v10  ;;  %7985 = vmatpush1.bf16.msra.mxu0 %v7984_v46  ;;  %v1971_v31 = vmul.f32 %v1907_v5, %v9859_v60 }
 0x2a4   : > { %v2019_v37 = vadd.f32 2.7557319e-06, %v1955_v27  ;;  %v1909_v61 = vadd.f32 -2.5052108e-08, %v1845_v20  ;;  %v1957_v35 = vmul.f32 %v1893_v38, %v9757_v55  ;;  %v1795_v6 = vadd.f32 1.6059044e-10, %v1731_v29 }
 0x2a5   : > { %v7990_v59 = vpack.c.bf16 %v2641_v13, %v2625_v30  ;;  %v1811_v33 = vadd.f32 1.6059044e-10, %v1747_v2  ;;  %v1733_v47 = vmul.f32 -7.6471636e-13, %v14188_v0  ;;  %v2035_v16 = vadd.f32 2.7557319e-06, %v1971_v31 }
 0x2a6   : > { %v2083_v50 = vmul.f32 %v2019_v37, %v14179_v51  ;;  %v1973_v15 = vmul.f32 %v1909_v61, %v9885_v48  ;;  %v2021_v32 = vadd.f32 2.7557319e-06, %v1957_v35  ;;  %7884 = vmatmul.mubr.msk.f32.vlgmr.msra.gmra.mrb[48].mxu0 %vm2674_vm2, %v10017_v56  ;;  %v1859_v46 = vmul.f32 %v1795_v6, %v9915_v9 }
 0x2a7   : > { %7991 = vmatprep.subr.bf16.mxu1 %v7990_v59  ;;  %v1875_v40 = vmul.f32 %v1811_v33, %v10063_v10  ;;  %v1749_v21 = vmul.f32 -7.6471636e-13, %v14189_v44  ;;  %v1797_v18 = vadd.f32 1.6059044e-10, %v1733_v47  ;;  %3113 = vmatprep.mubr.f32.mxu0 %v14135_v45  ;;  %v2099_v57 = vmul.f32 %v2035_v16, %v9859_v60 }
 0x2a8   : > { %7993 = vmatpush1.bf16.msra.mxu1 %v7992_v36  ;;  %v2147_v8 = vadd.f32 -0.0001984127, %v2083_v50  ;;  %v2037_v58 = vadd.f32 2.7557319e-06, %v1973_v15  ;;  %v2085_v63 = vmul.f32 %v2021_v32, %v9757_v55  ;;  %v1923_v14 = vadd.f32 -2.5052108e-08, %v1859_v46 }
 0x2a9   : > { %v1939_v11 = vadd.f32 -2.5052108e-08, %v1875_v40  ;;  %v1813_v7 = vadd.f32 1.6059044e-10, %v1749_v21  ;;  %v1861_v42 = vmul.f32 %v1797_v18, %v14188_v0  ;;  %v2163_v22 = vadd.f32 -0.0001984127, %v2099_v57 }
 0x2aa   : > { %v2211_v12 = vmul.f32 %v2147_v8, %v14179_v51  ;;  %v2101_v19 = vmul.f32 %v2037_v58, %v9885_v48  ;;  %v2149_v25 = vadd.f32 -0.0001984127, %v2085_v63  ;;  %7885 = vmatmul.mubr.msk.f32.gmra.mrb[50].mxu0 %vm2674_vm2, %v10026_v4  ;;  %v1987_v41 = vmul.f32 %v1923_v14, %v9915_v9  ;;  %v14190_v32 = vld [vmem:[#allocation16_spill] sm:$0xff]  ;;  %v14191_v8 = vld [vmem:[#allocation42_spill] sm:$0xff] }
 0x2ab   : > { %7888 = vmatmul.mubr.msk.f32.vlgmr.msra.gmra.mrb[48].mxu1 %vm2674_vm2, %v10017_v56  ;;  %v2003_v36 = vmul.f32 %v1939_v11, %v10063_v10  ;;  %v1877_v52 = vmul.f32 %v1813_v7, %v14189_v44  ;;  %v1925_v39 = vadd.f32 -2.5052108e-08, %v1861_v42  ;;  %v2227_v62 = vmul.f32 %v2163_v22, %v9859_v60  ;;  %3119 = vmatprep.mubr.f32.mxu0 %v14135_v45  ;;  %v14192_v63 = vld [vmem:[#allocation18_spill] sm:$0xff] }
 0x2ac   : > { %3202 = vmatprep.mubr.f32.mxu1 %v14135_v45  ;;  %v2275_v54 = vadd.f32 0.008333334, %v2211_v12  ;;  %v2165_v53 = vadd.f32 -0.0001984127, %v2101_v19  ;;  %v2213_v5 = vmul.f32 %v2149_v25, %v9757_v55  ;;  %v2051_v27 = vadd.f32 2.7557319e-06, %v1987_v41 }
 0x2ad   : > { %v2067_v20 = vadd.f32 2.7557319e-06, %v2003_v36  ;;  %v1941_v38 = vadd.f32 -2.5052108e-08, %v1877_v52  ;;  %v1989_v23 = vmul.f32 %v1925_v39, %v14188_v0  ;;  %v2291_v30 = vadd.f32 0.008333334, %v2227_v62 }
 0x2ae   : > { %v2339_v34 = vmul.f32 %v2275_v54, %v14179_v51  ;;  %v2229_v13 = vmul.f32 %v2165_v53, %v9885_v48  ;;  %v2277_v29 = vadd.f32 0.008333334, %v2213_v5  ;;  %7886 = vmatmul.mubr.msk.f32.gmra.mrb[52].mxu0 %vm2674_vm2, %v10041_v1  ;;  %v2115_v2 = vmul.f32 %v2051_v27, %v9915_v9  ;;  %v14193_v11 = vld [vmem:[#allocation22_spill] sm:$0xff]  ;;  %v14194_v25 = vld [vmem:[#allocation95_spill] sm:$0xff]  ;;  %v14195_v36 = vld [vmem:[#allocation17_spill] sm:$0xff] }
 0x2af   : > { %7889 = vmatmul.mubr.msk.f32.gmra.mrb[50].mxu1 %vm2674_vm2, %v10026_v4  ;;  %v2131_v31 = vmul.f32 %v2067_v20, %v10063_v10  ;;  %v2005_v37 = vmul.f32 %v1941_v38, %v14189_v44  ;;  %v2053_v61 = vadd.f32 2.7557319e-06, %v1989_v23  ;;  %v2355_v35 = vmul.f32 %v2291_v30, %v9859_v60  ;;  %3125 = vmatprep.mubr.f32.mxu0 %v14135_v45  ;;  %v14196_v39 = vld [vmem:[#allocation19_spill] sm:$0xff]  ;;  %v14197_v54 = vld [vmem:[#allocation20_spill] sm:$0xff] }
 0x2b0   : > { %v2403_v59 = vadd.f32 -0.16666667, %v2339_v34  ;;  %v2293_v51 = vadd.f32 0.008333334, %v2229_v13  ;;  %v2341_v6 = vmul.f32 %v2277_v29, %v9757_v55  ;;  %3208 = vmatprep.mubr.f32.mxu1 %v14135_v45  ;;  %v2179_v33 = vadd.f32 -0.0001984127, %v2115_v2 }
 0x2b1   : > { %v2195_v47 = vadd.f32 -0.0001984127, %v2131_v31  ;;  %v2069_v16 = vadd.f32 2.7557319e-06, %v2005_v37  ;;  %v2117_v50 = vmul.f32 %v2053_v61, %v14188_v0  ;;  %v2419_v15 = vadd.f32 -0.16666667, %v2355_v35 }
 0x2b2   : > { %v2531_v46 = vmul.f32 %v14190_v32, %v2403_v59  ;;  %v2357_v40 = vmul.f32 %v2293_v51, %v9885_v48  ;;  %v2405_v21 = vadd.f32 -0.16666667, %v2341_v6  ;;  %7887 = vmatmul.mubr.msk.f32.gmra.mrb[54].mxu0 %vm2674_vm2, %v10067_v17  ;;  %v2243_v55 = vmul.f32 %v2179_v33, %v9915_v9  ;;  %v14198_v53 = vld [vmem:[#allocation32_spill] sm:$0xff]  ;;  %v14201_v31 = vld [vmem:[#allocation34_spill] sm:$0xff]  ;;  %v14202_v37 = vld [vmem:[#allocation21_spill] sm:$0xff] }
 0x2b3   : > { %7890 = vmatmul.mubr.msk.f32.gmra.mrb[52].mxu1 %vm2674_vm2, %v10041_v1  ;;  %v2259_v60 = vmul.f32 %v2195_v47, %v10063_v10  ;;  %v2133_v18 = vmul.f32 %v2069_v16, %v14189_v44  ;;  %v2181_v57 = vadd.f32 -0.0001984127, %v2117_v50  ;;  %v2515_v58 = vmul.f32 %v10063_v10, %v14191_v8  ;;  %3285 = vmatprep.mubr.f32.mxu0 %v14135_v45  ;;  %v14199_v34 = vld [vmem:[#allocation96_spill] sm:$0xff]  ;;  %v14203_v6 = vld [vmem:[#allocation14_spill] sm:$0xff]  ;;  %v14204_v47 = vld [vmem:[#allocation39_spill] sm:$0xff] }
 0x2b4   : > { %v2547_v14 = vmul.f32 %v14192_v63, %v2419_v15  ;;  %v2421_v48 = vadd.f32 -0.16666667, %v2357_v40  ;;  %v2533_v7 = vmul.f32 %v14193_v11, %v2405_v21  ;;  %3214 = vmatprep.mubr.f32.mxu1 %v14135_v45  ;;  %v2307_v42 = vadd.f32 0.008333334, %v2243_v55  ;;  %v14200_v29 = vld [vmem:[#allocation24_spill] sm:$0xff] }
 0x2b5   : > { %v2323_v22 = vadd.f32 0.008333334, %v2259_v60  ;;  %v2197_v12 = vadd.f32 -0.0001984127, %v2133_v18  ;;  %v2245_v19 = vmul.f32 %v2181_v57, %v14188_v0  ;;  %v2595_v41 = vadd.f32 %v2531_v46, %v14194_v25  ;;  %v14205_v46 = vld [vmem:[#allocation15_spill] sm:$0xff] }
 0x2b6   : > { %v2611_v52 = vadd.f32 %v2547_v14, %v14195_v36  ;;  %v2549_v62 = vmul.f32 %v14196_v39, %v2421_v48  ;;  %v8000_v5 = vpack.c.bf16 %v14198_v53, %v14197_v54  ;;  %v2371_v27 = vmul.f32 %v2307_v42, %v9915_v9 }
 0x2b7   : > { %7891 = vmatmul.mubr.msk.f32.gmra.mrb[54].mxu1 %vm2674_vm2, %v10067_v17  ;;  %v2387_v20 = vmul.f32 %v2323_v22, %v10063_v10  ;;  %v2261_v38 = vmul.f32 %v2197_v12, %v14189_v44  ;;  %v2309_v23 = vadd.f32 0.008333334, %v2245_v19  ;;  %v2597_v13 = vadd.f32 %v2533_v7, %v14199_v34 }
 0x2b8   : > { %v7994_v30 = vpack.c.bf16 %v2611_v52, %v2595_v41  ;;  %v2613_v2 = vadd.f32 %v2549_v62, %v14200_v29  ;;  %v8008_v61 = vpack.c.bf16 %v14202_v37, %v14201_v31  ;;  %3374 = vmatprep.mubr.f32.mxu1 %v14135_v45  ;;  %v2435_v35 = vadd.f32 -0.16666667, %v2371_v27 }
 0x2b9   : > { %v2451_v59 = vadd.f32 -0.16666667, %v2387_v20  ;;  %v2325_v51 = vadd.f32 0.008333334, %v2261_v38  ;;  %v2373_v9 = vmul.f32 %v2309_v23, %v14188_v0  ;;  %v2501_v10 = vmul.f32 %v14188_v0, %v14203_v6  ;;  %v14206_v0 = vld [vmem:[#allocation30_spill] sm:$0xff] }
 0x2ba   : > { %7995 = vmatprep.subr.bf16.mxu0 %v7994_v30  ;;  %v8002_v33 = vpack.c.bf16 %v2613_v2, %v2597_v13  ;;  %v2563_v16 = vmul.f32 %v14204_v47, %v2435_v35  ;;  %v2517_v40 = vmul.f32 %v14189_v44, %v14205_v46 }
 0x2bb   : > { %7997 = vmatpush1.bf16.msra.mxu0 %v7996_v3  ;;  %v2579_v50 = vmul.f32 %v2515_v58, %v2451_v59  ;;  %v2389_v15 = vmul.f32 %v2325_v51, %v14189_v44  ;;  %v2437_v32 = vadd.f32 -0.16666667, %v2373_v9 }
 0x2bc   : > { %8003 = vmatprep.subr.bf16.mxu1 %v8002_v33  ;;  %v2627_v21 = vadd.f32 %v2563_v16, %v14206_v0 }
 0x2bd   : > { %8005 = vmatpush1.bf16.msra.mxu1 %v8004_v28  ;;  %v2643_v55 = vadd.f32 %v2579_v50, %v14191_v8  ;;  %v2453_v43 = vadd.f32 -0.16666667, %v2389_v15  ;;  %v2565_v49 = vmul.f32 %v2501_v10, %v2437_v32  ;;  %v10387_v8 = vpop.permute.xlu1 %2661 }
 0x2bf   : > { %v7998_v3 = vpack.c.bf16 %v2643_v55, %v2627_v21  ;;  %v2581_v60 = vmul.f32 %v2517_v40, %v2453_v43  ;;  %v2629_v18 = vadd.f32 %v2565_v49, %v14203_v6 }
 0x2c1   : > { %7999 = vmatprep.subr.bf16.mxu0 %v7998_v3  ;;  %v2645_v57 = vadd.f32 %v2581_v60, %v14205_v46 }
 0x2c2   : > { %8001 = vmatpush1.bf16.msra.mxu0 %v8000_v5 }
 0x2c3   : > { %v8006_v44 = vpack.c.bf16 %v2645_v57, %v2629_v18 }
 0x2c5   : > { %8007 = vmatprep.subr.bf16.mxu1 %v8006_v44  ;;  %7892 = vmatmul.mubr.msk.f32.vlgmr.msra.gmra.mrb[56].mxu0 %vm2674_vm2, %v10017_v56 }
 0x2c6   : > { %8009 = vmatpush1.bf16.msra.mxu1 %v8008_v61  ;;  %3291 = vmatprep.mubr.f32.mxu0 %v14135_v45 }
 0x2c9   : > { %7896 = vmatmul.mubr.msk.f32.vlgmr.msra.gmra.mrb[56].mxu1 %vm2674_vm2, %v10017_v56  ;;  %7893 = vmatmul.mubr.msk.f32.gmra.mrb[58].mxu0 %vm2674_vm2, %v10026_v4 }
 0x2ca   : > { %3380 = vmatprep.mubr.f32.mxu1 %v14135_v45  ;;  %3297 = vmatprep.mubr.f32.mxu0 %v14135_v45 }
 0x2cd   : > { %7897 = vmatmul.mubr.msk.f32.gmra.mrb[58].mxu1 %vm2674_vm2, %v10026_v4  ;;  %7894 = vmatmul.mubr.msk.f32.gmra.mrb[60].mxu0 %vm2674_vm2, %v10041_v1 }
 0x2ce   : > { %3386 = vmatprep.mubr.f32.mxu1 %v14135_v45  ;;  %3303 = vmatprep.mubr.f32.mxu0 %v14135_v45 }
 0x2d1   : > { %7898 = vmatmul.mubr.msk.f32.gmra.mrb[60].mxu1 %vm2674_vm2, %v10041_v1  ;;  %7895 = vmatmul.mubr.msk.f32.gmra.mrb[62].mxu0 %vm2674_vm2, %v10067_v17 }
 0x2d2   : > { %3392 = vmatprep.mubr.f32.mxu1 %v14135_v45  ;;  %4975 = vmatprep.mubr.f32.mxu0 %v14135_v45 }
 0x2d5   : > { %7899 = vmatmul.mubr.msk.f32.gmra.mrb[62].mxu1 %vm2674_vm2, %v10067_v17 }
 0x2d6   : > { %5064 = vmatprep.mubr.f32.mxu1 %v14135_v45 }
 0x332   : > { %v2753_v26 = vpop.f32.mrb[32].mxu0 }
 0x333   : > { %v2754_v56 = vadd.f32 %v2753_v26, %v10383_v24  ;;  %v2755_v4 = vpop.f32.mrb[33].mxu0 }
 0x334   : > { %v2756_v1 = vadd.f32 %v2755_v4, %v10383_v24 }
 0x335   : > { %v3399_v28 = vmul.f32 0.15915494, %v2754_v56 }
 0x336   : > { %v3400_v58 = vmul.f32 0.15915494, %v2756_v1  ;;  %v2759_v63 = vpop.f32.mrb[34].mxu0 }
 0x337   : > { %v3463_v14 = vadd.f32 0.5, %v3399_v28  ;;  %v2760_v48 = vadd.f32 %v2759_v63, %v10387_v8  ;;  %v2761_v11 = vpop.f32.mrb[35].mxu0  ;;  %v10421_v28 = vpop.permute.xlu0 %2666 }
 0x338   : > { %v3464_v7 = vadd.f32 0.5, %v3400_v58  ;;  %v10391_v42 = vadd.f32 %v2761_v11, %v10387_v8 }
 0x339   : > { %v2842_v17 = vpop.f32.mrb[32].mxu1  ;;  %v3527_v22 = vfloor.f32 %v3463_v14  ;;  %v3415_v25 = vmul.f32 0.15915494, %v2760_v48 }
 0x33a   : > { %v2843_v12 = vadd.f32 %v2842_v17, %v10383_v24  ;;  %v2844_v19 = vpop.f32.mrb[33].mxu1  ;;  %v3528_v41 = vfloor.f32 %v3464_v7  ;;  %v3416_v52 = vmul.f32 0.15915494, %v10391_v42  ;;  %v2765_v39 = vpop.f32.mrb[36].mxu0 }
 0x33b   : > { %v2845_v36 = vadd.f32 %v2844_v19, %v10383_v24  ;;  %v3591_v62 = vmul.f32 6.28125, %v3527_v22  ;;  %v3479_v53 = vadd.f32 0.5, %v3415_v25  ;;  %v3719_v5 = vmul.f32 0.0019353072, %v3527_v22  ;;  %v10397_v2 = vpop.f32.mrb[37].mxu0 }
 0x33c   : > { %v3401_v54 = vmul.f32 0.15915494, %v2843_v12  ;;  %v3592_v27 = vmul.f32 6.28125, %v3528_v41  ;;  %v3480_v61 = vadd.f32 0.5, %v3416_v52  ;;  %v3720_v9 = vmul.f32 0.0019353072, %v3528_v41 }
 0x33d   : > { %v3402_v20 = vmul.f32 0.15915494, %v2845_v36  ;;  %v2848_v38 = vpop.f32.mrb[34].mxu1  ;;  %v3655_v23 = vsub.f32 %v2754_v56, %v3591_v62  ;;  %v3543_v34 = vfloor.f32 %v3479_v53 }
 0x33e   : > { %v3465_v30 = vadd.f32 0.5, %v3401_v54  ;;  %v2849_v13 = vadd.f32 %v2848_v38, %v10387_v8  ;;  %v2850_v29 = vpop.f32.mrb[35].mxu1  ;;  %v3656_v31 = vsub.f32 %v2756_v1, %v3592_v27  ;;  %v10399_v35 = vpop.f32.mrb[38].mxu0  ;;  %v3544_v50 = vfloor.f32 %v3480_v61 }
 0x33f   : > { %v3466_v37 = vadd.f32 0.5, %v3402_v20  ;;  %v10401_v59 = vsub.f32 %v3655_v23, %v3719_v5  ;;  %v3607_v6 = vmul.f32 6.28125, %v3543_v34  ;;  %v10403_v10 = vpop.f32.mrb[39].mxu0  ;;  %v3735_v47 = vmul.f32 0.0019353072, %v3543_v34 }
 0x340   : > { %v3529_v51 = vfloor.f32 %v3465_v30  ;;  %v3417_v16 = vmul.f32 0.15915494, %v2849_v13  ;;  %v10409_v40 = vsub.f32 %v3656_v31, %v3720_v9  ;;  %v10414_v49 = vadd.f32 %v2850_v29, %v10387_v8 }
 0x341   : > { %v3530_v33 = vfloor.f32 %v3466_v37  ;;  %v2854_v15 = vpop.f32.mrb[36].mxu1  ;;  %v10407_v32 = vmul.f32 %v10401_v59, %v10401_v59  ;;  %v3671_v0 = vsub.f32 %v2760_v48, %v3607_v6  ;;  %v3608_v4 = vmul.f32 6.28125, %v3544_v50 }
 0x342   : > { %v3593_v46 = vmul.f32 6.28125, %v3529_v51  ;;  %14207 = vst [vmem:[#allocation28_spill] sm:$0xff] %v10409_v40  ;;  %v10411_v21 = vpop.f32.mrb[37].mxu1  ;;  %v3481_v43 = vadd.f32 0.5, %v3417_v16  ;;  %v3721_v18 = vmul.f32 0.0019353072, %v3529_v51  ;;  %v10427_v14 = vmul.f32 %v10409_v40, %v10409_v40 }
 0x343   : > { %v3594_v55 = vmul.f32 6.28125, %v3530_v33  ;;  %v3911_v3 = vmul.f32 -7.6471636e-13, %v10407_v32  ;;  %v10417_v57 = vsub.f32 %v3671_v0, %v3735_v47  ;;  %v3722_v26 = vmul.f32 0.0019353072, %v3530_v33 }
 0x344   : > { %v3657_v60 = vsub.f32 %v2843_v12, %v3593_v46  ;;  %v3545_v56 = vfloor.f32 %v3481_v43  ;;  %14208 = vst [vmem:[#allocation35_spill] sm:$0xff] %v10427_v14  ;;  %v10437_v17 = vmul.f32 %v10407_v32, %v10401_v59  ;;  %v2766_v12 = vadd.f32 %v2765_v39, %v10421_v28 }
 0x345   : > { %v3658_v44 = vsub.f32 %v2845_v36, %v3594_v55  ;;  %v10419_v1 = vpop.f32.mrb[38].mxu1  ;;  %v3975_v58 = vadd.f32 1.6059044e-10, %v3911_v3  ;;  %v10431_v48 = vmul.f32 %v10417_v57, %v10417_v57  ;;  %v3736_v36 = vmul.f32 0.0019353072, %v3544_v50 }
 0x346   : > { %v10423_v63 = vsub.f32 %v3657_v60, %v3721_v18  ;;  %v10433_v11 = vpop.f32.mrb[39].mxu1  ;;  %v3609_v22 = vmul.f32 6.28125, %v3545_v56  ;;  %v3737_v62 = vmul.f32 0.0019353072, %v3545_v56  ;;  %v3672_v54 = vsub.f32 %v10391_v42, %v3608_v4 }
 0x347   : > { %v10439_v7 = vsub.f32 %v3658_v44, %v3722_v26  ;;  %v4039_v19 = vmul.f32 %v3975_v58, %v10407_v32  ;;  %v3927_v41 = vmul.f32 -7.6471636e-13, %v10431_v48  ;;  %v3418_v53 = vmul.f32 0.15915494, %v10414_v49 }
 0x348   : > { %v10445_v25 = vmul.f32 %v10423_v63, %v10423_v63  ;;  %v3673_v52 = vsub.f32 %v2849_v13, %v3609_v22  ;;  %v10453_v39 = vmul.f32 %v10427_v14, %v10409_v40  ;;  %v10461_v23 = vmul.f32 %v10431_v48, %v10417_v57 }
 0x349   : > { %14209 = vst [vmem:[#allocation43_spill] sm:$0xff] %v10439_v7  ;;  %v4103_v5 = vadd.f32 -2.5052108e-08, %v4039_v19  ;;  %v3991_v20 = vadd.f32 1.6059044e-10, %v3927_v41  ;;  %v10457_v38 = vmul.f32 %v10439_v7, %v10439_v7  ;;  %v3482_v42 = vadd.f32 0.5, %v3418_v53 }
 0x34a   : > { %v3913_v27 = vmul.f32 -7.6471636e-13, %v10445_v25  ;;  %14210 = vst [vmem:[#allocation40_spill] sm:$0xff] %v10453_v39  ;;  %v10463_v30 = vsub.f32 %v3673_v52, %v3737_v62  ;;  %v3431_v31 = vmul.f32 0.15915494, %v2766_v12  ;;  %v10471_v61 = vsub.f32 %v3672_v54, %v3736_v36 }
 0x34b   : > { %14211 = vst [vmem:[#allocation48_spill] sm:$0xff] %v10457_v38  ;;  %v4167_v34 = vmul.f32 %v4103_v5, %v10407_v32  ;;  %v4055_v29 = vmul.f32 %v3991_v20, %v10431_v48  ;;  %v3546_v51 = vfloor.f32 %v3482_v42  ;;  %v2855_v9 = vadd.f32 %v2854_v15, %v10421_v28 }
 0x34c   : > { %v3977_v13 = vadd.f32 1.6059044e-10, %v3913_v27  ;;  %v10469_v37 = vmul.f32 %v10463_v30, %v10463_v30  ;;  %14212 = vst [vmem:[#allocation37_spill] sm:$0xff] %v10471_v61  ;;  %v3495_v16 = vadd.f32 0.5, %v3431_v31  ;;  %v10477_v50 = vmul.f32 %v10445_v25, %v10423_v63 }
 0x34d   : > { %v4231_v6 = vadd.f32 2.7557319e-06, %v4167_v34  ;;  %v4119_v47 = vadd.f32 -2.5052108e-08, %v4055_v29  ;;  %v10481_v46 = vmul.f32 %v10457_v38, %v10439_v7  ;;  %v3610_v55 = vmul.f32 6.28125, %v3546_v51 }
 0x34e   : > { %v4041_v33 = vmul.f32 %v3977_v13, %v10445_v25  ;;  %v3929_v0 = vmul.f32 -7.6471636e-13, %v10469_v37  ;;  %v3559_v60 = vfloor.f32 %v3495_v16  ;;  %v10488_v44 = vmul.f32 %v10471_v61, %v10471_v61 }
 0x34f   : > { %14213 = vst [vmem:[#allocation46_spill] sm:$0xff] %v10481_v46  ;;  %v4295_v43 = vmul.f32 %v4231_v6, %v10407_v32  ;;  %v4183_v15 = vmul.f32 %v4119_v47, %v10431_v48  ;;  %v3433_v26 = vmul.f32 0.15915494, %v2855_v9  ;;  %v10492_v56 = vadd.f32 %v10397_v2, %v10421_v28 }
 0x350   : > { %v4105_v3 = vadd.f32 -2.5052108e-08, %v4041_v33  ;;  %v3993_v18 = vadd.f32 1.6059044e-10, %v3929_v0  ;;  %14214 = vst [vmem:[#allocation31_spill] sm:$0xff] %v10488_v44  ;;  %v3623_v19 = vmul.f32 6.28125, %v3559_v60  ;;  %v3674_v36 = vsub.f32 %v10414_v49, %v3610_v55 }
 0x351   : > { %v4359_v4 = vadd.f32 -0.0001984127, %v4295_v43  ;;  %v4247_v22 = vadd.f32 2.7557319e-06, %v4183_v15  ;;  %v3751_v52 = vmul.f32 0.0019353072, %v3559_v60  ;;  %v10506_v33 = vmul.f32 %v10488_v44, %v10471_v61 }
 0x352   : > { %v4169_v58 = vmul.f32 %v4105_v3, %v10445_v25  ;;  %v4057_v41 = vmul.f32 %v3993_v18, %v10469_v37  ;;  %v3497_v62 = vadd.f32 0.5, %v3433_v26  ;;  %v3687_v27 = vsub.f32 %v2766_v12, %v3623_v19 }
 0x353   : > { %v4423_v54 = vmul.f32 %v4359_v4, %v10407_v32  ;;  %v4311_v5 = vmul.f32 %v4247_v22, %v10431_v48  ;;  %v3738_v2 = vmul.f32 0.0019353072, %v3546_v51  ;;  %v3432_v34 = vmul.f32 0.15915494, %v10492_v56  ;;  %14215 = vst [vmem:[#allocation41_spill] sm:$0xff] %v10506_v33 }
 0x354   : > { %v4233_v53 = vadd.f32 2.7557319e-06, %v4169_v58  ;;  %v4121_v20 = vadd.f32 -2.5052108e-08, %v4057_v41  ;;  %v3561_v42 = vfloor.f32 %v3497_v62  ;;  %v10501_v6 = vsub.f32 %v3687_v27, %v3751_v52 }
 0x355   : > { %v4487_v13 = vadd.f32 0.008333334, %v4423_v54  ;;  %v4375_v31 = vadd.f32 -0.0001984127, %v4311_v5  ;;  %v10508_v47 = vsub.f32 %v3674_v36, %v3738_v2  ;;  %v3496_v60 = vadd.f32 0.5, %v3432_v34 }
 0x356   : > { %v4297_v29 = vmul.f32 %v4233_v53, %v10445_v25  ;;  %v4185_v49 = vmul.f32 %v4121_v20, %v10469_v37  ;;  %v3625_v12 = vmul.f32 6.28125, %v3561_v42  ;;  %v10514_v55 = vmul.f32 %v10501_v6, %v10501_v6 }
 0x357   : > { %14216 = vst [vmem:[#allocation44_spill] sm:$0xff] %v10508_v47  ;;  %v4551_v51 = vmul.f32 %v4487_v13, %v10407_v32  ;;  %v4439_v0 = vmul.f32 %v4375_v31, %v10431_v48  ;;  %v3753_v15 = vmul.f32 0.0019353072, %v3561_v42  ;;  %v10521_v32 = vmul.f32 %v10508_v47, %v10508_v47 }
 0x358   : > { %v4361_v16 = vadd.f32 -0.0001984127, %v4297_v29  ;;  %v4249_v43 = vadd.f32 2.7557319e-06, %v4185_v49  ;;  %v3689_v3 = vsub.f32 %v2855_v9, %v3625_v12  ;;  %v3943_v58 = vmul.f32 -7.6471636e-13, %v10514_v55 }
 0x359   : > { %v4615_v18 = vadd.f32 -0.16666667, %v4551_v51  ;;  %v4503_v4 = vadd.f32 0.008333334, %v4439_v0  ;;  %14217 = vst [vmem:[#allocation47_spill] sm:$0xff] %v10521_v32  ;;  %v3560_v41 = vfloor.f32 %v3496_v60  ;;  %v10530_v54 = vadd.f32 %v10411_v21, %v10421_v28  ;;  %v10550_v51 = vpop.permute.xlu1 %2671 }
 0x35a   : > { %v4425_v26 = vmul.f32 %v4361_v16, %v10445_v25  ;;  %v4313_v22 = vmul.f32 %v4249_v43, %v10469_v37  ;;  %v10523_v19 = vsub.f32 %v3689_v3, %v3753_v15  ;;  %v4007_v62 = vadd.f32 1.6059044e-10, %v3943_v58 }
 0x35b   : > { %v10525_v36 = vpop.f32.mrb[40].mxu0  ;;  %v4567_v52 = vmul.f32 %v4503_v4, %v10431_v48  ;;  %v10536_v27 = vmul.f32 %v10469_v37, %v10463_v30  ;;  %v3624_v2 = vmul.f32 6.28125, %v3560_v41  ;;  %v4743_v42 = vmul.f32 %v10437_v17, %v4615_v18 }
 0x35c   : > { %v4489_v9 = vadd.f32 0.008333334, %v4425_v26  ;;  %v10532_v53 = vpop.f32.mrb[41].mxu0  ;;  %v4377_v5 = vadd.f32 -0.0001984127, %v4313_v22  ;;  %v10540_v20 = vmul.f32 %v10523_v19, %v10523_v19  ;;  %v4071_v21 = vmul.f32 %v4007_v62, %v10514_v55 }
 0x35d   : > { %v4631_v34 = vadd.f32 -0.16666667, %v4567_v52  ;;  %v3688_v31 = vsub.f32 %v10492_v56, %v3624_v2  ;;  %v3752_v49 = vmul.f32 0.0019353072, %v3560_v41  ;;  %v10554_v17 = vmul.f32 %v10521_v32, %v10508_v47 }
 0x35e   : > { %v4553_v48 = vmul.f32 %v4489_v9, %v10445_v25  ;;  %v4441_v13 = vmul.f32 %v4377_v5, %v10469_v37  ;;  %v3945_v29 = vmul.f32 -7.6471636e-13, %v10540_v20  ;;  %v4135_v25 = vadd.f32 -2.5052108e-08, %v4071_v21 }
 0x35f   : > { %v10548_v12 = vpop.f32.mrb[42].mxu0  ;;  %14218 = vst [vmem:[#allocation58_spill] sm:$0xff] %v10554_v17  ;;  %v3434_v0 = vmul.f32 0.15915494, %v10530_v54  ;;  %v4759_v43 = vmul.f32 %v10461_v23, %v4631_v34  ;;  %v2772_v56 = vadd.f32 %v10399_v35, %v10550_v51  ;;  %v10567_v4 = vmul.f32 %v10514_v55, %v10501_v6 }
 0x360   : > { %v4617_v16 = vadd.f32 -0.16666667, %v4553_v48  ;;  %v4505_v3 = vadd.f32 0.008333334, %v4441_v13  ;;  %v4009_v15 = vadd.f32 1.6059044e-10, %v3945_v29  ;;  %v4199_v26 = vmul.f32 %v4135_v25, %v10514_v55 }
 0x361   : > { %v10562_v18 = vpop.f32.mrb[43].mxu0  ;;  %v10569_v58 = vsub.f32 %v3688_v31, %v3752_v49  ;;  %v3498_v22 = vadd.f32 0.5, %v3434_v0  ;;  %v10574_v23 = vadd.f32 %v4743_v42, %v10401_v59  ;;  %v3447_v52 = vmul.f32 0.15915494, %v2772_v56 }
 0x362   : > { %v10560_v60 = vpop.f32.mrb[40].mxu1  ;;  %v4569_v35 = vmul.f32 %v4505_v3, %v10469_v37  ;;  %v4073_v9 = vmul.f32 %v4009_v15, %v10540_v20  ;;  %v4263_v5 = vadd.f32 2.7557319e-06, %v4199_v26  ;;  %v10582_v2 = vmul.f32 %v10540_v20, %v10523_v19 }
 0x363   : > { %14219 = vst [vmem:[#allocation49_spill] sm:$0xff] %v10569_v58  ;;  %v10571_v41 = vpop.f32.mrb[41].mxu1  ;;  %14220 = vst [vmem:[#allocation59_spill] sm:$0xff] %v10574_v23  ;;  %v10578_v62 = vpop.f32.mrb[44].mxu0  ;;  %v3562_v48 = vfloor.f32 %v3498_v22  ;;  %v2861_v34 = vadd.f32 %v10419_v1, %v10550_v51  ;;  %v4745_v59 = vmul.f32 %v10477_v50, %v4617_v16  ;;  %v10590_v37 = vadd.f32 %v4759_v43, %v10417_v57 }
 0x364   : > { %v10586_v21 = vpop.f32.mrb[45].mxu0  ;;  %v4137_v42 = vadd.f32 -2.5052108e-08, %v4073_v9  ;;  %v3511_v13 = vadd.f32 0.5, %v3447_v52  ;;  %v4327_v31 = vmul.f32 %v4263_v5, %v10514_v55  ;;  %v10597_v49 = vmul.f32 %v10569_v58, %v10569_v58 }
 0x365   : > { %14221 = vst [vmem:[#allocation52_spill] sm:$0xff] %v10590_v37  ;;  %v3626_v25 = vmul.f32 6.28125, %v3562_v48  ;;  %v3449_v0 = vmul.f32 0.15915494, %v2861_v34  ;;  %v4633_v3 = vadd.f32 -0.16666667, %v4569_v35  ;;  %v10604_v57 = vadd.f32 %v10403_v10, %v10550_v51 }
 0x366   : > { %v10592_v29 = vpop.f32.mrb[42].mxu1  ;;  %14222 = vst [vmem:[#allocation38_spill] sm:$0xff] %v10597_v49  ;;  %v4201_v50 = vmul.f32 %v4137_v42, %v10540_v20  ;;  %v3575_v16 = vfloor.f32 %v3511_v13  ;;  %v4391_v15 = vadd.f32 -0.0001984127, %v4327_v31  ;;  %v10611_v9 = vadd.f32 %v10433_v11, %v10550_v51 }
 0x367   : > { %v10599_v1 = vpop.f32.mrb[43].mxu1  ;;  %v10606_v43 = vpop.f32.mrb[46].mxu0  ;;  %v3690_v26 = vsub.f32 %v10530_v54, %v3626_v25  ;;  %v3513_v22 = vadd.f32 0.5, %v3449_v0  ;;  %v10616_v35 = vadd.f32 %v4745_v59, %v10423_v63  ;;  %v3754_v42 = vmul.f32 0.0019353072, %v3562_v48 }
 0x368   : > { %v10613_v52 = vpop.f32.mrb[47].mxu0  ;;  %v4265_v5 = vadd.f32 2.7557319e-06, %v4201_v50  ;;  %v3639_v13 = vmul.f32 6.28125, %v3575_v16  ;;  %v4455_v45 = vmul.f32 %v4391_v15, %v10514_v55  ;;  %v3767_v31 = vmul.f32 0.0019353072, %v3575_v16 }
 0x369   : > { %14223 = vst [vmem:[#allocation54_spill] sm:$0xff] %v10616_v35  ;;  %v3577_v47 = vfloor.f32 %v3513_v22  ;;  %v3448_v54 = vmul.f32 0.15915494, %v10604_v57  ;;  %v3450_v7 = vmul.f32 0.15915494, %v10611_v9  ;;  %v10628_v63 = vadd.f32 %v10525_v36, %v10383_v24 }
 0x36a   : > { %v10618_v10 = vpop.f32.mrb[44].mxu1  ;;  %v4329_v11 = vmul.f32 %v4265_v5, %v10540_v20  ;;  %v3703_v0 = vsub.f32 %v2772_v56, %v3639_v13  ;;  %v4761_v48 = vmul.f32 %v10536_v27, %v4633_v3  ;;  %v4519_v59 = vadd.f32 0.008333334, %v4455_v45 }
 0x36b   : > { %v10622_v25 = vpop.f32.mrb[45].mxu1  ;;  %v10631_v50 = vsub.f32 %v3690_v26, %v3754_v42  ;;  %v3641_v16 = vmul.f32 6.28125, %v3577_v47  ;;  %v3512_v35 = vadd.f32 0.5, %v3448_v54  ;;  %v3514_v17 = vadd.f32 0.5, %v3450_v7 }
 0x36c   : > { %v4393_v15 = vadd.f32 -0.0001984127, %v4329_v11  ;;  %v10633_v22 = vsub.f32 %v3703_v0, %v3767_v31  ;;  %v4583_v56 = vmul.f32 %v4519_v59, %v10514_v55  ;;  %v3769_v13 = vmul.f32 0.0019353072, %v3577_v47 }
 0x36d   : > { %14224 = vst [vmem:[#allocation45_spill] sm:$0xff] %v10631_v50  ;;  %v3705_v5 = vsub.f32 %v2861_v34, %v3641_v16  ;;  %v3403_v36 = vmul.f32 0.15915494, %v10628_v63  ;;  %v3576_v3 = vfloor.f32 %v3512_v35  ;;  %v3578_v26 = vfloor.f32 %v3514_v17 }
 0x36e   : > { %v10635_v46 = vpop.f32.mrb[46].mxu1  ;;  %v4457_v45 = vmul.f32 %v4393_v15, %v10540_v20  ;;  %v10644_v27 = vmul.f32 %v10633_v22, %v10633_v22  ;;  %v4647_v42 = vadd.f32 -0.16666667, %v4583_v56  ;;  %v10648_v7 = vmul.f32 %v10597_v49, %v10569_v58 }
 0x36f   : > { %v10639_v37 = vpop.f32.mrb[47].mxu1  ;;  %v10652_v47 = vmul.f32 %v10631_v50, %v10631_v50  ;;  %v10654_v55 = vsub.f32 %v3705_v5, %v3769_v13  ;;  %v3640_v54 = vmul.f32 6.28125, %v3576_v3  ;;  %v3467_v11 = vadd.f32 0.5, %v3403_v36 }
 0x370   : > { %14225 = vst [vmem:[#allocation61_spill] sm:$0xff] %v10648_v7  ;;  %v4521_v34 = vadd.f32 0.008333334, %v4457_v45  ;;  %v3959_v31 = vmul.f32 -7.6471636e-13, %v10644_v27  ;;  %v10658_v0 = vadd.f32 %v4761_v48, %v10463_v30  ;;  %v3642_v35 = vmul.f32 6.28125, %v3578_v26 }
 0x371   : > { %14226 = vst [vmem:[#allocation55_spill] sm:$0xff] %v10652_v47  ;;  %v10662_v17 = vmul.f32 %v10654_v55, %v10654_v55  ;;  %v3021_v59 = vadd.f32 %v10560_v60, %v10383_v24  ;;  %v4775_v16 = vmul.f32 %v10567_v4, %v4647_v42  ;;  %v3704_v5 = vsub.f32 %v10604_v57, %v3640_v54 }
 0x372   : > { %14227 = vst [vmem:[#allocation65_spill] sm:$0xff] %v10658_v0  ;;  %v4585_v15 = vmul.f32 %v4521_v34, %v10540_v20  ;;  %v4023_v56 = vadd.f32 1.6059044e-10, %v3959_v31  ;;  %v10671_v13 = vmul.f32 %v10652_v47, %v10631_v50  ;;  %v3768_v48 = vmul.f32 0.0019353072, %v3576_v3 }
 0x373   : > { %v3961_v30 = vmul.f32 -7.6471636e-13, %v10662_v17  ;;  %v3706_v36 = vsub.f32 %v10611_v9, %v3642_v35  ;;  %v3770_v60 = vmul.f32 0.0019353072, %v3578_v26  ;;  %v3531_v7 = vfloor.f32 %v3467_v11 }
 0x374   : > { %14228 = vst [vmem:[#allocation62_spill] sm:$0xff] %v10671_v13  ;;  %v4649_v45 = vadd.f32 -0.16666667, %v4585_v15  ;;  %v4087_v58 = vmul.f32 %v4023_v56, %v10644_v27  ;;  %v10676_v42 = vsub.f32 %v3704_v5, %v3768_v48  ;;  %v3405_v20 = vmul.f32 0.15915494, %v3021_v59 }
 0x375   : > { %v4025_v4 = vadd.f32 1.6059044e-10, %v3961_v30  ;;  %v10680_v57 = vadd.f32 %v10532_v53, %v10383_v24  ;;  %v10683_v34 = vadd.f32 %v4775_v16, %v10501_v6  ;;  %v10687_v9 = vmul.f32 %v10644_v27, %v10633_v22 }
 0x376   : > { %14229 = vst [vmem:[#allocation70_spill] sm:$0xff] %v10676_v42  ;;  %v4151_v31 = vadd.f32 -2.5052108e-08, %v4087_v58  ;;  %v3595_v3 = vmul.f32 6.28125, %v3531_v7  ;;  %v10692_v54 = vmul.f32 %v10662_v17, %v10654_v55  ;;  %v10694_v11 = vsub.f32 %v3706_v36, %v3770_v60 }
 0x377   : > { %14230 = vst [vmem:[#allocation66_spill] sm:$0xff] %v10683_v34  ;;  %v4089_v26 = vmul.f32 %v4025_v4, %v10662_v17  ;;  %v3469_v35 = vadd.f32 0.5, %v3405_v20  ;;  %v4777_v53 = vmul.f32 %v10582_v2, %v4649_v45  ;;  %v3723_v16 = vmul.f32 0.0019353072, %v3531_v7 }
 0x378   : > { %14231 = vst [vmem:[#allocation26_spill] sm:$0xff] %v10694_v11  ;;  %v4215_v6 = vmul.f32 %v4151_v31, %v10644_v27  ;;  %v3659_v58 = vsub.f32 %v10628_v63, %v3595_v3  ;;  %v10703_v5 = vmul.f32 %v10676_v42, %v10676_v42  ;;  %v3404_v48 = vmul.f32 0.15915494, %v10680_v57 }
 0x379   : > { %v10699_v15 = vpop.f32.mrb[48].mxu0  ;;  %v4153_v56 = vadd.f32 -2.5052108e-08, %v4089_v26  ;;  %v3533_v30 = vfloor.f32 %v3469_v35  ;;  %v10712_v2 = vadd.f32 %v10571_v41, %v10383_v24  ;;  %v10716_v63 = vadd.f32 %v10548_v12, %v10387_v8 }
 0x37a   : > { %14232 = vst [vmem:[#allocation69_spill] sm:$0xff] %v10703_v5  ;;  %v10706_v36 = vpop.f32.mrb[49].mxu0  ;;  %v4279_v60 = vadd.f32 2.7557319e-06, %v4215_v6  ;;  %v10708_v4 = vsub.f32 %v3659_v58, %v3723_v16  ;;  %v3468_v31 = vadd.f32 0.5, %v3404_v48  ;;  %v10740_v13 = vmul.f32 %v10694_v11, %v10694_v11 }
 0x37b   : > { %v4217_v7 = vmul.f32 %v4153_v56, %v10662_v17  ;;  %v3597_v45 = vmul.f32 6.28125, %v3533_v30  ;;  %v3725_v20 = vmul.f32 0.0019353072, %v3533_v30  ;;  %v3406_v35 = vmul.f32 0.15915494, %v10712_v2 }
 0x37c   : > { %v4343_v3 = vmul.f32 %v4279_v60, %v10644_v27  ;;  %v10722_v26 = vmul.f32 %v10708_v4, %v10708_v4  ;;  %v3419_v41 = vmul.f32 0.15915494, %v10716_v63  ;;  %v3532_v56 = vfloor.f32 %v3468_v31  ;;  %14233 = vst [vmem:[#allocation74_spill] sm:$0xff] %v10740_v13 }
 0x37d   : > { %v10728_v58 = vpop.f32.mrb[50].mxu0  ;;  %v4281_v12 = vadd.f32 2.7557319e-06, %v4217_v7  ;;  %v3661_v16 = vsub.f32 %v3021_v59, %v3597_v45  ;;  %v10732_v30 = vadd.f32 %v10592_v29, %v10387_v8  ;;  %v3470_v47 = vadd.f32 0.5, %v3406_v35 }
 0x37e   : > { %v10726_v6 = vpop.f32.mrb[48].mxu1  ;;  %v10736_v60 = vpop.f32.mrb[51].mxu0  ;;  %v4407_v50 = vadd.f32 -0.0001984127, %v4343_v3  ;;  %v3915_v34 = vmul.f32 -7.6471636e-13, %v10722_v26 }
 0x37f   : > { %v10734_v48 = vpop.f32.mrb[49].mxu1  ;;  %v4345_v7 = vmul.f32 %v4281_v12, %v10662_v17  ;;  %v10744_v59 = vsub.f32 %v3661_v16, %v3725_v20  ;;  %v3596_v45 = vmul.f32 6.28125, %v3532_v56  ;;  %v3724_v31 = vmul.f32 0.0019353072, %v3532_v56 }
 0x380   : > { %v4471_v29 = vmul.f32 %v4407_v50, %v10644_v27  ;;  %v3979_v49 = vadd.f32 1.6059044e-10, %v3915_v34  ;;  %v3534_v0 = vfloor.f32 %v3470_v47  ;;  %v3483_v23 = vadd.f32 0.5, %v3419_v41 }
 0x381   : > { %v10749_v3 = vpop.f32.mrb[52].mxu0  ;;  %v4409_v40 = vadd.f32 -0.0001984127, %v4345_v7  ;;  %v10753_v33 = vmul.f32 %v10744_v59, %v10744_v59  ;;  %v3660_v35 = vsub.f32 %v10680_v57, %v3596_v45  ;;  %v3421_v20 = vmul.f32 0.15915494, %v10732_v30 }
 0x382   : > { %v10747_v61 = vpop.f32.mrb[50].mxu1  ;;  %v10759_v16 = vpop.f32.mrb[53].mxu0  ;;  %v10762_v50 = vadd.f32 %v4777_v53, %v10523_v19  ;;  %v4535_v47 = vadd.f32 0.008333334, %v4471_v29  ;;  %v4043_v34 = vmul.f32 %v3979_v49, %v10722_v26  ;;  %v3598_v41 = vmul.f32 6.28125, %v3534_v0 }
 0x383   : > { %v10757_v12 = vpop.f32.mrb[51].mxu1  ;;  %v4473_v56 = vmul.f32 %v4409_v40, %v10662_v17  ;;  %v3917_v7 = vmul.f32 -7.6471636e-13, %v10753_v33  ;;  %v10767_v39 = vsub.f32 %v3660_v35, %v3724_v31  ;;  %v3726_v57 = vmul.f32 0.0019353072, %v3534_v0 }
 0x384   : > { %14234 = vst [vmem:[#allocation25_spill] sm:$0xff] %v10762_v50  ;;  %v4599_v45 = vmul.f32 %v4535_v47, %v10644_v27  ;;  %v4107_v32 = vadd.f32 -2.5052108e-08, %v4043_v34  ;;  %v3662_v38 = vsub.f32 %v10712_v2, %v3598_v41  ;;  %v3547_v44 = vfloor.f32 %v3483_v23 }
 0x385   : > { %14235 = vst [vmem:[#allocation56_spill] sm:$0xff] %v10767_v39  ;;  %v10773_v19 = vpop.f32.mrb[54].mxu0  ;;  %v4537_v53 = vadd.f32 0.008333334, %v4473_v56  ;;  %v10777_v49 = vmul.f32 %v10703_v5, %v10676_v42  ;;  %v3981_v40 = vadd.f32 1.6059044e-10, %v3917_v7  ;;  %v10783_v27 = vmul.f32 %v10740_v13, %v10694_v11 }
 0x386   : > { %v10771_v14 = vpop.f32.mrb[52].mxu1  ;;  %v3485_v29 = vadd.f32 0.5, %v3421_v20  ;;  %v4171_v0 = vmul.f32 %v4107_v32, %v10722_v26  ;;  %v10788_v23 = vmul.f32 %v10767_v39, %v10767_v39  ;;  %v3611_v2 = vmul.f32 6.28125, %v3547_v44  ;;  %v10790_v35 = vpop.f32.mrb[55].mxu0 }
 0x387   : > { %14236 = vst [vmem:[#allocation63_spill] sm:$0xff] %v10777_v49  ;;  %v10779_v31 = vpop.f32.mrb[53].mxu1  ;;  %14237 = vst [vmem:[#allocation51_spill] sm:$0xff] %v10783_v27  ;;  %v4663_v47 = vadd.f32 -0.16666667, %v4599_v45  ;;  %v4601_v34 = vmul.f32 %v4537_v53, %v10662_v17  ;;  %v4045_v20 = vmul.f32 %v3981_v40, %v10753_v33  ;;  %v10794_v41 = vsub.f32 %v3662_v38, %v3726_v57 }
 0x388   : > { %14238 = vst [vmem:[#allocation57_spill] sm:$0xff] %v10788_v23  ;;  %v4235_v56 = vadd.f32 2.7557319e-06, %v4171_v0  ;;  %v4683_v7 = vmul.f32 %v10722_v26, %v10708_v4  ;;  %v3675_v32 = vsub.f32 %v10716_v63, %v3611_v2  ;;  %v3739_v11 = vmul.f32 0.0019353072, %v3547_v44 }
 0x389   : > { %14239 = vst [vmem:[#allocation67_spill] sm:$0xff] %v10794_v41  ;;  %v4109_v50 = vadd.f32 -2.5052108e-08, %v4045_v20  ;;  %v10803_v42 = vmul.f32 %v10753_v33, %v10744_v59  ;;  %v3549_v45 = vfloor.f32 %v3485_v29  ;;  %v10807_v17 = vadd.f32 %v10562_v18, %v10387_v8 }
 0x38a   : > { %v10799_v27 = vpop.f32.mrb[54].mxu1  ;;  %v4665_v57 = vadd.f32 -0.16666667, %v4601_v34  ;;  %v4299_v53 = vmul.f32 %v4235_v56, %v10722_v26  ;;  %v10814_v44 = vmul.f32 %v10788_v23, %v10767_v39  ;;  %v10816_v63 = vsub.f32 %v3675_v32, %v3739_v11 }
 0x38b   : > { %v10809_v38 = vpop.f32.mrb[55].mxu1  ;;  %v4791_v40 = vmul.f32 %v10687_v9, %v4663_v47  ;;  %v4173_v0 = vmul.f32 %v4109_v50, %v10753_v33  ;;  %v10822_v29 = vmul.f32 %v10794_v41, %v10794_v41  ;;  %v3613_v18 = vmul.f32 6.28125, %v3549_v45 }
 0x38c   : > { %14240 = vst [vmem:[#allocation60_spill] sm:$0xff] %v10814_v44  ;;  %v4363_v2 = vadd.f32 -0.0001984127, %v4299_v53  ;;  %v10826_v34 = vmul.f32 %v10816_v63, %v10816_v63  ;;  %v3420_v20 = vmul.f32 0.15915494, %v10807_v17  ;;  %v10831_v11 = vadd.f32 %v10599_v1, %v10387_v8 }
 0x38d   : > { %14241 = vst [vmem:[#allocation53_spill] sm:$0xff] %v10822_v29  ;;  %v4237_v56 = vadd.f32 2.7557319e-06, %v4173_v0  ;;  %v3677_v9 = vsub.f32 %v10732_v30, %v3613_v18  ;;  %v3741_v50 = vmul.f32 0.0019353072, %v3549_v45  ;;  %v2944_v47 = vadd.f32 %v10578_v62, %v10421_v28 }
 0x38e   : > { %v4793_v32 = vmul.f32 %v10692_v54, %v4665_v57  ;;  %v4427_v53 = vmul.f32 %v4363_v2, %v10722_v26  ;;  %v3931_v39 = vmul.f32 -7.6471636e-13, %v10826_v34  ;;  %v3484_v44 = vadd.f32 0.5, %v3420_v20 }
 0x38f   : > { %v4301_v23 = vmul.f32 %v4237_v56, %v10753_v33  ;;  %v10840_v49 = vsub.f32 %v3677_v9, %v3741_v50  ;;  %v3422_v1 = vmul.f32 0.15915494, %v10831_v11  ;;  %v3435_v0 = vmul.f32 0.15915494, %v2944_v47 }
 0x390   : > { %v10844_v30 = vadd.f32 %v4791_v40, %v10633_v22  ;;  %v4491_v45 = vadd.f32 0.008333334, %v4427_v53  ;;  %v3995_v18 = vadd.f32 1.6059044e-10, %v3931_v39  ;;  %v3548_v62 = vfloor.f32 %v3484_v44 }
 0x391   : > { %v4365_v13 = vadd.f32 -0.0001984127, %v4301_v23  ;;  %v10848_v54 = vmul.f32 %v10840_v49, %v10840_v49  ;;  %v3486_v57 = vadd.f32 0.5, %v3422_v1  ;;  %v3499_v2 = vadd.f32 0.5, %v3435_v0 }
 0x392   : > { %14242 = vst [vmem:[#allocation64_spill] sm:$0xff] %v10844_v30  ;;  %v4555_v20 = vmul.f32 %v4491_v45, %v10722_v26  ;;  %v10853_v56 = vmul.f32 %v10822_v29, %v10794_v41  ;;  %v4059_v9 = vmul.f32 %v3995_v18, %v10826_v34  ;;  %v3612_v22 = vmul.f32 6.28125, %v3548_v62 }
 0x393   : > { %v10857_v40 = vadd.f32 %v4793_v32, %v10654_v55  ;;  %v4429_v39 = vmul.f32 %v4365_v13, %v10753_v33  ;;  %v3933_v23 = vmul.f32 -7.6471636e-13, %v10848_v54  ;;  %v3550_v44 = vfloor.f32 %v3486_v57 }
 0x394   : > { %14243 = vst [vmem:[#allocation75_spill] sm:$0xff] %v10853_v56  ;;  %v4619_v50 = vadd.f32 -0.16666667, %v4555_v20  ;;  %v4123_v53 = vadd.f32 -2.5052108e-08, %v4059_v9  ;;  %v3676_v1 = vsub.f32 %v10807_v17, %v3612_v22  ;;  %v3563_v26 = vfloor.f32 %v3499_v2 }
 0x395   : > { %14244 = vst [vmem:[#allocation29_spill] sm:$0xff] %v10857_v40  ;;  %v4493_v0 = vadd.f32 0.008333334, %v4429_v39  ;;  %v3997_v45 = vadd.f32 1.6059044e-10, %v3933_v23  ;;  %v3614_v41 = vmul.f32 6.28125, %v3550_v44  ;;  %v10864_v18 = vadd.f32 %v10618_v10, %v10421_v28 }
 0x396   : > { %v4747_v56 = vmul.f32 %v4683_v7, %v4619_v50  ;;  %v4187_v55 = vmul.f32 %v4123_v53, %v10826_v34  ;;  %v3740_v32 = vmul.f32 0.0019353072, %v3548_v62  ;;  %v2946_v13 = vadd.f32 %v10586_v21, %v10421_v28 }
 0x397   : > { %v4557_v20 = vmul.f32 %v4493_v0, %v10753_v33  ;;  %v4061_v17 = vmul.f32 %v3997_v45, %v10848_v54  ;;  %v3678_v2 = vsub.f32 %v10831_v11, %v3614_v41  ;;  %v3627_v9 = vmul.f32 6.28125, %v3563_v26 }
 0x398   : > { %v10869_v57 = vpop.f32.mrb[56].mxu0  ;;  %v4251_v10 = vadd.f32 2.7557319e-06, %v4187_v55  ;;  %v4699_v7 = vmul.f32 %v10826_v34, %v10816_v63  ;;  %v10878_v39 = vsub.f32 %v3676_v1, %v3740_v32  ;;  %v3742_v62 = vmul.f32 0.0019353072, %v3550_v44 }
 0x399   : > { %v10874_v22 = vpop.f32.mrb[57].mxu0  ;;  %v4621_v23 = vadd.f32 -0.16666667, %v4557_v20  ;;  %v4125_v21 = vadd.f32 -2.5052108e-08, %v4061_v17  ;;  %v3691_v50 = vsub.f32 %v2944_v47, %v3627_v9  ;;  %v10883_v0 = vmul.f32 %v10848_v54, %v10840_v49 }
 0x39a   : > { %14245 = vst [vmem:[#allocation71_spill] sm:$0xff] %v10874_v22  ;;  %14246 = vst [vmem:[#allocation76_spill] sm:$0xff] %v10878_v39  ;;  %v3755_v53 = vmul.f32 0.0019353072, %v3563_v26  ;;  %v4315_v33 = vmul.f32 %v4251_v10, %v10826_v34  ;;  %v3437_v41 = vmul.f32 0.15915494, %v10864_v18  ;;  %v10891_v1 = vadd.f32 %v4747_v56, %v10708_v4 }
 0x39b   : > { %v3436_v11 = vmul.f32 0.15915494, %v2946_v13  ;;  %v4189_v44 = vmul.f32 %v4125_v21, %v10848_v54  ;;  %v10894_v47 = vsub.f32 %v3678_v2, %v3742_v62  ;;  %v10902_v10 = vadd.f32 %v10622_v25, %v10421_v28 }
 0x39c   : > { %v10886_v45 = vpop.f32.mrb[56].mxu1  ;;  %v10888_v55 = vpop.f32.mrb[58].mxu0  ;;  %14249 = vst [vmem:[#allocation72_spill] sm:$0xff] %v10891_v1  ;;  %v10896_v26 = vsub.f32 %v3691_v50, %v3755_v53  ;;  %v4379_v20 = vadd.f32 -0.0001984127, %v4315_v33  ;;  %v3501_v17 = vadd.f32 0.5, %v3437_v41  ;;  %v4749_v29 = vmul.f32 %v10803_v42, %v4621_v23 }
 0x39d   : > { %14247 = vst [vmem:[#allocation68_spill] sm:$0xff] %v10886_v45  ;;  %14248 = vst [vmem:[#allocation73_spill] sm:$0xff] %v10888_v55  ;;  %v10898_v32 = vpop.f32.mrb[57].mxu1  ;;  %v3500_v9 = vadd.f32 0.5, %v3436_v11  ;;  %v4253_v40 = vadd.f32 2.7557319e-06, %v4189_v44  ;;  %v10907_v4 = vmul.f32 %v10878_v39, %v10878_v39  ;;  %v10920_v42 = vmul.f32 %v10894_v47, %v10894_v47 }
 0x39e   : > { %14250 = vst [vmem:[#allocation80_spill] sm:$0xff] %v10894_v47  ;;  %14251 = vst [vmem:[#allocation23_spill] sm:$0xff] %v10898_v32  ;;  %v10911_v56 = vmul.f32 %v10896_v26, %v10896_v26  ;;  %v4443_v2 = vmul.f32 %v4379_v20, %v10826_v34  ;;  %v3565_v62 = vfloor.f32 %v3501_v17  ;;  %v3438_v50 = vmul.f32 0.15915494, %v10902_v10 }
 0x39f   : > { %v3564_v21 = vfloor.f32 %v3500_v9  ;;  %v4317_v25 = vmul.f32 %v4253_v40, %v10848_v54  ;;  %v2950_v33 = vadd.f32 %v10606_v43, %v10550_v51  ;;  %v3039_v30 = vadd.f32 %v10635_v46, %v10550_v51 }
 0x3a0   : > { %v10915_v53 = vpop.f32.mrb[58].mxu1  ;;  %v3947_v23 = vmul.f32 -7.6471636e-13, %v10911_v56  ;;  %v4507_v41 = vadd.f32 0.008333334, %v4443_v2  ;;  %v3629_v11 = vmul.f32 6.28125, %v3565_v62  ;;  %v10937_v46 = vmul.f32 %v10907_v4, %v10878_v39 }
 0x3a1   : > { %14252 = vst [vmem:[#allocation77_spill] sm:$0xff] %v10915_v53  ;;  %v3757_v44 = vmul.f32 0.0019353072, %v3565_v62  ;;  %v3628_v20 = vmul.f32 6.28125, %v3564_v21  ;;  %v4381_v17 = vadd.f32 -0.0001984127, %v4317_v25 }
 0x3a2   : > { %v4011_v9 = vadd.f32 1.6059044e-10, %v3947_v23  ;;  %v3756_v1 = vmul.f32 0.0019353072, %v3564_v21  ;;  %v4571_v40 = vmul.f32 %v4507_v41, %v10826_v34  ;;  %v3693_v5 = vsub.f32 %v10864_v18, %v3629_v11  ;;  %14254 = vst [vmem:[#allocation85_spill] sm:$0xff] %v10937_v46 }
 0x3a3   : > { %v3692_v53 = vsub.f32 %v2946_v13, %v3628_v20  ;;  %v3502_v55 = vadd.f32 0.5, %v3438_v50  ;;  %v4445_v32 = vmul.f32 %v4381_v17, %v10848_v54  ;;  %v3451_v2 = vmul.f32 0.15915494, %v2950_v33 }
 0x3a4   : > { %v4075_v43 = vmul.f32 %v4011_v9, %v10911_v56  ;;  %v3453_v22 = vmul.f32 0.15915494, %v3039_v30  ;;  %v4635_v62 = vadd.f32 -0.16666667, %v4571_v40  ;;  %v10931_v45 = vsub.f32 %v3693_v5, %v3757_v44 }
 0x3a5   : > { %v10933_v25 = vsub.f32 %v3692_v53, %v3756_v1  ;;  %v3566_v21 = vfloor.f32 %v3502_v55  ;;  %v4509_v23 = vadd.f32 0.008333334, %v4445_v32  ;;  %v3515_v18 = vadd.f32 0.5, %v3451_v2 }
 0x3a6   : > { %v4139_v34 = vadd.f32 -2.5052108e-08, %v4075_v43  ;;  %v4763_v13 = vmul.f32 %v4699_v7, %v4635_v62  ;;  %v10941_v50 = vmul.f32 %v10931_v45, %v10931_v45  ;;  %v3517_v11 = vadd.f32 0.5, %v3453_v22 }
 0x3a7   : > { %14253 = vst [vmem:[#allocation81_spill] sm:$0xff] %v10933_v25  ;;  %v3630_v41 = vmul.f32 6.28125, %v3566_v21  ;;  %v10944_v5 = vadd.f32 %v4749_v29, %v10744_v59  ;;  %v10948_v55 = vmul.f32 %v10920_v42, %v10894_v47  ;;  %v3579_v32 = vfloor.f32 %v3515_v18 }
 0x3a8   : > { %v4203_v1 = vmul.f32 %v4139_v34, %v10911_v56  ;;  %v4573_v53 = vmul.f32 %v4509_v23, %v10848_v54  ;;  %v10954_v7 = vmul.f32 %v10911_v56, %v10896_v26  ;;  %v3949_v44 = vmul.f32 -7.6471636e-13, %v10941_v50 }
 0x3a9   : > { %14255 = vst [vmem:[#allocation78_spill] sm:$0xff] %v10944_v5  ;;  %14256 = vst [vmem:[#allocation82_spill] sm:$0xff] %v10948_v55  ;;  %v10959_v22 = vmul.f32 %v10933_v25, %v10933_v25  ;;  %v3694_v29 = vsub.f32 %v10902_v10, %v3630_v41  ;;  %v3758_v20 = vmul.f32 0.0019353072, %v3566_v21  ;;  %v3643_v17 = vmul.f32 6.28125, %v3579_v32 }
 0x3aa   : > { %v4267_v59 = vadd.f32 2.7557319e-06, %v4203_v1  ;;  %v10963_v9 = vadd.f32 %v4763_v13, %v10816_v63  ;;  %v4013_v40 = vadd.f32 1.6059044e-10, %v3949_v44  ;;  %v3581_v54 = vfloor.f32 %v3517_v11 }
 0x3ab   : > { %14257 = vst [vmem:[#allocation83_spill] sm:$0xff] %v10959_v22  ;;  %v2952_v43 = vadd.f32 %v10613_v52, %v10550_v51  ;;  %v10970_v62 = vmul.f32 %v10941_v50, %v10931_v45  ;;  %v3707_v23 = vsub.f32 %v2950_v33, %v3643_v17  ;;  %v3771_v34 = vmul.f32 0.0019353072, %v3579_v32 }
 0x3ac   : > { %v4331_v2 = vmul.f32 %v4267_v59, %v10911_v56  ;;  %v4637_v18 = vadd.f32 -0.16666667, %v4573_v53  ;;  %v4077_v10 = vmul.f32 %v4013_v40, %v10941_v50  ;;  %v3645_v21 = vmul.f32 6.28125, %v3581_v54 }
 0x3ad   : > { %v3452_v41 = vmul.f32 0.15915494, %v2952_v43  ;;  %v10973_v13 = vsub.f32 %v3694_v29, %v3758_v20  ;;  %v10975_v11 = vsub.f32 %v3707_v23, %v3771_v34  ;;  %v3773_v1 = vmul.f32 0.0019353072, %v3581_v54 }
 0x3ae   : > { %v4395_v63 = vadd.f32 -0.0001984127, %v4331_v2  ;;  %v4141_v52 = vadd.f32 -2.5052108e-08, %v4077_v10  ;;  %v3709_v44 = vsub.f32 %v3039_v30, %v3645_v21  ;;  %v3041_v47 = vadd.f32 %v10639_v37, %v10550_v51 }
 0x3af   : > { %14258 = vst [vmem:[#allocation86_spill] sm:$0xff] %v10973_v13  ;;  %v3516_v59 = vadd.f32 0.5, %v3452_v41  ;;  %v10982_v32 = vmul.f32 %v10959_v22, %v10933_v25  ;;  %v10986_v53 = vmul.f32 %v10975_v11, %v10975_v11  ;;  %v3110_v29 = vadd.f32 %v10699_v15, %v10383_v24 }
 0x3b0   : > { %v4459_v33 = vmul.f32 %v4395_v63, %v10911_v56  ;;  %v4205_v20 = vmul.f32 %v4141_v52, %v10941_v50  ;;  %v10991_v30 = vsub.f32 %v3709_v44, %v3773_v1  ;;  %v3454_v40 = vmul.f32 0.15915494, %v3041_v47 }
 0x3b1   : > { %14259 = vst [vmem:[#allocation79_spill] sm:$0xff] %v10982_v32  ;;  %v3580_v17 = vfloor.f32 %v3516_v59  ;;  %v4765_v37 = vmul.f32 %v10883_v0, %v4637_v18  ;;  %v3963_v2 = vmul.f32 -7.6471636e-13, %v10986_v53  ;;  %v3407_v23 = vmul.f32 0.15915494, %v3110_v29 }
 0x3b2   : > { %v4523_v54 = vadd.f32 0.008333334, %v4459_v33  ;;  %v4269_v34 = vadd.f32 2.7557319e-06, %v4205_v20  ;;  %v10997_v10 = vmul.f32 %v10973_v13, %v10973_v13  ;;  %v11001_v15 = vmul.f32 %v10991_v30, %v10991_v30 }
 0x3b3   : > { %v3644_v21 = vmul.f32 6.28125, %v3580_v17  ;;  %v4027_v63 = vadd.f32 1.6059044e-10, %v3963_v2  ;;  %v3518_v1 = vadd.f32 0.5, %v3454_v40  ;;  %v3471_v52 = vadd.f32 0.5, %v3407_v23  ;;  %v11016_v2 = vpop.f32.mrb[59].mxu1 }
 0x3b4   : > { %14260 = vst [vmem:[#allocation92_spill] sm:$0xff] %v10997_v10  ;;  %v4587_v41 = vmul.f32 %v4523_v54, %v10911_v56  ;;  %v4333_v0 = vmul.f32 %v4269_v34, %v10941_v50  ;;  %v3965_v18 = vmul.f32 -7.6471636e-13, %v11001_v15  ;;  %v3772_v59 = vmul.f32 0.0019353072, %v3580_v17  ;;  %v11014_v54 = vpop.f32.mrb[59].mxu0 }
 0x3b5   : > { %v3708_v44 = vsub.f32 %v2952_v43, %v3644_v21  ;;  %v4091_v20 = vmul.f32 %v4027_v63, %v10986_v53  ;;  %v3582_v25 = vfloor.f32 %v3518_v1  ;;  %v3535_v32 = vfloor.f32 %v3471_v52 }
 0x3b6   : > { %v4651_v33 = vadd.f32 -0.16666667, %v4587_v41  ;;  %v11008_v39 = vadd.f32 %v4765_v37, %v10840_v49  ;;  %v4397_v55 = vadd.f32 -0.0001984127, %v4333_v0  ;;  %v11012_v56 = vmul.f32 %v10997_v10, %v10973_v13  ;;  %v11024_v37 = vpop.f32.mrb[60].mxu0 }
 0x3b7   : > { %v4029_v40 = vadd.f32 1.6059044e-10, %v3965_v18  ;;  %v4155_v43 = vadd.f32 -2.5052108e-08, %v4091_v20  ;;  %v11020_v17 = vmul.f32 %v10986_v53, %v10975_v11  ;;  %v3646_v23 = vmul.f32 6.28125, %v3582_v25 }
 0x3b8   : > { %14261 = vst [vmem:[#allocation98_spill] sm:$0xff] %v11008_v39  ;;  %14262 = vst [vmem:[#allocation84_spill] sm:$0xff] %v11012_v56  ;;  %v3199_v49 = vadd.f32 %v10726_v6, %v10383_v24  ;;  %v4461_v34 = vmul.f32 %v4397_v55, %v10941_v50  ;;  %v11028_v41 = vsub.f32 %v3708_v44, %v3772_v59  ;;  %v3599_v63 = vmul.f32 6.28125, %v3535_v32 }
 0x3b9   : > { %v4093_v21 = vmul.f32 %v4029_v40, %v11001_v15  ;;  %v4779_v1 = vmul.f32 %v10954_v7, %v4651_v33  ;;  %v4219_v52 = vmul.f32 %v4155_v43, %v10986_v53  ;;  %v3710_v0 = vsub.f32 %v3041_v47, %v3646_v23  ;;  %v11049_v40 = vpop.f32.mrb[60].mxu1  ;;  %v11064_v23 = vpop.f32.mrb[61].mxu0 }
 0x3ba   : > { %14263 = vst [vmem:[#allocation94_spill] sm:$0xff] %v11028_v41  ;;  %v3774_v18 = vmul.f32 0.0019353072, %v3582_v25  ;;  %v4525_v20 = vadd.f32 0.008333334, %v4461_v34  ;;  %v3663_v56 = vsub.f32 %v3110_v29, %v3599_v63  ;;  %v3112_v55 = vadd.f32 %v10706_v36, %v10383_v24  ;;  %v11066_v34 = vpop.f32.mrb[61].mxu1 }
 0x3bb   : > { %v4157_v13 = vadd.f32 -2.5052108e-08, %v4093_v21  ;;  %v3727_v46 = vmul.f32 0.0019353072, %v3535_v32  ;;  %v4283_v6 = vadd.f32 2.7557319e-06, %v4219_v52  ;;  %v11039_v7 = vmul.f32 %v11028_v41, %v11028_v41 }
 0x3bc   : > { %v11032_v10 = vsub.f32 %v3710_v0, %v3774_v18  ;;  %v3409_v39 = vmul.f32 0.15915494, %v3199_v49  ;;  %v11045_v47 = vadd.f32 %v10734_v48, %v10383_v24  ;;  %v4589_v25 = vmul.f32 %v4525_v20, %v10941_v50 }
 0x3bd   : > { %v4221_v44 = vmul.f32 %v4157_v13, %v11001_v15  ;;  %14265 = vst [vmem:[#allocation88_spill] sm:$0xff] %v11039_v7  ;;  %v11041_v59 = vsub.f32 %v3663_v56, %v3727_v46  ;;  %v4347_v32 = vmul.f32 %v4283_v6, %v10986_v53  ;;  %v3408_v33 = vmul.f32 0.15915494, %v3112_v55 }
 0x3be   : > { %14264 = vst [vmem:[#allocation97_spill] sm:$0xff] %v11032_v10  ;;  %v3473_v29 = vadd.f32 0.5, %v3409_v39  ;;  %v11053_v13 = vmul.f32 %v11032_v10, %v11032_v10  ;;  %v3410_v48 = vmul.f32 0.15915494, %v11045_v47  ;;  %v11062_v50 = vmul.f32 %v11001_v15, %v10991_v30 }
 0x3bf   : > { %v4285_v36 = vadd.f32 2.7557319e-06, %v4221_v44  ;;  %v11057_v46 = vmul.f32 %v11041_v59, %v11041_v59  ;;  %v4411_v56 = vadd.f32 -0.0001984127, %v4347_v32  ;;  %v3472_v43 = vadd.f32 0.5, %v3408_v33  ;;  %v11078_v32 = vpop.f32.mrb[62].mxu0 }
 0x3c0   : > { %v3537_v39 = vfloor.f32 %v3473_v29  ;;  %v11069_v21 = vadd.f32 %v4779_v1, %v10896_v26  ;;  %v11074_v52 = vmul.f32 %v11039_v7, %v11028_v41  ;;  %v4653_v18 = vadd.f32 -0.16666667, %v4589_v25  ;;  %v11080_v29 = vpop.f32.mrb[62].mxu1 }
 0x3c1   : > { %v4349_v63 = vmul.f32 %v4285_v36, %v11001_v15  ;;  %v3919_v0 = vmul.f32 -7.6471636e-13, %v11057_v46  ;;  %v4475_v20 = vmul.f32 %v4411_v56, %v10986_v53  ;;  %v3536_v44 = vfloor.f32 %v3472_v43 }
 0x3c2   : > { %14266 = vst [vmem:[#allocation93_spill] sm:$0xff] %v11069_v21  ;;  %14267 = vst [vmem:[#allocation36_spill] sm:$0xff] %v11074_v52  ;;  %v3601_v6 = vmul.f32 6.28125, %v3537_v39  ;;  %v11084_v26 = vmul.f32 %v11053_v13, %v11032_v10  ;;  %v3474_v36 = vadd.f32 0.5, %v3410_v48  ;;  %v3729_v21 = vmul.f32 0.0019353072, %v3537_v39 }
 0x3c3   : > { %v4413_v33 = vadd.f32 -0.0001984127, %v4349_v63  ;;  %v3983_v1 = vadd.f32 1.6059044e-10, %v3919_v0  ;;  %v4539_v41 = vadd.f32 0.008333334, %v4475_v20  ;;  %v3116_v5 = vadd.f32 %v10728_v58, %v10387_v8 }
 0x3c4   : > { %14268 = vst [vmem:[#allocation90_spill] sm:$0xff] %v11084_v26  ;;  %v3665_v52 = vsub.f32 %v3199_v49, %v3601_v6  ;;  %v3600_v7 = vmul.f32 6.28125, %v3536_v44  ;;  %v3538_v43 = vfloor.f32 %v3474_v36  ;;  %v3728_v26 = vmul.f32 0.0019353072, %v3536_v44 }
 0x3c5   : > { %v4477_v25 = vmul.f32 %v4413_v33, %v11001_v15  ;;  %v4047_v56 = vmul.f32 %v3983_v1, %v11057_v46  ;;  %v4603_v63 = vmul.f32 %v4539_v41, %v10986_v53  ;;  %v4781_v48 = vmul.f32 %v10970_v62, %v4653_v18 }
 0x3c6   : > { %v11091_v22 = vsub.f32 %v3665_v52, %v3729_v21  ;;  %v3664_v10 = vsub.f32 %v3112_v55, %v3600_v7  ;;  %v3602_v39 = vmul.f32 6.28125, %v3538_v43  ;;  %v3205_v58 = vadd.f32 %v10747_v61, %v10387_v8 }
 0x3c7   : > { %v4541_v0 = vadd.f32 0.008333334, %v4477_v25  ;;  %v4111_v49 = vadd.f32 -2.5052108e-08, %v4047_v56  ;;  %v4667_v20 = vadd.f32 -0.16666667, %v4603_v63  ;;  %v11107_v7 = vmul.f32 %v11057_v46, %v11041_v59 }
 0x3c8   : > { %v11096_v6 = vmul.f32 %v11091_v22, %v11091_v22  ;;  %v11098_v33 = vsub.f32 %v3664_v10, %v3728_v26  ;;  %v3666_v55 = vsub.f32 %v11045_v47, %v3602_v39  ;;  %v3423_v62 = vmul.f32 0.15915494, %v3116_v5 }
 0x3c9   : > { %v4605_v53 = vmul.f32 %v4541_v0, %v11001_v15  ;;  %v4175_v41 = vmul.f32 %v4111_v49, %v11057_v46  ;;  %v3730_v52 = vmul.f32 0.0019353072, %v3538_v43  ;;  %v3118_v10 = vadd.f32 %v10736_v60, %v10387_v8 }
 0x3ca   : > { %14269 = vst [vmem:[#allocation89_spill] sm:$0xff] %v11098_v33  ;;  %v3921_v21 = vmul.f32 -7.6471636e-13, %v11096_v6  ;;  %v4795_v18 = vmul.f32 %v11020_v17, %v4667_v20  ;;  %v3487_v15 = vadd.f32 0.5, %v3423_v62  ;;  %v11114_v26 = vadd.f32 %v4781_v48, %v10931_v45 }
 0x3cb   : > { %v4669_v61 = vadd.f32 -0.16666667, %v4605_v53  ;;  %v4239_v44 = vadd.f32 2.7557319e-06, %v4175_v41  ;;  %v11118_v1 = vmul.f32 %v11096_v6, %v11091_v22  ;;  %v3425_v36 = vmul.f32 0.15915494, %v3205_v58 }
 0x3cc   : > { %v3985_v47 = vadd.f32 1.6059044e-10, %v3921_v21  ;;  %v11123_v56 = vmul.f32 %v11098_v33, %v11098_v33  ;;  %v11125_v60 = vsub.f32 %v3666_v55, %v3730_v52  ;;  %v3551_v17 = vfloor.f32 %v3487_v15 }
 0x3cd   : > { %v4303_v25 = vmul.f32 %v4239_v44, %v11057_v46  ;;  %v3489_v63 = vadd.f32 0.5, %v3425_v36  ;;  %v3424_v45 = vmul.f32 0.15915494, %v3118_v10  ;;  %v3207_v48 = vadd.f32 %v10757_v12, %v10387_v8 }
 0x3ce   : > { %14270 = vst [vmem:[#allocation50_spill] sm:$0xff] %v11125_v60  ;;  %v4049_v43 = vmul.f32 %v3985_v47, %v11096_v6  ;;  %v11131_v0 = vadd.f32 %v4795_v18, %v10975_v11  ;;  %v4797_v49 = vmul.f32 %v11062_v50, %v4669_v61  ;;  %v3615_v20 = vmul.f32 6.28125, %v3551_v17 }
 0x3cf   : > { %v4367_v39 = vadd.f32 -0.0001984127, %v4303_v25  ;;  %v3743_v41 = vmul.f32 0.0019353072, %v3551_v17  ;;  %v3553_v62 = vfloor.f32 %v3489_v63  ;;  %v3488_v55 = vadd.f32 0.5, %v3424_v45 }
 0x3d0   : > { %v4113_v53 = vadd.f32 -2.5052108e-08, %v4049_v43  ;;  %v3679_v52 = vsub.f32 %v3116_v5, %v3615_v20  ;;  %v3426_v44 = vmul.f32 0.15915494, %v3207_v48  ;;  %v3122_v15 = vadd.f32 %v10749_v3, %v10421_v28 }
 0x3d1   : > { %v4431_v21 = vmul.f32 %v4367_v39, %v11057_v46  ;;  %v11140_v11 = vmul.f32 %v11125_v60, %v11125_v60  ;;  %v3617_v50 = vmul.f32 6.28125, %v3553_v62  ;;  %v3552_v18 = vfloor.f32 %v3488_v55 }
 0x3d2   : > { %v4177_v12 = vmul.f32 %v4113_v53, %v11096_v6  ;;  %v11142_v47 = vsub.f32 %v3679_v52, %v3743_v41  ;;  %v3490_v36 = vadd.f32 0.5, %v3426_v44  ;;  %v3439_v25 = vmul.f32 0.15915494, %v3122_v15 }
 0x3d3   : > { %14271 = vst [vmem:[#allocation87_spill] sm:$0xff] %v11140_v11  ;;  %v4495_v61 = vadd.f32 0.008333334, %v4431_v21  ;;  %v3681_v43 = vsub.f32 %v3205_v58, %v3617_v50  ;;  %v3745_v5 = vmul.f32 0.0019353072, %v3553_v62  ;;  %v3616_v63 = vmul.f32 6.28125, %v3552_v18 }
 0x3d4   : > { %v4241_v17 = vadd.f32 2.7557319e-06, %v4177_v12  ;;  %v11147_v3 = vmul.f32 %v11142_v47, %v11142_v47  ;;  %v3554_v39 = vfloor.f32 %v3490_v36  ;;  %v3503_v20 = vadd.f32 0.5, %v3439_v25 }
 0x3d5   : > { %v4559_v45 = vmul.f32 %v4495_v61, %v11057_v46  ;;  %v11150_v55 = vsub.f32 %v3681_v43, %v3745_v5  ;;  %v3680_v41 = vsub.f32 %v3118_v10, %v3616_v63  ;;  %v3744_v21 = vmul.f32 0.0019353072, %v3552_v18 }
 0x3d6   : > { %v4305_v53 = vmul.f32 %v4241_v17, %v11096_v6  ;;  %v11154_v58 = vmul.f32 %v11123_v56, %v11098_v33  ;;  %v3935_v62 = vmul.f32 -7.6471636e-13, %v11147_v3  ;;  %v3618_v46 = vmul.f32 6.28125, %v3554_v39 }
 0x3d7   : > { %v4623_v52 = vadd.f32 -0.16666667, %v4559_v45  ;;  %v11158_v44 = vadd.f32 %v4797_v49, %v10991_v30  ;;  %v11162_v50 = vmul.f32 %v11150_v55, %v11150_v55  ;;  %v11164_v61 = vsub.f32 %v3680_v41, %v3744_v21 }
 0x3d8   : > { %14272 = vst [vmem:[#allocation91_spill] sm:$0xff] %v11154_v58  ;;  %v4369_v12 = vadd.f32 -0.0001984127, %v4305_v53  ;;  %v3999_v10 = vadd.f32 1.6059044e-10, %v3935_v62  ;;  %v3682_v18 = vsub.f32 %v3207_v48, %v3618_v46  ;;  %v3567_v36 = vfloor.f32 %v3503_v20 }
 0x3d9   : > { %14273 = vst [vmem:[#allocation33_spill] sm:$0xff] %v11164_v61  ;;  %v3211_v25 = vadd.f32 %v10771_v14, %v10421_v28  ;;  %v11171_v43 = vmul.f32 %v11140_v11, %v11125_v60  ;;  %v3937_v30 = vmul.f32 -7.6471636e-13, %v11162_v50  ;;  %v3746_v49 = vmul.f32 0.0019353072, %v3554_v39 }
 0x3da   : > { %v4433_v17 = vmul.f32 %v4369_v12, %v11096_v6  ;;  %v4751_v5 = vmul.f32 %v11107_v7, %v4623_v52  ;;  %v4063_v63 = vmul.f32 %v3999_v10, %v11147_v3  ;;  %v11178_v48 = vmul.f32 %v11147_v3, %v11142_v47 }
 0x3db   : > { %14274 = vst [vmem:[#allocation27_spill] sm:$0xff] %v11171_v43  ;;  %v3631_v45 = vmul.f32 6.28125, %v3567_v36  ;;  %v4001_v20 = vadd.f32 1.6059044e-10, %v3937_v30  ;;  %v11182_v14 = vmul.f32 %v11162_v50, %v11150_v55  ;;  %v11186_v53 = vmul.f32 %v11164_v61, %v11164_v61 }
 0x3dc   : > { %v11188_v41 = vsub.f32 %v3682_v18, %v3746_v49  ;;  %v4127_v39 = vadd.f32 -2.5052108e-08, %v4063_v63  ;;  %v3759_v21 = vmul.f32 0.0019353072, %v3567_v36  ;;  %v3441_v52 = vmul.f32 0.15915494, %v3211_v25 }
 0x3dd   : > { %14275 = vst [vmem:[#allocation16_spill] sm:$0xff] %v11186_v53  ;;  %v3695_v7 = vsub.f32 %v3122_v15, %v3631_v45  ;;  %v4497_v62 = vadd.f32 0.008333334, %v4433_v17  ;;  %v4065_v46 = vmul.f32 %v4001_v20, %v11162_v50  ;;  %v3124_v12 = vadd.f32 %v10759_v16, %v10421_v28 }
 0x3de   : > { %14276 = vst [vmem:[#allocation42_spill] sm:$0xff] %v11188_v41  ;;  %v11195_v10 = vadd.f32 %v10779_v31, %v10421_v28  ;;  %v11198_v30 = vadd.f32 %v4751_v5, %v11041_v59  ;;  %v4191_v18 = vmul.f32 %v4127_v39, %v11147_v3  ;;  %v3505_v15 = vadd.f32 0.5, %v3441_v52 }
 0x3df   : > { %v11201_v49 = vsub.f32 %v3695_v7, %v3759_v21  ;;  %v4129_v36 = vadd.f32 -2.5052108e-08, %v4065_v46  ;;  %v11205_v17 = vmul.f32 %v11188_v41, %v11188_v41  ;;  %v3440_v63 = vmul.f32 0.15915494, %v3124_v12 }
 0x3e0   : > { %14277 = vst [vmem:[#allocation18_spill] sm:$0xff] %v11198_v30  ;;  %v11209_v16 = vadd.f32 %v10773_v19, %v10550_v51  ;;  %v4255_v31 = vadd.f32 2.7557319e-06, %v4191_v18  ;;  %v3569_v5 = vfloor.f32 %v3505_v15  ;;  %v3442_v45 = vmul.f32 0.15915494, %v11195_v10 }
 0x3e1   : > { %v11213_v59 = vmul.f32 %v11201_v49, %v11201_v49  ;;  %v4561_v20 = vmul.f32 %v4497_v62, %v11096_v6  ;;  %v4193_v39 = vmul.f32 %v4129_v36, %v11162_v50  ;;  %v3504_v7 = vadd.f32 0.5, %v3440_v63 }
 0x3e2   : > { %v3455_v21 = vmul.f32 0.15915494, %v11209_v16  ;;  %v4319_v52 = vmul.f32 %v4255_v31, %v11147_v3  ;;  %v11222_v19 = vmul.f32 %v11186_v53, %v11164_v61  ;;  %v3633_v18 = vmul.f32 6.28125, %v3569_v5 }
 0x3e3   : > { %v3951_v46 = vmul.f32 -7.6471636e-13, %v11213_v59  ;;  %v4257_v60 = vadd.f32 2.7557319e-06, %v4193_v39  ;;  %v11227_v15 = vmul.f32 %v11205_v17, %v11188_v41  ;;  %v3761_v6 = vmul.f32 0.0019353072, %v3569_v5 }
 0x3e4   : > { %14278 = vst [vmem:[#allocation22_spill] sm:$0xff] %v11222_v19  ;;  %v3568_v62 = vfloor.f32 %v3504_v7  ;;  %v4383_v36 = vadd.f32 -0.0001984127, %v4319_v52  ;;  %v3697_v33 = vsub.f32 %v3211_v25, %v3633_v18  ;;  %v3506_v43 = vadd.f32 0.5, %v3442_v45  ;;  %v11234_v52 = vpop.f32.mrb[63].mxu0  ;;  %v11244_v18 = vpop.f32.mrb[63].mxu1 }
 0x3e5   : > { %14279 = vst [vmem:[#allocation95_spill] sm:$0xff] %v11227_v15  ;;  %v4015_v63 = vadd.f32 1.6059044e-10, %v3951_v46  ;;  %v4625_v58 = vadd.f32 -0.16666667, %v4561_v20  ;;  %v4321_v31 = vmul.f32 %v4257_v60, %v11162_v50  ;;  %v3519_v61 = vadd.f32 0.5, %v3455_v21 }
 0x3e6   : > { %v3632_v30 = vmul.f32 6.28125, %v3568_v62  ;;  %v4447_v19 = vmul.f32 %v4383_v36, %v11147_v3  ;;  %v11232_v39 = vsub.f32 %v3697_v33, %v3761_v6  ;;  %v3570_v53 = vfloor.f32 %v3506_v43 }
 0x3e7   : > { %v4079_v11 = vmul.f32 %v4015_v63, %v11213_v59  ;;  %v4385_v41 = vadd.f32 -0.0001984127, %v4321_v31  ;;  %v3760_v5 = vmul.f32 0.0019353072, %v3568_v62  ;;  %v3583_v7 = vfloor.f32 %v3519_v61 }
 0x3e8   : > { %v3696_v15 = vsub.f32 %v3124_v12, %v3632_v30  ;;  %v4511_v25 = vadd.f32 0.008333334, %v4447_v19  ;;  %v11238_v60 = vmul.f32 %v11232_v39, %v11232_v39  ;;  %v3634_v20 = vmul.f32 6.28125, %v3570_v53 }
 0x3e9   : > { %v4143_v45 = vadd.f32 -2.5052108e-08, %v4079_v11  ;;  %v4753_v21 = vmul.f32 %v11118_v1, %v4625_v58  ;;  %v4449_v46 = vmul.f32 %v4385_v41, %v11162_v50  ;;  %v3647_v43 = vmul.f32 6.28125, %v3583_v7 }
 0x3ea   : > { %v11242_v33 = vsub.f32 %v3696_v15, %v3760_v5  ;;  %v4575_v61 = vmul.f32 %v4511_v25, %v11147_v3  ;;  %v3953_v11 = vmul.f32 -7.6471636e-13, %v11238_v60  ;;  %v3217_v30 = vadd.f32 %v10799_v27, %v10550_v51 }
 0x3eb   : > { %v4207_v12 = vmul.f32 %v4143_v45, %v11213_v59  ;;  %v4513_v19 = vadd.f32 0.008333334, %v4449_v46  ;;  %v11253_v1 = vmul.f32 %v11213_v59, %v11201_v49  ;;  %v3698_v58 = vsub.f32 %v11195_v10, %v3634_v20 }
 0x3ec   : > { %14280 = vst [vmem:[#allocation17_spill] sm:$0xff] %v11242_v33  ;;  %v3711_v41 = vsub.f32 %v11209_v16, %v3647_v43  ;;  %v4017_v6 = vadd.f32 1.6059044e-10, %v3953_v11  ;;  %v3762_v62 = vmul.f32 0.0019353072, %v3570_v53  ;;  %v3130_v3 = vadd.f32 %v10790_v35, %v10550_v51 }
 0x3ed   : > { %v4271_v15 = vadd.f32 2.7557319e-06, %v4207_v12  ;;  %v4639_v36 = vadd.f32 -0.16666667, %v4575_v61  ;;  %v4577_v63 = vmul.f32 %v4513_v19, %v11162_v50  ;;  %v11262_v27 = vmul.f32 %v11242_v33, %v11242_v33 }
 0x3ee   : > { %v3775_v31 = vmul.f32 0.0019353072, %v3583_v7  ;;  %v4081_v10 = vmul.f32 %v4017_v6, %v11238_v60  ;;  %v11266_v25 = vsub.f32 %v3698_v58, %v3762_v62  ;;  %v3457_v16 = vmul.f32 0.15915494, %v3217_v30 }
 0x3ef   : > { %14281 = vst [vmem:[#allocation19_spill] sm:$0xff] %v11262_v27  ;;  %v4335_v5 = vmul.f32 %v4271_v15, %v11213_v59  ;;  %v11269_v53 = vadd.f32 %v4753_v21, %v11091_v22  ;;  %v4641_v45 = vadd.f32 -0.16666667, %v4577_v63  ;;  %v3456_v20 = vmul.f32 0.15915494, %v3130_v3 }
 0x3f0   : > { %14282 = vst [vmem:[#allocation20_spill] sm:$0xff] %v11266_v25  ;;  %v11271_v35 = vsub.f32 %v3711_v41, %v3775_v31  ;;  %v4145_v46 = vadd.f32 -2.5052108e-08, %v4081_v10  ;;  %v11275_v43 = vmul.f32 %v11238_v60, %v11232_v39  ;;  %v3521_v7 = vadd.f32 0.5, %v3457_v16 }
 0x3f1   : > { %14283 = vst [vmem:[#allocation32_spill] sm:$0xff] %v11269_v53  ;;  %v4399_v50 = vadd.f32 -0.0001984127, %v4335_v5  ;;  %v4767_v61 = vmul.f32 %v11178_v48, %v4639_v36  ;;  %v11280_v12 = vmul.f32 %v11262_v27, %v11242_v33  ;;  %v3520_v21 = vadd.f32 0.5, %v3456_v20 }
 0x3f2   : > { %v11284_v22 = vmul.f32 %v11271_v35, %v11271_v35  ;;  %v4209_v19 = vmul.f32 %v4145_v46, %v11238_v60  ;;  %v11290_v58 = vmul.f32 %v11266_v25, %v11266_v25  ;;  %v3585_v41 = vfloor.f32 %v3521_v7 }
 0x3f3   : > { %14284 = vst [vmem:[#allocation96_spill] sm:$0xff] %v11280_v12  ;;  %v4463_v11 = vmul.f32 %v4399_v50, %v11213_v59  ;;  %v4769_v48 = vmul.f32 %v11182_v14, %v4641_v45  ;;  %v3584_v6 = vfloor.f32 %v3520_v21  ;;  %v3219_v62 = vadd.f32 %v10809_v38, %v10550_v51  ;;  %v14286_v50 = vld [vmem:[#allocation68_spill] sm:$0xff] }
 0x3f4   : > { %14285 = vst [vmem:[#allocation24_spill] sm:$0xff] %v11290_v58  ;;  %v3967_v15 = vmul.f32 -7.6471636e-13, %v11284_v22  ;;  %v4273_v63 = vadd.f32 2.7557319e-06, %v4209_v19  ;;  %v3649_v31 = vmul.f32 6.28125, %v3585_v41  ;;  %v3288_v5 = vadd.f32 %v10869_v57, %v10383_v24 }
 0x3f5   : > { %v4527_v36 = vadd.f32 0.008333334, %v4463_v11  ;;  %v3777_v16 = vmul.f32 0.0019353072, %v3585_v41  ;;  %v3648_v20 = vmul.f32 6.28125, %v3584_v6  ;;  %v11300_v46 = vadd.f32 %v14286_v50, %v10383_v24 }
 0x3f6   : > { %v4031_v10 = vadd.f32 1.6059044e-10, %v3967_v15  ;;  %v4337_v45 = vmul.f32 %v4273_v63, %v11238_v60  ;;  %v3713_v7 = vsub.f32 %v3217_v30, %v3649_v31  ;;  %v3776_v21 = vmul.f32 0.0019353072, %v3584_v6 }
 0x3f7   : > { %v4591_v14 = vmul.f32 %v4527_v36, %v11213_v59  ;;  %v3712_v11 = vsub.f32 %v3130_v3, %v3648_v20  ;;  %v3458_v19 = vmul.f32 0.15915494, %v3219_v62  ;;  %v3411_v33 = vmul.f32 0.15915494, %v3288_v5 }
 0x3f8   : > { %v4095_v38 = vmul.f32 %v4031_v10, %v11284_v22  ;;  %v4401_v57 = vadd.f32 -0.0001984127, %v4337_v45  ;;  %v11305_v15 = vsub.f32 %v3713_v7, %v3777_v16  ;;  %v3413_v41 = vmul.f32 0.15915494, %v11300_v46 }
 0x3f9   : > { %v4655_v12 = vadd.f32 -0.16666667, %v4591_v14  ;;  %v11308_v50 = vsub.f32 %v3712_v11, %v3776_v21  ;;  %v3522_v53 = vadd.f32 0.5, %v3458_v19  ;;  %v3475_v59 = vadd.f32 0.5, %v3411_v33 }
 0x3fa   : > { %v4159_v27 = vadd.f32 -2.5052108e-08, %v4095_v38  ;;  %v11311_v36 = vadd.f32 %v4767_v61, %v11142_v47  ;;  %v4465_v30 = vmul.f32 %v4401_v57, %v11238_v60  ;;  %v11316_v3 = vmul.f32 %v11290_v58, %v11266_v25  ;;  %v14289_v57 = vld [vmem:[#allocation71_spill] sm:$0xff] }
 0x3fb   : > { %14287 = vst [vmem:[#allocation34_spill] sm:$0xff] %v11308_v50  ;;  %v11320_v6 = vmul.f32 %v11305_v15, %v11305_v15  ;;  %v3586_v31 = vfloor.f32 %v3522_v53  ;;  %v3539_v10 = vfloor.f32 %v3475_v59  ;;  %v3477_v16 = vadd.f32 0.5, %v3413_v41 }
 0x3fc   : > { %14288 = vst [vmem:[#allocation21_spill] sm:$0xff] %v11316_v3  ;;  %v4223_v63 = vmul.f32 %v4159_v27, %v11284_v22  ;;  %v11324_v33 = vadd.f32 %v4769_v48, %v11150_v55  ;;  %v4529_v47 = vadd.f32 0.008333334, %v4465_v30  ;;  %v11328_v61 = vmul.f32 %v11284_v22, %v11271_v35  ;;  %v14290_v30 = vld [vmem:[#allocation23_spill] sm:$0xff] }
 0x3fd   : > { %v3969_v20 = vmul.f32 -7.6471636e-13, %v11320_v6  ;;  %v4783_v14 = vmul.f32 %v11253_v1, %v4655_v12  ;;  %v11334_v7 = vmul.f32 %v11308_v50, %v11308_v50  ;;  %v3650_v27 = vmul.f32 6.28125, %v3586_v31 }
 0x3fe   : > { %v4287_v45 = vadd.f32 2.7557319e-06, %v4223_v63  ;;  %v4593_v53 = vmul.f32 %v4529_v47, %v11238_v60  ;;  %v3778_v55 = vmul.f32 0.0019353072, %v3586_v31  ;;  %v3603_v48 = vmul.f32 6.28125, %v3539_v10 }
 0x3ff   : > { %v4033_v21 = vadd.f32 1.6059044e-10, %v3969_v20  ;;  %v3714_v11 = vsub.f32 %v3219_v62, %v3650_v27  ;;  %v3541_v19 = vfloor.f32 %v3477_v16  ;;  %v3290_v41 = vadd.f32 %v14289_v57, %v10383_v24 }
 0x400   : > { %v4351_v38 = vmul.f32 %v4287_v45, %v11284_v22  ;;  %v3667_v12 = vsub.f32 %v3288_v5, %v3603_v48  ;;  %v3731_v59 = vmul.f32 0.0019353072, %v3539_v10  ;;  %v11343_v63 = vadd.f32 %v14290_v30, %v10383_v24 }
 0x401   : > { %v4097_v1 = vmul.f32 %v4033_v21, %v11320_v6  ;;  %v11346_v60 = vadd.f32 %v4783_v14, %v11201_v49  ;;  %v4657_v31 = vadd.f32 -0.16666667, %v4593_v53  ;;  %v3605_v20 = vmul.f32 6.28125, %v3541_v19 }
 0x402   : > { %v4415_v47 = vadd.f32 -0.0001984127, %v4351_v38  ;;  %v11348_v62 = vsub.f32 %v3714_v11, %v3778_v55  ;;  %v11350_v16 = vsub.f32 %v3667_v12, %v3731_v59  ;;  %v3412_v27 = vmul.f32 0.15915494, %v3290_v41 }
 0x403   : > { %14291 = vst [vmem:[#allocation14_spill] sm:$0xff] %v11346_v60  ;;  %v4161_v45 = vadd.f32 -2.5052108e-08, %v4097_v1  ;;  %v3669_v5 = vsub.f32 %v11300_v46, %v3605_v20  ;;  %v3733_v10 = vmul.f32 0.0019353072, %v3541_v19  ;;  %v11358_v49 = vmul.f32 %v11320_v6, %v11305_v15 }
 0x404   : > { %14292 = vst [vmem:[#allocation39_spill] sm:$0xff] %v11348_v62  ;;  %v4479_v21 = vmul.f32 %v4415_v47, %v11284_v22  ;;  %v3414_v24 = vmul.f32 0.15915494, %v11343_v63  ;;  %v11362_v14 = vmul.f32 %v11350_v16, %v11350_v16  ;;  %v3476_v53 = vadd.f32 0.5, %v3412_v27 }
 0x405   : > { %v4225_v48 = vmul.f32 %v4161_v45, %v11320_v6  ;;  %v4785_v55 = vmul.f32 %v11275_v43, %v4657_v31  ;;  %v11365_v11 = vsub.f32 %v3669_v5, %v3733_v10  ;;  %v11369_v57 = vmul.f32 %v11348_v62, %v11348_v62  ;;  %v14294_v43 = vld [vmem:[#allocation73_spill] sm:$0xff] }
 0x406   : > { %v4543_v38 = vadd.f32 0.008333334, %v4479_v21  ;;  %v3478_v46 = vadd.f32 0.5, %v3414_v24  ;;  %v3923_v1 = vmul.f32 -7.6471636e-13, %v11362_v14  ;;  %v3540_v12 = vfloor.f32 %v3476_v53 }
 0x407   : > { %v4289_v19 = vadd.f32 2.7557319e-06, %v4225_v48  ;;  %14293 = vst [vmem:[#allocation15_spill] sm:$0xff] %v11369_v57  ;;  %v11375_v30 = vmul.f32 %v11365_v11, %v11365_v11  ;;  %v3294_v31 = vadd.f32 %v14294_v43, %v10387_v8  ;;  %v11382_v45 = vmul.f32 %v11334_v7, %v11308_v50 }
 0x408   : > { %v4607_v59 = vmul.f32 %v4543_v38, %v11284_v22  ;;  %v3542_v47 = vfloor.f32 %v3478_v46  ;;  %v3987_v27 = vadd.f32 1.6059044e-10, %v3923_v1  ;;  %v3604_v21 = vmul.f32 6.28125, %v3540_v12 }
 0x409   : > { %v4353_v20 = vmul.f32 %v4289_v19, %v11320_v6  ;;  %14295 = vst [vmem:[#allocation30_spill] sm:$0xff] %v11382_v45  ;;  %v11385_v5 = vadd.f32 %v4785_v55, %v11232_v39  ;;  %v3925_v10 = vmul.f32 -7.6471636e-13, %v11375_v30  ;;  %v11390_v53 = vmul.f32 %v11369_v57, %v11348_v62 }
 0x40a   : > { %v4671_v22 = vadd.f32 -0.16666667, %v4607_v59  ;;  %v3606_v24 = vmul.f32 6.28125, %v3542_v47  ;;  %v4051_v38 = vmul.f32 %v3987_v27, %v11362_v14  ;;  %v3668_v46 = vsub.f32 %v3290_v41, %v3604_v21 }
 0x40b   : > { %14296 = vst [vmem:[#allocation68_spill] sm:$0xff] %v11385_v5  ;;  %v4417_v48 = vadd.f32 -0.0001984127, %v4353_v20  ;;  %14297 = vst [vmem:[#allocation71_spill] sm:$0xff] %v11390_v53  ;;  %v11395_v19 = vmul.f32 %v11362_v14, %v11350_v16  ;;  %v3989_v1 = vadd.f32 1.6059044e-10, %v3925_v10 }
 0x40c   : > { %v3732_v43 = vmul.f32 0.0019353072, %v3540_v12  ;;  %v3427_v39 = vmul.f32 0.15915494, %v3294_v31  ;;  %v4115_v59 = vadd.f32 -2.5052108e-08, %v4051_v38  ;;  %v3670_v25 = vsub.f32 %v11343_v63, %v3606_v24 }
 0x40d   : > { %v4481_v55 = vmul.f32 %v4417_v48, %v11320_v6  ;;  %v14298_v20 = vld [vmem:[#allocation77_spill] sm:$0xff]  ;;  %v4799_v62 = vmul.f32 %v11328_v61, %v4671_v22  ;;  %v4053_v27 = vmul.f32 %v3989_v1, %v11375_v30  ;;  %v3734_v12 = vmul.f32 0.0019353072, %v3542_v47  ;;  %v14300_v24 = vld [vmem:[#allocation35_spill] sm:$0xff] }
 0x40e   : > { %v3383_v3 = vadd.f32 %v14298_v20, %v10387_v8  ;;  %v11403_v41 = vsub.f32 %v3668_v46, %v3732_v43  ;;  %v3491_v21 = vadd.f32 0.5, %v3427_v39  ;;  %v4179_v10 = vmul.f32 %v4115_v59, %v11362_v14 }
 0x40f   : > { %v4545_v53 = vadd.f32 0.008333334, %v4481_v55  ;;  %v4117_v45 = vadd.f32 -2.5052108e-08, %v4053_v27  ;;  %v11408_v48 = vmul.f32 %v11375_v30, %v11365_v11  ;;  %v3912_v38 = vmul.f32 -7.6471636e-13, %v14300_v24 }
 0x410   : > { %14299 = vst [vmem:[#allocation23_spill] sm:$0xff] %v11403_v41  ;;  %v3429_v50 = vmul.f32 0.15915494, %v3383_v3  ;;  %v3555_v63 = vfloor.f32 %v3491_v21  ;;  %v4243_v22 = vadd.f32 2.7557319e-06, %v4179_v10  ;;  %v11412_v1 = vsub.f32 %v3670_v25, %v3734_v12  ;;  %v14303_v21 = vld [vmem:[#allocation31_spill] sm:$0xff] }
 0x411   : > { %v4609_v61 = vmul.f32 %v4545_v53, %v11320_v6  ;;  %v11415_v43 = vadd.f32 %v4799_v62, %v11271_v35  ;;  %v4181_v47 = vmul.f32 %v4117_v45, %v11375_v30  ;;  %v11420_v39 = vmul.f32 %v11403_v41, %v11403_v41  ;;  %v14305_v45 = vld [vmem:[#allocation48_spill] sm:$0xff] }
 0x412   : > { %14301 = vst [vmem:[#allocation73_spill] sm:$0xff] %v11412_v1  ;;  %v3493_v46 = vadd.f32 0.5, %v3429_v50  ;;  %v3619_v55 = vmul.f32 6.28125, %v3555_v63  ;;  %v4307_v59 = vmul.f32 %v4243_v22, %v11362_v14  ;;  %v3747_v20 = vmul.f32 0.0019353072, %v3555_v63 }
 0x413   : > { %14302 = vst [vmem:[#allocation77_spill] sm:$0xff] %v11415_v43  ;;  %v3928_v6 = vmul.f32 -7.6471636e-13, %v14303_v21  ;;  %v4673_v53 = vadd.f32 -0.16666667, %v4609_v61  ;;  %v11426_v35 = vmul.f32 %v11412_v1, %v11412_v1 }
 0x414   : > { %v3557_v27 = vfloor.f32 %v3493_v46  ;;  %v4245_v25 = vadd.f32 2.7557319e-06, %v4181_v47  ;;  %v3683_v10 = vsub.f32 %v3294_v31, %v3619_v55  ;;  %v3976_v50 = vadd.f32 1.6059044e-10, %v3912_v38  ;;  %v14306_v38 = vld [vmem:[#allocation47_spill] sm:$0xff] }
 0x415   : > { %v4371_v12 = vadd.f32 -0.0001984127, %v4307_v59  ;;  %14304 = vst [vmem:[#allocation35_spill] sm:$0xff] %v11426_v35  ;;  %v3914_v5 = vmul.f32 -7.6471636e-13, %v14305_v45 }
 0x416   : > { %v3621_v62 = vmul.f32 6.28125, %v3557_v27  ;;  %v4309_v43 = vmul.f32 %v4245_v25, %v11375_v30  ;;  %v11430_v60 = vsub.f32 %v3683_v10, %v3747_v20  ;;  %v3992_v63 = vadd.f32 1.6059044e-10, %v3928_v6 }
 0x417   : > { %v4040_v22 = vmul.f32 %v3976_v50, %v14300_v24  ;;  %v4435_v61 = vmul.f32 %v4371_v12, %v11362_v14  ;;  %v3749_v31 = vmul.f32 0.0019353072, %v3557_v27  ;;  %v3930_v47 = vmul.f32 -7.6471636e-13, %v14306_v38 }
 0x418   : > { %v3685_v46 = vsub.f32 %v3383_v3, %v3621_v62  ;;  %v4373_v55 = vadd.f32 -0.0001984127, %v4309_v43  ;;  %v11437_v59 = vmul.f32 %v11430_v60, %v11430_v60  ;;  %v4056_v57 = vmul.f32 %v3992_v63, %v14303_v21 }
 0x419   : > { %v4104_v58 = vadd.f32 -2.5052108e-08, %v4040_v22  ;;  %v4499_v25 = vadd.f32 0.008333334, %v4435_v61  ;;  %v3978_v6 = vadd.f32 1.6059044e-10, %v3914_v5  ;;  %v4801_v50 = vmul.f32 %v11358_v49, %v4673_v53 }
 0x41a   : > { %v11440_v20 = vsub.f32 %v3685_v46, %v3749_v31  ;;  %v3994_v10 = vadd.f32 1.6059044e-10, %v3930_v47  ;;  %v4437_v3 = vmul.f32 %v4373_v55, %v11375_v30  ;;  %v3939_v27 = vmul.f32 -7.6471636e-13, %v11437_v59 }
 0x41b   : > { %v4120_v12 = vadd.f32 -2.5052108e-08, %v4056_v57  ;;  %v4563_v43 = vmul.f32 %v4499_v25, %v11362_v14  ;;  %v4168_v63 = vmul.f32 %v4104_v58, %v14300_v24  ;;  %v4042_v22 = vmul.f32 %v3978_v6, %v14305_v45 }
 0x41c   : > { %v11448_v62 = vmul.f32 %v11440_v20, %v11440_v20  ;;  %v4501_v61 = vadd.f32 0.008333334, %v4437_v3  ;;  %v4003_v5 = vadd.f32 1.6059044e-10, %v3939_v27  ;;  %v4058_v49 = vmul.f32 %v3994_v10, %v14306_v38 }
 0x41d   : > { %v4184_v46 = vmul.f32 %v4120_v12, %v14303_v21  ;;  %v11456_v53 = vmul.f32 %v11420_v39, %v11403_v41  ;;  %v11460_v14 = vmul.f32 %v11426_v35, %v11412_v1  ;;  %v4232_v31 = vadd.f32 2.7557319e-06, %v4168_v63 }
 0x41e   : > { %v3941_v57 = vmul.f32 -7.6471636e-13, %v11448_v62  ;;  %v4627_v58 = vadd.f32 -0.16666667, %v4563_v43  ;;  %v4067_v47 = vmul.f32 %v4003_v5, %v11437_v59  ;;  %v4106_v25 = vadd.f32 -2.5052108e-08, %v4042_v22 }
 0x41f   : > { %14307 = vst [vmem:[#allocation31_spill] sm:$0xff] %v11456_v53  ;;  %14308 = vst [vmem:[#allocation48_spill] sm:$0xff] %v11460_v14  ;;  %v4248_v55 = vadd.f32 2.7557319e-06, %v4184_v46  ;;  %v11465_v6 = vadd.f32 %v4801_v50, %v11305_v15  ;;  %v4296_v3 = vmul.f32 %v4232_v31, %v14300_v24  ;;  %v4122_v27 = vadd.f32 -2.5052108e-08, %v4058_v49 }
 0x420   : > { %v4005_v10 = vadd.f32 1.6059044e-10, %v3941_v57  ;;  %v4565_v12 = vmul.f32 %v4501_v61, %v11375_v30  ;;  %v4131_v41 = vadd.f32 -2.5052108e-08, %v4067_v47  ;;  %v4170_v14 = vmul.f32 %v4106_v25, %v14305_v45 }
 0x421   : > { %v4312_v1 = vmul.f32 %v4248_v55, %v14303_v21  ;;  %v11473_v43 = vmul.f32 %v11437_v59, %v11430_v60  ;;  %v4360_v22 = vadd.f32 -0.0001984127, %v4296_v3  ;;  %v4186_v15 = vmul.f32 %v4122_v27, %v14306_v38 }
 0x422   : > { %v4069_v63 = vmul.f32 %v4005_v10, %v11448_v62  ;;  %v4755_v50 = vmul.f32 %v11395_v19, %v4627_v58  ;;  %v4195_v5 = vmul.f32 %v4131_v41, %v11437_v59  ;;  %v4234_v30 = vadd.f32 2.7557319e-06, %v4170_v14 }
 0x423   : > { %v4376_v46 = vadd.f32 -0.0001984127, %v4312_v1  ;;  %v4424_v49 = vmul.f32 %v4360_v22, %v14300_v24  ;;  %v4250_v57 = vadd.f32 2.7557319e-06, %v4186_v15  ;;  %v3296_v31 = vadd.f32 %v11014_v54, %v10387_v8 }
 0x424   : > { %v4133_v61 = vadd.f32 -2.5052108e-08, %v4069_v63  ;;  %v4629_v47 = vadd.f32 -0.16666667, %v4565_v12  ;;  %v4259_v55 = vadd.f32 2.7557319e-06, %v4195_v5  ;;  %v4298_v10 = vmul.f32 %v4234_v30, %v14305_v45 }
 0x425   : > { %v4440_v25 = vmul.f32 %v4376_v46, %v14303_v21  ;;  %v4488_v19 = vadd.f32 0.008333334, %v4424_v49  ;;  %v4314_v41 = vmul.f32 %v4250_v57, %v14306_v38  ;;  %v3428_v1 = vmul.f32 0.15915494, %v3296_v31 }
 0x426   : > { %v4197_v3 = vmul.f32 %v4133_v61, %v11448_v62  ;;  %v4323_v14 = vmul.f32 %v4259_v55, %v11437_v59  ;;  %v4362_v27 = vadd.f32 -0.0001984127, %v4298_v10  ;;  %v3385_v63 = vadd.f32 %v11016_v2, %v10387_v8 }
 0x427   : > { %v4504_v58 = vadd.f32 0.008333334, %v4440_v25  ;;  %v4552_v12 = vmul.f32 %v4488_v19, %v14300_v24  ;;  %v4378_v22 = vadd.f32 -0.0001984127, %v4314_v41  ;;  %v3492_v15 = vadd.f32 0.5, %v3428_v1  ;;  %v14309_v19 = vld [vmem:[#allocation40_spill] sm:$0xff] }
 0x428   : > { %v4261_v54 = vadd.f32 2.7557319e-06, %v4197_v3  ;;  %v4387_v5 = vadd.f32 -0.0001984127, %v4323_v14  ;;  %v4426_v30 = vmul.f32 %v4362_v27, %v14305_v45  ;;  %v3430_v61 = vmul.f32 0.15915494, %v3385_v63 }
 0x429   : > { %v4568_v46 = vmul.f32 %v4504_v58, %v14303_v21  ;;  %v4616_v57 = vadd.f32 -0.16666667, %v4552_v12  ;;  %v4442_v55 = vmul.f32 %v4378_v22, %v14306_v38  ;;  %v3556_v25 = vfloor.f32 %v3492_v15  ;;  %v14310_v58 = vld [vmem:[#allocation41_spill] sm:$0xff]  ;;  %v14311_v22 = vld [vmem:[#allocation28_spill] sm:$0xff] }
 0x42a   : > { %v4325_v49 = vmul.f32 %v4261_v54, %v11448_v62  ;;  %v4451_v10 = vmul.f32 %v4387_v5, %v11437_v59  ;;  %v4490_v2 = vadd.f32 0.008333334, %v4426_v30  ;;  %v3494_v3 = vadd.f32 0.5, %v3430_v61  ;;  %v14312_v61 = vld [vmem:[#allocation37_spill] sm:$0xff] }
 0x42b   : > { %v4632_v8 = vadd.f32 -0.16666667, %v4568_v46  ;;  %v4744_v41 = vmul.f32 %v14309_v19, %v4616_v57  ;;  %v4506_v1 = vadd.f32 0.008333334, %v4442_v55  ;;  %v3620_v14 = vmul.f32 6.28125, %v3556_v25 }
 0x42c   : > { %v4389_v24 = vadd.f32 -0.0001984127, %v4325_v49  ;;  %v4515_v21 = vadd.f32 0.008333334, %v4451_v10  ;;  %v4554_v53 = vmul.f32 %v4490_v2, %v14305_v45  ;;  %v3748_v54 = vmul.f32 0.0019353072, %v3556_v25 }
 0x42d   : > { %v4760_v27 = vmul.f32 %v14310_v58, %v4632_v8  ;;  %v4808_v15 = vadd.f32 %v4744_v41, %v14311_v22  ;;  %v4570_v5 = vmul.f32 %v4506_v1, %v14306_v38  ;;  %v3684_v46 = vsub.f32 %v3296_v31, %v3620_v14  ;;  %v14313_v8 = vld [vmem:[#allocation59_spill] sm:$0xff]  ;;  %v14314_v45 = vld [vmem:[#allocation52_spill] sm:$0xff]  ;;  %v14315_v41 = vld [vmem:[#allocation46_spill] sm:$0xff] }
 0x42e   : > { %v4453_v12 = vmul.f32 %v4389_v24, %v11448_v62  ;;  %v4579_v30 = vmul.f32 %v4515_v21, %v11437_v59  ;;  %v4618_v57 = vadd.f32 -0.16666667, %v4554_v53  ;;  %v3558_v55 = vfloor.f32 %v3494_v3  ;;  %v14316_v3 = vld [vmem:[#allocation58_spill] sm:$0xff] }
 0x42f   : > { %v4824_v49 = vadd.f32 %v4760_v27, %v14312_v61  ;;  %v4634_v10 = vadd.f32 -0.16666667, %v4570_v5  ;;  %v11503_v35 = vsub.f32 %v3684_v46, %v3748_v54  ;;  %v8012_v25 = vpack.c.bf16 %v14314_v45, %v14313_v8  ;;  %v14318_v27 = vld [vmem:[#allocation65_spill] sm:$0xff] }
 0x430   : > { %v4517_v19 = vadd.f32 0.008333334, %v4453_v12  ;;  %v4757_v2 = vmul.f32 %v11408_v48, %v4629_v47  ;;  %v4746_v58 = vmul.f32 %v14315_v41, %v4618_v57  ;;  %v3622_v38 = vmul.f32 6.28125, %v3558_v55  ;;  %v14317_v47 = vld [vmem:[#allocation54_spill] sm:$0xff]  ;;  %v14319_v12 = vld [vmem:[#allocation43_spill] sm:$0xff] }
 0x431   : > { %v8010_v24 = vpack.c.bf16 %v4824_v49, %v4808_v15  ;;  %v11510_v31 = vadd.f32 %v4755_v50, %v11350_v16  ;;  %v4709_v53 = vmul.f32 %v11448_v62, %v11440_v20  ;;  %v4762_v1 = vmul.f32 %v14316_v3, %v4634_v10  ;;  %v14320_v50 = vld [vmem:[#allocation44_spill] sm:$0xff]  ;;  %v14322_v3 = vld [vmem:[#allocation38_spill] sm:$0xff] }
 0x432   : > { %v4581_v59 = vmul.f32 %v4517_v19, %v11448_v62  ;;  %v4643_v14 = vadd.f32 -0.16666667, %v4579_v30  ;;  %v11518_v21 = vmul.f32 %v11503_v35, %v11503_v35  ;;  %v3686_v48 = vsub.f32 %v3385_v63, %v3622_v38 }
 0x433   : > { %8011 = vmatprep.subr.bf16.mxu0 %v8010_v24  ;;  %v8020_v54 = vpack.c.bf16 %v14318_v27, %v14317_v47  ;;  %v4810_v16 = vadd.f32 %v4746_v58, %v14319_v12  ;;  %v4826_v22 = vadd.f32 %v4762_v1, %v14320_v50  ;;  %v3750_v15 = vmul.f32 0.0019353072, %v3558_v55 }
 0x434   : > { %8013 = vmatpush1.bf16.msra.mxu0 %v8012_v25  ;;  %v3300_v62 = vadd.f32 %v11024_v37, %v10421_v28  ;;  %v11527_v5 = vadd.f32 %v4757_v2, %v11365_v11  ;;  %v4645_v46 = vadd.f32 -0.16666667, %v4581_v59  ;;  %v3389_v30 = vadd.f32 %v11049_v40, %v10421_v28 }
 0x435   : > { %v3302_v63 = vadd.f32 %v11064_v23, %v10421_v28  ;;  %v8018_v61 = vpack.c.bf16 %v4826_v22, %v4810_v16  ;;  %v11533_v49 = vsub.f32 %v3686_v48, %v3750_v15  ;;  %v3391_v55 = vadd.f32 %v11066_v34, %v10421_v28 }
 0x436   : > { %v3443_v57 = vmul.f32 0.15915494, %v3300_v62  ;;  %v4771_v19 = vmul.f32 %v11473_v43, %v4643_v14  ;;  %v3445_v37 = vmul.f32 0.15915494, %v3389_v30  ;;  %v3306_v11 = vadd.f32 %v11078_v32, %v10550_v51 }
 0x437   : > { %14321 = vst [vmem:[#allocation47_spill] sm:$0xff] %v11533_v49  ;;  %v3444_v10 = vmul.f32 0.15915494, %v3302_v63  ;;  %8019 = vmatprep.subr.bf16.mxu1 %v8018_v61  ;;  %v11542_v40 = vmul.f32 %v11518_v21, %v11503_v35  ;;  %v3446_v8 = vmul.f32 0.15915494, %v3391_v55  ;;  %v3395_v45 = vadd.f32 %v11080_v29, %v10550_v51 }
 0x438   : > { %v3507_v23 = vadd.f32 0.5, %v3443_v57  ;;  %v4773_v25 = vmul.f32 %v4709_v53, %v4645_v46  ;;  %8021 = vmatpush1.bf16.msra.mxu1 %v8020_v54  ;;  %v3509_v28 = vadd.f32 0.5, %v3445_v37  ;;  %v3459_v43 = vmul.f32 0.15915494, %v3306_v11  ;;  %v14323_v53 = vld [vmem:[#allocation69_spill] sm:$0xff] }
 0x439   : > { %v3508_v34 = vadd.f32 0.5, %v3444_v10  ;;  %v11548_v2 = vmul.f32 %v11533_v49, %v11533_v49  ;;  %v3510_v24 = vadd.f32 0.5, %v3446_v8  ;;  %v3461_v41 = vmul.f32 0.15915494, %v3395_v45 }
 0x43a   : > { %v3571_v32 = vfloor.f32 %v3507_v23  ;;  %v3573_v58 = vfloor.f32 %v3509_v28  ;;  %v3523_v59 = vadd.f32 0.5, %v3459_v43  ;;  %v3944_v1 = vmul.f32 -7.6471636e-13, %v14322_v3 }
 0x43b   : > { %v3572_v38 = vfloor.f32 %v3508_v34  ;;  %v3574_v48 = vfloor.f32 %v3510_v24  ;;  %v3525_v29 = vadd.f32 0.5, %v3461_v41  ;;  %v3960_v47 = vmul.f32 -7.6471636e-13, %v14323_v53 }
 0x43c   : > { %v3635_v14 = vmul.f32 6.28125, %v3571_v32  ;;  %v3763_v27 = vmul.f32 0.0019353072, %v3571_v32  ;;  %v3637_v54 = vmul.f32 6.28125, %v3573_v58  ;;  %v3765_v12 = vmul.f32 0.0019353072, %v3573_v58 }
 0x43d   : > { %v3636_v16 = vmul.f32 6.28125, %v3572_v38  ;;  %v3764_v22 = vmul.f32 0.0019353072, %v3572_v38  ;;  %v3638_v15 = vmul.f32 6.28125, %v3574_v48  ;;  %v3587_v46 = vfloor.f32 %v3523_v59 }
 0x43e   : > { %v3699_v50 = vsub.f32 %v3300_v62, %v3635_v14  ;;  %v3701_v61 = vsub.f32 %v3389_v30, %v3637_v54  ;;  %v3589_v37 = vfloor.f32 %v3525_v29  ;;  %v4008_v10 = vadd.f32 1.6059044e-10, %v3944_v1 }
 0x43f   : > { %v3700_v57 = vsub.f32 %v3302_v63, %v3636_v16  ;;  %v3702_v8 = vsub.f32 %v3391_v55, %v3638_v15  ;;  %v3766_v28 = vmul.f32 0.0019353072, %v3574_v48  ;;  %v3651_v34 = vmul.f32 6.28125, %v3587_v46 }
 0x440   : > { %v11552_v23 = vsub.f32 %v3699_v50, %v3763_v27  ;;  %v11554_v43 = vsub.f32 %v3701_v61, %v3765_v12  ;;  %v3779_v32 = vmul.f32 0.0019353072, %v3587_v46  ;;  %v3653_v41 = vmul.f32 6.28125, %v3589_v37 }
 0x441   : > { %v11556_v24 = vsub.f32 %v3700_v57, %v3764_v22  ;;  %v3715_v58 = vsub.f32 %v3306_v11, %v3651_v34  ;;  %v3781_v30 = vmul.f32 0.0019353072, %v3589_v37  ;;  %v4024_v63 = vadd.f32 1.6059044e-10, %v3960_v47  ;;  %v14326_v57 = vld [vmem:[#allocation55_spill] sm:$0xff] }
 0x442   : > { %v11560_v62 = vmul.f32 %v11552_v23, %v11552_v23  ;;  %v11564_v38 = vmul.f32 %v11554_v43, %v11554_v43  ;;  %v11566_v55 = vsub.f32 %v3702_v8, %v3766_v28  ;;  %v3717_v59 = vsub.f32 %v3395_v45, %v3653_v41 }
 0x443   : > { %14324 = vst [vmem:[#allocation40_spill] sm:$0xff] %v11556_v24  ;;  %v4072_v1 = vmul.f32 %v4008_v10, %v14322_v3  ;;  %v11570_v14 = vadd.f32 %v4771_v19, %v11430_v60  ;;  %v11573_v48 = vadd.f32 %v4773_v25, %v11440_v20  ;;  %v11576_v11 = vsub.f32 %v3715_v58, %v3779_v32 }
 0x444   : > { %14325 = vst [vmem:[#allocation41_spill] sm:$0xff] %v11566_v55  ;;  %v3955_v29 = vmul.f32 -7.6471636e-13, %v11560_v62  ;;  %v11580_v47 = vmul.f32 %v11548_v2, %v11533_v49  ;;  %v3957_v27 = vmul.f32 -7.6471636e-13, %v11564_v38  ;;  %v11585_v45 = vmul.f32 %v11556_v24, %v11556_v24 }
 0x445   : > { %v11587_v54 = vsub.f32 %v3717_v59, %v3781_v30  ;;  %v11591_v20 = vmul.f32 %v11560_v62, %v11552_v23  ;;  %v11595_v19 = vmul.f32 %v11576_v11, %v11576_v11  ;;  %v4088_v25 = vmul.f32 %v4024_v63, %v14323_v53  ;;  %v14327_v30 = vld [vmem:[#allocation74_spill] sm:$0xff] }
 0x446   : > { %v4019_v60 = vadd.f32 1.6059044e-10, %v3955_v29  ;;  %v4021_v12 = vadd.f32 1.6059044e-10, %v3957_v27  ;;  %v11600_v16 = vmul.f32 %v11566_v55, %v11566_v55  ;;  %v4136_v22 = vadd.f32 -2.5052108e-08, %v4072_v1 }
 0x447   : > { %v11604_v50 = vmul.f32 %v11587_v54, %v11587_v54  ;;  %v3971_v46 = vmul.f32 -7.6471636e-13, %v11595_v19  ;;  %v4152_v61 = vadd.f32 -2.5052108e-08, %v4088_v25  ;;  %v3946_v37 = vmul.f32 -7.6471636e-13, %v14326_v57 }
 0x448   : > { %v4083_v15 = vmul.f32 %v4019_v60, %v11560_v62  ;;  %v4085_v10 = vmul.f32 %v4021_v12, %v11564_v38  ;;  %v11612_v8 = vmul.f32 %v11564_v38, %v11554_v43  ;;  %v4200_v34 = vmul.f32 %v4136_v22, %v14322_v3 }
 0x449   : > { %v3973_v28 = vmul.f32 -7.6471636e-13, %v11604_v50  ;;  %v4035_v41 = vadd.f32 1.6059044e-10, %v3971_v46  ;;  %v4216_v58 = vmul.f32 %v4152_v61, %v14323_v53  ;;  %v3962_v63 = vmul.f32 -7.6471636e-13, %v14327_v30 }
 0x44a   : > { %v4147_v32 = vadd.f32 -2.5052108e-08, %v4083_v15  ;;  %v4149_v59 = vadd.f32 -2.5052108e-08, %v4085_v10  ;;  %v4264_v29 = vadd.f32 2.7557319e-06, %v4200_v34  ;;  %v11620_v27 = vadd.f32 %v11234_v52, %v10550_v51 }
 0x44b   : > { %v4037_v1 = vadd.f32 1.6059044e-10, %v3973_v28  ;;  %v4099_v25 = vmul.f32 %v4035_v41, %v11595_v19  ;;  %v4280_v12 = vadd.f32 2.7557319e-06, %v4216_v58  ;;  %v4010_v55 = vadd.f32 1.6059044e-10, %v3946_v37 }
 0x44c   : > { %v4211_v60 = vmul.f32 %v4147_v32, %v11560_v62  ;;  %v4213_v22 = vmul.f32 %v4149_v59, %v11564_v38  ;;  %v4328_v46 = vmul.f32 %v4264_v29, %v14322_v3  ;;  %v4026_v61 = vadd.f32 1.6059044e-10, %v3962_v63 }
 0x44d   : > { %v4101_v15 = vmul.f32 %v4037_v1, %v11604_v50  ;;  %v4163_v28 = vadd.f32 -2.5052108e-08, %v4099_v25  ;;  %v4344_v34 = vmul.f32 %v4280_v12, %v14323_v53  ;;  %v4074_v52 = vmul.f32 %v4010_v55, %v14326_v57 }
 0x44e   : > { %v4275_v10 = vadd.f32 2.7557319e-06, %v4211_v60  ;;  %v4277_v24 = vadd.f32 2.7557319e-06, %v4213_v22  ;;  %v4392_v32 = vadd.f32 -0.0001984127, %v4328_v46  ;;  %v4090_v41 = vmul.f32 %v4026_v61, %v14327_v30 }
 0x44f   : > { %v4165_v49 = vadd.f32 -2.5052108e-08, %v4101_v15  ;;  %v4227_v58 = vmul.f32 %v4163_v28, %v11595_v19  ;;  %v4408_v59 = vadd.f32 -0.0001984127, %v4344_v34  ;;  %v4138_v1 = vadd.f32 -2.5052108e-08, %v4074_v52 }
 0x450   : > { %v4339_v37 = vmul.f32 %v4275_v10, %v11560_v62  ;;  %v4341_v29 = vmul.f32 %v4277_v24, %v11564_v38  ;;  %v4456_v60 = vmul.f32 %v4392_v32, %v14322_v3  ;;  %v4154_v25 = vadd.f32 -2.5052108e-08, %v4090_v41 }
 0x451   : > { %v4229_v63 = vmul.f32 %v4165_v49, %v11604_v50  ;;  %v4291_v55 = vadd.f32 2.7557319e-06, %v4227_v58  ;;  %v4472_v22 = vmul.f32 %v4408_v59, %v14323_v53  ;;  %v4202_v15 = vmul.f32 %v4138_v1, %v14326_v57 }
 0x452   : > { %v4403_v12 = vadd.f32 -0.0001984127, %v4339_v37  ;;  %v4405_v46 = vadd.f32 -0.0001984127, %v4341_v29  ;;  %v4520_v10 = vadd.f32 0.008333334, %v4456_v60  ;;  %v4218_v28 = vmul.f32 %v4154_v25, %v14327_v30 }
 0x453   : > { %v4293_v61 = vadd.f32 2.7557319e-06, %v4229_v63  ;;  %v4355_v24 = vmul.f32 %v4291_v55, %v11595_v19  ;;  %v4536_v52 = vadd.f32 0.008333334, %v4472_v22  ;;  %v4266_v49 = vadd.f32 2.7557319e-06, %v4202_v15 }
 0x454   : > { %v4467_v34 = vmul.f32 %v4403_v12, %v11560_v62  ;;  %v4469_v32 = vmul.f32 %v4405_v46, %v11564_v38  ;;  %v4584_v37 = vmul.f32 %v4520_v10, %v14322_v3  ;;  %v4282_v58 = vadd.f32 2.7557319e-06, %v4218_v28  ;;  %v14328_v28 = vld [vmem:[#allocation61_spill] sm:$0xff] }
 0x455   : > { %v4357_v41 = vmul.f32 %v4293_v61, %v11604_v50  ;;  %v4419_v1 = vadd.f32 -0.0001984127, %v4355_v24  ;;  %v4600_v29 = vmul.f32 %v4536_v52, %v14323_v53  ;;  %v4330_v63 = vmul.f32 %v4266_v49, %v14326_v57  ;;  %v14329_v49 = vld [vmem:[#allocation63_spill] sm:$0xff] }
 0x456   : > { %v4531_v59 = vadd.f32 0.008333334, %v4467_v34  ;;  %v4533_v60 = vadd.f32 0.008333334, %v4469_v32  ;;  %v4648_v12 = vadd.f32 -0.16666667, %v4584_v37  ;;  %v4346_v55 = vmul.f32 %v4282_v58, %v14327_v30 }
 0x457   : > { %v4421_v25 = vadd.f32 -0.0001984127, %v4357_v41  ;;  %v4483_v15 = vmul.f32 %v4419_v1, %v11595_v19  ;;  %v4664_v46 = vadd.f32 -0.16666667, %v4600_v29  ;;  %v4394_v61 = vadd.f32 -0.0001984127, %v4330_v63 }
 0x458   : > { %v4595_v22 = vmul.f32 %v4531_v59, %v11560_v62  ;;  %v4597_v3 = vmul.f32 %v4533_v60, %v11564_v38  ;;  %v4776_v34 = vmul.f32 %v14328_v28, %v4648_v12  ;;  %v4410_v53 = vadd.f32 -0.0001984127, %v4346_v55  ;;  %v14330_v62 = vld [vmem:[#allocation49_spill] sm:$0xff]  ;;  %v14331_v63 = vld [vmem:[#allocation70_spill] sm:$0xff] }
 0x459   : > { %v4485_v10 = vmul.f32 %v4421_v25, %v11604_v50  ;;  %v4547_v52 = vadd.f32 0.008333334, %v4483_v15  ;;  %v4792_v32 = vmul.f32 %v14329_v49, %v4664_v46  ;;  %v4458_v41 = vmul.f32 %v4394_v61, %v14326_v57  ;;  %v14332_v49 = vld [vmem:[#allocation66_spill] sm:$0xff] }
 0x45a   : > { %v4659_v24 = vadd.f32 -0.16666667, %v4595_v22  ;;  %v4661_v37 = vadd.f32 -0.16666667, %v4597_v3  ;;  %v4840_v59 = vadd.f32 %v4776_v34, %v14330_v62  ;;  %v4474_v1 = vmul.f32 %v4410_v53, %v14327_v30 }
 0x45b   : > { %v4549_v58 = vadd.f32 0.008333334, %v4485_v10  ;;  %v4611_v38 = vmul.f32 %v4547_v52, %v11595_v19  ;;  %v4856_v60 = vadd.f32 %v4792_v32, %v14331_v63  ;;  %v4522_v25 = vadd.f32 0.008333334, %v4458_v41  ;;  %v14339_v63 = vld [vmem:[#allocation51_spill] sm:$0xff] }
 0x45c   : > { %v4787_v29 = vmul.f32 %v11591_v20, %v4659_v24  ;;  %v4789_v12 = vmul.f32 %v11612_v8, %v4661_v37  ;;  %v4538_v22 = vadd.f32 0.008333334, %v4474_v1  ;;  %v3460_v15 = vmul.f32 0.15915494, %v11620_v27 }
 0x45d   : > { %v4613_v55 = vmul.f32 %v4549_v58, %v11604_v50  ;;  %v4675_v46 = vadd.f32 -0.16666667, %v4611_v38  ;;  %v4739_v61 = vmul.f32 %v11595_v19, %v11576_v11  ;;  %v8014_v3 = vpack.c.bf16 %v4856_v60, %v4840_v59  ;;  %v14333_v19 = vld [vmem:[#allocation64_spill] sm:$0xff]  ;;  %v14336_v58 = vld [vmem:[#allocation29_spill] sm:$0xff]  ;;  %v14337_v59 = vld [vmem:[#allocation62_spill] sm:$0xff] }
 0x45e   : > { %v4586_v10 = vmul.f32 %v4522_v25, %v14326_v57  ;;  %v4741_v28 = vmul.f32 %v11604_v50, %v11587_v54  ;;  %v4602_v34 = vmul.f32 %v4538_v22, %v14327_v30  ;;  %v3524_v53 = vadd.f32 0.5, %v3460_v15  ;;  %v14335_v50 = vld [vmem:[#allocation25_spill] sm:$0xff] }
 0x45f   : > { %v4677_v20 = vadd.f32 -0.16666667, %v4613_v55  ;;  %v11668_v8 = vadd.f32 %v4787_v29, %v11552_v23  ;;  %8015 = vmatprep.subr.bf16.mxu0 %v8014_v3  ;;  %v3397_v52 = vadd.f32 %v11244_v18, %v10550_v51  ;;  %v8016_v32 = vpack.c.bf16 %v14333_v19, %v14332_v49  ;;  %v11680_v29 = vld [vmem:[#allocation5] sm:$0xff]  ;;  %v14338_v38 = vld [vmem:[#allocation57_spill] sm:$0xff]  ;;  %v11693_v49 = vld [vmem:[#allocation5 + $0x8] sm:$0xff] }
 0x460   : > { %v4650_v24 = vadd.f32 -0.16666667, %v4586_v10  ;;  %v11675_v57 = vadd.f32 %v4789_v12, %v11554_v43  ;;  %v4666_v41 = vadd.f32 -0.16666667, %v4602_v34  ;;  %v3588_v37 = vfloor.f32 %v3524_v53  ;;  %v14340_v12 = vld [vmem:[#allocation45_spill] sm:$0xff] }
 0x461   : > { %v8024_v30 = vpack.c.bf16 %v14336_v58, %v14335_v50  ;;  %v4803_v62 = vmul.f32 %v4739_v61, %v4675_v46  ;;  %v3462_v1 = vmul.f32 0.15915494, %v3397_v52  ;;  %8017 = vmatpush1.bf16.msra.mxu0 %v8016_v32  ;;  %v3916_v51 = vmul.f32 -7.6471636e-13, %v14338_v38  ;;  %v14341_v46 = vld [vmem:[#allocation26_spill] sm:$0xff]  ;;  %v14342_v34 = vld [vmem:[#allocation53_spill] sm:$0xff] }
 0x462   : > { %14334 = vst [vmem:[#allocation28_spill] sm:$0xff] %v11675_v57  ;;  %v4778_v23 = vmul.f32 %v14337_v59, %v4650_v24  ;;  %v4805_v18 = vmul.f32 %v4741_v28, %v4677_v20  ;;  %v4794_v60 = vmul.f32 %v14339_v63, %v4666_v41  ;;  %v3652_v25 = vmul.f32 6.28125, %v3588_v37  ;;  %v14344_v41 = vld [vmem:[#allocation72_spill] sm:$0xff]  ;;  %v14359_v57 = vld [vmem:[#allocation93_spill] sm:$0xff] }
 0x463   : > { %v3780_v43 = vmul.f32 0.0019353072, %v3588_v37  ;;  %v3526_v22 = vadd.f32 0.5, %v3462_v1  ;;  %v3932_v15 = vmul.f32 -7.6471636e-13, %v10907_v4  ;;  %v14343_v24 = vmov 0.0  }
 0x464   : > { %v4842_v55 = vadd.f32 %v4778_v23, %v14340_v12  ;;  %v3980_v3 = vadd.f32 1.6059044e-10, %v3916_v51  ;;  %v4858_v61 = vadd.f32 %v4794_v60, %v14341_v46  ;;  %v3716_v10 = vsub.f32 %v11620_v27, %v3652_v25  ;;  %7900 = vmatmul.mubr.msk.f32.vlgmr.msra.gmra.mrb[64].mxu0 %vm2674_vm2, %v11680_v29 }
 0x465   : > { %v3918_v53 = vmul.f32 -7.6471636e-13, %v14342_v34  ;;  %v3934_v20 = vmul.f32 -7.6471636e-13, %v10920_v42  ;;  %v3590_v28 = vfloor.f32 %v3526_v22  ;;  %4981 = vmatprep.mubr.f32.mxu0 %v14343_v24  ;;  %v3996_v19 = vadd.f32 1.6059044e-10, %v3932_v15 }
 0x466   : > { %v4044_v32 = vmul.f32 %v3980_v3, %v14338_v38  ;;  %v11699_v27 = vadd.f32 %v4803_v62, %v11576_v11  ;;  %v8022_v50 = vpack.c.bf16 %v4858_v61, %v4842_v55  ;;  %v11701_v23 = vsub.f32 %v3716_v10, %v3780_v43  ;;  %v14346_v11 = vld [vmem:[#allocation83_spill] sm:$0xff]  ;;  %v14347_v15 = vld [vmem:[#allocation78_spill] sm:$0xff]  ;;  %v11713_v61 = vld [vmem:[#allocation5 + $0x10] sm:$0xff] }
 0x467   : > { %v3982_v58 = vadd.f32 1.6059044e-10, %v3918_v53  ;;  %v3998_v59 = vadd.f32 1.6059044e-10, %v3934_v20  ;;  %v3654_v1 = vmul.f32 6.28125, %v3590_v28  ;;  %v4060_v51 = vmul.f32 %v3996_v19, %v10907_v4  ;;  %v14348_v3 = vld [vmem:[#allocation98_spill] sm:$0xff] }
 0x468   : > { %14345 = vst [vmem:[#allocation37_spill] sm:$0xff] %v11701_v23  ;;  %v4108_v63 = vadd.f32 -2.5052108e-08, %v4044_v32  ;;  %8023 = vmatprep.subr.bf16.mxu1 %v8022_v50  ;;  %v3782_v60 = vmul.f32 0.0019353072, %v3590_v28  ;;  %7901 = vmatmul.mubr.msk.f32.gmra.mrb[66].mxu0 %vm2674_vm2, %v11693_v49  ;;  %v11716_v10 = vadd.f32 %v4805_v18, %v11587_v54  ;;  %v14350_v28 = vld [vmem:[#allocation88_spill] sm:$0xff] }
 0x469   : > { %v4046_v25 = vmul.f32 %v3982_v58, %v14342_v34  ;;  %v4062_v12 = vmul.f32 %v3998_v59, %v10920_v42  ;;  %v3948_v62 = vmul.f32 -7.6471636e-13, %v14346_v11  ;;  %v3718_v55 = vsub.f32 %v3397_v52, %v3654_v1  ;;  %8025 = vmatpush1.bf16.msra.mxu1 %v8024_v30  ;;  %4987 = vmatprep.mubr.f32.mxu0 %v14343_v24  ;;  %v14352_v18 = vld [vmem:[#allocation92_spill] sm:$0xff] }
 0x46a   : > { %v4124_v22 = vadd.f32 -2.5052108e-08, %v4060_v51  ;;  %v4172_v43 = vmul.f32 %v4108_v63, %v14338_v38  ;;  %14349 = vst [vmem:[#allocation59_spill] sm:$0xff] %v11716_v10  ;;  %v3964_v19 = vmul.f32 -7.6471636e-13, %v14350_v28  ;;  %v11731_v51 = vmul.f32 %v11701_v23, %v11701_v23 }
 0x46b   : > { %v4110_v53 = vadd.f32 -2.5052108e-08, %v4046_v25  ;;  %v4126_v20 = vadd.f32 -2.5052108e-08, %v4062_v12  ;;  %v11719_v32 = vsub.f32 %v3718_v55, %v3782_v60  ;;  %v4012_v50 = vadd.f32 1.6059044e-10, %v3948_v62 }
 0x46c   : > { %v4188_v52 = vmul.f32 %v4124_v22, %v10907_v4  ;;  %v4236_v30 = vadd.f32 2.7557319e-06, %v4172_v43  ;;  %7904 = vmatmul.mubr.msk.f32.vlgmr.msra.gmra.mrb[64].mxu1 %vm2674_vm2, %v11680_v29  ;;  %7902 = vmatmul.mubr.msk.f32.gmra.mrb[68].mxu0 %vm2674_vm2, %v11713_v61  ;;  %v4028_v54 = vadd.f32 1.6059044e-10, %v3964_v19  ;;  %v3950_v1 = vmul.f32 -7.6471636e-13, %v14352_v18 }
 0x46d   : > { %14351 = vst [vmem:[#allocation52_spill] sm:$0xff] %v11719_v32  ;;  %v4174_v58 = vmul.f32 %v4110_v53, %v14342_v34  ;;  %v4190_v59 = vmul.f32 %v4126_v20, %v10920_v42  ;;  %5070 = vmatprep.mubr.f32.mxu1 %v14343_v24  ;;  %4993 = vmatprep.mubr.f32.mxu0 %v14343_v24  ;;  %v11736_v25 = vld [vmem:[#allocation5 + $0x18] sm:$0xff]  ;;  %v3966_v43 = vmul.f32 -7.6471636e-13, %v11053_v13 }
 0x46e   : > { %v4252_v63 = vadd.f32 2.7557319e-06, %v4188_v52  ;;  %v4300_v60 = vmul.f32 %v4236_v30, %v14338_v38  ;;  %v4076_v12 = vmul.f32 %v4012_v50, %v14346_v11  ;;  %v4092_v22 = vmul.f32 %v4028_v54, %v14350_v28 }
 0x46f   : > { %v4238_v62 = vadd.f32 2.7557319e-06, %v4174_v58  ;;  %v4254_v55 = vadd.f32 2.7557319e-06, %v4190_v59  ;;  %v11743_v53 = vmul.f32 %v11719_v32, %v11719_v32  ;;  %v4014_v59 = vadd.f32 1.6059044e-10, %v3950_v1 }
 0x470   : > { %v4316_v20 = vmul.f32 %v4252_v63, %v10907_v4  ;;  %v4364_v19 = vadd.f32 -0.0001984127, %v4300_v60  ;;  %v4140_v52 = vadd.f32 -2.5052108e-08, %v4076_v12  ;;  %7905 = vmatmul.mubr.msk.f32.gmra.mrb[66].mxu1 %vm2674_vm2, %v11693_v49  ;;  %7903 = vmatmul.mubr.msk.f32.gmra.mrb[70].mxu0 %vm2674_vm2, %v11736_v25  ;;  %v4156_v58 = vadd.f32 -2.5052108e-08, %v4092_v22 }
 0x471   : > { %v4302_v30 = vmul.f32 %v4238_v62, %v14342_v34  ;;  %v4318_v50 = vmul.f32 %v4254_v55, %v10920_v42  ;;  %5076 = vmatprep.mubr.f32.mxu1 %v14343_v24  ;;  %v4030_v60 = vadd.f32 1.6059044e-10, %v3966_v43  ;;  %5153 = vmatprep.mubr.f32.mxu0 %v14343_v24  ;;  %v4078_v55 = vmul.f32 %v4014_v59, %v14352_v18 }
 0x472   : > { %v4380_v54 = vadd.f32 -0.0001984127, %v4316_v20  ;;  %v4428_v46 = vmul.f32 %v4364_v19, %v14338_v38  ;;  %v4204_v63 = vmul.f32 %v4140_v52, %v14346_v11  ;;  %v4220_v62 = vmul.f32 %v4156_v58, %v14350_v28 }
 0x473   : > { %v4366_v12 = vadd.f32 -0.0001984127, %v4302_v30  ;;  %v4382_v37 = vadd.f32 -0.0001984127, %v4318_v50  ;;  %v4094_v20 = vmul.f32 %v4030_v60, %v11053_v13  ;;  %v4142_v52 = vadd.f32 -2.5052108e-08, %v4078_v55 }
 0x474   : > { %v4444_v32 = vmul.f32 %v4380_v54, %v10907_v4  ;;  %v4492_v22 = vadd.f32 0.008333334, %v4428_v46  ;;  %v4268_v1 = vadd.f32 2.7557319e-06, %v4204_v63  ;;  %7906 = vmatmul.mubr.msk.f32.gmra.mrb[68].mxu1 %vm2674_vm2, %v11713_v61  ;;  %v4284_v43 = vadd.f32 2.7557319e-06, %v4220_v62 }
 0x475   : > { %v4430_v19 = vmul.f32 %v4366_v12, %v14342_v34  ;;  %v4446_v23 = vmul.f32 %v4382_v37, %v10920_v42  ;;  %5082 = vmatprep.mubr.f32.mxu1 %v14343_v24  ;;  %v4158_v46 = vadd.f32 -2.5052108e-08, %v4094_v20  ;;  %v4206_v60 = vmul.f32 %v4142_v52, %v14352_v18 }
 0x476   : > { %v4508_v30 = vadd.f32 0.008333334, %v4444_v32  ;;  %v4556_v50 = vmul.f32 %v4492_v22, %v14338_v38  ;;  %v4332_v58 = vmul.f32 %v4268_v1, %v14346_v11  ;;  %v4348_v63 = vmul.f32 %v4284_v43, %v14350_v28  ;;  %v14353_v1 = vld [vmem:[#allocation60_spill] sm:$0xff] }
 0x477   : > { %v4494_v59 = vadd.f32 0.008333334, %v4430_v19  ;;  %v4510_v54 = vadd.f32 0.008333334, %v4446_v23  ;;  %v4222_v62 = vmul.f32 %v4158_v46, %v11053_v13  ;;  %v4270_v22 = vadd.f32 2.7557319e-06, %v4206_v60 }
 0x478   : > { %v4572_v37 = vmul.f32 %v4508_v30, %v10907_v4  ;;  %v4620_v12 = vadd.f32 -0.16666667, %v4556_v50  ;;  %v4396_v10 = vadd.f32 -0.0001984127, %v4332_v58  ;;  %7907 = vmatmul.mubr.msk.f32.gmra.mrb[70].mxu1 %vm2674_vm2, %v11736_v25  ;;  %v4412_v55 = vadd.f32 -0.0001984127, %v4348_v63 }
 0x479   : > { %v4558_v32 = vmul.f32 %v4494_v59, %v14342_v34  ;;  %v4574_v38 = vmul.f32 %v4510_v54, %v10920_v42  ;;  %v4286_v43 = vadd.f32 2.7557319e-06, %v4222_v62  ;;  %5242 = vmatprep.mubr.f32.mxu1 %v14343_v24  ;;  %v4334_v34 = vmul.f32 %v4270_v22, %v14352_v18  ;;  %v14354_v42 = vld [vmem:[#allocation85_spill] sm:$0xff]  ;;  %v14355_v58 = vld [vmem:[#allocation56_spill] sm:$0xff]  ;;  %v14356_v63 = vld [vmem:[#allocation75_spill] sm:$0xff] }
 0x47a   : > { %v4636_v23 = vadd.f32 -0.16666667, %v4572_v37  ;;  %v4748_v20 = vmul.f32 %v14353_v1, %v4620_v12  ;;  %v4460_v19 = vmul.f32 %v4396_v10, %v14346_v11  ;;  %v4476_v30 = vmul.f32 %v4412_v55, %v14350_v28  ;;  %v14357_v37 = vld [vmem:[#allocation82_spill] sm:$0xff]  ;;  %v14358_v1 = vld [vmem:[#allocation76_spill] sm:$0xff] }
 0x47b   : > { %v4622_v4 = vadd.f32 -0.16666667, %v4558_v32  ;;  %v4638_v52 = vadd.f32 -0.16666667, %v4574_v38  ;;  %v4350_v54 = vmul.f32 %v4286_v43, %v11053_v13  ;;  %v4398_v62 = vadd.f32 -0.0001984127, %v4334_v34 }
 0x47c   : > { %v4764_v50 = vmul.f32 %v14354_v42, %v4636_v23  ;;  %v4812_v46 = vadd.f32 %v4748_v20, %v14355_v58  ;;  %v4524_v59 = vadd.f32 0.008333334, %v4460_v19  ;;  %v4540_v12 = vadd.f32 0.008333334, %v4476_v30  ;;  %v14360_v23 = vld [vmem:[#allocation67_spill] sm:$0xff]  ;;  %v14361_v20 = vld [vmem:[#allocation80_spill] sm:$0xff] }
 0x47d   : > { %v4750_v60 = vmul.f32 %v14356_v63, %v4622_v4  ;;  %v4766_v10 = vmul.f32 %v14357_v37, %v4638_v52  ;;  %v4414_v55 = vadd.f32 -0.0001984127, %v4350_v54  ;;  %v8032_v22 = vpack.c.bf16 %v11131_v0, %v14359_v57  ;;  %v14362_v57 = vld [vmem:[#allocation79_spill] sm:$0xff] }
 0x47e   : > { %v4828_v32 = vadd.f32 %v4764_v50, %v14358_v1  ;;  %v4588_v38 = vmul.f32 %v4524_v59, %v14346_v11  ;;  %v4604_v43 = vmul.f32 %v4540_v12, %v14350_v28  ;;  %v4462_v4 = vmul.f32 %v4398_v62, %v14352_v18  ;;  %v14364_v37 = vld [vmem:[#allocation87_spill] sm:$0xff]  ;;  %v14366_v12 = vld [vmem:[#allocation36_spill] sm:$0xff] }
 0x47f   : > { %v4814_v42 = vadd.f32 %v4750_v60, %v14360_v23  ;;  %v4830_v19 = vadd.f32 %v4766_v10, %v14361_v20  ;;  %v4478_v30 = vmul.f32 %v4414_v55, %v11053_v13  ;;  %v8040_v34 = vpack.c.bf16 %v11158_v44, %v11114_v26  ;;  %v14363_v60 = vld [vmem:[#allocation16_spill] sm:$0xff]  ;;  %v14368_v23 = vld [vmem:[#allocation81_spill] sm:$0xff] }
 0x480   : > { %v8026_v58 = vpack.c.bf16 %v4828_v32, %v4812_v46  ;;  %v4652_v52 = vadd.f32 -0.16666667, %v4588_v38  ;;  %v4668_v50 = vadd.f32 -0.16666667, %v4604_v43  ;;  %v4526_v59 = vadd.f32 0.008333334, %v4462_v4 }
 0x481   : > { %v8034_v11 = vpack.c.bf16 %v4830_v19, %v4814_v42  ;;  %v3920_v0 = vmul.f32 -7.6471636e-13, %v11123_v56  ;;  %v4542_v63 = vadd.f32 0.008333334, %v4478_v30  ;;  %v3936_v28 = vmul.f32 -7.6471636e-13, %v14363_v60 }
 0x482   : > { %8027 = vmatprep.subr.bf16.mxu0 %v8026_v58  ;;  %v4780_v54 = vmul.f32 %v14362_v57, %v4652_v52  ;;  %v3922_v10 = vmul.f32 -7.6471636e-13, %v14364_v37  ;;  %v14365_v46 = vpack.c.bf16 %v10963_v9, %v14344_v41  ;;  %v4796_v62 = vmul.f32 %v14366_v12, %v4668_v50  ;;  %v14369_v4 = vld [vmem:[#allocation94_spill] sm:$0xff] }
 0x483   : > { %8035 = vmatprep.subr.bf16.mxu1 %v8034_v11  ;;  %v4590_v1 = vmul.f32 %v4526_v59, %v14352_v18  ;;  %v3984_v32 = vadd.f32 1.6059044e-10, %v3920_v0  ;;  %v3938_v38 = vmul.f32 -7.6471636e-13, %v11205_v17  ;;  %v14367_v55 = vpack.c.bf16 %v14348_v3, %v14347_v15  ;;  %v14370_v50 = vld [vmem:[#allocation18_spill] sm:$0xff]  ;;  %v14371_v59 = vld [vmem:[#allocation84_spill] sm:$0xff] }
 0x484   : > { %8029 = vmatpush1.bf16.msra.mxu0 %v14365_v46  ;;  %v4844_v42 = vadd.f32 %v4780_v54, %v14368_v23  ;;  %v4606_v20 = vmul.f32 %v4542_v63, %v11053_v13  ;;  %v4000_v19 = vadd.f32 1.6059044e-10, %v3936_v28  ;;  %v3986_v43 = vadd.f32 1.6059044e-10, %v3922_v10  ;;  %v14372_v54 = vld [vmem:[#allocation90_spill] sm:$0xff]  ;;  %v14373_v46 = vld [vmem:[#allocation32_spill] sm:$0xff] }
 0x485   : > { %8037 = vmatpush1.bf16.msra.mxu1 %v14367_v55  ;;  %v4860_v9 = vadd.f32 %v4796_v62, %v14369_v4  ;;  %v4654_v41 = vadd.f32 -0.16666667, %v4590_v1  ;;  %v4048_v58 = vmul.f32 %v3984_v32, %v11123_v56  ;;  %v4002_v52 = vadd.f32 1.6059044e-10, %v3938_v38  ;;  %v14374_v62 = vld [vmem:[#allocation86_spill] sm:$0xff]  ;;  %v14375_v55 = vld [vmem:[#allocation19_spill] sm:$0xff] }
 0x486   : > { %v4670_v18 = vadd.f32 -0.16666667, %v4606_v20  ;;  %v4064_v30 = vmul.f32 %v4000_v19, %v14363_v60  ;;  %v4050_v11 = vmul.f32 %v3986_v43, %v14364_v37  ;;  %v8044_v15 = vpack.c.bf16 %v11311_v36, %v14370_v50 }
 0x487   : > { %v8030_v3 = vpack.c.bf16 %v4860_v9, %v4844_v42  ;;  %v4782_v0 = vmul.f32 %v14371_v59, %v4654_v41  ;;  %v4112_v13 = vadd.f32 -2.5052108e-08, %v4048_v58  ;;  %v4066_v57 = vmul.f32 %v4002_v52, %v11205_v17  ;;  %v14376_v42 = vld [vmem:[#allocation97_spill] sm:$0xff]  ;;  %v14377_v52 = vld [vmem:[#allocation24_spill] sm:$0xff] }
 0x488   : > { %v4798_v63 = vmul.f32 %v14372_v54, %v4670_v18  ;;  %v4128_v28 = vadd.f32 -2.5052108e-08, %v4064_v30  ;;  %v4114_v10 = vadd.f32 -2.5052108e-08, %v4050_v11  ;;  %v8052_v12 = vpack.c.bf16 %v11324_v33, %v14373_v46  ;;  %v14396_v46 = vld [vmem:[#allocation71_spill] sm:$0xff] }
 0x489   : > { %8031 = vmatprep.subr.bf16.mxu0 %v8030_v3  ;;  %v4846_v1 = vadd.f32 %v4782_v0, %v14374_v62  ;;  %v4176_v32 = vmul.f32 %v4112_v13, %v11123_v56  ;;  %v4130_v38 = vadd.f32 -2.5052108e-08, %v4066_v57  ;;  %v3952_v23 = vmul.f32 -7.6471636e-13, %v14375_v55  ;;  %v14378_v57 = vld [vmem:[#allocation15_spill] sm:$0xff] }
 0x48a   : > { %v4862_v20 = vadd.f32 %v4798_v63, %v14376_v42  ;;  %8033 = vmatpush1.bf16.msra.mxu0 %v8032_v22  ;;  %v4192_v19 = vmul.f32 %v4128_v28, %v14363_v60  ;;  %v4178_v43 = vmul.f32 %v4114_v10, %v14364_v37  ;;  %v3968_v4 = vmul.f32 -7.6471636e-13, %v11334_v7 }
 0x48b   : > { %v4240_v9 = vadd.f32 2.7557319e-06, %v4176_v32  ;;  %v4194_v41 = vmul.f32 %v4130_v38, %v11205_v17  ;;  %v4016_v58 = vadd.f32 1.6059044e-10, %v3952_v23  ;;  %v3954_v18 = vmul.f32 -7.6471636e-13, %v14377_v52 }
 0x48c   : > { %v8038_v30 = vpack.c.bf16 %v4862_v20, %v4846_v1  ;;  %v4256_v11 = vadd.f32 2.7557319e-06, %v4192_v19  ;;  %v4242_v3 = vadd.f32 2.7557319e-06, %v4178_v43  ;;  %v4032_v59 = vadd.f32 1.6059044e-10, %v3968_v4 }
 0x48d   : > { %7908 = vmatmul.mubr.msk.f32.vlgmr.msra.gmra.mrb[72].mxu0 %vm2674_vm2, %v11680_v29  ;;  %v4304_v22 = vmul.f32 %v4240_v9, %v11123_v56  ;;  %v4258_v0 = vadd.f32 2.7557319e-06, %v4194_v41  ;;  %v4080_v13 = vmul.f32 %v4016_v58, %v14375_v55  ;;  %v3970_v54 = vmul.f32 -7.6471636e-13, %v14378_v57 }
 0x48e   : > { %8039 = vmatprep.subr.bf16.mxu1 %v8038_v30  ;;  %5159 = vmatprep.mubr.f32.mxu0 %v14343_v24  ;;  %v4320_v63 = vmul.f32 %v4256_v11, %v14363_v60  ;;  %v4306_v28 = vmul.f32 %v4242_v3, %v14364_v37  ;;  %v4096_v10 = vmul.f32 %v4032_v59, %v11334_v7  ;;  %v4018_v62 = vadd.f32 1.6059044e-10, %v3954_v18 }
 0x48f   : > { %8041 = vmatpush1.bf16.msra.mxu1 %v8040_v34  ;;  %v4368_v1 = vadd.f32 -0.0001984127, %v4304_v22  ;;  %v4322_v32 = vmul.f32 %v4258_v0, %v11205_v17  ;;  %v4144_v38 = vadd.f32 -2.5052108e-08, %v4080_v13  ;;  %v4034_v23 = vadd.f32 1.6059044e-10, %v3970_v54 }
 0x490   : > { %v4384_v42 = vadd.f32 -0.0001984127, %v4320_v63  ;;  %v4370_v20 = vadd.f32 -0.0001984127, %v4306_v28  ;;  %v4160_v19 = vadd.f32 -2.5052108e-08, %v4096_v10  ;;  %v4082_v43 = vmul.f32 %v4018_v62, %v14377_v52 }
 0x491   : > { %7909 = vmatmul.mubr.msk.f32.gmra.mrb[74].mxu0 %vm2674_vm2, %v11693_v49  ;;  %v4432_v4 = vmul.f32 %v4368_v1, %v11123_v56  ;;  %v4386_v9 = vadd.f32 -0.0001984127, %v4322_v32  ;;  %v4208_v41 = vmul.f32 %v4144_v38, %v14375_v55  ;;  %v4098_v26 = vmul.f32 %v4034_v23, %v14378_v57 }
 0x492   : > { %7912 = vmatmul.mubr.msk.f32.vlgmr.msra.gmra.mrb[72].mxu1 %vm2674_vm2, %v11680_v29  ;;  %v4448_v44 = vmul.f32 %v4384_v42, %v14363_v60  ;;  %v4434_v34 = vmul.f32 %v4370_v20, %v14364_v37  ;;  %5165 = vmatprep.mubr.f32.mxu0 %v14343_v24  ;;  %v4224_v58 = vmul.f32 %v4160_v19, %v11334_v7  ;;  %v4146_v18 = vadd.f32 -2.5052108e-08, %v4082_v43 }
 0x493   : > { %5248 = vmatprep.mubr.f32.mxu1 %v14343_v24  ;;  %v4496_v30 = vadd.f32 0.008333334, %v4432_v4  ;;  %v4450_v11 = vmul.f32 %v4386_v9, %v11205_v17  ;;  %v4272_v3 = vadd.f32 2.7557319e-06, %v4208_v41  ;;  %v4162_v59 = vadd.f32 -2.5052108e-08, %v4098_v26 }
 0x494   : > { %v4512_v22 = vadd.f32 0.008333334, %v4448_v44  ;;  %v4498_v0 = vadd.f32 0.008333334, %v4434_v34  ;;  %v4288_v13 = vadd.f32 2.7557319e-06, %v4224_v58  ;;  %v4210_v54 = vmul.f32 %v4146_v18, %v14377_v52 }
 0x495   : > { %v4560_v63 = vmul.f32 %v4496_v30, %v11123_v56  ;;  %v4514_v28 = vadd.f32 0.008333334, %v4450_v11  ;;  %7910 = vmatmul.mubr.msk.f32.gmra.mrb[76].mxu0 %vm2674_vm2, %v11713_v61  ;;  %v4336_v10 = vmul.f32 %v4272_v3, %v14375_v55  ;;  %v4226_v62 = vmul.f32 %v4162_v59, %v14378_v57  ;;  %v14381_v18 = vld [vmem:[#allocation27_spill] sm:$0xff]  ;;  %v14382_v59 = vld [vmem:[#allocation89_spill] sm:$0xff] }
 0x496   : > { %7913 = vmatmul.mubr.msk.f32.gmra.mrb[74].mxu1 %vm2674_vm2, %v11693_v49  ;;  %v4576_v1 = vmul.f32 %v4512_v22, %v14363_v60  ;;  %v4562_v32 = vmul.f32 %v4498_v0, %v14364_v37  ;;  %5171 = vmatprep.mubr.f32.mxu0 %v14343_v24  ;;  %v4352_v38 = vmul.f32 %v4288_v13, %v11334_v7  ;;  %v4274_v56 = vadd.f32 2.7557319e-06, %v4210_v54  ;;  %v14379_v60 = vld [vmem:[#allocation91_spill] sm:$0xff] }
 0x497   : > { %v4624_v23 = vadd.f32 -0.16666667, %v4560_v63  ;;  %v4578_v42 = vmul.f32 %v4514_v28, %v11205_v17  ;;  %5254 = vmatprep.mubr.f32.mxu1 %v14343_v24  ;;  %v4400_v20 = vadd.f32 -0.0001984127, %v4336_v10  ;;  %v4290_v19 = vadd.f32 2.7557319e-06, %v4226_v62 }
 0x498   : > { %v4640_v43 = vadd.f32 -0.16666667, %v4576_v1  ;;  %v4626_v4 = vadd.f32 -0.16666667, %v4562_v32  ;;  %v4416_v9 = vadd.f32 -0.0001984127, %v4352_v38  ;;  %v4338_v41 = vmul.f32 %v4274_v56, %v14377_v52 }
 0x499   : > { %v4752_v26 = vmul.f32 %v14379_v60, %v4624_v23  ;;  %v4642_v37 = vadd.f32 -0.16666667, %v4578_v42  ;;  %7911 = vmatmul.mubr.msk.f32.gmra.mrb[78].mxu0 %vm2674_vm2, %v11736_v25  ;;  %v4464_v44 = vmul.f32 %v4400_v20, %v14375_v55  ;;  %v4354_v34 = vmul.f32 %v4290_v19, %v14378_v57  ;;  %v14380_v17 = vld [vmem:[#allocation22_spill] sm:$0xff]  ;;  %v14383_v0 = vld [vmem:[#allocation95_spill] sm:$0xff]  ;;  %v14384_v28 = vld [vmem:[#allocation33_spill] sm:$0xff] }
 0x49a   : > { %v4768_v58 = vmul.f32 %v14380_v17, %v4640_v43  ;;  %v4754_v30 = vmul.f32 %v14381_v18, %v4626_v4  ;;  %7914 = vmatmul.mubr.msk.f32.gmra.mrb[76].mxu1 %vm2674_vm2, %v11713_v61  ;;  %v4480_v11 = vmul.f32 %v4416_v9, %v11334_v7  ;;  %v4402_v3 = vadd.f32 -0.0001984127, %v4338_v41  ;;  %5331 = vmatprep.mubr.f32.mxu0 %v14343_v24  ;;  %v14385_v62 = vld [vmem:[#allocation50_spill] sm:$0xff]  ;;  %v14388_v43 = vld [vmem:[#allocation77_spill] sm:$0xff] }
 0x49b   : > { %v4816_v22 = vadd.f32 %v4752_v26, %v14382_v59  ;;  %v4770_v13 = vmul.f32 %v14383_v0, %v4642_v37  ;;  %5260 = vmatprep.mubr.f32.mxu1 %v14343_v24  ;;  %v4528_v54 = vadd.f32 0.008333334, %v4464_v44  ;;  %v4418_v63 = vadd.f32 -0.0001984127, %v4354_v34  ;;  %v14386_v56 = vld [vmem:[#allocation42_spill] sm:$0xff]  ;;  %v14389_v26 = vld [vmem:[#allocation68_spill] sm:$0xff] }
 0x49c   : > { %v4832_v10 = vadd.f32 %v4768_v58, %v14384_v28  ;;  %v4818_v1 = vadd.f32 %v4754_v30, %v14385_v62  ;;  %v4544_v32 = vadd.f32 0.008333334, %v4480_v11  ;;  %v4466_v38 = vmul.f32 %v4402_v3, %v14377_v52  ;;  %v14387_v19 = vld [vmem:[#allocation14_spill] sm:$0xff]  ;;  %v14390_v11 = vld [vmem:[#allocation35_spill] sm:$0xff] }
 0x49d   : > { %v4834_v23 = vadd.f32 %v4770_v13, %v14386_v56  ;;  %v4592_v42 = vmul.f32 %v4528_v54, %v14375_v55  ;;  %v4482_v20 = vmul.f32 %v4418_v63, %v14378_v57  ;;  %v8048_v4 = vpack.c.bf16 %v14388_v43, %v14387_v19  ;;  %v14397_v43 = vld [vmem:[#allocation20_spill] sm:$0xff] }
 0x49e   : > { %v8042_v9 = vpack.c.bf16 %v4832_v10, %v4816_v22  ;;  %7915 = vmatmul.mubr.msk.f32.gmra.mrb[78].mxu1 %vm2674_vm2, %v11736_v25  ;;  %v4608_v41 = vmul.f32 %v4544_v32, %v11334_v7  ;;  %v4530_v60 = vadd.f32 0.008333334, %v4466_v38  ;;  %v8056_v37 = vpack.c.bf16 %v11465_v6, %v14389_v26  ;;  %v14391_v7 = vld [vmem:[#allocation96_spill] sm:$0xff]  ;;  %v14393_v10 = vld [vmem:[#allocation17_spill] sm:$0xff]  ;;  %v14398_v26 = vld [vmem:[#allocation39_spill] sm:$0xff] }
 0x49f   : > { %v8050_v44 = vpack.c.bf16 %v4834_v23, %v4818_v1  ;;  %v4656_v34 = vadd.f32 -0.16666667, %v4592_v42  ;;  %v4546_v17 = vadd.f32 0.008333334, %v4482_v20  ;;  %5420 = vmatprep.mubr.f32.mxu1 %v14343_v24  ;;  %v3924_v55 = vmul.f32 -7.6471636e-13, %v11420_v39 }
 0x4a0   : > { %8043 = vmatprep.subr.bf16.mxu0 %v8042_v9  ;;  %v4672_v58 = vadd.f32 -0.16666667, %v4608_v41  ;;  %v4594_v18 = vmul.f32 %v4530_v60, %v14377_v52  ;;  %v3940_v30 = vmul.f32 -7.6471636e-13, %v11518_v21  ;;  %v3926_v3 = vmul.f32 -7.6471636e-13, %v14390_v11 }
 0x4a1   : > { %8051 = vmatprep.subr.bf16.mxu1 %v8050_v44  ;;  %8045 = vmatpush1.bf16.msra.mxu0 %v8044_v15  ;;  %v4784_v6 = vmul.f32 %v14391_v7, %v4656_v34  ;;  %v4610_v59 = vmul.f32 %v4546_v17, %v14378_v57  ;;  %v3988_v22 = vadd.f32 1.6059044e-10, %v3924_v55  ;;  %v3942_v0 = vmul.f32 -7.6471636e-13, %v11548_v2  ;;  %v14392_v52 = vld [vmem:[#allocation30_spill] sm:$0xff]  ;;  %v14395_v32 = vld [vmem:[#allocation21_spill] sm:$0xff] }
 0x4a2   : > { %8053 = vmatpush1.bf16.msra.mxu1 %v8052_v12  ;;  %v4800_v13 = vmul.f32 %v14392_v52, %v4672_v58  ;;  %v4658_v54 = vadd.f32 -0.16666667, %v4594_v18  ;;  %v4004_v63 = vadd.f32 1.6059044e-10, %v3940_v30  ;;  %v3990_v28 = vadd.f32 1.6059044e-10, %v3926_v3 }
 0x4a3   : > { %v4848_v62 = vadd.f32 %v4784_v6, %v14393_v10  ;;  %v4674_v36 = vadd.f32 -0.16666667, %v4610_v59  ;;  %v4052_v50 = vmul.f32 %v3988_v22, %v11420_v39  ;;  %v4006_v15 = vadd.f32 1.6059044e-10, %v3942_v0  ;;  %v14394_v1 = vld [vmem:[#allocation34_spill] sm:$0xff] }
 0x4a4   : > { %v4864_v57 = vadd.f32 %v4800_v13, %v14394_v1  ;;  %v4786_v38 = vmul.f32 %v14395_v32, %v4658_v54  ;;  %v4068_v56 = vmul.f32 %v4004_v63, %v11518_v21  ;;  %v4054_v33 = vmul.f32 %v3990_v28, %v14390_v11 }
 0x4a5   : > { %v4802_v12 = vmul.f32 %v14396_v46, %v4674_v36  ;;  %v4116_v23 = vadd.f32 -2.5052108e-08, %v4052_v50  ;;  %v4070_v42 = vmul.f32 %v4006_v15, %v11548_v2  ;;  %v8060_v20 = vpack.c.bf16 %v11570_v14, %v11510_v31 }
 0x4a6   : > { %v8046_v19 = vpack.c.bf16 %v4864_v57, %v4848_v62  ;;  %v4850_v9 = vadd.f32 %v4786_v38, %v14397_v43  ;;  %v4132_v41 = vadd.f32 -2.5052108e-08, %v4068_v56  ;;  %v4118_v60 = vadd.f32 -2.5052108e-08, %v4054_v33 }
 0x4a7   : > { %v4866_v44 = vadd.f32 %v4802_v12, %v14398_v26  ;;  %v4180_v34 = vmul.f32 %v4116_v23, %v11420_v39  ;;  %v4134_v17 = vadd.f32 -2.5052108e-08, %v4070_v42  ;;  %v8068_v55 = vpack.c.bf16 %v11573_v48, %v11527_v5  ;;  %v12050_v48 = vpop.permute.xlu0 %4881 }
 0x4a8   : > { %8047 = vmatprep.subr.bf16.mxu0 %v8046_v19  ;;  %v4196_v58 = vmul.f32 %v4132_v41, %v11518_v21  ;;  %v4182_v18 = vmul.f32 %v4118_v60, %v14390_v11  ;;  %v3956_v30 = vmul.f32 -7.6471636e-13, %v11585_v45  ;;  %v3972_v3 = vmul.f32 -7.6471636e-13, %v11731_v51 }
 0x4a9   : > { %v8054_v7 = vpack.c.bf16 %v4866_v44, %v4850_v9  ;;  %8049 = vmatpush1.bf16.msra.mxu0 %v8048_v4  ;;  %v4244_v6 = vadd.f32 2.7557319e-06, %v4180_v34  ;;  %v4198_v59 = vmul.f32 %v4134_v17, %v11548_v2  ;;  %v3958_v22 = vmul.f32 -7.6471636e-13, %v11600_v16 }
 0x4aa   : > { %v4260_v0 = vadd.f32 2.7557319e-06, %v4196_v58  ;;  %v4246_v52 = vadd.f32 2.7557319e-06, %v4182_v18  ;;  %v4020_v13 = vadd.f32 1.6059044e-10, %v3956_v30  ;;  %v8064_v54 = vpack.c.bf16 %v11699_v27, %v11668_v8 }
 0x4ab   : > { %8055 = vmatprep.subr.bf16.mxu1 %v8054_v7  ;;  %v4308_v63 = vmul.f32 %v4244_v6, %v11420_v39  ;;  %v4262_v28 = vadd.f32 2.7557319e-06, %v4198_v59  ;;  %v4036_v10 = vadd.f32 1.6059044e-10, %v3972_v3  ;;  %v3974_v62 = vmul.f32 -7.6471636e-13, %v11743_v53 }
 0x4ac   : > { %8057 = vmatpush1.bf16.msra.mxu1 %v8056_v37  ;;  %7916 = vmatmul.mubr.msk.f32.vlgmr.msra.gmra.mrb[80].mxu0 %vm2674_vm2, %v11680_v29  ;;  %v4324_v4 = vmul.f32 %v4260_v0, %v11518_v21  ;;  %v4310_v36 = vmul.f32 %v4246_v52, %v14390_v11  ;;  %v4084_v50 = vmul.f32 %v4020_v13, %v11585_v45  ;;  %v4022_v15 = vadd.f32 1.6059044e-10, %v3958_v22 }
 0x4ad   : > { %5337 = vmatprep.mubr.f32.mxu0 %v14343_v24  ;;  %v4372_v1 = vadd.f32 -0.0001984127, %v4308_v63  ;;  %v4326_v57 = vmul.f32 %v4262_v28, %v11548_v2  ;;  %v4100_v32 = vmul.f32 %v4036_v10, %v11731_v51  ;;  %v4038_v38 = vadd.f32 1.6059044e-10, %v3974_v62 }
 0x4ae   : > { %v4388_v56 = vadd.f32 -0.0001984127, %v4324_v4  ;;  %v4374_v37 = vadd.f32 -0.0001984127, %v4310_v36  ;;  %v4148_v33 = vadd.f32 -2.5052108e-08, %v4084_v50  ;;  %v4086_v46 = vmul.f32 %v4022_v15, %v11600_v16 }
 0x4af   : > { %7920 = vmatmul.mubr.msk.f32.vlgmr.msra.gmra.mrb[80].mxu1 %vm2674_vm2, %v11680_v29  ;;  %v4436_v12 = vmul.f32 %v4372_v1, %v11420_v39  ;;  %v4390_v23 = vadd.f32 -0.0001984127, %v4326_v57  ;;  %v4164_v42 = vadd.f32 -2.5052108e-08, %v4100_v32  ;;  %v4102_v19 = vmul.f32 %v4038_v38, %v11743_v53  ;;  %v14399_v50 = vld [vmem:[#allocation31_spill] sm:$0xff]  ;;  %v14400_v38 = vld [vmem:[#allocation48_spill] sm:$0xff] }
 0x4b0   : > { %5426 = vmatprep.mubr.f32.mxu1 %v14343_v24  ;;  %7917 = vmatmul.mubr.msk.f32.gmra.mrb[82].mxu0 %vm2674_vm2, %v11693_v49  ;;  %v4452_v43 = vmul.f32 %v4388_v56, %v11518_v21  ;;  %v4438_v9 = vmul.f32 %v4374_v37, %v14390_v11  ;;  %v4212_v41 = vmul.f32 %v4148_v33, %v11585_v45  ;;  %v4150_v60 = vadd.f32 -2.5052108e-08, %v4086_v46  ;;  %v14401_v46 = vld [vmem:[#allocation23_spill] sm:$0xff] }
 0x4b1   : > { %v4500_v26 = vadd.f32 0.008333334, %v4436_v12  ;;  %v4454_v44 = vmul.f32 %v4390_v23, %v11548_v2  ;;  %5343 = vmatprep.mubr.f32.mxu0 %v14343_v24  ;;  %v4228_v34 = vmul.f32 %v4164_v42, %v11731_v51  ;;  %v4166_v17 = vadd.f32 -2.5052108e-08, %v4102_v19 }
 0x4b2   : > { %v4516_v58 = vadd.f32 0.008333334, %v4452_v43  ;;  %v4502_v18 = vadd.f32 0.008333334, %v4438_v9  ;;  %v4276_v30 = vadd.f32 2.7557319e-06, %v4212_v41  ;;  %v4214_v3 = vmul.f32 %v4150_v60, %v11600_v16 }
 0x4b3   : > { %7921 = vmatmul.mubr.msk.f32.gmra.mrb[82].mxu1 %vm2674_vm2, %v11693_v49  ;;  %v4564_v7 = vmul.f32 %v4500_v26, %v11420_v39  ;;  %v4518_v6 = vadd.f32 0.008333334, %v4454_v44  ;;  %v4292_v59 = vadd.f32 2.7557319e-06, %v4228_v34  ;;  %v4230_v22 = vmul.f32 %v4166_v17, %v11743_v53  ;;  %v14402_v43 = vld [vmem:[#allocation73_spill] sm:$0xff]  ;;  %v14403_v26 = vld [vmem:[#allocation47_spill] sm:$0xff] }
 0x4b4   : > { %v4580_v0 = vmul.f32 %v4516_v58, %v11518_v21  ;;  %v4566_v52 = vmul.f32 %v4502_v18, %v14390_v11  ;;  %5432 = vmatprep.mubr.f32.mxu1 %v14343_v24  ;;  %7918 = vmatmul.mubr.msk.f32.gmra.mrb[84].mxu0 %vm2674_vm2, %v11713_v61  ;;  %v4340_v13 = vmul.f32 %v4276_v30, %v11585_v45  ;;  %v4278_v63 = vadd.f32 2.7557319e-06, %v4214_v3  ;;  %v14404_v17 = vld [vmem:[#allocation28_spill] sm:$0xff]  ;;  %v14405_v58 = vld [vmem:[#allocation59_spill] sm:$0xff] }
 0x4b5   : > { %v4628_v28 = vadd.f32 -0.16666667, %v4564_v7  ;;  %v4582_v10 = vmul.f32 %v4518_v6, %v11548_v2  ;;  %5349 = vmatprep.mubr.f32.mxu0 %v14343_v24  ;;  %v4356_v39 = vmul.f32 %v4292_v59, %v11731_v51  ;;  %v4294_v62 = vadd.f32 2.7557319e-06, %v4230_v22  ;;  %v14406_v22 = vld [vmem:[#allocation40_spill] sm:$0xff] }
 0x4b6   : > { %v4644_v4 = vadd.f32 -0.16666667, %v4580_v0  ;;  %v4630_v21 = vadd.f32 -0.16666667, %v4566_v52  ;;  %v4404_v36 = vadd.f32 -0.0001984127, %v4340_v13  ;;  %v4342_v11 = vmul.f32 %v4278_v63, %v11600_v16 }
 0x4b7   : > { %v4756_v15 = vmul.f32 %v14399_v50, %v4628_v28  ;;  %v4646_v1 = vadd.f32 -0.16666667, %v4582_v10  ;;  %7922 = vmatmul.mubr.msk.f32.gmra.mrb[84].mxu1 %vm2674_vm2, %v11713_v61  ;;  %v4420_v57 = vadd.f32 -0.0001984127, %v4356_v39  ;;  %v4358_v32 = vmul.f32 %v4294_v62, %v11743_v53  ;;  %v14407_v63 = vld [vmem:[#allocation37_spill] sm:$0xff] }
 0x4b8   : > { %v4772_v2 = vmul.f32 %v11542_v40, %v4644_v4  ;;  %v4758_v56 = vmul.f32 %v14400_v38, %v4630_v21  ;;  %5438 = vmatprep.mubr.f32.mxu1 %v14343_v24  ;;  %7919 = vmatmul.mubr.msk.f32.gmra.mrb[86].mxu0 %vm2674_vm2, %v11736_v25  ;;  %v4468_v37 = vmul.f32 %v4404_v36, %v11585_v45  ;;  %v4406_v33 = vadd.f32 -0.0001984127, %v4342_v11  ;;  %v14408_v62 = vld [vmem:[#allocation41_spill] sm:$0xff]  ;;  %v14409_v36 = vld [vmem:[#allocation52_spill] sm:$0xff] }
 0x4b9   : > { %v4820_v12 = vadd.f32 %v4756_v15, %v14401_v46  ;;  %v4774_v23 = vmul.f32 %v11580_v47, %v4646_v1  ;;  %v4484_v42 = vmul.f32 %v4420_v57, %v11731_v51  ;;  %v4422_v19 = vadd.f32 -0.0001984127, %v4358_v32  ;;  %5509 = vmatprep.mubr.f32.mxu0 %v14343_v24 }
 0x4ba   : > { %v4836_v40 = vadd.f32 %v4772_v2, %v11503_v35  ;;  %v4822_v9 = vadd.f32 %v4758_v56, %v14402_v43  ;;  %v4532_v41 = vadd.f32 0.008333334, %v4468_v37  ;;  %v4470_v60 = vmul.f32 %v4406_v33, %v11600_v16 }
 0x4bb   : > { %v4838_v44 = vadd.f32 %v4774_v23, %v14403_v26  ;;  %7923 = vmatmul.mubr.msk.f32.gmra.mrb[86].mxu1 %vm2674_vm2, %v11736_v25  ;;  %v4548_v34 = vadd.f32 0.008333334, %v4484_v42  ;;  %v4486_v47 = vmul.f32 %v4422_v19, %v11743_v53  ;;  %v8072_v18 = vpack.c.bf16 %v14405_v58, %v14404_v17 }
 0x4bc   : > { %v8058_v30 = vpack.c.bf16 %v4836_v40, %v4820_v12  ;;  %v4596_v3 = vmul.f32 %v4532_v41, %v11585_v45  ;;  %v4534_v35 = vadd.f32 0.008333334, %v4470_v60  ;;  %5598 = vmatprep.mubr.f32.mxu1 %v14343_v24  ;;  %v4724_v0 = vmul.f32 %v11585_v45, %v14406_v22 }
 0x4bd   : > { %v8066_v7 = vpack.c.bf16 %v4838_v44, %v4822_v9  ;;  %v4612_v6 = vmul.f32 %v4548_v34, %v11731_v51  ;;  %v4550_v59 = vadd.f32 0.008333334, %v4486_v47  ;;  %v4740_v28 = vmul.f32 %v11731_v51, %v14407_v63 }
 0x4be   : > { %8059 = vmatprep.subr.bf16.mxu0 %v8058_v30  ;;  %v4660_v52 = vadd.f32 -0.16666667, %v4596_v3  ;;  %v4598_v13 = vmul.f32 %v4534_v35, %v11600_v16  ;;  %v4726_v4 = vmul.f32 %v11600_v16, %v14408_v62  ;;  %v4742_v51 = vmul.f32 %v11743_v53, %v14409_v36 }
 0x4bf   : > { %8067 = vmatprep.subr.bf16.mxu1 %v8066_v7  ;;  %8061 = vmatpush1.bf16.msra.mxu0 %v8060_v20  ;;  %v4676_v10 = vadd.f32 -0.16666667, %v4612_v6  ;;  %v4614_v39 = vmul.f32 %v4550_v59, %v11743_v53  ;;  %v12054_v53 = vpop.permute.xlu1 %4886 }
 0x4c0   : > { %8069 = vmatpush1.bf16.msra.mxu1 %v8068_v55  ;;  %v4788_v45 = vmul.f32 %v4724_v0, %v4660_v52  ;;  %v4662_v21 = vadd.f32 -0.16666667, %v4598_v13 }
 0x4c1   : > { %v4804_v11 = vmul.f32 %v4740_v28, %v4676_v10  ;;  %v4678_v50 = vadd.f32 -0.16666667, %v4614_v39 }
 0x4c2   : > { %v4790_v15 = vmul.f32 %v4726_v4, %v4662_v21  ;;  %v4852_v31 = vadd.f32 %v4788_v45, %v14406_v22  ;;  %v12073_v21 = vpop.permute.xlu0 %4891 }
 0x4c3   : > { %v4868_v14 = vadd.f32 %v4804_v11, %v14407_v63  ;;  %v4806_v20 = vmul.f32 %v4742_v51, %v4678_v50 }
 0x4c4   : > { %v4854_v16 = vadd.f32 %v4790_v15, %v14408_v62 }
 0x4c5   : > { %v8062_v1 = vpack.c.bf16 %v4868_v14, %v4852_v31  ;;  %v4870_v57 = vadd.f32 %v4806_v20, %v14409_v36 }
 0x4c7   : > { %8063 = vmatprep.subr.bf16.mxu0 %v8062_v1  ;;  %v8070_v5 = vpack.c.bf16 %v4870_v57, %v4854_v16 }
 0x4c8   : > { %8065 = vmatpush1.bf16.msra.mxu0 %v8064_v54 }
 0x4c9   : > { %8071 = vmatprep.subr.bf16.mxu1 %v8070_v5 }
 0x4ca   : > { %8073 = vmatpush1.bf16.msra.mxu1 %v8072_v18 }
 0x4cb   : > { %7924 = vmatmul.mubr.msk.f32.vlgmr.msra.gmra.mrb[88].mxu0 %vm2674_vm2, %v11680_v29 }
 0x4cc   : > { %5515 = vmatprep.mubr.f32.mxu0 %v14343_v24 }
 0x4cd   : > { %7928 = vmatmul.mubr.msk.f32.vlgmr.msra.gmra.mrb[88].mxu1 %vm2674_vm2, %v11680_v29 }
 0x4ce   : > { %5604 = vmatprep.mubr.f32.mxu1 %v14343_v24 }
 0x4cf   : > { %7925 = vmatmul.mubr.msk.f32.gmra.mrb[90].mxu0 %vm2674_vm2, %v11693_v49 }
 0x4d0   : > { %5521 = vmatprep.mubr.f32.mxu0 %v14343_v24 }
 0x4d1   : > { %7929 = vmatmul.mubr.msk.f32.gmra.mrb[90].mxu1 %vm2674_vm2, %v11693_v49 }
 0x4d2   : > { %5610 = vmatprep.mubr.f32.mxu1 %v14343_v24 }
 0x4d3   : > { %7926 = vmatmul.mubr.msk.f32.gmra.mrb[92].mxu0 %vm2674_vm2, %v11713_v61 }
 0x4d4   : > { %5527 = vmatprep.mubr.f32.mxu0 %v14343_v24 }
 0x4d5   : > { %7930 = vmatmul.mubr.msk.f32.gmra.mrb[92].mxu1 %vm2674_vm2, %v11713_v61 }
 0x4d6   : > { %5616 = vmatprep.mubr.f32.mxu1 %v14343_v24 }
 0x4d7   : > { %7927 = vmatmul.mubr.msk.f32.gmra.mrb[94].mxu0 %vm2674_vm2, %v11736_v25 }
 0x4d8   : > { %7169 = vmatprep.mubr.f32.mxu0 %v14343_v24 }
 0x4d9   : > { %7931 = vmatmul.mubr.msk.f32.gmra.mrb[94].mxu1 %vm2674_vm2, %v11736_v25 }
 0x4da   : > { %7240 = vmatprep.mubr.f32.mxu1 %v14343_v24 }
 0x537   : > { %v4977_v8 = vpop.f32.mrb[64].mxu0 }
 0x538   : > { %v4978_v29 = vadd.f32 %v4977_v8, %v12050_v48  ;;  %v4979_v49 = vpop.f32.mrb[65].mxu0 }
 0x539   : > { %v4980_v27 = vadd.f32 %v4979_v49, %v12050_v48 }
 0x53a   : > { %v5623_v61 = vmul.f32 0.15915494, %v4978_v29 }
 0x53b   : > { %v5624_v55 = vmul.f32 0.15915494, %v4980_v27  ;;  %v4983_v54 = vpop.f32.mrb[66].mxu0 }
 0x53c   : > { %v5687_v32 = vadd.f32 0.5, %v5623_v61  ;;  %v4984_v2 = vadd.f32 %v4983_v54, %v12054_v53  ;;  %v4985_v38 = vpop.f32.mrb[67].mxu0 }
 0x53d   : > { %v5688_v25 = vadd.f32 0.5, %v5624_v55  ;;  %v4986_v56 = vadd.f32 %v4985_v38, %v12054_v53 }
 0x53e   : > { %v5751_v37 = vfloor.f32 %v5687_v32  ;;  %v5639_v33 = vmul.f32 0.15915494, %v4984_v2 }
 0x53f   : > { %v5066_v46 = vpop.f32.mrb[64].mxu1  ;;  %v5752_v12 = vfloor.f32 %v5688_v25  ;;  %v5640_v23 = vmul.f32 0.15915494, %v4986_v56  ;;  %v4989_v42 = vpop.f32.mrb[68].mxu0 }
 0x540   : > { %v5815_v19 = vmul.f32 6.28125, %v5751_v37  ;;  %v5067_v40 = vadd.f32 %v5066_v46, %v12050_v48  ;;  %v5068_v43 = vpop.f32.mrb[65].mxu1  ;;  %v5703_v9 = vadd.f32 0.5, %v5639_v33  ;;  %v4991_v41 = vpop.f32.mrb[69].mxu0  ;;  %v5943_v47 = vmul.f32 0.0019353072, %v5751_v37 }
 0x541   : > { %v5816_v60 = vmul.f32 6.28125, %v5752_v12  ;;  %v5069_v26 = vadd.f32 %v5068_v43, %v12050_v48  ;;  %v5704_v44 = vadd.f32 0.5, %v5640_v23  ;;  %v5944_v30 = vmul.f32 0.0019353072, %v5752_v12 }
 0x542   : > { %v5879_v34 = vsub.f32 %v4978_v29, %v5815_v19  ;;  %v5625_v17 = vmul.f32 0.15915494, %v5067_v40  ;;  %v5767_v58 = vfloor.f32 %v5703_v9  ;;  %v12077_v20 = vadd.f32 %v4989_v42, %v12073_v21 }
 0x543   : > { %v5880_v18 = vsub.f32 %v4980_v27, %v5816_v60  ;;  %v5626_v3 = vmul.f32 0.15915494, %v5069_v26  ;;  %v5072_v35 = vpop.f32.mrb[66].mxu1  ;;  %v5768_v7 = vfloor.f32 %v5704_v44  ;;  %v12060_v6 = vpop.f32.mrb[70].mxu0  ;;  %v12080_v1 = vadd.f32 %v4991_v41, %v12073_v21 }
 0x544   : > { %v12062_v59 = vsub.f32 %v5879_v34, %v5943_v47  ;;  %v5689_v22 = vadd.f32 0.5, %v5625_v17  ;;  %v5831_v0 = vmul.f32 6.28125, %v5767_v58  ;;  %v5074_v52 = vpop.f32.mrb[67].mxu1  ;;  %v12064_v13 = vpop.f32.mrb[71].mxu0  ;;  %v5073_v10 = vadd.f32 %v5072_v35, %v12054_v53 }
 0x545   : > { %v12066_v63 = vsub.f32 %v5880_v18, %v5944_v30  ;;  %v5690_v28 = vadd.f32 0.5, %v5626_v3  ;;  %v5832_v39 = vmul.f32 6.28125, %v5768_v7  ;;  %v5959_v51 = vmul.f32 0.0019353072, %v5767_v58 }
 0x546   : > { %v12071_v62 = vmul.f32 %v12062_v59, %v12062_v59  ;;  %v5753_v4 = vfloor.f32 %v5689_v22  ;;  %v5895_v45 = vsub.f32 %v4984_v2, %v5831_v0  ;;  %v5641_v11 = vmul.f32 0.15915494, %v5073_v10 }
 0x547   : > { %14410 = vst [vmem:[#allocation46_spill] sm:$0xff] %v12066_v63  ;;  %v5754_v36 = vfloor.f32 %v5690_v28  ;;  %v5896_v50 = vsub.f32 %v4986_v56, %v5832_v39  ;;  %v5078_v15 = vpop.f32.mrb[68].mxu1  ;;  %v12086_v57 = vmul.f32 %v12066_v63, %v12066_v63  ;;  %v5960_v29 = vmul.f32 0.0019353072, %v5768_v7 }
 0x548   : > { %v6135_v31 = vmul.f32 -7.6471636e-13, %v12071_v62  ;;  %v5817_v14 = vmul.f32 6.28125, %v5753_v4  ;;  %v12082_v16 = vpop.f32.mrb[69].mxu1  ;;  %v12088_v8 = vsub.f32 %v5895_v45, %v5959_v51  ;;  %v5945_v61 = vmul.f32 0.0019353072, %v5753_v4 }
 0x549   : > { %14411 = vst [vmem:[#allocation58_spill] sm:$0xff] %v12086_v57  ;;  %v5818_v5 = vmul.f32 6.28125, %v5754_v36  ;;  %v5705_v55 = vadd.f32 0.5, %v5641_v11  ;;  %v12094_v2 = vsub.f32 %v5896_v50, %v5960_v29  ;;  %v12097_v38 = vadd.f32 %v5074_v52, %v12054_v53 }
 0x54a   : > { %v6199_v49 = vadd.f32 1.6059044e-10, %v6135_v31  ;;  %v5881_v27 = vsub.f32 %v5067_v40, %v5817_v14  ;;  %v12092_v32 = vmul.f32 %v12088_v8, %v12088_v8  ;;  %v5946_v33 = vmul.f32 0.0019353072, %v5754_v36 }
 0x54b   : > { %v5882_v54 = vsub.f32 %v5069_v26, %v5818_v5  ;;  %14412 = vst [vmem:[#allocation54_spill] sm:$0xff] %v12094_v2  ;;  %v12099_v25 = vpop.f32.mrb[70].mxu1  ;;  %v5769_v46 = vfloor.f32 %v5705_v55  ;;  %v12108_v23 = vmul.f32 %v12071_v62, %v12062_v59  ;;  %v5642_v19 = vmul.f32 0.15915494, %v12097_v38 }
 0x54c   : > { %v6263_v56 = vmul.f32 %v6199_v49, %v12071_v62  ;;  %v12102_v37 = vsub.f32 %v5881_v27, %v5945_v61  ;;  %v12104_v12 = vpop.f32.mrb[71].mxu1  ;;  %v6151_v42 = vmul.f32 -7.6471636e-13, %v12092_v32  ;;  %v5655_v40 = vmul.f32 0.15915494, %v12077_v20 }
 0x54d   : > { %v12119_v41 = vmul.f32 %v12086_v57, %v12066_v63  ;;  %v5833_v60 = vmul.f32 6.28125, %v5769_v46  ;;  %v12121_v26 = vsub.f32 %v5882_v54, %v5946_v33  ;;  %v12125_v34 = vmul.f32 %v12094_v2, %v12094_v2 }
 0x54e   : > { %v6327_v43 = vadd.f32 -2.5052108e-08, %v6263_v56  ;;  %v12115_v9 = vmul.f32 %v12102_v37, %v12102_v37  ;;  %v6215_v44 = vadd.f32 1.6059044e-10, %v6151_v42  ;;  %v5706_v47 = vadd.f32 0.5, %v5642_v19 }
 0x54f   : > { %14413 = vst [vmem:[#allocation65_spill] sm:$0xff] %v12119_v41  ;;  %14414 = vst [vmem:[#allocation43_spill] sm:$0xff] %v12121_v26  ;;  %v5897_v18 = vsub.f32 %v5073_v10, %v5833_v60  ;;  %v5961_v30 = vmul.f32 0.0019353072, %v5769_v46  ;;  %v12132_v35 = vmul.f32 %v12092_v32, %v12088_v8  ;;  %v5719_v22 = vadd.f32 0.5, %v5655_v40 }
 0x550   : > { %14415 = vst [vmem:[#allocation44_spill] sm:$0xff] %v12125_v34  ;;  %v6391_v17 = vmul.f32 %v6327_v43, %v12071_v62  ;;  %v6137_v58 = vmul.f32 -7.6471636e-13, %v12115_v9  ;;  %v6279_v3 = vmul.f32 %v6215_v44, %v12092_v32  ;;  %v5770_v7 = vfloor.f32 %v5706_v47 }
 0x551   : > { %v12134_v28 = vsub.f32 %v5897_v18, %v5961_v30  ;;  %v5079_v39 = vadd.f32 %v5078_v15, %v12073_v21  ;;  %v12139_v4 = vmul.f32 %v12121_v26, %v12121_v26  ;;  %v5783_v36 = vfloor.f32 %v5719_v22 }
 0x552   : > { %v6455_v0 = vadd.f32 2.7557319e-06, %v6391_v17  ;;  %v6201_v52 = vadd.f32 1.6059044e-10, %v6137_v58  ;;  %v6343_v10 = vadd.f32 -2.5052108e-08, %v6279_v3  ;;  %v12149_v14 = vmul.f32 %v12115_v9, %v12102_v37 }
 0x553   : > { %14416 = vst [vmem:[#allocation38_spill] sm:$0xff] %v12139_v4  ;;  %v5834_v45 = vmul.f32 6.28125, %v5770_v7  ;;  %v12145_v50 = vmul.f32 %v12134_v28, %v12134_v28  ;;  %v5657_v31 = vmul.f32 0.15915494, %v5079_v39  ;;  %v12154_v5 = vmul.f32 %v12125_v34, %v12094_v2 }
 0x554   : > { %v6519_v51 = vmul.f32 %v6455_v0, %v12071_v62  ;;  %v6265_v11 = vmul.f32 %v6201_v52, %v12115_v9  ;;  %v6407_v15 = vmul.f32 %v6343_v10, %v12092_v32  ;;  %v5847_v29 = vmul.f32 6.28125, %v5783_v36 }
 0x555   : > { %14417 = vst [vmem:[#allocation69_spill] sm:$0xff] %v12154_v5  ;;  %v6153_v61 = vmul.f32 -7.6471636e-13, %v12145_v50  ;;  %v5898_v55 = vsub.f32 %v12097_v38, %v5834_v45  ;;  %v5975_v33 = vmul.f32 0.0019353072, %v5783_v36  ;;  %v5721_v46 = vadd.f32 0.5, %v5657_v31 }
 0x556   : > { %v6583_v49 = vadd.f32 -0.0001984127, %v6519_v51  ;;  %v6329_v27 = vadd.f32 -2.5052108e-08, %v6265_v11  ;;  %v6471_v54 = vadd.f32 2.7557319e-06, %v6407_v15  ;;  %v5911_v56 = vsub.f32 %v12077_v20, %v5847_v29 }
 0x557   : > { %v6217_v40 = vadd.f32 1.6059044e-10, %v6153_v61  ;;  %v5656_v43 = vmul.f32 0.15915494, %v12080_v1  ;;  %v5962_v44 = vmul.f32 0.0019353072, %v5770_v7  ;;  %v5785_v17 = vfloor.f32 %v5721_v46 }
 0x558   : > { %v6647_v42 = vmul.f32 %v6583_v49, %v12071_v62  ;;  %v6393_v19 = vmul.f32 %v6329_v27, %v12115_v9  ;;  %v6535_v60 = vmul.f32 %v6471_v54, %v12092_v32  ;;  %v12163_v47 = vsub.f32 %v5911_v56, %v5975_v33 }
 0x559   : > { %v6281_v18 = vmul.f32 %v6217_v40, %v12145_v50  ;;  %v5720_v20 = vadd.f32 0.5, %v5656_v43  ;;  %v12166_v3 = vsub.f32 %v5898_v55, %v5962_v44  ;;  %v5849_v0 = vmul.f32 6.28125, %v5785_v17 }
 0x55a   : > { %v6711_v58 = vadd.f32 0.008333334, %v6647_v42  ;;  %v6457_v38 = vadd.f32 2.7557319e-06, %v6393_v19  ;;  %v6599_v30 = vadd.f32 -0.0001984127, %v6535_v60  ;;  %v12170_v22 = vmul.f32 %v12163_v47, %v12163_v47 }
 0x55b   : > { %14418 = vst [vmem:[#allocation55_spill] sm:$0xff] %v12166_v3  ;;  %v12176_v10 = vmul.f32 %v12139_v4, %v12121_v26  ;;  %v6345_v45 = vadd.f32 -2.5052108e-08, %v6281_v18  ;;  %v5913_v11 = vsub.f32 %v5079_v39, %v5849_v0  ;;  %v5977_v31 = vmul.f32 0.0019353072, %v5785_v17  ;;  %v12208_v18 = vpop.permute.xlu1 %4896 }
 0x55c   : > { %v6775_v52 = vmul.f32 %v6711_v58, %v12071_v62  ;;  %v6521_v7 = vmul.f32 %v6457_v38, %v12115_v9  ;;  %v6663_v36 = vmul.f32 %v6599_v30, %v12092_v32  ;;  %v6167_v51 = vmul.f32 -7.6471636e-13, %v12170_v22 }
 0x55d   : > { %14419 = vst [vmem:[#allocation74_spill] sm:$0xff] %v12176_v10  ;;  %v6409_v49 = vmul.f32 %v6345_v45, %v12145_v50  ;;  %v5784_v27 = vfloor.f32 %v5720_v20  ;;  %v12183_v62 = vmul.f32 %v12166_v3, %v12166_v3  ;;  %v12185_v54 = vsub.f32 %v5913_v11, %v5977_v31 }
 0x55e   : > { %v6839_v15 = vadd.f32 -0.16666667, %v6775_v52  ;;  %v6585_v29 = vadd.f32 -0.0001984127, %v6521_v7  ;;  %v6727_v61 = vadd.f32 0.008333334, %v6663_v36  ;;  %v12192_v42 = vadd.f32 %v12082_v16, %v12073_v21 }
 0x55f   : > { %14420 = vst [vmem:[#allocation61_spill] sm:$0xff] %v12183_v62  ;;  %v6231_v55 = vadd.f32 1.6059044e-10, %v6167_v51  ;;  %v6473_v46 = vadd.f32 2.7557319e-06, %v6409_v49  ;;  %v5848_v39 = vmul.f32 6.28125, %v5784_v27  ;;  %v12199_v43 = vmul.f32 %v12145_v50, %v12134_v28 }
 0x560   : > { %v12187_v56 = vpop.f32.mrb[72].mxu0  ;;  %v6649_v33 = vmul.f32 %v6585_v29, %v12115_v9  ;;  %v6791_v40 = vmul.f32 %v6727_v61, %v12092_v32  ;;  %v12204_v44 = vmul.f32 %v12185_v54, %v12185_v54  ;;  %v5976_v38 = vmul.f32 0.0019353072, %v5784_v27 }
 0x561   : > { %v12194_v19 = vpop.f32.mrb[73].mxu0  ;;  %v6295_v60 = vmul.f32 %v6231_v55, %v12170_v22  ;;  %v6537_v58 = vmul.f32 %v6473_v46, %v12145_v50  ;;  %v5912_v16 = vsub.f32 %v12080_v1, %v5848_v39  ;;  %v6967_v32 = vmul.f32 %v12108_v23, %v6839_v15 }
 0x562   : > { %v6713_v17 = vadd.f32 0.008333334, %v6649_v33  ;;  %v6855_v20 = vadd.f32 -0.16666667, %v6791_v40  ;;  %v6169_v0 = vmul.f32 -7.6471636e-13, %v12204_v44  ;;  %v12215_v45 = vmul.f32 %v12183_v62, %v12166_v3 }
 0x563   : > { %v6359_v30 = vadd.f32 -2.5052108e-08, %v6295_v60  ;;  %v6601_v7 = vadd.f32 -0.0001984127, %v6537_v58  ;;  %v5658_v36 = vmul.f32 0.15915494, %v12192_v42  ;;  %v12225_v23 = vmul.f32 %v12170_v22, %v12163_v47 }
 0x564   : > { %v6777_v52 = vmul.f32 %v6713_v17, %v12115_v9  ;;  %14421 = vst [vmem:[#allocation63_spill] sm:$0xff] %v12215_v45  ;;  %v12220_v1 = vpop.f32.mrb[74].mxu0  ;;  %v6233_v31 = vadd.f32 1.6059044e-10, %v6169_v0  ;;  %v4996_v9 = vadd.f32 %v12060_v6, %v12208_v18  ;;  %v6983_v49 = vmul.f32 %v12132_v35, %v6855_v20 }
 0x565   : > { %v12218_v51 = vpop.f32.mrb[72].mxu1  ;;  %v6423_v11 = vmul.f32 %v6359_v30, %v12170_v22  ;;  %v12231_v29 = vpop.f32.mrb[75].mxu0  ;;  %v6665_v27 = vmul.f32 %v6601_v7, %v12145_v50  ;;  %v12235_v61 = vsub.f32 %v5912_v16, %v5976_v38  ;;  %v5722_v55 = vadd.f32 0.5, %v5658_v36 }
 0x566   : > { %v12229_v15 = vpop.f32.mrb[73].mxu1  ;;  %v12238_v33 = vadd.f32 %v6967_v32, %v12062_v59  ;;  %v6297_v39 = vmul.f32 %v6233_v31, %v12204_v44  ;;  %v5671_v40 = vmul.f32 0.15915494, %v4996_v9  ;;  %v6841_v6 = vadd.f32 -0.16666667, %v6777_v52 }
 0x567   : > { %14422 = vst [vmem:[#allocation49_spill] sm:$0xff] %v12235_v61  ;;  %v6487_v46 = vadd.f32 2.7557319e-06, %v6423_v11  ;;  %v6729_v17 = vadd.f32 0.008333334, %v6665_v27  ;;  %v12245_v58 = vmul.f32 %v12204_v44, %v12185_v54  ;;  %v5786_v35 = vfloor.f32 %v5722_v55 }
 0x568   : > { %14423 = vst [vmem:[#allocation70_spill] sm:$0xff] %v12238_v33  ;;  %v12241_v60 = vpop.f32.mrb[76].mxu0  ;;  %v6361_v38 = vadd.f32 -2.5052108e-08, %v6297_v39  ;;  %v5735_v32 = vadd.f32 0.5, %v5671_v40  ;;  %v5085_v30 = vadd.f32 %v12099_v25, %v12208_v18  ;;  %v12257_v52 = vadd.f32 %v6983_v49, %v12088_v8 }
 0x569   : > { %v12247_v20 = vpop.f32.mrb[74].mxu1  ;;  %v12249_v16 = vpop.f32.mrb[77].mxu0  ;;  %v6551_v59 = vmul.f32 %v6487_v46, %v12170_v22  ;;  %v6793_v7 = vmul.f32 %v6729_v17, %v12145_v50  ;;  %v12262_v36 = vmul.f32 %v12235_v61, %v12235_v61  ;;  %v5850_v11 = vmul.f32 6.28125, %v5786_v35 }
 0x56a   : > { %v12254_v0 = vpop.f32.mrb[75].mxu1  ;;  %14424 = vst [vmem:[#allocation66_spill] sm:$0xff] %v12257_v52  ;;  %v6425_v27 = vmul.f32 %v6361_v38, %v12204_v44  ;;  %v5799_v55 = vfloor.f32 %v5735_v32  ;;  %v5673_v46 = vmul.f32 0.15915494, %v5085_v30  ;;  %v4998_v8 = vadd.f32 %v12064_v13, %v12208_v18 }
 0x56b   : > { %14425 = vst [vmem:[#allocation64_spill] sm:$0xff] %v12262_v36  ;;  %v6615_v31 = vadd.f32 -0.0001984127, %v6551_v59  ;;  %v6857_v25 = vadd.f32 -0.16666667, %v6793_v7  ;;  %v5914_v40 = vsub.f32 %v12192_v42, %v5850_v11  ;;  %v12272_v50 = vadd.f32 %v12104_v12, %v12208_v18 }
 0x56c   : > { %v12265_v39 = vpop.f32.mrb[78].mxu0  ;;  %v6489_v38 = vadd.f32 2.7557319e-06, %v6425_v27  ;;  %v5978_v32 = vmul.f32 0.0019353072, %v5786_v35  ;;  %v5863_v24 = vmul.f32 6.28125, %v5799_v55  ;;  %v6969_v42 = vmul.f32 %v12149_v14, %v6841_v6 }
 0x56d   : > { %v12274_v49 = vpop.f32.mrb[76].mxu1  ;;  %v12276_v17 = vpop.f32.mrb[79].mxu0  ;;  %v6679_v59 = vmul.f32 %v6615_v31, %v12170_v22  ;;  %v5991_v7 = vmul.f32 0.0019353072, %v5799_v55  ;;  %v5737_v11 = vadd.f32 0.5, %v5673_v46  ;;  %v6985_v45 = vmul.f32 %v12199_v43, %v6857_v25 }
 0x56e   : > { %v12279_v3 = vpop.f32.mrb[77].mxu1  ;;  %v5672_v13 = vmul.f32 0.15915494, %v4998_v8  ;;  %v6553_v12 = vmul.f32 %v6489_v38, %v12204_v44  ;;  %v5927_v52 = vsub.f32 %v4996_v9, %v5863_v24  ;;  %v5674_v33 = vmul.f32 0.15915494, %v12272_v50 }
 0x56f   : > { %v6743_v26 = vadd.f32 0.008333334, %v6679_v59  ;;  %v12285_v10 = vsub.f32 %v5914_v40, %v5978_v32  ;;  %v5801_v31 = vfloor.f32 %v5737_v11  ;;  %v12295_v24 = vadd.f32 %v6969_v42, %v12102_v37 }
 0x570   : > { %v5736_v35 = vadd.f32 0.5, %v5672_v13  ;;  %v6617_v14 = vadd.f32 -0.0001984127, %v6553_v12  ;;  %v12290_v6 = vsub.f32 %v5927_v52, %v5991_v7  ;;  %v5738_v55 = vadd.f32 0.5, %v5674_v33 }
 0x571   : > { %14426 = vst [vmem:[#allocation25_spill] sm:$0xff] %v12285_v10  ;;  %v12287_v27 = vpop.f32.mrb[78].mxu1  ;;  %v6807_v2 = vmul.f32 %v6743_v26, %v12170_v22  ;;  %14427 = vst [vmem:[#allocation29_spill] sm:$0xff] %v12295_v24  ;;  %v12299_v43 = vmul.f32 %v12262_v36, %v12235_v61  ;;  %v5865_v9 = vmul.f32 6.28125, %v5801_v31  ;;  %v5993_v52 = vmul.f32 0.0019353072, %v5801_v31 }
 0x572   : > { %v12292_v46 = vpop.f32.mrb[79].mxu1  ;;  %v5800_v25 = vfloor.f32 %v5736_v35  ;;  %v6681_v59 = vmul.f32 %v6617_v14, %v12204_v44  ;;  %v12304_v26 = vmul.f32 %v12290_v6, %v12290_v6  ;;  %v5802_v22 = vfloor.f32 %v5738_v55 }
 0x573   : > { %14428 = vst [vmem:[#allocation62_spill] sm:$0xff] %v12299_v43  ;;  %v6871_v40 = vadd.f32 -0.16666667, %v6807_v2  ;;  %v5929_v33 = vsub.f32 %v5085_v30, %v5865_v9  ;;  %v5156_v37 = vadd.f32 %v12187_v56, %v12050_v48  ;;  %v12309_v32 = vadd.f32 %v6985_v45, %v12134_v28 }
 0x574   : > { %v5864_v38 = vmul.f32 6.28125, %v5800_v25  ;;  %v6745_v42 = vadd.f32 0.008333334, %v6681_v59  ;;  %v12313_v2 = vmul.f32 %v12285_v10, %v12285_v10  ;;  %v6183_v7 = vmul.f32 -7.6471636e-13, %v12304_v26 }
 0x575   : > { %14429 = vst [vmem:[#allocation57_spill] sm:$0xff] %v12309_v32  ;;  %v12316_v11 = vsub.f32 %v5929_v33, %v5993_v52  ;;  %v5992_v12 = vmul.f32 0.0019353072, %v5800_v25  ;;  %v5866_v30 = vmul.f32 6.28125, %v5802_v22  ;;  %v6999_v31 = vmul.f32 %v12225_v23, %v6871_v40 }
 0x576   : > { %14430 = vst [vmem:[#allocation51_spill] sm:$0xff] %v12313_v2  ;;  %v5928_v13 = vsub.f32 %v4998_v8, %v5864_v38  ;;  %v6809_v35 = vmul.f32 %v6745_v42, %v12204_v44  ;;  %v6247_v56 = vadd.f32 1.6059044e-10, %v6183_v7  ;;  %v5627_v14 = vmul.f32 0.15915494, %v5156_v37 }
 0x577   : > { %v12322_v28 = vmul.f32 %v12316_v11, %v12316_v11  ;;  %v5930_v55 = vsub.f32 %v12272_v50, %v5866_v30  ;;  %v5245_v9 = vadd.f32 %v12218_v51, %v12050_v48  ;;  %v12332_v44 = vadd.f32 %v12194_v19, %v12050_v48 }
 0x578   : > { %v12324_v45 = vsub.f32 %v5928_v13, %v5992_v12  ;;  %v6873_v8 = vadd.f32 -0.16666667, %v6809_v35  ;;  %v6311_v25 = vmul.f32 %v6247_v56, %v12304_v26  ;;  %v5691_v59 = vadd.f32 0.5, %v5627_v14 }
 0x579   : > { %v12336_v23 = vmul.f32 %v12313_v2, %v12285_v10  ;;  %v12340_v40 = vmul.f32 %v12304_v26, %v12290_v6  ;;  %v6185_v50 = vmul.f32 -7.6471636e-13, %v12322_v28  ;;  %v5994_v33 = vmul.f32 0.0019353072, %v5802_v22 }
 0x57a   : > { %14431 = vst [vmem:[#allocation45_spill] sm:$0xff] %v12324_v45  ;;  %v12344_v51 = vadd.f32 %v6999_v31, %v12163_v47  ;;  %v6375_v52 = vadd.f32 -2.5052108e-08, %v6311_v25  ;;  %v5755_v38 = vfloor.f32 %v5691_v59  ;;  %v5629_v42 = vmul.f32 0.15915494, %v5245_v9 }
 0x57b   : > { %14432 = vst [vmem:[#allocation26_spill] sm:$0xff] %v12336_v23  ;;  %v6249_v7 = vadd.f32 1.6059044e-10, %v6185_v50  ;;  %v12348_v19 = vmul.f32 %v12322_v28, %v12316_v11  ;;  %v12352_v13 = vmul.f32 %v12324_v45, %v12324_v45  ;;  %v5628_v12 = vmul.f32 0.15915494, %v12332_v44 }
 0x57c   : > { %14433 = vst [vmem:[#allocation53_spill] sm:$0xff] %v12344_v51  ;;  %v7001_v30 = vmul.f32 %v12245_v58, %v6873_v8  ;;  %v6439_v22 = vmul.f32 %v6375_v52, %v12304_v26  ;;  %v12357_v47 = vsub.f32 %v5930_v55, %v5994_v33  ;;  %v5819_v31 = vmul.f32 6.28125, %v5755_v38 }
 0x57d   : > { %14434 = vst [vmem:[#allocation72_spill] sm:$0xff] %v12352_v13  ;;  %v6313_v35 = vmul.f32 %v6249_v7, %v12322_v28  ;;  %v5947_v56 = vmul.f32 0.0019353072, %v5755_v38  ;;  %v5693_v14 = vadd.f32 0.5, %v5629_v42  ;;  %v5692_v25 = vadd.f32 0.5, %v5628_v12 }
 0x57e   : > { %14435 = vst [vmem:[#allocation83_spill] sm:$0xff] %v12357_v47  ;;  %v6503_v50 = vadd.f32 2.7557319e-06, %v6439_v22  ;;  %v5883_v10 = vsub.f32 %v5156_v37, %v5819_v31  ;;  %v12364_v51 = vadd.f32 %v12229_v15, %v12050_v48  ;;  %v12368_v58 = vadd.f32 %v12220_v1, %v12054_v53 }
 0x57f   : > { %v12360_v59 = vpop.f32.mrb[80].mxu0  ;;  %v6377_v8 = vadd.f32 -2.5052108e-08, %v6313_v35  ;;  %v12374_v33 = vmul.f32 %v12352_v13, %v12324_v45  ;;  %v5757_v52 = vfloor.f32 %v5693_v14  ;;  %v5756_v38 = vfloor.f32 %v5692_v25 }
 0x580   : > { %v12370_v55 = vpop.f32.mrb[81].mxu0  ;;  %v6567_v42 = vmul.f32 %v6503_v50, %v12304_v26  ;;  %v12377_v37 = vsub.f32 %v5883_v10, %v5947_v56  ;;  %v5630_v15 = vmul.f32 0.15915494, %v12364_v51  ;;  %v5643_v7 = vmul.f32 0.15915494, %v12368_v58 }
 0x581   : > { %14436 = vst [vmem:[#allocation78_spill] sm:$0xff] %v12374_v33  ;;  %v6441_v1 = vmul.f32 %v6377_v8, %v12322_v28  ;;  %v12386_v22 = vmul.f32 %v12357_v47, %v12357_v47  ;;  %v5821_v31 = vmul.f32 6.28125, %v5757_v52  ;;  %v5820_v35 = vmul.f32 6.28125, %v5756_v38 }
 0x582   : > { %v12381_v12 = vpop.f32.mrb[80].mxu1  ;;  %v6631_v10 = vadd.f32 -0.0001984127, %v6567_v42  ;;  %v12394_v56 = vmul.f32 %v12377_v37, %v12377_v37  ;;  %v5949_v50 = vmul.f32 0.0019353072, %v5757_v52  ;;  %v5694_v23 = vadd.f32 0.5, %v5630_v15 }
 0x583   : > { %14437 = vst [vmem:[#allocation98_spill] sm:$0xff] %v12386_v22  ;;  %v12388_v14 = vpop.f32.mrb[81].mxu1  ;;  %v12390_v25 = vpop.f32.mrb[82].mxu0  ;;  %v6505_v8 = vadd.f32 2.7557319e-06, %v6441_v1  ;;  %v5885_v61 = vsub.f32 %v5245_v9, %v5821_v31  ;;  %v5884_v33 = vsub.f32 %v12332_v44, %v5820_v35  ;;  %v5707_v43 = vadd.f32 0.5, %v5643_v7 }
 0x584   : > { %v12396_v45 = vpop.f32.mrb[83].mxu0  ;;  %v12400_v2 = vadd.f32 %v7001_v30, %v12185_v54  ;;  %v6695_v13 = vmul.f32 %v6631_v10, %v12304_v26  ;;  %v6139_v42 = vmul.f32 -7.6471636e-13, %v12394_v56  ;;  %v5758_v36 = vfloor.f32 %v5694_v23 }
 0x585   : > { %v6569_v52 = vmul.f32 %v6505_v8, %v12322_v28  ;;  %v12407_v15 = vsub.f32 %v5885_v61, %v5949_v50  ;;  %v5948_v24 = vmul.f32 0.0019353072, %v5756_v38  ;;  %v5771_v1 = vfloor.f32 %v5707_v43 }
 0x586   : > { %14438 = vst [vmem:[#allocation88_spill] sm:$0xff] %v12400_v2  ;;  %v12404_v32 = vpop.f32.mrb[82].mxu1  ;;  %v6759_v7 = vadd.f32 0.008333334, %v6695_v13  ;;  %v12415_v54 = vmul.f32 %v12386_v22, %v12357_v47  ;;  %v6203_v30 = vadd.f32 1.6059044e-10, %v6139_v42  ;;  %v12427_v43 = vadd.f32 %v12247_v20, %v12054_v53 }
 0x587   : > { %v12409_v9 = vpop.f32.mrb[83].mxu1  ;;  %v12411_v44 = vpop.f32.mrb[84].mxu0  ;;  %v5822_v31 = vmul.f32 6.28125, %v5758_v36  ;;  %v6633_v35 = vadd.f32 -0.0001984127, %v6569_v52  ;;  %v12421_v61 = vmul.f32 %v12407_v15, %v12407_v15  ;;  %v12423_v38 = vsub.f32 %v5884_v33, %v5948_v24 }
 0x588   : > { %14439 = vst [vmem:[#allocation92_spill] sm:$0xff] %v12415_v54  ;;  %v12417_v23 = vpop.f32.mrb[85].mxu0  ;;  %v6823_v13 = vmul.f32 %v6759_v7, %v12304_v26  ;;  %v6267_v10 = vmul.f32 %v6203_v30, %v12394_v56  ;;  %v5835_v8 = vmul.f32 6.28125, %v5771_v1  ;;  %v5950_v2 = vmul.f32 0.0019353072, %v5758_v36 }
 0x589   : > { %14440 = vst [vmem:[#allocation60_spill] sm:$0xff] %v12423_v38  ;;  %v5886_v50 = vsub.f32 %v12364_v51, %v5822_v31  ;;  %v6697_v52 = vmul.f32 %v6633_v35, %v12322_v28  ;;  %v6141_v47 = vmul.f32 -7.6471636e-13, %v12421_v61  ;;  %v12438_v24 = vadd.f32 %v12231_v29, %v12054_v53 }
 0x58a   : > { %v12432_v42 = vpop.f32.mrb[84].mxu1  ;;  %v6887_v26 = vadd.f32 -0.16666667, %v6823_v13  ;;  %v6331_v7 = vadd.f32 -2.5052108e-08, %v6267_v10  ;;  %v12446_v51 = vmul.f32 %v12394_v56, %v12377_v37  ;;  %v5899_v30 = vsub.f32 %v12368_v58, %v5835_v8 }
 0x58b   : > { %v12440_v20 = vpop.f32.mrb[85].mxu1  ;;  %v12442_v33 = vpop.f32.mrb[86].mxu0  ;;  %v6761_v35 = vadd.f32 0.008333334, %v6697_v52  ;;  %v6205_v36 = vadd.f32 1.6059044e-10, %v6141_v47  ;;  %v12453_v29 = vmul.f32 %v12423_v38, %v12423_v38  ;;  %v12456_v63 = vsub.f32 %v5886_v50, %v5950_v2 }
 0x58c   : > { %v12449_v31 = vpop.f32.mrb[87].mxu0  ;;  %v5963_v54 = vmul.f32 0.0019353072, %v5771_v1  ;;  %v6395_v22 = vmul.f32 %v6331_v7, %v12394_v56  ;;  %v5645_v13 = vmul.f32 0.15915494, %v12427_v43  ;;  %v12461_v10 = vadd.f32 %v12254_v0, %v12054_v53 }
 0x58d   : > { %14441 = vst [vmem:[#allocation85_spill] sm:$0xff] %v12449_v31  ;;  %14442 = vst [vmem:[#allocation56_spill] sm:$0xff] %v12453_v29  ;;  %v6825_v8 = vmul.f32 %v6761_v35, %v12322_v28  ;;  %v6269_v47 = vmul.f32 %v6205_v36, %v12421_v61  ;;  %v5644_v1 = vmul.f32 0.15915494, %v12438_v24  ;;  %v7015_v2 = vmul.f32 %v12340_v40, %v6887_v26 }
 0x58e   : > { %14443 = vst [vmem:[#allocation75_spill] sm:$0xff] %v12456_v63  ;;  %v12463_v58 = vpop.f32.mrb[86].mxu1  ;;  %v12467_v52 = vsub.f32 %v5899_v30, %v5963_v54  ;;  %v6459_v50 = vadd.f32 2.7557319e-06, %v6395_v22  ;;  %v12475_v7 = vmul.f32 %v12421_v61, %v12407_v15  ;;  %v5709_v0 = vadd.f32 0.5, %v5645_v13 }
 0x58f   : > { %v12470_v5 = vpop.f32.mrb[87].mxu1  ;;  %v6889_v41 = vadd.f32 -0.16666667, %v6825_v8  ;;  %v6333_v62 = vadd.f32 -2.5052108e-08, %v6269_v47  ;;  %v5708_v54 = vadd.f32 0.5, %v5644_v1  ;;  %v12484_v35 = vmul.f32 %v12453_v29, %v12423_v38 }
 0x590   : > { %14444 = vst [vmem:[#allocation82_spill] sm:$0xff] %v12470_v5  ;;  %v12479_v28 = vmul.f32 %v12467_v52, %v12467_v52  ;;  %v6523_v30 = vmul.f32 %v6459_v50, %v12394_v56  ;;  %v5773_v40 = vfloor.f32 %v5709_v0  ;;  %v5646_v22 = vmul.f32 0.15915494, %v12461_v10 }
 0x591   : > { %14445 = vst [vmem:[#allocation76_spill] sm:$0xff] %v12484_v35  ;;  %v6397_v26 = vmul.f32 %v6333_v62, %v12421_v61  ;;  %v12490_v36 = vmul.f32 %v12456_v63, %v12456_v63  ;;  %v5168_v8 = vadd.f32 %v12241_v60, %v12073_v21  ;;  %v12496_v47 = vadd.f32 %v7015_v2, %v12290_v6 }
 0x592   : > { %v6155_v13 = vmul.f32 -7.6471636e-13, %v12479_v28  ;;  %v6587_v1 = vadd.f32 -0.0001984127, %v6523_v30  ;;  %v5837_v50 = vmul.f32 6.28125, %v5773_v40  ;;  %v5772_v38 = vfloor.f32 %v5708_v54 }
 0x593   : > { %14446 = vst [vmem:[#allocation93_spill] sm:$0xff] %v12490_v36  ;;  %14447 = vst [vmem:[#allocation67_spill] sm:$0xff] %v12496_v47  ;;  %v7017_v0 = vmul.f32 %v12348_v19, %v6889_v41  ;;  %v6461_v35 = vadd.f32 2.7557319e-06, %v6397_v26  ;;  %v5710_v62 = vadd.f32 0.5, %v5646_v22 }
 0x594   : > { %v6219_v29 = vadd.f32 1.6059044e-10, %v6155_v13  ;;  %v6651_v4 = vmul.f32 %v6587_v1, %v12394_v56  ;;  %v5901_v34 = vsub.f32 %v12427_v43, %v5837_v50  ;;  %v5965_v57 = vmul.f32 0.0019353072, %v5773_v40 }
 0x595   : > { %v5836_v5 = vmul.f32 6.28125, %v5772_v38  ;;  %v6525_v31 = vmul.f32 %v6461_v35, %v12421_v61  ;;  %v5774_v6 = vfloor.f32 %v5710_v62  ;;  %v5659_v2 = vmul.f32 0.15915494, %v5168_v8 }
 0x596   : > { %v6283_v60 = vmul.f32 %v6219_v29, %v12479_v28  ;;  %v6715_v30 = vadd.f32 0.008333334, %v6651_v4  ;;  %v12503_v47 = vsub.f32 %v5901_v34, %v5965_v57  ;;  %v5964_v19 = vmul.f32 0.0019353072, %v5772_v38 }
 0x597   : > { %v5900_v41 = vsub.f32 %v12438_v24, %v5836_v5  ;;  %v6589_v54 = vadd.f32 -0.0001984127, %v6525_v31  ;;  %v5838_v26 = vmul.f32 6.28125, %v5774_v6  ;;  %v5723_v13 = vadd.f32 0.5, %v5659_v2 }
 0x598   : > { %v6347_v22 = vadd.f32 -2.5052108e-08, %v6283_v60  ;;  %v6779_v43 = vmul.f32 %v6715_v30, %v12394_v56  ;;  %v12509_v40 = vmul.f32 %v12490_v36, %v12456_v63  ;;  %v12513_v29 = vmul.f32 %v12503_v47, %v12503_v47 }
 0x599   : > { %v12515_v4 = vsub.f32 %v5900_v41, %v5964_v19  ;;  %v6653_v57 = vmul.f32 %v6589_v54, %v12421_v61  ;;  %v12521_v5 = vmul.f32 %v12479_v28, %v12467_v52  ;;  %v5787_v38 = vfloor.f32 %v5723_v13 }
 0x59a   : > { %14448 = vst [vmem:[#allocation80_spill] sm:$0xff] %v12509_v40  ;;  %v6411_v34 = vmul.f32 %v6347_v22, %v12479_v28  ;;  %v6843_v56 = vadd.f32 -0.16666667, %v6779_v43  ;;  %v6157_v24 = vmul.f32 -7.6471636e-13, %v12513_v29  ;;  %v5902_v31 = vsub.f32 %v12461_v10, %v5838_v26 }
 0x59b   : > { %14449 = vst [vmem:[#allocation79_spill] sm:$0xff] %v12515_v4  ;;  %v5257_v35 = vadd.f32 %v12274_v49, %v12073_v21  ;;  %v12528_v1 = vadd.f32 %v7017_v0, %v12316_v11  ;;  %v6717_v50 = vadd.f32 0.008333334, %v6653_v57  ;;  %v5851_v60 = vmul.f32 6.28125, %v5787_v38 }
 0x59c   : > { %v6475_v62 = vadd.f32 2.7557319e-06, %v6411_v34  ;;  %v6221_v2 = vadd.f32 1.6059044e-10, %v6157_v24  ;;  %v12532_v30 = vmul.f32 %v12513_v29, %v12503_v47  ;;  %v12536_v41 = vmul.f32 %v12515_v4, %v12515_v4 }
 0x59d   : > { %14450 = vst [vmem:[#allocation16_spill] sm:$0xff] %v12528_v1  ;;  %v5966_v19 = vmul.f32 0.0019353072, %v5774_v6  ;;  %v6781_v49 = vmul.f32 %v6717_v50, %v12421_v61  ;;  %v5915_v0 = vsub.f32 %v5168_v8, %v5851_v60  ;;  %v5979_v54 = vmul.f32 0.0019353072, %v5787_v38 }
 0x59e   : > { %14451 = vst [vmem:[#allocation87_spill] sm:$0xff] %v12536_v41  ;;  %v12538_v10 = vpop.f32.mrb[88].mxu0  ;;  %v6539_v11 = vmul.f32 %v6475_v62, %v12479_v28  ;;  %v6285_v26 = vmul.f32 %v6221_v2, %v12513_v29  ;;  %v5661_v43 = vmul.f32 0.15915494, %v5257_v35  ;;  %v5170_v57 = vadd.f32 %v12249_v16, %v12073_v21 }
 0x59f   : > { %v12542_v22 = vpop.f32.mrb[89].mxu0  ;;  %v12545_v13 = vsub.f32 %v5902_v31, %v5966_v19  ;;  %v6971_v6 = vmul.f32 %v12446_v51, %v6843_v56  ;;  %v6845_v24 = vadd.f32 -0.16666667, %v6781_v49  ;;  %v12552_v50 = vsub.f32 %v5915_v0, %v5979_v54 }
 0x5a0   : > { %14452 = vst [vmem:[#allocation36_spill] sm:$0xff] %v12542_v22  ;;  %v12549_v34 = vpop.f32.mrb[88].mxu1  ;;  %v6603_v61 = vadd.f32 -0.0001984127, %v6539_v11  ;;  %v6349_v38 = vadd.f32 -2.5052108e-08, %v6285_v26  ;;  %v12558_v31 = vadd.f32 %v12279_v3, %v12073_v21  ;;  %v12565_v51 = vmul.f32 %v12536_v41, %v12515_v4 }
 0x5a1   : > { %14453 = vst [vmem:[#allocation81_spill] sm:$0xff] %v12545_v13  ;;  %v12554_v8 = vpop.f32.mrb[89].mxu1  ;;  %v5725_v62 = vadd.f32 0.5, %v5661_v43  ;;  %v5660_v60 = vmul.f32 0.15915494, %v5170_v57  ;;  %v12569_v56 = vmul.f32 %v12552_v50, %v12552_v50  ;;  %v12573_v19 = vadd.f32 %v12265_v39, %v12208_v18 }
 0x5a2   : > { %14454 = vst [vmem:[#allocation94_spill] sm:$0xff] %v12554_v8  ;;  %v12560_v2 = vpop.f32.mrb[90].mxu0  ;;  %v6667_v16 = vmul.f32 %v6603_v61, %v12479_v28  ;;  %14456 = vst [vmem:[#allocation84_spill] sm:$0xff] %v12565_v51  ;;  %v6413_v49 = vmul.f32 %v6349_v38, %v12513_v29  ;;  %v5662_v0 = vmul.f32 0.15915494, %v12558_v31  ;;  %v6973_v26 = vmul.f32 %v12475_v7, %v6845_v24 }
 0x5a3   : > { %14455 = vst [vmem:[#allocation18_spill] sm:$0xff] %v12560_v2  ;;  %v5789_v3 = vfloor.f32 %v5725_v62  ;;  %v5724_v11 = vadd.f32 0.5, %v5660_v60  ;;  %v12582_v61 = vmul.f32 %v12545_v13, %v12545_v13  ;;  %v6171_v63 = vmul.f32 -7.6471636e-13, %v12569_v56 }
 0x5a4   : > { %v12577_v54 = vpop.f32.mrb[90].mxu1  ;;  %v6731_v43 = vadd.f32 0.008333334, %v6667_v16  ;;  %v6477_v40 = vadd.f32 2.7557319e-06, %v6413_v49  ;;  %v5726_v60 = vadd.f32 0.5, %v5662_v0 }
 0x5a5   : > { %14457 = vst [vmem:[#allocation90_spill] sm:$0xff] %v12577_v54  ;;  %v5853_v39 = vmul.f32 6.28125, %v5789_v3  ;;  %v5981_v4 = vmul.f32 0.0019353072, %v5789_v3  ;;  %v5788_v51 = vfloor.f32 %v5724_v11  ;;  %v6235_v62 = vadd.f32 1.6059044e-10, %v6171_v63 }
 0x5a6   : > { %v6795_v38 = vmul.f32 %v6731_v43, %v12479_v28  ;;  %v5675_v36 = vmul.f32 0.15915494, %v12573_v19  ;;  %v6541_v41 = vmul.f32 %v6477_v40, %v12513_v29  ;;  %v5790_v2 = vfloor.f32 %v5726_v60 }
 0x5a7   : > { %v5917_v7 = vsub.f32 %v5257_v35, %v5853_v39  ;;  %v5852_v24 = vmul.f32 6.28125, %v5788_v51  ;;  %v5980_v16 = vmul.f32 0.0019353072, %v5788_v51  ;;  %v6299_v54 = vmul.f32 %v6235_v62, %v12569_v56 }
 0x5a8   : > { %v6859_v1 = vadd.f32 -0.16666667, %v6795_v38  ;;  %v5739_v8 = vadd.f32 0.5, %v5675_v36  ;;  %v6605_v49 = vadd.f32 -0.0001984127, %v6541_v41  ;;  %v5263_v63 = vadd.f32 %v12287_v27, %v12208_v18 }
 0x5a9   : > { %v12589_v22 = vsub.f32 %v5917_v7, %v5981_v4  ;;  %v5916_v3 = vsub.f32 %v5170_v57, %v5852_v24  ;;  %v12594_v28 = vadd.f32 %v6971_v6, %v12377_v37  ;;  %v6363_v35 = vadd.f32 -2.5052108e-08, %v6299_v54 }
 0x5aa   : > { %v6987_v40 = vmul.f32 %v12521_v5, %v6859_v1  ;;  %v5854_v11 = vmul.f32 6.28125, %v5790_v2  ;;  %v6669_v51 = vmul.f32 %v6605_v49, %v12513_v29  ;;  %v5803_v4 = vfloor.f32 %v5739_v8 }
 0x5ab   : > { %v12600_v0 = vmul.f32 %v12589_v22, %v12589_v22  ;;  %v12602_v36 = vsub.f32 %v5916_v3, %v5980_v16  ;;  %v12605_v41 = vadd.f32 %v6973_v26, %v12407_v15  ;;  %v12609_v27 = vmul.f32 %v12582_v61, %v12545_v13 }
 0x5ac   : > { %v6427_v37 = vmul.f32 %v6363_v35, %v12569_v56  ;;  %v5677_v5 = vmul.f32 0.15915494, %v5263_v63  ;;  %v6733_v1 = vadd.f32 0.008333334, %v6669_v51  ;;  %v6939_v57 = vmul.f32 %v12569_v56, %v12552_v50 }
 0x5ad   : > { %14458 = vst [vmem:[#allocation32_spill] sm:$0xff] %v12602_v36  ;;  %14459 = vst [vmem:[#allocation86_spill] sm:$0xff] %v12609_v27  ;;  %v6173_v6 = vmul.f32 -7.6471636e-13, %v12600_v0  ;;  %v5982_v54 = vmul.f32 0.0019353072, %v5790_v2  ;;  %v12616_v43 = vadd.f32 %v6987_v40, %v12467_v52  ;;  %v5918_v15 = vsub.f32 %v12558_v31, %v5854_v11 }
 0x5ae   : > { %v6491_v8 = vadd.f32 2.7557319e-06, %v6427_v37  ;;  %v5867_v26 = vmul.f32 6.28125, %v5803_v4  ;;  %v6797_v39 = vmul.f32 %v6733_v1, %v12513_v29  ;;  %v12622_v62 = vmul.f32 %v12602_v36, %v12602_v36 }
 0x5af   : > { %v6237_v38 = vadd.f32 1.6059044e-10, %v6173_v6  ;;  %v5741_v60 = vadd.f32 0.5, %v5677_v5  ;;  %v5995_v2 = vmul.f32 0.0019353072, %v5803_v4  ;;  %v5176_v52 = vadd.f32 %v12276_v17, %v12208_v18 }
 0x5b0   : > { %14460 = vst [vmem:[#allocation19_spill] sm:$0xff] %v12622_v62  ;;  %v6555_v7 = vmul.f32 %v6491_v8, %v12569_v56  ;;  %v5931_v24 = vsub.f32 %v12573_v19, %v5867_v26  ;;  %v12631_v31 = vmul.f32 %v12600_v0, %v12589_v22  ;;  %v12635_v49 = vadd.f32 %v12292_v46, %v12208_v18 }
 0x5b1   : > { %v6301_v16 = vmul.f32 %v6237_v38, %v12600_v0  ;;  %v5805_v29 = vfloor.f32 %v5741_v60  ;;  %v12637_v40 = vsub.f32 %v5918_v15, %v5982_v54  ;;  %v5676_v19 = vmul.f32 0.15915494, %v5176_v52 }
 0x5b2   : > { %v6619_v3 = vadd.f32 -0.0001984127, %v6555_v7  ;;  %v12639_v35 = vsub.f32 %v5931_v24, %v5995_v2  ;;  %v6861_v11 = vadd.f32 -0.16666667, %v6797_v39  ;;  %v12643_v17 = vmul.f32 %v12622_v62, %v12602_v36 }
 0x5b3   : > { %14461 = vst [vmem:[#allocation97_spill] sm:$0xff] %v12637_v40  ;;  %v6365_v51 = vadd.f32 -2.5052108e-08, %v6301_v16  ;;  %v5869_v4 = vmul.f32 6.28125, %v5805_v29  ;;  %v5740_v46 = vadd.f32 0.5, %v5676_v19  ;;  %v5334_v15 = vadd.f32 %v12360_v59, %v12050_v48 }
 0x5b4   : > { %14462 = vst [vmem:[#allocation24_spill] sm:$0xff] %v12643_v17  ;;  %v6683_v37 = vmul.f32 %v6619_v3, %v12569_v56  ;;  %v12648_v5 = vmul.f32 %v12639_v35, %v12639_v35  ;;  %v5678_v1 = vmul.f32 0.15915494, %v12635_v49  ;;  %v5997_v8 = vmul.f32 0.0019353072, %v5805_v29 }
 0x5b5   : > { %v6429_v6 = vmul.f32 %v6365_v51, %v12600_v0  ;;  %v5933_v54 = vsub.f32 %v5263_v63, %v5869_v4  ;;  %v12656_v39 = vmul.f32 %v12637_v40, %v12637_v40  ;;  %v5804_v60 = vfloor.f32 %v5740_v46 }
 0x5b6   : > { %v6747_v26 = vadd.f32 0.008333334, %v6683_v37  ;;  %v6187_v38 = vmul.f32 -7.6471636e-13, %v12648_v5  ;;  %v5742_v2 = vadd.f32 0.5, %v5678_v1  ;;  %v6989_v3 = vmul.f32 %v12532_v30, %v6861_v11 }
 0x5b7   : > { %14463 = vst [vmem:[#allocation15_spill] sm:$0xff] %v12656_v39  ;;  %v6493_v7 = vadd.f32 2.7557319e-06, %v6429_v6  ;;  %v12659_v24 = vsub.f32 %v5933_v54, %v5997_v8  ;;  %v5631_v16 = vmul.f32 0.15915494, %v5334_v15  ;;  %v5868_v19 = vmul.f32 6.28125, %v5804_v60 }
 0x5b8   : > { %v6811_v63 = vmul.f32 %v6747_v26, %v12569_v56  ;;  %v6251_v29 = vadd.f32 1.6059044e-10, %v6187_v38  ;;  %v5806_v4 = vfloor.f32 %v5742_v2  ;;  %v12671_v1 = vadd.f32 %v12381_v12, %v12050_v48 }
 0x5b9   : > { %v6557_v59 = vmul.f32 %v6493_v7, %v12600_v0  ;;  %v12666_v51 = vmul.f32 %v12659_v24, %v12659_v24  ;;  %v5695_v37 = vadd.f32 0.5, %v5631_v16  ;;  %v5932_v54 = vsub.f32 %v5176_v52, %v5868_v19 }
 0x5ba   : > { %v6875_v46 = vadd.f32 -0.16666667, %v6811_v63  ;;  %v6315_v6 = vmul.f32 %v6251_v29, %v12648_v5  ;;  %v12675_v56 = vmul.f32 %v12656_v39, %v12637_v40  ;;  %v5870_v8 = vmul.f32 6.28125, %v5806_v4 }
 0x5bb   : > { %v6621_v30 = vadd.f32 -0.0001984127, %v6557_v59  ;;  %v6189_v11 = vmul.f32 -7.6471636e-13, %v12666_v51  ;;  %v12679_v26 = vadd.f32 %v6989_v3, %v12503_v47  ;;  %v5996_v2 = vmul.f32 0.0019353072, %v5804_v60 }
 0x5bc   : > { %14464 = vst [vmem:[#allocation91_spill] sm:$0xff] %v12675_v56  ;;  %v7003_v38 = vmul.f32 %v6939_v57, %v6875_v46  ;;  %v6379_v7 = vadd.f32 -2.5052108e-08, %v6315_v6  ;;  %v12684_v12 = vmul.f32 %v12648_v5, %v12639_v35  ;;  %v5759_v63 = vfloor.f32 %v5695_v37  ;;  %v12694_v57 = vpop.f32.mrb[91].mxu0  ;;  %v12696_v60 = vpop.f32.mrb[91].mxu1 }
 0x5bd   : > { %14465 = vst [vmem:[#allocation22_spill] sm:$0xff] %v12679_v26  ;;  %v6685_v52 = vmul.f32 %v6621_v30, %v12600_v0  ;;  %v6253_v16 = vadd.f32 1.6059044e-10, %v6189_v11  ;;  %v12689_v19 = vmul.f32 %v12666_v51, %v12659_v24  ;;  %v12691_v59 = vsub.f32 %v5932_v54, %v5996_v2  ;;  %v12700_v30 = vpop.f32.mrb[92].mxu0 }
 0x5be   : > { %v6443_v29 = vmul.f32 %v6379_v7, %v12648_v5  ;;  %v5633_v47 = vmul.f32 0.15915494, %v12671_v1  ;;  %v5934_v6 = vsub.f32 %v12635_v49, %v5870_v8  ;;  %v5823_v37 = vmul.f32 6.28125, %v5759_v63 }
 0x5bf   : > { %14466 = vst [vmem:[#allocation27_spill] sm:$0xff] %v12691_v59  ;;  %v6749_v3 = vadd.f32 0.008333334, %v6685_v52  ;;  %v6317_v46 = vmul.f32 %v6253_v16, %v12666_v51  ;;  %v12703_v11 = vadd.f32 %v7003_v38, %v12552_v50  ;;  %v5998_v54 = vmul.f32 0.0019353072, %v5806_v4 }
 0x5c0   : > { %v6507_v7 = vadd.f32 2.7557319e-06, %v6443_v29  ;;  %v5697_v2 = vadd.f32 0.5, %v5633_v47  ;;  %v5887_v36 = vsub.f32 %v5334_v15, %v5823_v37  ;;  %v5951_v17 = vmul.f32 0.0019353072, %v5759_v63  ;;  %v12720_v15 = vpop.f32.mrb[92].mxu1 }
 0x5c1   : > { %14467 = vst [vmem:[#allocation89_spill] sm:$0xff] %v12703_v11  ;;  %v6813_v40 = vmul.f32 %v6749_v3, %v12600_v0  ;;  %v6381_v56 = vadd.f32 -2.5052108e-08, %v6317_v46  ;;  %v12709_v49 = vadd.f32 %v12370_v55, %v12050_v48  ;;  %v12713_v8 = vadd.f32 %v12388_v14, %v12050_v48  ;;  %v12726_v47 = vpop.f32.mrb[93].mxu0 }
 0x5c2   : > { %v6571_v52 = vmul.f32 %v6507_v7, %v12648_v5  ;;  %v5761_v13 = vfloor.f32 %v5697_v2  ;;  %v12716_v38 = vsub.f32 %v5934_v6, %v5998_v54  ;;  %v12718_v0 = vsub.f32 %v5887_v36, %v5951_v17  ;;  %v12750_v2 = vpop.f32.mrb[94].mxu0 }
 0x5c3   : > { %v6877_v50 = vadd.f32 -0.16666667, %v6813_v40  ;;  %v6445_v4 = vmul.f32 %v6381_v56, %v12666_v51  ;;  %v12724_v55 = vadd.f32 %v12390_v25, %v12054_v53  ;;  %v12730_v40 = vmul.f32 %v12691_v59, %v12691_v59  ;;  %v12737_v56 = vpop.f32.mrb[93].mxu1 }
 0x5c4   : > { %14468 = vst [vmem:[#allocation95_spill] sm:$0xff] %v12716_v38  ;;  %v6635_v16 = vadd.f32 -0.0001984127, %v6571_v52  ;;  %v5825_v63 = vmul.f32 6.28125, %v5761_v13  ;;  %v5953_v29 = vmul.f32 0.0019353072, %v5761_v13  ;;  %v12734_v36 = vmul.f32 %v12718_v0, %v12718_v0 }
 0x5c5   : > { %v6509_v14 = vadd.f32 2.7557319e-06, %v6445_v4  ;;  %v5632_v17 = vmul.f32 0.15915494, %v12709_v49  ;;  %v5634_v3 = vmul.f32 0.15915494, %v12713_v8  ;;  %v7005_v6 = vmul.f32 %v12631_v31, %v6877_v50 }
 0x5c6   : > { %v6699_v13 = vmul.f32 %v6635_v16, %v12648_v5  ;;  %v5889_v25 = vsub.f32 %v12671_v1, %v5825_v63  ;;  %v5647_v46 = vmul.f32 0.15915494, %v12724_v55  ;;  %v12747_v7 = vmul.f32 %v12716_v38, %v12716_v38  ;;  %v12752_v52 = vpop.f32.mrb[94].mxu1 }
 0x5c7   : > { %v6573_v37 = vmul.f32 %v6509_v14, %v12666_v51  ;;  %v6143_v54 = vmul.f32 -7.6471636e-13, %v12734_v36  ;;  %v5696_v16 = vadd.f32 0.5, %v5632_v17  ;;  %v5698_v63 = vadd.f32 0.5, %v5634_v3 }
 0x5c8   : > { %v6763_v4 = vadd.f32 0.008333334, %v6699_v13  ;;  %v12754_v1 = vsub.f32 %v5889_v25, %v5953_v29  ;;  %v5711_v31 = vadd.f32 0.5, %v5647_v46  ;;  %v12758_v50 = vadd.f32 %v12404_v32, %v12054_v53 }
 0x5c9   : > { %v6637_v11 = vadd.f32 -0.0001984127, %v6573_v37  ;;  %v6207_v27 = vadd.f32 1.6059044e-10, %v6143_v54  ;;  %v5760_v62 = vfloor.f32 %v5696_v16  ;;  %v5762_v26 = vfloor.f32 %v5698_v63 }
 0x5ca   : > { %v6827_v14 = vmul.f32 %v6763_v4, %v12648_v5  ;;  %v12763_v39 = vmul.f32 %v12754_v1, %v12754_v1  ;;  %v12768_v17 = vmul.f32 %v12730_v40, %v12691_v59  ;;  %v5775_v25 = vfloor.f32 %v5711_v31 }
 0x5cb   : > { %v6701_v29 = vmul.f32 %v6637_v11, %v12666_v51  ;;  %v6271_v13 = vmul.f32 %v6207_v27, %v12734_v36  ;;  %v12773_v32 = vmul.f32 %v12747_v7, %v12716_v38  ;;  %v5824_v46 = vmul.f32 6.28125, %v5760_v62 }
 0x5cc   : > { %14469 = vst [vmem:[#allocation33_spill] sm:$0xff] %v12768_v17  ;;  %v6891_v3 = vadd.f32 -0.16666667, %v6827_v14  ;;  %v6145_v5 = vmul.f32 -7.6471636e-13, %v12763_v39  ;;  %v12777_v37 = vadd.f32 %v7005_v6, %v12589_v22  ;;  %v5826_v31 = vmul.f32 6.28125, %v5762_v26 }
 0x5cd   : > { %14470 = vst [vmem:[#allocation50_spill] sm:$0xff] %v12773_v32  ;;  %v6765_v54 = vadd.f32 0.008333334, %v6701_v29  ;;  %v6335_v11 = vadd.f32 -2.5052108e-08, %v6271_v13  ;;  %v5888_v63 = vsub.f32 %v12709_v49, %v5824_v46  ;;  %v5839_v32 = vmul.f32 6.28125, %v5775_v25 }
 0x5ce   : > { %v5649_v4 = vmul.f32 0.15915494, %v12758_v50  ;;  %v6209_v16 = vadd.f32 1.6059044e-10, %v6145_v5  ;;  %v5952_v27 = vmul.f32 0.0019353072, %v5760_v62  ;;  %v12785_v59 = vadd.f32 %v12396_v45, %v12054_v53 }
 0x5cf   : > { %v6829_v14 = vmul.f32 %v6765_v54, %v12666_v51  ;;  %v6399_v38 = vmul.f32 %v6335_v11, %v12734_v36  ;;  %v7019_v22 = vmul.f32 %v12684_v12, %v6891_v3  ;;  %v12790_v6 = vmul.f32 %v12734_v36, %v12718_v0 }
 0x5d0   : > { %v6273_v29 = vmul.f32 %v6209_v16, %v12763_v39  ;;  %v12793_v49 = vsub.f32 %v5888_v63, %v5952_v27  ;;  %v5890_v51 = vsub.f32 %v12713_v8, %v5826_v31  ;;  %v5903_v13 = vsub.f32 %v12724_v55, %v5839_v32 }
 0x5d1   : > { %v6463_v62 = vadd.f32 2.7557319e-06, %v6399_v38  ;;  %v5967_v5 = vmul.f32 0.0019353072, %v5775_v25  ;;  %v6893_v46 = vadd.f32 -0.16666667, %v6829_v14  ;;  %v12806_v38 = vadd.f32 %v7019_v22, %v12639_v35 }
 0x5d2   : > { %14471 = vst [vmem:[#allocation42_spill] sm:$0xff] %v12793_v49  ;;  %v6337_v54 = vadd.f32 -2.5052108e-08, %v6273_v29  ;;  %v12799_v45 = vmul.f32 %v12793_v49, %v12793_v49  ;;  %v5713_v12 = vadd.f32 0.5, %v5649_v4  ;;  %v5954_v11 = vmul.f32 0.0019353072, %v5762_v26 }
 0x5d3   : > { %v6527_v3 = vmul.f32 %v6463_v62, %v12734_v36  ;;  %v12802_v17 = vsub.f32 %v5903_v13, %v5967_v5  ;;  %v5648_v16 = vmul.f32 0.15915494, %v12785_v59  ;;  %v12811_v55 = vmul.f32 %v12763_v39, %v12754_v1 }
 0x5d4   : > { %14472 = vst [vmem:[#allocation14_spill] sm:$0xff] %v12799_v45  ;;  %v6401_v8 = vmul.f32 %v6337_v54, %v12763_v39  ;;  %v5777_v25 = vfloor.f32 %v5713_v12  ;;  %v12813_v63 = vsub.f32 %v5890_v51, %v5954_v11  ;;  %v7021_v27 = vmul.f32 %v12689_v19, %v6893_v46 }
 0x5d5   : > { %v6591_v32 = vadd.f32 -0.0001984127, %v6527_v3  ;;  %v12817_v26 = vmul.f32 %v12802_v17, %v12802_v17  ;;  %v5712_v4 = vadd.f32 0.5, %v5648_v16  ;;  %v12822_v35 = vmul.f32 %v12799_v45, %v12793_v49 }
 0x5d6   : > { %14473 = vst [vmem:[#allocation77_spill] sm:$0xff] %v12813_v63  ;;  %v6465_v31 = vadd.f32 2.7557319e-06, %v6401_v8  ;;  %v5841_v14 = vmul.f32 6.28125, %v5777_v25  ;;  %v5969_v62 = vmul.f32 0.0019353072, %v5777_v25  ;;  %v5431_v54 = vadd.f32 %v12409_v9, %v12054_v53 }
 0x5d7   : > { %14474 = vst [vmem:[#allocation68_spill] sm:$0xff] %v12822_v35  ;;  %v6655_v22 = vmul.f32 %v6591_v32, %v12734_v36  ;;  %v6159_v29 = vmul.f32 -7.6471636e-13, %v12817_v26  ;;  %v5776_v51 = vfloor.f32 %v5712_v4  ;;  %v5346_v19 = vadd.f32 %v12411_v44, %v12073_v21 }
 0x5d8   : > { %v6529_v13 = vmul.f32 %v6465_v31, %v12763_v39  ;;  %v5905_v5 = vsub.f32 %v12758_v50, %v5841_v14  ;;  %v12834_v12 = vmul.f32 %v12813_v63, %v12813_v63  ;;  %v12837_v16 = vadd.f32 %v7021_v27, %v12659_v24 }
 0x5d9   : > { %v6719_v46 = vadd.f32 0.008333334, %v6655_v22  ;;  %v6223_v3 = vadd.f32 1.6059044e-10, %v6159_v29  ;;  %v5840_v11 = vmul.f32 6.28125, %v5776_v51  ;;  %v12845_v44 = vadd.f32 %v12432_v42, %v12073_v21 }
 0x5da   : > { %14475 = vst [vmem:[#allocation35_spill] sm:$0xff] %v12834_v12  ;;  %v6593_v8 = vadd.f32 -0.0001984127, %v6529_v13  ;;  %v12839_v25 = vsub.f32 %v5905_v5, %v5969_v62  ;;  %v5650_v50 = vmul.f32 0.15915494, %v5431_v54 }
 0x5db   : > { %v6783_v32 = vmul.f32 %v6719_v46, %v12734_v36  ;;  %v6287_v9 = vmul.f32 %v6223_v3, %v12817_v26  ;;  %v5663_v4 = vmul.f32 0.15915494, %v5346_v19  ;;  %v5904_v24 = vsub.f32 %v12785_v59, %v5840_v11 }
 0x5dc   : > { %v6657_v31 = vmul.f32 %v6593_v8, %v12763_v39  ;;  %v12850_v14 = vmul.f32 %v12839_v25, %v12839_v25  ;;  %v5714_v27 = vadd.f32 0.5, %v5650_v50  ;;  %v12855_v36 = vmul.f32 %v12834_v12, %v12813_v63 }
 0x5dd   : > { %v6847_v22 = vadd.f32 -0.16666667, %v6783_v32  ;;  %v6351_v29 = vadd.f32 -2.5052108e-08, %v6287_v9  ;;  %v5727_v62 = vadd.f32 0.5, %v5663_v4  ;;  %v12861_v8 = vmul.f32 %v12817_v26, %v12802_v17 }
 0x5de   : > { %14476 = vst [vmem:[#allocation96_spill] sm:$0xff] %v12855_v36  ;;  %v6721_v13 = vadd.f32 0.008333334, %v6657_v31  ;;  %v6161_v42 = vmul.f32 -7.6471636e-13, %v12850_v14  ;;  %v5778_v46 = vfloor.f32 %v5714_v27 }
 0x5df   : > { %v5968_v5 = vmul.f32 0.0019353072, %v5776_v51  ;;  %v6415_v3 = vmul.f32 %v6351_v29, %v12817_v26  ;;  %v5791_v59 = vfloor.f32 %v5727_v62  ;;  %v5665_v11 = vmul.f32 0.15915494, %v12845_v44 }
 0x5e0   : > { %v6785_v50 = vmul.f32 %v6721_v13, %v12763_v39  ;;  %v6225_v32 = vadd.f32 1.6059044e-10, %v6161_v42  ;;  %v5842_v9 = vmul.f32 6.28125, %v5778_v46  ;;  %v6975_v4 = vmul.f32 %v12790_v6, %v6847_v22 }
 0x5e1   : > { %v12865_v63 = vsub.f32 %v5904_v24, %v5968_v5  ;;  %v6479_v31 = vadd.f32 2.7557319e-06, %v6415_v3  ;;  %v5970_v51 = vmul.f32 0.0019353072, %v5778_v46  ;;  %v5855_v27 = vmul.f32 6.28125, %v5791_v59 }
 0x5e2   : > { %v6849_v36 = vadd.f32 -0.16666667, %v6785_v50  ;;  %v6289_v29 = vmul.f32 %v6225_v32, %v12850_v14  ;;  %v5906_v49 = vsub.f32 %v5431_v54, %v5842_v9  ;;  %v5983_v35 = vmul.f32 0.0019353072, %v5791_v59 }
 0x5e3   : > { %14477 = vst [vmem:[#allocation30_spill] sm:$0xff] %v12865_v63  ;;  %v6543_v62 = vmul.f32 %v6479_v31, %v12817_v26  ;;  %v5919_v12 = vsub.f32 %v5346_v19, %v5855_v27  ;;  %v5729_v45 = vadd.f32 0.5, %v5665_v11  ;;  %v5348_v39 = vadd.f32 %v12417_v23, %v12073_v21 }
 0x5e4   : > { %v6353_v24 = vadd.f32 -2.5052108e-08, %v6289_v29  ;;  %v12874_v13 = vmul.f32 %v12850_v14, %v12839_v25  ;;  %v12876_v6 = vsub.f32 %v5906_v49, %v5970_v51  ;;  %v5437_v22 = vadd.f32 %v12440_v20, %v12073_v21 }
 0x5e5   : > { %v6607_v42 = vadd.f32 -0.0001984127, %v6543_v62  ;;  %v12880_v54 = vsub.f32 %v5919_v12, %v5983_v35  ;;  %v5793_v5 = vfloor.f32 %v5729_v45  ;;  %v5664_v46 = vmul.f32 0.15915494, %v5348_v39 }
 0x5e6   : > { %14478 = vst [vmem:[#allocation17_spill] sm:$0xff] %v12876_v6  ;;  %v12883_v19 = vadd.f32 %v6975_v4, %v12718_v0  ;;  %v6417_v23 = vmul.f32 %v6353_v24, %v12850_v14  ;;  %v12888_v3 = vmul.f32 %v12865_v63, %v12865_v63  ;;  %v5666_v59 = vmul.f32 0.15915494, %v5437_v22 }
 0x5e7   : > { %v6977_v49 = vmul.f32 %v12811_v55, %v6849_v36  ;;  %v6671_v11 = vmul.f32 %v6607_v42, %v12817_v26  ;;  %v12894_v20 = vmul.f32 %v12880_v54, %v12880_v54  ;;  %v5857_v45 = vmul.f32 6.28125, %v5793_v5 }
 0x5e8   : > { %14479 = vst [vmem:[#allocation34_spill] sm:$0xff] %v12883_v19  ;;  %v6481_v35 = vadd.f32 2.7557319e-06, %v6417_v23  ;;  %v12898_v0 = vmul.f32 %v12876_v6, %v12876_v6  ;;  %v5728_v12 = vadd.f32 0.5, %v5664_v46  ;;  %v5730_v50 = vadd.f32 0.5, %v5666_v59  ;;  %v12912_v46 = vpop.f32.mrb[95].mxu0 }
 0x5e9   : > { %v6735_v32 = vadd.f32 0.008333334, %v6671_v11  ;;  %v6175_v9 = vmul.f32 -7.6471636e-13, %v12894_v20  ;;  %v5921_v4 = vsub.f32 %v12845_v44, %v5857_v45  ;;  %v5985_v55 = vmul.f32 0.0019353072, %v5793_v5 }
 0x5ea   : > { %14480 = vst [vmem:[#allocation21_spill] sm:$0xff] %v12898_v0  ;;  %v6545_v36 = vmul.f32 %v6481_v35, %v12850_v14  ;;  %v5792_v31 = vfloor.f32 %v5728_v12  ;;  %v5794_v51 = vfloor.f32 %v5730_v50  ;;  %v5352_v27 = vadd.f32 %v12442_v33, %v12208_v18 }
 0x5eb   : > { %v6799_v29 = vmul.f32 %v6735_v32, %v12817_v26  ;;  %v6239_v62 = vadd.f32 1.6059044e-10, %v6175_v9  ;;  %v12906_v24 = vsub.f32 %v5921_v4, %v5985_v55  ;;  %v12910_v42 = vadd.f32 %v12463_v58, %v12208_v18 }
 0x5ec   : > { %v6609_v44 = vadd.f32 -0.0001984127, %v6545_v36  ;;  %v5856_v5 = vmul.f32 6.28125, %v5792_v31  ;;  %v5984_v23 = vmul.f32 0.0019353072, %v5792_v31  ;;  %v5858_v59 = vmul.f32 6.28125, %v5794_v51 }
 0x5ed   : > { %v6863_v11 = vadd.f32 -0.16666667, %v6799_v29  ;;  %v6303_v45 = vmul.f32 %v6239_v62, %v12894_v20  ;;  %v12917_v33 = vmul.f32 %v12906_v24, %v12906_v24  ;;  %v5986_v26 = vmul.f32 0.0019353072, %v5794_v51  ;;  %v12928_v36 = vpop.f32.mrb[95].mxu1 }
 0x5ee   : > { %v6673_v35 = vmul.f32 %v6609_v44, %v12850_v14  ;;  %v5920_v12 = vsub.f32 %v5348_v39, %v5856_v5  ;;  %v5922_v50 = vsub.f32 %v5437_v22, %v5858_v59  ;;  %v5679_v58 = vmul.f32 0.15915494, %v5352_v27 }
 0x5ef   : > { %v12921_v32 = vadd.f32 %v6977_v49, %v12754_v1  ;;  %v12925_v9 = vmul.f32 %v12888_v3, %v12865_v63  ;;  %v6367_v4 = vadd.f32 -2.5052108e-08, %v6303_v45  ;;  %v6177_v55 = vmul.f32 -7.6471636e-13, %v12917_v33 }
 0x5f0   : > { %v6991_v31 = vmul.f32 %v12861_v8, %v6863_v11  ;;  %v6737_v51 = vadd.f32 0.008333334, %v6673_v35  ;;  %v12931_v29 = vsub.f32 %v5920_v12, %v5984_v23  ;;  %v5743_v39 = vadd.f32 0.5, %v5679_v58 }
 0x5f1   : > { %14481 = vst [vmem:[#allocation71_spill] sm:$0xff] %v12921_v32  ;;  %14482 = vst [vmem:[#allocation20_spill] sm:$0xff] %v12925_v9  ;;  %v6431_v22 = vmul.f32 %v6367_v4, %v12894_v20  ;;  %v6241_v62 = vadd.f32 1.6059044e-10, %v6177_v55  ;;  %v12934_v1 = vsub.f32 %v5922_v50, %v5986_v26  ;;  %v5681_v49 = vmul.f32 0.15915494, %v12910_v42 }
 0x5f2   : > { %14483 = vst [vmem:[#allocation39_spill] sm:$0xff] %v12931_v29  ;;  %v6801_v44 = vmul.f32 %v6737_v51, %v12850_v14  ;;  %v12940_v5 = vmul.f32 %v12898_v0, %v12876_v6  ;;  %v12944_v8 = vmul.f32 %v12894_v20, %v12880_v54  ;;  %v5807_v23 = vfloor.f32 %v5743_v39  ;;  %v14486_v26 = vld [vmem:[#allocation85_spill] sm:$0xff] }
 0x5f3   : > { %14484 = vst [vmem:[#allocation31_spill] sm:$0xff] %v12934_v1  ;;  %v6495_v59 = vadd.f32 2.7557319e-06, %v6431_v22  ;;  %v6305_v11 = vmul.f32 %v6241_v62, %v12917_v33  ;;  %v5745_v45 = vadd.f32 0.5, %v5681_v49  ;;  %v5354_v35 = vadd.f32 %v14486_v26, %v12208_v18  ;;  %v14490_v62 = vld [vmem:[#allocation82_spill] sm:$0xff] }
 0x5f4   : > { %14485 = vst [vmem:[#allocation48_spill] sm:$0xff] %v12940_v5  ;;  %v12950_v12 = vadd.f32 %v6991_v31, %v12802_v17  ;;  %v12954_v14 = vmul.f32 %v12917_v33, %v12906_v24  ;;  %v12958_v50 = vmul.f32 %v12931_v29, %v12931_v29  ;;  %v5871_v58 = vmul.f32 6.28125, %v5807_v23 }
 0x5f5   : > { %v6559_v4 = vmul.f32 %v6495_v59, %v12894_v20  ;;  %v6369_v55 = vadd.f32 -2.5052108e-08, %v6305_v11  ;;  %v12963_v51 = vmul.f32 %v12934_v1, %v12934_v1  ;;  %v5809_v39 = vfloor.f32 %v5745_v45 }
 0x5f6   : > { %14487 = vst [vmem:[#allocation23_spill] sm:$0xff] %v12950_v12  ;;  %14488 = vst [vmem:[#allocation73_spill] sm:$0xff] %v12958_v50  ;;  %v5935_v22 = vsub.f32 %v5352_v27, %v5871_v58  ;;  %v5999_v17 = vmul.f32 0.0019353072, %v5807_v23  ;;  %v5680_v31 = vmul.f32 0.15915494, %v5354_v35  ;;  %v5443_v49 = vadd.f32 %v14490_v62, %v12208_v18 }
 0x5f7   : > { %14489 = vst [vmem:[#allocation47_spill] sm:$0xff] %v12963_v51  ;;  %v6865_v26 = vadd.f32 -0.16666667, %v6801_v44  ;;  %v6623_v6 = vadd.f32 -0.0001984127, %v6559_v4  ;;  %v6433_v5 = vmul.f32 %v6369_v55, %v12917_v33  ;;  %v5873_v63 = vmul.f32 6.28125, %v5809_v39 }
 0x5f8   : > { %v12968_v9 = vsub.f32 %v5935_v22, %v5999_v17  ;;  %v6001_v59 = vmul.f32 0.0019353072, %v5809_v39  ;;  %v5744_v11 = vadd.f32 0.5, %v5680_v31  ;;  %v5682_v32 = vmul.f32 0.15915494, %v5443_v49 }
 0x5f9   : > { %v6687_v0 = vmul.f32 %v6623_v6, %v12894_v20  ;;  %v6497_v12 = vadd.f32 2.7557319e-06, %v6433_v5  ;;  %v5937_v27 = vsub.f32 %v12910_v42, %v5873_v63  ;;  %v5512_v23 = vadd.f32 %v12538_v10, %v12050_v48 }
 0x5fa   : > { %v12976_v44 = vmul.f32 %v12968_v9, %v12968_v9  ;;  %v5808_v45 = vfloor.f32 %v5744_v11  ;;  %v5746_v58 = vadd.f32 0.5, %v5682_v32  ;;  %v12980_v4 = vadd.f32 %v12549_v34, %v12050_v48 }
 0x5fb   : > { %v6751_v55 = vadd.f32 0.008333334, %v6687_v0  ;;  %v6561_v39 = vmul.f32 %v6497_v12, %v12917_v33  ;;  %v12983_v6 = vsub.f32 %v5937_v27, %v6001_v59  ;;  %v5635_v5 = vmul.f32 0.15915494, %v5512_v23 }
 0x5fc   : > { %v6993_v63 = vmul.f32 %v12874_v13, %v6865_v26  ;;  %v12988_v10 = vmul.f32 %v12958_v50, %v12931_v29  ;;  %v6191_v42 = vmul.f32 -7.6471636e-13, %v12976_v44  ;;  %v5872_v22 = vmul.f32 6.28125, %v5808_v45 }
 0x5fd   : > { %v6815_v32 = vmul.f32 %v6751_v55, %v12894_v20  ;;  %v6625_v17 = vadd.f32 -0.0001984127, %v6561_v39  ;;  %v12994_v34 = vmul.f32 %v12983_v6, %v12983_v6  ;;  %v5810_v0 = vfloor.f32 %v5746_v58 }
 0x5fe   : > { %14491 = vst [vmem:[#allocation28_spill] sm:$0xff] %v12988_v10  ;;  %v6255_v12 = vadd.f32 1.6059044e-10, %v6191_v42  ;;  %v5936_v31 = vsub.f32 %v5354_v35, %v5872_v22  ;;  %v5699_v62 = vadd.f32 0.5, %v5635_v5  ;;  %v5637_v13 = vmul.f32 0.15915494, %v12980_v4 }
 0x5ff   : > { %v6879_v26 = vadd.f32 -0.16666667, %v6815_v32  ;;  %v6689_v59 = vmul.f32 %v6625_v17, %v12917_v33  ;;  %v6193_v11 = vmul.f32 -7.6471636e-13, %v12994_v34  ;;  %v6000_v27 = vmul.f32 0.0019353072, %v5808_v45 }
 0x600   : > { %v13000_v29 = vadd.f32 %v6993_v63, %v12839_v25  ;;  %v13004_v20 = vmul.f32 %v12963_v51, %v12934_v1  ;;  %v6319_v58 = vmul.f32 %v6255_v12, %v12976_v44  ;;  %v5874_v55 = vmul.f32 6.28125, %v5810_v0 }
 0x601   : > { %v6753_v35 = vadd.f32 0.008333334, %v6689_v59  ;;  %v6257_v39 = vadd.f32 1.6059044e-10, %v6193_v11  ;;  %v13007_v5 = vsub.f32 %v5936_v31, %v6000_v27  ;;  %v5763_v42 = vfloor.f32 %v5699_v62  ;;  %v14497_v27 = vld [vmem:[#allocation36_spill] sm:$0xff] }
 0x602   : > { %14492 = vst [vmem:[#allocation59_spill] sm:$0xff] %v13000_v29  ;;  %14493 = vst [vmem:[#allocation40_spill] sm:$0xff] %v13004_v20  ;;  %v6383_v22 = vadd.f32 -2.5052108e-08, %v6319_v58  ;;  %v5938_v32 = vsub.f32 %v5443_v49, %v5874_v55  ;;  %v6002_v17 = vmul.f32 0.0019353072, %v5810_v0  ;;  %v7007_v45 = vmul.f32 %v12944_v8, %v6879_v26 }
 0x603   : > { %14494 = vst [vmem:[#allocation37_spill] sm:$0xff] %v13007_v5  ;;  %v5701_v10 = vadd.f32 0.5, %v5637_v13  ;;  %v13012_v25 = vmul.f32 %v12976_v44, %v12968_v9  ;;  %v6321_v63 = vmul.f32 %v6257_v39, %v12994_v34  ;;  %v5827_v1 = vmul.f32 6.28125, %v5763_v42  ;;  %v14498_v58 = vld [vmem:[#allocation94_spill] sm:$0xff] }
 0x604   : > { %v6817_v12 = vmul.f32 %v6753_v35, %v12917_v33  ;;  %v6447_v59 = vmul.f32 %v6383_v22, %v12976_v44  ;;  %v13019_v31 = vmul.f32 %v12994_v34, %v12983_v6  ;;  %v13021_v49 = vsub.f32 %v5938_v32, %v6002_v17 }
 0x605   : > { %v6385_v0 = vadd.f32 -2.5052108e-08, %v6321_v63  ;;  %v5891_v62 = vsub.f32 %v5512_v23, %v5827_v1  ;;  %v5955_v8 = vmul.f32 0.0019353072, %v5763_v42  ;;  %v5765_v13 = vfloor.f32 %v5701_v10 }
 0x606   : > { %14495 = vst [vmem:[#allocation41_spill] sm:$0xff] %v13021_v49  ;;  %v6511_v26 = vadd.f32 2.7557319e-06, %v6447_v59  ;;  %v13025_v11 = vmul.f32 %v13007_v5, %v13007_v5  ;;  %v5514_v33 = vadd.f32 %v14497_v27, %v12050_v48  ;;  %v5603_v55 = vadd.f32 %v14498_v58, %v12050_v48 }
 0x607   : > { %v13032_v35 = vadd.f32 %v7007_v45, %v12880_v54  ;;  %v6449_v39 = vmul.f32 %v6385_v0, %v12994_v34  ;;  %v13035_v22 = vsub.f32 %v5891_v62, %v5955_v8  ;;  %v5829_v1 = vmul.f32 6.28125, %v5765_v13 }
 0x608   : > { %14496 = vst [vmem:[#allocation52_spill] sm:$0xff] %v13025_v11  ;;  %v6881_v23 = vadd.f32 -0.16666667, %v6817_v12  ;;  %v6575_v10 = vmul.f32 %v6511_v26, %v12976_v44  ;;  %v13040_v42 = vmul.f32 %v13021_v49, %v13021_v49  ;;  %v5636_v32 = vmul.f32 0.15915494, %v5514_v33  ;;  %v14501_v12 = vld [vmem:[#allocation18_spill] sm:$0xff] }
 0x609   : > { %14499 = vst [vmem:[#allocation85_spill] sm:$0xff] %v13032_v35  ;;  %v6513_v17 = vadd.f32 2.7557319e-06, %v6449_v39  ;;  %v13044_v48 = vmul.f32 %v13035_v22, %v13035_v22  ;;  %v5893_v54 = vsub.f32 %v12980_v4, %v5829_v1  ;;  %v5957_v45 = vmul.f32 0.0019353072, %v5765_v13 }
 0x60a   : > { %14500 = vst [vmem:[#allocation82_spill] sm:$0xff] %v13040_v42  ;;  %v6639_v63 = vadd.f32 -0.0001984127, %v6575_v10  ;;  %v5700_v59 = vadd.f32 0.5, %v5636_v32  ;;  %v5638_v0 = vmul.f32 0.15915494, %v5603_v55  ;;  %v5518_v62 = vadd.f32 %v14501_v12, %v12054_v53 }
 0x60b   : > { %v6577_v8 = vmul.f32 %v6513_v17, %v12994_v34  ;;  %v13052_v26 = vmul.f32 %v13025_v11, %v13007_v5  ;;  %v6147_v27 = vmul.f32 -7.6471636e-13, %v13044_v48  ;;  %v13055_v58 = vsub.f32 %v5893_v54, %v5957_v45 }
 0x60c   : > { %v7009_v39 = vmul.f32 %v12954_v14, %v6881_v23  ;;  %v6703_v4 = vmul.f32 %v6639_v63, %v12976_v44  ;;  %v5764_v13 = vfloor.f32 %v5700_v59  ;;  %v5702_v1 = vadd.f32 0.5, %v5638_v0  ;;  %v14504_v59 = vld [vmem:[#allocation90_spill] sm:$0xff] }
 0x60d   : > { %14502 = vst [vmem:[#allocation36_spill] sm:$0xff] %v13052_v26  ;;  %v6641_v10 = vadd.f32 -0.0001984127, %v6577_v8  ;;  %v13061_v32 = vmul.f32 %v13040_v42, %v13021_v49  ;;  %v6211_v17 = vadd.f32 1.6059044e-10, %v6147_v27  ;;  %v13065_v12 = vmul.f32 %v13055_v58, %v13055_v58 }
 0x60e   : > { %v6767_v20 = vadd.f32 0.008333334, %v6703_v4  ;;  %v5828_v5 = vmul.f32 6.28125, %v5764_v13  ;;  %v5766_v54 = vfloor.f32 %v5702_v1  ;;  %v5651_v45 = vmul.f32 0.15915494, %v5518_v62 }
 0x60f   : > { %14503 = vst [vmem:[#allocation94_spill] sm:$0xff] %v13061_v32  ;;  %v6705_v14 = vmul.f32 %v6641_v10, %v12994_v34  ;;  %v6275_v23 = vmul.f32 %v6211_v17, %v13044_v48  ;;  %v6149_v63 = vmul.f32 -7.6471636e-13, %v13065_v12  ;;  %v13072_v0 = vadd.f32 %v14504_v59, %v12054_v53 }
 0x610   : > { %v6831_v8 = vmul.f32 %v6767_v20, %v12976_v44  ;;  %v5892_v27 = vsub.f32 %v5514_v33, %v5828_v5  ;;  %v5956_v49 = vmul.f32 0.0019353072, %v5764_v13  ;;  %v5830_v32 = vmul.f32 6.28125, %v5766_v54 }
 0x611   : > { %v13076_v4 = vadd.f32 %v7009_v39, %v12906_v24  ;;  %v6769_v1 = vadd.f32 0.008333334, %v6705_v14  ;;  %v6339_v26 = vadd.f32 -2.5052108e-08, %v6275_v23  ;;  %v6213_v35 = vadd.f32 1.6059044e-10, %v6149_v63 }
 0x612   : > { %v6895_v10 = vadd.f32 -0.16666667, %v6831_v8  ;;  %v13078_v42 = vsub.f32 %v5892_v27, %v5956_v49  ;;  %v5894_v17 = vsub.f32 %v5603_v55, %v5830_v32  ;;  %v5715_v51 = vadd.f32 0.5, %v5651_v45  ;;  %v14508_v8 = vld [vmem:[#allocation58_spill] sm:$0xff] }
 0x613   : > { %14505 = vst [vmem:[#allocation18_spill] sm:$0xff] %v13076_v4  ;;  %v6833_v11 = vmul.f32 %v6769_v1, %v12994_v34  ;;  %v6403_v59 = vmul.f32 %v6339_v26, %v13044_v48  ;;  %v6277_v44 = vmul.f32 %v6213_v35, %v13065_v12  ;;  %v5958_v20 = vmul.f32 0.0019353072, %v5766_v54 }
 0x614   : > { %v7023_v5 = vmul.f32 %v13012_v25, %v6895_v10  ;;  %v13086_v24 = vmul.f32 %v13044_v48, %v13035_v22  ;;  %v5779_v33 = vfloor.f32 %v5715_v51  ;;  %v5653_v39 = vmul.f32 0.15915494, %v13072_v0 }
 0x615   : > { %v6467_v49 = vadd.f32 2.7557319e-06, %v6403_v59  ;;  %v6341_v13 = vadd.f32 -2.5052108e-08, %v6277_v44  ;;  %v13091_v55 = vmul.f32 %v13065_v12, %v13055_v58  ;;  %v13093_v34 = vsub.f32 %v5894_v17, %v5958_v20 }
 0x616   : > { %v6897_v26 = vadd.f32 -0.16666667, %v6833_v11  ;;  %v13097_v35 = vmul.f32 %v13078_v42, %v13078_v42  ;;  %v5843_v25 = vmul.f32 6.28125, %v5779_v33  ;;  %v13101_v32 = vadd.f32 %v12694_v57, %v12054_v53 }
 0x617   : > { %14506 = vst [vmem:[#allocation90_spill] sm:$0xff] %v13093_v34  ;;  %v13104_v51 = vadd.f32 %v7023_v5, %v12968_v9  ;;  %v6531_v54 = vmul.f32 %v6467_v49, %v13044_v48  ;;  %v6405_v45 = vmul.f32 %v6341_v13, %v13065_v12  ;;  %v13110_v14 = vadd.f32 %v12696_v60, %v12054_v53  ;;  %v14509_v9 = vld [vmem:[#allocation44_spill] sm:$0xff]  ;;  %v14510_v5 = vld [vmem:[#allocation38_spill] sm:$0xff] }
 0x618   : > { %v5907_v11 = vsub.f32 %v5518_v62, %v5843_v25  ;;  %v5971_v23 = vmul.f32 0.0019353072, %v5779_v33  ;;  %v5717_v63 = vadd.f32 0.5, %v5653_v39  ;;  %v6136_v27 = vmul.f32 -7.6471636e-13, %v14508_v8  ;;  %v14511_v39 = vld [vmem:[#allocation61_spill] sm:$0xff] }
 0x619   : > { %14507 = vst [vmem:[#allocation99_spill] sm:$0xff] %v13104_v51  ;;  %v6595_v1 = vadd.f32 -0.0001984127, %v6531_v54  ;;  %v6469_v10 = vadd.f32 2.7557319e-06, %v6405_v45  ;;  %v13115_v57 = vmul.f32 %v13093_v34, %v13093_v34  ;;  %v7025_v13 = vmul.f32 %v13019_v31, %v6897_v26 }
 0x61a   : > { %v6152_v17 = vmul.f32 -7.6471636e-13, %v14509_v9  ;;  %v13118_v59 = vsub.f32 %v5907_v11, %v5971_v23  ;;  %v5781_v44 = vfloor.f32 %v5717_v63  ;;  %v6200_v20 = vadd.f32 1.6059044e-10, %v6136_v27 }
 0x61b   : > { %v6138_v53 = vmul.f32 -7.6471636e-13, %v14510_v5  ;;  %v6659_v60 = vmul.f32 %v6595_v1, %v13044_v48  ;;  %v6533_v62 = vmul.f32 %v6469_v10, %v13065_v12  ;;  %v6154_v49 = vmul.f32 -7.6471636e-13, %v14511_v39 }
 0x61c   : > { %v6216_v33 = vadd.f32 1.6059044e-10, %v6152_v17  ;;  %v13127_v25 = vmul.f32 %v13118_v59, %v13118_v59  ;;  %v5845_v54 = vmul.f32 6.28125, %v5781_v44  ;;  %v6264_v45 = vmul.f32 %v6200_v20, %v14508_v8 }
 0x61d   : > { %v6723_v11 = vadd.f32 0.008333334, %v6659_v60  ;;  %v6597_v23 = vadd.f32 -0.0001984127, %v6533_v62  ;;  %v6202_v27 = vadd.f32 1.6059044e-10, %v6138_v53  ;;  %v13141_v62 = vmul.f32 %v13097_v35, %v13078_v42 }
 0x61e   : > { %v6280_v63 = vmul.f32 %v6216_v33, %v14509_v9  ;;  %v6163_v1 = vmul.f32 -7.6471636e-13, %v13127_v25  ;;  %v5909_v10 = vsub.f32 %v13072_v0, %v5845_v54  ;;  %v5973_v17 = vmul.f32 0.0019353072, %v5781_v44 }
 0x61f   : > { %v6328_v4 = vadd.f32 -2.5052108e-08, %v6264_v45  ;;  %v6787_v31 = vmul.f32 %v6723_v11, %v13044_v48  ;;  %v6661_v26 = vmul.f32 %v6597_v23, %v13065_v12  ;;  %v6218_v50 = vadd.f32 1.6059044e-10, %v6154_v49 }
 0x620   : > { %v6344_v51 = vadd.f32 -2.5052108e-08, %v6280_v63  ;;  %v6227_v29 = vadd.f32 1.6059044e-10, %v6163_v1  ;;  %v13135_v19 = vsub.f32 %v5909_v10, %v5973_v17  ;;  %v6266_v60 = vmul.f32 %v6202_v27, %v14510_v5 }
 0x621   : > { %v6392_v20 = vmul.f32 %v6328_v4, %v14508_v8  ;;  %v6725_v53 = vadd.f32 0.008333334, %v6661_v26  ;;  %v6282_v48 = vmul.f32 %v6218_v50, %v14511_v39  ;;  %v6851_v4 = vadd.f32 -0.16666667, %v6787_v31 }
 0x622   : > { %v6408_v0 = vmul.f32 %v6344_v51, %v14509_v9  ;;  %v6291_v44 = vmul.f32 %v6227_v29, %v13127_v25  ;;  %v13148_v33 = vmul.f32 %v13135_v19, %v13135_v19  ;;  %v6330_v54 = vadd.f32 -2.5052108e-08, %v6266_v60 }
 0x623   : > { %v6456_v49 = vadd.f32 2.7557319e-06, %v6392_v20  ;;  %v13152_v45 = vmul.f32 %v13115_v57, %v13093_v34  ;;  %v6346_v23 = vadd.f32 -2.5052108e-08, %v6282_v48  ;;  %v13155_v63 = vadd.f32 %v7025_v13, %v12983_v6 }
 0x624   : > { %v6472_v11 = vadd.f32 2.7557319e-06, %v6408_v0  ;;  %v6355_v51 = vadd.f32 -2.5052108e-08, %v6291_v44  ;;  %v6165_v50 = vmul.f32 -7.6471636e-13, %v13148_v33  ;;  %v6789_v27 = vmul.f32 %v6725_v53, %v13065_v12 }
 0x625   : > { %14512 = vst [vmem:[#allocation58_spill] sm:$0xff] %v13152_v45  ;;  %v6520_v29 = vmul.f32 %v6456_v49, %v14508_v8  ;;  %v13162_v1 = vmul.f32 %v13127_v25, %v13118_v59  ;;  %v6394_v17 = vmul.f32 %v6330_v54, %v14510_v5  ;;  %v6410_v13 = vmul.f32 %v6346_v23, %v14511_v39 }
 0x626   : > { %v6536_v10 = vmul.f32 %v6472_v11, %v14509_v9  ;;  %v6419_v31 = vmul.f32 %v6355_v51, %v13127_v25  ;;  %v6229_v26 = vadd.f32 1.6059044e-10, %v6165_v50  ;;  %v6979_v20 = vmul.f32 %v13086_v24, %v6851_v4 }
 0x627   : > { %v6584_v6 = vadd.f32 -0.0001984127, %v6520_v29  ;;  %v6458_v0 = vadd.f32 2.7557319e-06, %v6394_v17  ;;  %v5652_v12 = vmul.f32 0.15915494, %v13101_v32 }
 0x628   : > { %v6600_v60 = vadd.f32 -0.0001984127, %v6536_v10  ;;  %v6483_v53 = vadd.f32 2.7557319e-06, %v6419_v31  ;;  %v6293_v48 = vmul.f32 %v6229_v26, %v13148_v33  ;;  %v6474_v49 = vadd.f32 2.7557319e-06, %v6410_v13 }
 0x629   : > { %v6648_v44 = vmul.f32 %v6584_v6, %v14508_v8  ;;  %v6853_v11 = vadd.f32 -0.16666667, %v6789_v27  ;;  %v6522_v51 = vmul.f32 %v6458_v0, %v14510_v5  ;;  %v5716_v50 = vadd.f32 0.5, %v5652_v12 }
 0x62a   : > { %v6664_v54 = vmul.f32 %v6600_v60, %v14509_v9  ;;  %v6547_v23 = vmul.f32 %v6483_v53, %v13127_v25  ;;  %v6357_v29 = vadd.f32 -2.5052108e-08, %v6293_v48  ;;  %v6538_v4 = vmul.f32 %v6474_v49, %v14511_v39 }
 0x62b   : > { %v6712_v24 = vadd.f32 0.008333334, %v6648_v44  ;;  %v6586_v17 = vadd.f32 -0.0001984127, %v6522_v51  ;;  %v5780_v31 = vfloor.f32 %v5716_v50  ;;  %v5654_v26 = vmul.f32 0.15915494, %v13110_v14 }
 0x62c   : > { %v6728_v10 = vadd.f32 0.008333334, %v6664_v54  ;;  %v6611_v34 = vadd.f32 -0.0001984127, %v6547_v23  ;;  %v6421_v6 = vmul.f32 %v6357_v29, %v13148_v33  ;;  %v6602_v13 = vadd.f32 -0.0001984127, %v6538_v4 }
 0x62d   : > { %v6776_v27 = vmul.f32 %v6712_v24, %v14508_v8  ;;  %v6650_v0 = vmul.f32 %v6586_v17, %v14510_v5  ;;  %v5844_v12 = vmul.f32 6.28125, %v5780_v31  ;;  %v5972_v53 = vmul.f32 0.0019353072, %v5780_v31  ;;  %v14513_v24 = vld [vmem:[#allocation65_spill] sm:$0xff] }
 0x62e   : > { %v6792_v60 = vmul.f32 %v6728_v10, %v14509_v9  ;;  %v6675_v48 = vmul.f32 %v6611_v34, %v13127_v25  ;;  %v6485_v44 = vadd.f32 2.7557319e-06, %v6421_v6  ;;  %v6666_v54 = vmul.f32 %v6602_v13, %v14511_v39  ;;  %v14514_v17 = vld [vmem:[#allocation69_spill] sm:$0xff] }
 0x62f   : > { %v6840_v49 = vadd.f32 -0.16666667, %v6776_v27  ;;  %v6714_v50 = vadd.f32 0.008333334, %v6650_v0  ;;  %v5908_v23 = vsub.f32 %v13101_v32, %v5844_v12  ;;  %v5718_v29 = vadd.f32 0.5, %v5654_v26  ;;  %v14515_v26 = vld [vmem:[#allocation46_spill] sm:$0xff] }
 0x630   : > { %v6856_v51 = vadd.f32 -0.16666667, %v6792_v60  ;;  %v6739_v45 = vadd.f32 0.008333334, %v6675_v48  ;;  %v6549_v8 = vmul.f32 %v6485_v44, %v13148_v33  ;;  %v6730_v4 = vadd.f32 0.008333334, %v6666_v54 }
 0x631   : > { %v6968_v9 = vmul.f32 %v14513_v24, %v6840_v49  ;;  %v6981_v10 = vmul.f32 %v13091_v55, %v6853_v11  ;;  %v6778_v34 = vmul.f32 %v6714_v50, %v14510_v5  ;;  %v5782_v6 = vfloor.f32 %v5718_v29  ;;  %v14516_v12 = vld [vmem:[#allocation54_spill] sm:$0xff] }
 0x632   : > { %v6984_v31 = vmul.f32 %v14514_v17, %v6856_v51  ;;  %v6803_v27 = vmul.f32 %v6739_v45, %v13127_v25  ;;  %v6613_v13 = vadd.f32 -0.0001984127, %v6549_v8  ;;  %v6794_v60 = vmul.f32 %v6730_v4, %v14511_v39  ;;  %v14520_v8 = vld [vmem:[#allocation66_spill] sm:$0xff] }
 0x633   : > { %v13191_v32 = vsub.f32 %v5908_v23, %v5972_v53  ;;  %v7032_v0 = vadd.f32 %v6968_v9, %v14515_v26  ;;  %v6842_v44 = vadd.f32 -0.16666667, %v6778_v34  ;;  %v5846_v49 = vmul.f32 6.28125, %v5782_v6  ;;  %v14517_v53 = vld [vmem:[#allocation74_spill] sm:$0xff]  ;;  %v14518_v23 = vld [vmem:[#allocation63_spill] sm:$0xff] }
 0x634   : > { %v7048_v48 = vadd.f32 %v6984_v31, %v14516_v12  ;;  %v13196_v55 = vadd.f32 %v6979_v20, %v13035_v22  ;;  %v6677_v11 = vmul.f32 %v6613_v13, %v13148_v33  ;;  %v6933_v5 = vmul.f32 %v13148_v33, %v13135_v19  ;;  %v14519_v20 = vld [vmem:[#allocation70_spill] sm:$0xff]  ;;  %v14523_v34 = vld [vmem:[#allocation43_spill] sm:$0xff] }
 0x635   : > { %v6858_v25 = vadd.f32 -0.16666667, %v6794_v60  ;;  %v13202_v45 = vadd.f32 %v6981_v10, %v13055_v58  ;;  %v6970_v54 = vmul.f32 %v14517_v53, %v6842_v44  ;;  %v5910_v51 = vsub.f32 %v13110_v14, %v5846_v49  ;;  %v14521_v58 = vld [vmem:[#allocation29_spill] sm:$0xff]  ;;  %v14524_v60 = vld [vmem:[#allocation55_spill] sm:$0xff] }
 0x636   : > { %v8074_v39 = vpack.c.bf16 %v7048_v48, %v7032_v0  ;;  %v6741_v50 = vadd.f32 0.008333334, %v6677_v11  ;;  %v13209_v22 = vmul.f32 %v13191_v32, %v13191_v32  ;;  %v8076_v24 = vpack.c.bf16 %v14520_v8, %v14519_v20  ;;  %v14522_v10 = vld [vmem:[#allocation57_spill] sm:$0xff] }
 0x637   : > { %v6986_v29 = vmul.f32 %v14518_v23, %v6858_v25  ;;  %v6867_v9 = vadd.f32 -0.16666667, %v6803_v27  ;;  %v5974_v4 = vmul.f32 0.0019353072, %v5782_v6  ;;  %v8084_v17 = vpack.c.bf16 %v14522_v10, %v14521_v58 }
 0x638   : > { %8075 = vmatprep.subr.bf16.mxu0 %v8074_v39  ;;  %v5524_v31 = vadd.f32 %v12700_v30, %v12073_v21  ;;  %v6805_v14 = vmul.f32 %v6741_v50, %v13148_v33  ;;  %v7034_v13 = vadd.f32 %v6970_v54, %v14523_v34  ;;  %v5613_v0 = vadd.f32 %v12720_v15, %v12073_v21 }
 0x639   : > { %v7050_v26 = vadd.f32 %v6986_v29, %v14524_v60  ;;  %8077 = vmatpush1.bf16.msra.mxu0 %v8076_v24  ;;  %v13222_v12 = vsub.f32 %v5910_v51, %v5974_v4  ;;  %v5526_v6 = vadd.f32 %v12726_v47, %v12073_v21  ;;  %v5615_v48 = vadd.f32 %v12737_v56, %v12073_v21  ;;  %v14526_v4 = vld [vmem:[#allocation64_spill] sm:$0xff] }
 0x63a   : > { %v5667_v27 = vmul.f32 0.15915494, %v5524_v31  ;;  %v6869_v30 = vadd.f32 -0.16666667, %v6805_v14  ;;  %v5669_v33 = vmul.f32 0.15915494, %v5613_v0  ;;  %v5530_v49 = vadd.f32 %v12750_v2, %v12208_v18 }
 0x63b   : > { %14525 = vst [vmem:[#allocation44_spill] sm:$0xff] %v13222_v12  ;;  %v8082_v44 = vpack.c.bf16 %v7050_v26, %v7034_v13  ;;  %v13232_v11 = vmul.f32 %v13209_v22, %v13191_v32  ;;  %v5668_v25 = vmul.f32 0.15915494, %v5526_v6  ;;  %v5670_v39 = vmul.f32 0.15915494, %v5615_v48 }
 0x63c   : > { %v5731_v15 = vadd.f32 0.5, %v5667_v27  ;;  %v6995_v53 = vmul.f32 %v13162_v1, %v6867_v9  ;;  %v5733_v47 = vadd.f32 0.5, %v5669_v33  ;;  %v5683_v54 = vmul.f32 0.15915494, %v5530_v49 }
 0x63d   : > { %8083 = vmatprep.subr.bf16.mxu1 %v8082_v44  ;;  %v5619_v21 = vadd.f32 %v12752_v52, %v12208_v18  ;;  %v13239_v56 = vmul.f32 %v13222_v12, %v13222_v12  ;;  %v5732_v51 = vadd.f32 0.5, %v5668_v25  ;;  %v5734_v50 = vadd.f32 0.5, %v5670_v39 }
 0x63e   : > { %8085 = vmatpush1.bf16.msra.mxu1 %v8084_v17  ;;  %v5795_v2 = vfloor.f32 %v5731_v15  ;;  %v6997_v23 = vmul.f32 %v6933_v5, %v6869_v30  ;;  %v5797_v29 = vfloor.f32 %v5733_v47  ;;  %v5747_v20 = vadd.f32 0.5, %v5683_v54 }
 0x63f   : > { %v5685_v8 = vmul.f32 0.15915494, %v5619_v21  ;;  %v5796_v1 = vfloor.f32 %v5732_v51  ;;  %v5798_v9 = vfloor.f32 %v5734_v50  ;;  %v6168_v58 = vmul.f32 -7.6471636e-13, %v14526_v4  ;;  %v14528_v51 = vld [vmem:[#allocation72_spill] sm:$0xff] }
 0x640   : > { %v5859_v24 = vmul.f32 6.28125, %v5795_v2  ;;  %v5987_v10 = vmul.f32 0.0019353072, %v5795_v2  ;;  %v5861_v14 = vmul.f32 6.28125, %v5797_v29  ;;  %v5811_v52 = vfloor.f32 %v5747_v20 }
 0x641   : > { %v5749_v34 = vadd.f32 0.5, %v5685_v8  ;;  %v5989_v60 = vmul.f32 0.0019353072, %v5797_v29  ;;  %v5860_v26 = vmul.f32 6.28125, %v5796_v1  ;;  %v5862_v17 = vmul.f32 6.28125, %v5798_v9 }
 0x642   : > { %v5923_v13 = vsub.f32 %v5524_v31, %v5859_v24  ;;  %v5925_v27 = vsub.f32 %v5613_v0, %v5861_v14  ;;  %v5988_v44 = vmul.f32 0.0019353072, %v5796_v1  ;;  %v5990_v33 = vmul.f32 0.0019353072, %v5798_v9 }
 0x643   : > { %v5875_v5 = vmul.f32 6.28125, %v5811_v52  ;;  %v5924_v15 = vsub.f32 %v5526_v6, %v5860_v26  ;;  %v5926_v25 = vsub.f32 %v5615_v48, %v5862_v17  ;;  %v5813_v39 = vfloor.f32 %v5749_v34 }
 0x644   : > { %v13242_v30 = vsub.f32 %v5923_v13, %v5987_v10  ;;  %v13244_v47 = vsub.f32 %v5925_v27, %v5989_v60  ;;  %v6003_v2 = vmul.f32 0.0019353072, %v5811_v52  ;;  %v6184_v50 = vmul.f32 -7.6471636e-13, %v14528_v51 }
 0x645   : > { %v5939_v54 = vsub.f32 %v5530_v49, %v5875_v5  ;;  %v13251_v29 = vsub.f32 %v5924_v15, %v5988_v44  ;;  %v5877_v0 = vmul.f32 6.28125, %v5813_v39  ;;  %v6232_v20 = vadd.f32 1.6059044e-10, %v6168_v58 }
 0x646   : > { %14527 = vst [vmem:[#allocation38_spill] sm:$0xff] %v13244_v47  ;;  %v13249_v31 = vmul.f32 %v13242_v30, %v13242_v30  ;;  %v13254_v8 = vadd.f32 %v6995_v53, %v13118_v59  ;;  %v13258_v6 = vmul.f32 %v13244_v47, %v13244_v47  ;;  %v13260_v48 = vsub.f32 %v5926_v25, %v5990_v33  ;;  %v14532_v33 = vld [vmem:[#allocation51_spill] sm:$0xff] }
 0x647   : > { %14529 = vst [vmem:[#allocation61_spill] sm:$0xff] %v13251_v29  ;;  %v13262_v49 = vsub.f32 %v5939_v54, %v6003_v2  ;;  %v13265_v24 = vadd.f32 %v6997_v23, %v13135_v19  ;;  %v13269_v1 = vmul.f32 %v13239_v56, %v13222_v12  ;;  %v6248_v58 = vadd.f32 1.6059044e-10, %v6184_v50  ;;  %v14533_v54 = vld [vmem:[#allocation98_spill] sm:$0xff] }
 0x648   : > { %14530 = vst [vmem:[#allocation65_spill] sm:$0xff] %v13260_v48  ;;  %v6179_v9 = vmul.f32 -7.6471636e-13, %v13249_v31  ;;  %v6181_v59 = vmul.f32 -7.6471636e-13, %v13258_v6  ;;  %v5941_v10 = vsub.f32 %v5619_v21, %v5877_v0  ;;  %v13279_v19 = vmul.f32 %v13249_v31, %v13242_v30 }
 0x649   : > { %14531 = vst [vmem:[#allocation69_spill] sm:$0xff] %v13269_v1  ;;  %v13275_v53 = vmul.f32 %v13262_v49, %v13262_v49  ;;  %v6005_v14 = vmul.f32 0.0019353072, %v5813_v39  ;;  %v13283_v23 = vmul.f32 %v13251_v29, %v13251_v29  ;;  %v6296_v34 = vmul.f32 %v6232_v20, %v14526_v4 }
 0x64a   : > { %v6243_v52 = vadd.f32 1.6059044e-10, %v6179_v9  ;;  %v6245_v13 = vadd.f32 1.6059044e-10, %v6181_v59  ;;  %v13288_v60 = vmul.f32 %v13260_v48, %v13260_v48  ;;  %v6312_v27 = vmul.f32 %v6248_v58, %v14528_v51 }
 0x64b   : > { %v6195_v26 = vmul.f32 -7.6471636e-13, %v13275_v53  ;;  %v13291_v21 = vsub.f32 %v5941_v10, %v6005_v14  ;;  %v6360_v44 = vadd.f32 -2.5052108e-08, %v6296_v34  ;;  %v6170_v5 = vmul.f32 -7.6471636e-13, %v14532_v33 }
 0x64c   : > { %v6307_v17 = vmul.f32 %v6243_v52, %v13249_v31  ;;  %v6309_v15 = vmul.f32 %v6245_v13, %v13258_v6  ;;  %v6186_v2 = vmul.f32 -7.6471636e-13, %v14533_v54  ;;  %v6376_v0 = vadd.f32 -2.5052108e-08, %v6312_v27 }
 0x64d   : > { %v6259_v25 = vadd.f32 1.6059044e-10, %v6195_v26  ;;  %v13299_v39 = vmul.f32 %v13291_v21, %v13291_v21  ;;  %v6424_v20 = vmul.f32 %v6360_v44, %v14526_v4  ;;  %v6234_v9 = vadd.f32 1.6059044e-10, %v6170_v5 }
 0x64e   : > { %v6371_v50 = vadd.f32 -2.5052108e-08, %v6307_v17  ;;  %v6373_v59 = vadd.f32 -2.5052108e-08, %v6309_v15  ;;  %v13305_v58 = vmul.f32 %v13258_v6, %v13244_v47  ;;  %v6440_v34 = vmul.f32 %v6376_v0, %v14528_v51 }
 0x64f   : > { %v6323_v10 = vmul.f32 %v6259_v25, %v13275_v53  ;;  %v6197_v14 = vmul.f32 -7.6471636e-13, %v13299_v39  ;;  %v6488_v13 = vadd.f32 2.7557319e-06, %v6424_v20  ;;  %v6250_v26 = vadd.f32 1.6059044e-10, %v6186_v2 }
 0x650   : > { %v6435_v52 = vmul.f32 %v6371_v50, %v13249_v31  ;;  %v6437_v17 = vmul.f32 %v6373_v59, %v13258_v6  ;;  %v6298_v5 = vmul.f32 %v6234_v9, %v14532_v33  ;;  %v6504_v48 = vadd.f32 2.7557319e-06, %v6440_v34 }
 0x651   : > { %v6387_v27 = vadd.f32 -2.5052108e-08, %v6323_v10  ;;  %v6261_v44 = vadd.f32 1.6059044e-10, %v6197_v14  ;;  %v6552_v12 = vmul.f32 %v6488_v13, %v14526_v4  ;;  %v6314_v25 = vmul.f32 %v6250_v26, %v14533_v54 }
 0x652   : > { %v6499_v15 = vadd.f32 2.7557319e-06, %v6435_v52  ;;  %v6501_v1 = vadd.f32 2.7557319e-06, %v6437_v17  ;;  %v6362_v0 = vadd.f32 -2.5052108e-08, %v6298_v5  ;;  %v6568_v20 = vmul.f32 %v6504_v48, %v14528_v51 }
 0x653   : > { %v6451_v47 = vmul.f32 %v6387_v27, %v13275_v53  ;;  %v6325_v50 = vmul.f32 %v6261_v44, %v13299_v39  ;;  %v6616_v59 = vadd.f32 -0.0001984127, %v6552_v12  ;;  %v6378_v10 = vadd.f32 -2.5052108e-08, %v6314_v25 }
 0x654   : > { %v6563_v2 = vmul.f32 %v6499_v15, %v13249_v31  ;;  %v6565_v9 = vmul.f32 %v6501_v1, %v13258_v6  ;;  %v6426_v34 = vmul.f32 %v6362_v0, %v14532_v33  ;;  %v6632_v26 = vadd.f32 -0.0001984127, %v6568_v20 }
 0x655   : > { %v6515_v14 = vadd.f32 2.7557319e-06, %v6451_v47  ;;  %v6389_v52 = vadd.f32 -2.5052108e-08, %v6325_v50  ;;  %v6680_v17 = vmul.f32 %v6616_v59, %v14526_v4  ;;  %v6442_v27 = vmul.f32 %v6378_v10, %v14533_v54 }
 0x656   : > { %v6627_v13 = vadd.f32 -0.0001984127, %v6563_v2  ;;  %v6629_v44 = vadd.f32 -0.0001984127, %v6565_v9  ;;  %v6490_v48 = vadd.f32 2.7557319e-06, %v6426_v34  ;;  %v6696_v1 = vmul.f32 %v6632_v26, %v14528_v51 }
 0x657   : > { %v6579_v5 = vmul.f32 %v6515_v14, %v13275_v53  ;;  %v6453_v15 = vmul.f32 %v6389_v52, %v13299_v39  ;;  %v6744_v47 = vadd.f32 0.008333334, %v6680_v17  ;;  %v6506_v25 = vadd.f32 2.7557319e-06, %v6442_v27 }
 0x658   : > { %v6691_v12 = vmul.f32 %v6627_v13, %v13249_v31  ;;  %v6693_v50 = vmul.f32 %v6629_v44, %v13258_v6  ;;  %v6554_v20 = vmul.f32 %v6490_v48, %v14532_v33  ;;  %v6760_v10 = vadd.f32 0.008333334, %v6696_v1 }
 0x659   : > { %v6643_v0 = vadd.f32 -0.0001984127, %v6579_v5  ;;  %v6517_v2 = vadd.f32 2.7557319e-06, %v6453_v15  ;;  %v6808_v9 = vmul.f32 %v6744_v47, %v14526_v4  ;;  %v6570_v14 = vmul.f32 %v6506_v25, %v14533_v54  ;;  %v14534_v25 = vld [vmem:[#allocation62_spill] sm:$0xff] }
 0x65a   : > { %v6755_v59 = vadd.f32 0.008333334, %v6691_v12  ;;  %v6757_v52 = vadd.f32 0.008333334, %v6693_v50  ;;  %v6618_v26 = vadd.f32 -0.0001984127, %v6554_v20  ;;  %v6824_v27 = vmul.f32 %v6760_v10, %v14528_v51 }
 0x65b   : > { %v6707_v34 = vmul.f32 %v6643_v0, %v13275_v53  ;;  %v6581_v13 = vmul.f32 %v6517_v2, %v13299_v39  ;;  %v6872_v44 = vadd.f32 -0.16666667, %v6808_v9  ;;  %v6634_v5 = vadd.f32 -0.0001984127, %v6570_v14  ;;  %v14535_v10 = vld [vmem:[#allocation78_spill] sm:$0xff] }
 0x65c   : > { %v6819_v17 = vmul.f32 %v6755_v59, %v13249_v31  ;;  %v6821_v15 = vmul.f32 %v6757_v52, %v13258_v6  ;;  %v6682_v4 = vmul.f32 %v6618_v26, %v14532_v33  ;;  %v6888_v47 = vadd.f32 -0.16666667, %v6824_v27 }
 0x65d   : > { %v6771_v48 = vadd.f32 0.008333334, %v6707_v34  ;;  %v6645_v12 = vadd.f32 -0.0001984127, %v6581_v13  ;;  %v7000_v50 = vmul.f32 %v14534_v25, %v6872_v44  ;;  %v6698_v0 = vmul.f32 %v6634_v5, %v14533_v54  ;;  %v14537_v44 = vld [vmem:[#allocation45_spill] sm:$0xff] }
 0x65e   : > { %v6883_v1 = vadd.f32 -0.16666667, %v6819_v17  ;;  %v6885_v2 = vadd.f32 -0.16666667, %v6821_v15  ;;  %v6746_v51 = vadd.f32 0.008333334, %v6682_v4  ;;  %v13343_v59 = vmul.f32 %v13283_v23, %v13251_v29 }
 0x65f   : > { %v6835_v20 = vmul.f32 %v6771_v48, %v13275_v53  ;;  %v6709_v31 = vmul.f32 %v6645_v12, %v13299_v39  ;;  %v6963_v6 = vmul.f32 %v13275_v53, %v13262_v49  ;;  %v7016_v9 = vmul.f32 %v14535_v10, %v6888_v47  ;;  %v14536_v17 = vld [vmem:[#allocation49_spill] sm:$0xff] }
 0x660   : > { %v6762_v14 = vadd.f32 0.008333334, %v6698_v0  ;;  %v7011_v52 = vmul.f32 %v13279_v19, %v6883_v1  ;;  %v6965_v13 = vmul.f32 %v13299_v39, %v13291_v21  ;;  %v6810_v26 = vmul.f32 %v6746_v51, %v14532_v33  ;;  %v14538_v0 = vld [vmem:[#allocation26_spill] sm:$0xff]  ;;  %v14540_v51 = vld [vmem:[#allocation67_spill] sm:$0xff] }
 0x661   : > { %v6773_v34 = vadd.f32 0.008333334, %v6709_v31  ;;  %v7064_v27 = vadd.f32 %v7000_v50, %v14536_v17  ;;  %v7080_v5 = vadd.f32 %v7016_v9, %v14537_v44  ;;  %v5532_v53 = vadd.f32 %v12912_v46, %v12208_v18  ;;  %v14539_v46 = vld [vmem:[#allocation53_spill] sm:$0xff]  ;;  %v14542_v9 = vld [vmem:[#allocation88_spill] sm:$0xff] }
 0x662   : > { %v6826_v15 = vmul.f32 %v6762_v14, %v14533_v54  ;;  %v13358_v48 = vmul.f32 %v13305_v58, %v6885_v2  ;;  %v6899_v12 = vadd.f32 -0.16666667, %v6835_v20  ;;  %v6874_v4 = vadd.f32 -0.16666667, %v6810_v26  ;;  %v14541_v2 = vld [vmem:[#allocation92_spill] sm:$0xff]  ;;  %v14544_v17 = vld [vmem:[#allocation25_spill] sm:$0xff] }
 0x663   : > { %v6837_v19 = vmul.f32 %v6773_v34, %v13299_v39  ;;  %v8078_v1 = vpack.c.bf16 %v7080_v5, %v7064_v27  ;;  %v5684_v25 = vmul.f32 0.15915494, %v5532_v53  ;;  %v5621_v33 = vadd.f32 %v12928_v36, %v12208_v18  ;;  %v14543_v14 = vld [vmem:[#allocation16_spill] sm:$0xff]  ;;  %v13376_v36 = vld [vmem:[%s13729_s7] sm:$0x7]  ;;  %v14546_v27 = vld [vmem:[#allocation87_spill] sm:$0xff] }
 0x664   : > { %v6890_v47 = vadd.f32 -0.16666667, %v6826_v15  ;;  %v13364_v50 = vadd.f32 %v7011_v52, %v13242_v30  ;;  %v7002_v31 = vmul.f32 %v14538_v0, %v6874_v4  ;;  %v8080_v58 = vpack.c.bf16 %v14540_v51, %v14539_v46  ;;  %v14545_v30 = vld [vmem:[#allocation56_spill] sm:$0xff]  ;;  %v14547_v5 = vld [vmem:[#allocation83_spill] sm:$0xff] }
 0x665   : > { %v6901_v54 = vadd.f32 -0.16666667, %v6837_v19  ;;  %8079 = vmatprep.subr.bf16.mxu0 %v8078_v1  ;;  %v5748_v39 = vadd.f32 0.5, %v5684_v25  ;;  %v5686_v10 = vmul.f32 0.15915494, %v5621_v33  ;;  %v8088_v34 = vpack.c.bf16 %v14543_v14, %v14542_v9  ;;  %v14548_v1 = vld [vmem:[#allocation93_spill] sm:$0xff] }
 0x666   : > { %v7018_v20 = vmul.f32 %v14541_v2, %v6890_v47  ;;  %v7027_v26 = vmul.f32 %v6963_v6, %v6899_v12  ;;  %v7066_v18 = vadd.f32 %v7002_v31, %v14544_v17  ;;  %8081 = vmatpush1.bf16.msra.mxu0 %v8080_v58  ;;  %v6140_v52 = vmul.f32 -7.6471636e-13, %v14545_v30 }
 0x667   : > { %v6156_v44 = vmul.f32 -7.6471636e-13, %v14546_v27  ;;  %v5812_v19 = vfloor.f32 %v5748_v39  ;;  %v5750_v4 = vadd.f32 0.5, %v5686_v10  ;;  %v6142_v47 = vmul.f32 -7.6471636e-13, %v14548_v1 }
 0x668   : > { %v7082_v15 = vadd.f32 %v7018_v20, %v14547_v5  ;;  %v7029_v25 = vmul.f32 %v6965_v13, %v6901_v54  ;;  %v6204_v6 = vadd.f32 1.6059044e-10, %v6140_v52  ;;  %v6158_v0 = vmul.f32 -7.6471636e-13, %v12582_v61 }
 0x669   : > { %v6220_v12 = vadd.f32 1.6059044e-10, %v6156_v44  ;;  %v5876_v46 = vmul.f32 6.28125, %v5812_v19  ;;  %v6004_v51 = vmul.f32 0.0019353072, %v5812_v19  ;;  %v5814_v58 = vfloor.f32 %v5750_v4  ;;  %7932 = vmatmul.mubr.msk.f32.vlgmr.msra.gmra.mrb[96].mxu0 %vm2674_vm2, %v13376_v36  ;;  %v14550_v4 = vld [vmem:[#allocation22_spill] sm:$0xff] }
 0x66a   : > { %v8086_v31 = vpack.c.bf16 %v7082_v15, %v7066_v18  ;;  %v6268_v2 = vmul.f32 %v6204_v6, %v14545_v30  ;;  %v6206_v39 = vadd.f32 1.6059044e-10, %v6142_v47  ;;  %v6222_v10 = vadd.f32 1.6059044e-10, %v6158_v0  ;;  %v14551_v6 = vld [vmem:[#allocation19_spill] sm:$0xff] }
 0x66b   : > { %v6284_v20 = vmul.f32 %v6220_v12, %v14546_v27  ;;  %v14549_v9 = vmov 0.0   ;;  %v5940_v13 = vsub.f32 %v5532_v53, %v5876_v46  ;;  %v5878_v54 = vmul.f32 6.28125, %v5814_v58 }
 0x66c   : > { %7311 = vmatprep.mubr.f32.mxu0 %v14549_v9  ;;  %8087 = vmatprep.subr.bf16.mxu1 %v8086_v31  ;;  %v6006_v14 = vmul.f32 0.0019353072, %v5814_v58  ;;  %v6332_v18 = vadd.f32 -2.5052108e-08, %v6268_v2  ;;  %v6270_v44 = vmul.f32 %v6206_v39, %v14548_v1  ;;  %v6286_v5 = vmul.f32 %v6222_v10, %v12582_v61 }
 0x66d   : > { %8089 = vmatpush1.bf16.msra.mxu1 %v8088_v34  ;;  %v6348_v52 = vadd.f32 -2.5052108e-08, %v6284_v20  ;;  %v13392_v15 = vsub.f32 %v5940_v13, %v6004_v51  ;;  %v5942_v19 = vsub.f32 %v5621_v33, %v5878_v54  ;;  %v6172_v53 = vmul.f32 -7.6471636e-13, %v14551_v6 }
 0x66e   : > { %v6396_v12 = vmul.f32 %v6332_v18, %v14545_v30  ;;  %v6334_v31 = vadd.f32 -2.5052108e-08, %v6270_v44  ;;  %v6350_v34 = vadd.f32 -2.5052108e-08, %v6286_v5  ;;  %v13400_v46 = vadd.f32 %v7027_v26, %v13262_v49 }
 0x66f   : > { %v6412_v0 = vmul.f32 %v6348_v52, %v14546_v27  ;;  %v13402_v58 = vsub.f32 %v5942_v19, %v6006_v14  ;;  %v6188_v33 = vmul.f32 -7.6471636e-13, %v12730_v40  ;;  %v6236_v51 = vadd.f32 1.6059044e-10, %v6172_v53  ;;  %v14553_v19 = vld [vmem:[#allocation15_spill] sm:$0xff] }
 0x670   : > { %7933 = vmatmul.mubr.msk.f32.vlgmr.msra.gmra.mrb[96].mxu1 %vm2674_vm2, %v13376_v36  ;;  %v6460_v2 = vadd.f32 2.7557319e-06, %v6396_v12  ;;  %v6398_v39 = vmul.f32 %v6334_v31, %v14548_v1  ;;  %v6414_v10 = vmul.f32 %v6350_v34, %v12582_v61  ;;  %v13411_v13 = vadd.f32 %v7029_v25, %v13291_v21 }
 0x671   : > { %14552 = vst [vmem:[#allocation46_spill] sm:$0xff] %v13402_v58  ;;  %v6476_v20 = vadd.f32 2.7557319e-06, %v6412_v0  ;;  %7382 = vmatprep.mubr.f32.mxu1 %v14549_v9  ;;  %v13415_v49 = vmul.f32 %v13392_v15, %v13392_v15  ;;  %v6252_v26 = vadd.f32 1.6059044e-10, %v6188_v33  ;;  %v6300_v54 = vmul.f32 %v6236_v51, %v14551_v6 }
 0x672   : > { %v6524_v14 = vmul.f32 %v6460_v2, %v14545_v30  ;;  %v6462_v52 = vadd.f32 2.7557319e-06, %v6398_v39  ;;  %v6478_v44 = vadd.f32 2.7557319e-06, %v6414_v10  ;;  %v13422_v5 = vmul.f32 %v13402_v58, %v13402_v58 }
 0x673   : > { %v6540_v18 = vmul.f32 %v6476_v20, %v14546_v27  ;;  %v6316_v21 = vmul.f32 %v6252_v26, %v12730_v40  ;;  %v6364_v25 = vadd.f32 -2.5052108e-08, %v6300_v54  ;;  %v6174_v53 = vmul.f32 -7.6471636e-13, %v14553_v19 }
 0x674   : > { %v6588_v12 = vadd.f32 -0.0001984127, %v6524_v14  ;;  %v6526_v31 = vmul.f32 %v6462_v52, %v14548_v1  ;;  %v6542_v34 = vmul.f32 %v6478_v44, %v12582_v61  ;;  %v6190_v2 = vmul.f32 -7.6471636e-13, %v12747_v7 }
 0x675   : > { %v6604_v0 = vadd.f32 -0.0001984127, %v6540_v18  ;;  %v6380_v33 = vadd.f32 -2.5052108e-08, %v6316_v21  ;;  %v6428_v51 = vmul.f32 %v6364_v25, %v14551_v6  ;;  %v6238_v20 = vadd.f32 1.6059044e-10, %v6174_v53 }
 0x676   : > { %v6652_v39 = vmul.f32 %v6588_v12, %v14545_v30  ;;  %v6590_v26 = vadd.f32 -0.0001984127, %v6526_v31  ;;  %v6606_v54 = vadd.f32 -0.0001984127, %v6542_v34  ;;  %v6254_v18 = vadd.f32 1.6059044e-10, %v6190_v2 }
 0x677   : > { %v6668_v10 = vmul.f32 %v6604_v0, %v14546_v27  ;;  %v6444_v47 = vmul.f32 %v6380_v33, %v12730_v40  ;;  %v6492_v14 = vadd.f32 2.7557319e-06, %v6428_v51  ;;  %v6302_v52 = vmul.f32 %v6238_v20, %v14553_v19 }
 0x678   : > { %v6716_v17 = vadd.f32 0.008333334, %v6652_v39  ;;  %v6654_v21 = vmul.f32 %v6590_v26, %v14548_v1  ;;  %v6670_v25 = vmul.f32 %v6606_v54, %v12582_v61  ;;  %v6318_v12 = vmul.f32 %v6254_v18, %v12747_v7 }
 0x679   : > { %v6732_v44 = vadd.f32 0.008333334, %v6668_v10  ;;  %v6508_v29 = vadd.f32 2.7557319e-06, %v6444_v47  ;;  %v6556_v53 = vmul.f32 %v6492_v14, %v14551_v6  ;;  %v6366_v0 = vadd.f32 -2.5052108e-08, %v6302_v52 }
 0x67a   : > { %v6780_v31 = vmul.f32 %v6716_v17, %v14545_v30  ;;  %v6718_v33 = vadd.f32 0.008333334, %v6654_v21  ;;  %v6734_v51 = vadd.f32 0.008333334, %v6670_v25  ;;  %v6382_v39 = vadd.f32 -2.5052108e-08, %v6318_v12 }
 0x67b   : > { %v6796_v34 = vmul.f32 %v6732_v44, %v14546_v27  ;;  %v6572_v2 = vmul.f32 %v6508_v29, %v12730_v40  ;;  %v6620_v20 = vadd.f32 -0.0001984127, %v6556_v53  ;;  %v6430_v10 = vmul.f32 %v6366_v0, %v14553_v19  ;;  %v14554_v17 = vld [vmem:[#allocation76_spill] sm:$0xff] }
 0x67c   : > { %v6844_v26 = vadd.f32 -0.16666667, %v6780_v31  ;;  %v6782_v47 = vmul.f32 %v6718_v33, %v14548_v1  ;;  %v6798_v14 = vmul.f32 %v6734_v51, %v12582_v61  ;;  %v6446_v30 = vmul.f32 %v6382_v39, %v12747_v7  ;;  %v14555_v21 = vld [vmem:[#allocation84_spill] sm:$0xff]  ;;  %v14557_v33 = vld [vmem:[#allocation79_spill] sm:$0xff]  ;;  %v14559_v39 = vld [vmem:[#allocation86_spill] sm:$0xff] }
 0x67d   : > { %v6860_v54 = vadd.f32 -0.16666667, %v6796_v34  ;;  %v6636_v18 = vadd.f32 -0.0001984127, %v6572_v2  ;;  %v6684_v52 = vmul.f32 %v6620_v20, %v14551_v6  ;;  %v6494_v27 = vadd.f32 2.7557319e-06, %v6430_v10 }
 0x67e   : > { %v6972_v44 = vmul.f32 %v14554_v17, %v6844_v26  ;;  %v6846_v25 = vadd.f32 -0.16666667, %v6782_v47  ;;  %v6862_v53 = vadd.f32 -0.16666667, %v6798_v14  ;;  %v6510_v31 = vadd.f32 2.7557319e-06, %v6446_v30 }
 0x67f   : > { %v6988_v29 = vmul.f32 %v14555_v21, %v6860_v54  ;;  %v6700_v12 = vmul.f32 %v6636_v18, %v12730_v40  ;;  %v6748_v0 = vadd.f32 0.008333334, %v6684_v52  ;;  %v6558_v1 = vmul.f32 %v6494_v27, %v14553_v19  ;;  %v14556_v34 = vld [vmem:[#allocation60_spill] sm:$0xff]  ;;  %v14560_v18 = vld [vmem:[#allocation75_spill] sm:$0xff]  ;;  %v14561_v30 = vld [vmem:[#allocation81_spill] sm:$0xff] }
 0x680   : > { %v7036_v61 = vadd.f32 %v6972_v44, %v14556_v34  ;;  %v14558_v2 = vld [vmem:[#allocation80_spill] sm:$0xff]  ;;  %v6990_v10 = vmul.f32 %v14559_v39, %v6862_v53  ;;  %v6574_v54 = vmul.f32 %v6510_v31, %v12747_v7  ;;  %v14562_v27 = vld [vmem:[#allocation89_spill] sm:$0xff]  ;;  %v14564_v34 = vpack.c.bf16 %v12616_v43, %v12594_v28 }
 0x681   : > { %v7052_v51 = vadd.f32 %v6988_v29, %v14557_v33  ;;  %v6974_v20 = vmul.f32 %v14558_v2, %v6846_v25  ;;  %v6764_v58 = vadd.f32 0.008333334, %v6700_v12  ;;  %v6812_v26 = vmul.f32 %v6748_v0, %v14551_v6  ;;  %v14563_v0 = vld [vmem:[#allocation14_spill] sm:$0xff]  ;;  %v14570_v28 = vld [vmem:[#allocation33_spill] sm:$0xff] }
 0x682   : > { %v6622_v47 = vadd.f32 -0.0001984127, %v6558_v1  ;;  %v7054_v17 = vadd.f32 %v6990_v10, %v14561_v30  ;;  %v8096_v44 = vpack.c.bf16 %v12806_v38, %v14562_v27  ;;  %v6638_v25 = vadd.f32 -0.0001984127, %v6574_v54  ;;  %v14567_v10 = vld [vmem:[#allocation34_spill] sm:$0xff] }
 0x683   : > { %v8090_v14 = vpack.c.bf16 %v7052_v51, %v7036_v61  ;;  %v7038_v52 = vadd.f32 %v6974_v20, %v14560_v18  ;;  %v6828_v21 = vmul.f32 %v6764_v58, %v12730_v40  ;;  %v6876_v29 = vadd.f32 -0.16666667, %v6812_v26  ;;  %v14565_v61 = vld [vmem:[#allocation24_spill] sm:$0xff]  ;;  %v14566_v20 = vld [vmem:[#allocation35_spill] sm:$0xff] }
 0x684   : > { %v6686_v53 = vmul.f32 %v6622_v47, %v14553_v19  ;;  %v8104_v6 = vpack.c.bf16 %v12837_v16, %v12777_v37  ;;  %v6144_v31 = vmul.f32 -7.6471636e-13, %v14563_v0  ;;  %v6160_v1 = vmul.f32 -7.6471636e-13, %v12888_v3  ;;  %v14568_v26 = vld [vmem:[#allocation23_spill] sm:$0xff] }
 0x685   : > { %8091 = vmatprep.subr.bf16.mxu0 %v8090_v14  ;;  %v8098_v12 = vpack.c.bf16 %v7054_v17, %v7038_v52  ;;  %v6892_v38 = vadd.f32 -0.16666667, %v6828_v21  ;;  %v7004_v40 = vmul.f32 %v14565_v61, %v6876_v29  ;;  %v6702_v58 = vmul.f32 %v6638_v25, %v12747_v7  ;;  %v14571_v14 = vld [vmem:[#allocation32_spill] sm:$0xff]  ;;  %v14572_v21 = vld [vmem:[#allocation21_spill] sm:$0xff] }
 0x686   : > { %8093 = vmatpush1.bf16.msra.mxu0 %v14564_v34  ;;  %v6750_v33 = vadd.f32 0.008333334, %v6686_v53  ;;  %v6208_v51 = vadd.f32 1.6059044e-10, %v6144_v31  ;;  %v6224_v2 = vadd.f32 1.6059044e-10, %v6160_v1  ;;  %v8108_v54 = vpack.c.bf16 %v14568_v26, %v14567_v10 }
 0x687   : > { %8099 = vmatprep.subr.bf16.mxu1 %v8098_v12  ;;  %v6146_v39 = vmul.f32 -7.6471636e-13, %v14566_v20  ;;  %v14569_v47 = vpack.c.bf16 %v14550_v4, %v12605_v41  ;;  %v7020_v43 = vmul.f32 %v14570_v28, %v6892_v38  ;;  %v7068_v18 = vadd.f32 %v7004_v40, %v14571_v14  ;;  %v14573_v53 = vld [vmem:[#allocation27_spill] sm:$0xff] }
 0x688   : > { %v6766_v52 = vadd.f32 0.008333334, %v6702_v58  ;;  %v6814_v30 = vmul.f32 %v6750_v33, %v14553_v19  ;;  %v6272_v17 = vmul.f32 %v6208_v51, %v14563_v0  ;;  %v6288_v27 = vmul.f32 %v6224_v2, %v12888_v3  ;;  %v14574_v4 = vld [vmem:[#allocation71_spill] sm:$0xff] }
 0x689   : > { %8101 = vmatpush1.bf16.msra.mxu1 %v14569_v47  ;;  %v6162_v29 = vmul.f32 -7.6471636e-13, %v14572_v21  ;;  %v6210_v25 = vadd.f32 1.6059044e-10, %v6146_v39  ;;  %v7084_v12 = vadd.f32 %v7020_v43, %v14573_v53  ;;  %v14575_v1 = vld [vmem:[#allocation59_spill] sm:$0xff]  ;;  %v14577_v47 = vld [vmem:[#allocation73_spill] sm:$0xff] }
 0x68a   : > { %v6830_v31 = vmul.f32 %v6766_v52, %v12747_v7  ;;  %v6878_v41 = vadd.f32 -0.16666667, %v6814_v30  ;;  %v8116_v34 = vpack.c.bf16 %v14575_v1, %v14574_v4  ;;  %v6336_v38 = vadd.f32 -2.5052108e-08, %v6272_v17  ;;  %v14576_v51 = vld [vmem:[#allocation91_spill] sm:$0xff]  ;;  %v14578_v52 = vld [vmem:[#allocation50_spill] sm:$0xff] }
 0x68b   : > { %v6352_v61 = vadd.f32 -2.5052108e-08, %v6288_v27  ;;  %v6226_v40 = vadd.f32 1.6059044e-10, %v6162_v29  ;;  %v6274_v19 = vmul.f32 %v6210_v25, %v14566_v20  ;;  %v8094_v58 = vpack.c.bf16 %v7084_v12, %v7068_v18  ;;  %v14579_v17 = vld [vmem:[#allocation97_spill] sm:$0xff]  ;;  %v14580_v29 = vld [vmem:[#allocation52_spill] sm:$0xff] }
 0x68c   : > { %v6894_v33 = vadd.f32 -0.16666667, %v6830_v31  ;;  %v7006_v2 = vmul.f32 %v14576_v51, %v6878_v41  ;;  %v6176_v28 = vmul.f32 -7.6471636e-13, %v14577_v47  ;;  %v6400_v39 = vmul.f32 %v6336_v38, %v14563_v0  ;;  %v14581_v38 = vld [vmem:[#allocation95_spill] sm:$0xff] }
 0x68d   : > { %v6416_v43 = vmul.f32 %v6352_v61, %v12888_v3  ;;  %v6290_v7 = vmul.f32 %v6226_v40, %v14572_v21  ;;  %v6338_v14 = vadd.f32 -2.5052108e-08, %v6274_v19  ;;  %8095 = vmatprep.subr.bf16.mxu0 %v8094_v58  ;;  %v6192_v25 = vmul.f32 -7.6471636e-13, %v14580_v29  ;;  %v14582_v19 = vld [vmem:[#allocation47_spill] sm:$0xff] }
 0x68e   : > { %v7022_v30 = vmul.f32 %v14578_v52, %v6894_v33  ;;  %v7070_v27 = vadd.f32 %v7006_v2, %v14579_v17  ;;  %v6240_v18 = vadd.f32 1.6059044e-10, %v6176_v28  ;;  %8097 = vmatpush1.bf16.msra.mxu0 %v8096_v44  ;;  %v6464_v53 = vadd.f32 2.7557319e-06, %v6400_v39 }
 0x68f   : > { %v6480_v12 = vadd.f32 2.7557319e-06, %v6416_v43  ;;  %v6354_v31 = vadd.f32 -2.5052108e-08, %v6290_v7  ;;  %v6402_v41 = vmul.f32 %v6338_v14, %v14566_v20  ;;  %v6256_v61 = vadd.f32 1.6059044e-10, %v6192_v25 }
 0x690   : > { %v7086_v51 = vadd.f32 %v7022_v30, %v14581_v38  ;;  %v6304_v40 = vmul.f32 %v6240_v18, %v14577_v47  ;;  %v6178_v58 = vmul.f32 -7.6471636e-13, %v14582_v19  ;;  %v6528_v33 = vmul.f32 %v6464_v53, %v14563_v0  ;;  %v14583_v7 = vld [vmem:[#allocation82_spill] sm:$0xff] }
 0x691   : > { %v6544_v2 = vmul.f32 %v6480_v12, %v12888_v3  ;;  %v6418_v52 = vmul.f32 %v6354_v31, %v14572_v21  ;;  %v6466_v28 = vadd.f32 2.7557319e-06, %v6402_v41  ;;  %7934 = vmatmul.mubr.msk.f32.vlgmr.msra.gmra.mrb[98].mxu0 %vm2674_vm2, %v13376_v36  ;;  %v6320_v39 = vmul.f32 %v6256_v61, %v14580_v29 }
 0x692   : > { %v8102_v44 = vpack.c.bf16 %v7086_v51, %v7070_v27  ;;  %v6368_v43 = vadd.f32 -2.5052108e-08, %v6304_v40  ;;  %v6194_v14 = vmul.f32 -7.6471636e-13, %v14583_v7  ;;  %v6592_v30 = vadd.f32 -0.0001984127, %v6528_v33  ;;  %7453 = vmatprep.mubr.f32.mxu0 %v14549_v9 }
 0x693   : > { %v6608_v17 = vadd.f32 -0.0001984127, %v6544_v2  ;;  %v6482_v25 = vadd.f32 2.7557319e-06, %v6418_v52  ;;  %v6530_v18 = vmul.f32 %v6466_v28, %v14566_v20  ;;  %v6384_v53 = vadd.f32 -2.5052108e-08, %v6320_v39 }
 0x694   : > { %8103 = vmatprep.subr.bf16.mxu1 %v8102_v44  ;;  %v6432_v12 = vmul.f32 %v6368_v43, %v14577_v47  ;;  %v6242_v27 = vadd.f32 1.6059044e-10, %v6178_v58  ;;  %v6258_v31 = vadd.f32 1.6059044e-10, %v6194_v14  ;;  %v6656_v41 = vmul.f32 %v6592_v30, %v14563_v0 }
 0x695   : > { %8105 = vmatpush1.bf16.msra.mxu1 %v8104_v6  ;;  %v6672_v38 = vmul.f32 %v6608_v17, %v12888_v3  ;;  %v6546_v51 = vmul.f32 %v6482_v25, %v14572_v21  ;;  %v6594_v61 = vadd.f32 -0.0001984127, %v6530_v18  ;;  %v6448_v40 = vmul.f32 %v6384_v53, %v14580_v29 }
 0x696   : > { %v6496_v33 = vadd.f32 2.7557319e-06, %v6432_v12  ;;  %v6306_v2 = vmul.f32 %v6242_v27, %v14582_v19  ;;  %v6322_v52 = vmul.f32 %v6258_v31, %v14583_v7  ;;  %v6720_v58 = vadd.f32 0.008333334, %v6656_v41 }
 0x697   : > { %v6736_v28 = vadd.f32 0.008333334, %v6672_v38  ;;  %v6610_v44 = vadd.f32 -0.0001984127, %v6546_v51  ;;  %v6658_v37 = vmul.f32 %v6594_v61, %v14566_v20  ;;  %v6512_v16 = vadd.f32 2.7557319e-06, %v6448_v40 }
 0x698   : > { %7935 = vmatmul.mubr.msk.f32.vlgmr.msra.gmra.mrb[98].mxu1 %vm2674_vm2, %v13376_v36  ;;  %v6560_v6 = vmul.f32 %v6496_v33, %v14577_v47  ;;  %v6370_v39 = vadd.f32 -2.5052108e-08, %v6306_v2  ;;  %v6386_v43 = vadd.f32 -2.5052108e-08, %v6322_v52  ;;  %v6784_v14 = vmul.f32 %v6720_v58, %v14563_v0  ;;  %v14584_v33 = vld [vmem:[#allocation68_spill] sm:$0xff] }
 0x699   : > { %v6800_v30 = vmul.f32 %v6736_v28, %v12888_v3  ;;  %v6674_v17 = vmul.f32 %v6610_v44, %v14572_v21  ;;  %v6722_v25 = vadd.f32 0.008333334, %v6658_v37  ;;  %7524 = vmatprep.mubr.f32.mxu1 %v14549_v9  ;;  %v6576_v18 = vmul.f32 %v6512_v16, %v14580_v29  ;;  %v14585_v52 = vld [vmem:[#allocation20_spill] sm:$0xff] }
 0x69a   : > { %v6624_v53 = vadd.f32 -0.0001984127, %v6560_v6  ;;  %v6434_v12 = vmul.f32 %v6370_v39, %v14582_v19  ;;  %v6450_v27 = vmul.f32 %v6386_v43, %v14583_v7  ;;  %v6848_v31 = vadd.f32 -0.16666667, %v6784_v14  ;;  %v14587_v14 = vld [vmem:[#allocation30_spill] sm:$0xff] }
 0x69b   : > { %v6864_v41 = vadd.f32 -0.16666667, %v6800_v30  ;;  %v6738_v38 = vadd.f32 0.008333334, %v6674_v17  ;;  %v6786_v51 = vmul.f32 %v6722_v25, %v14566_v20  ;;  %v6640_v0 = vadd.f32 -0.0001984127, %v6576_v18 }
 0x69c   : > { %v6688_v3 = vmul.f32 %v6624_v53, %v14577_v47  ;;  %v6498_v61 = vadd.f32 2.7557319e-06, %v6434_v12  ;;  %v6514_v40 = vadd.f32 2.7557319e-06, %v6450_v27  ;;  %v6976_v2 = vmul.f32 %v14584_v33, %v6848_v31  ;;  %v14586_v20 = vld [vmem:[#allocation42_spill] sm:$0xff]  ;;  %v14588_v25 = vld [vmem:[#allocation96_spill] sm:$0xff] }
 0x69d   : > { %v6992_v58 = vmul.f32 %v14585_v52, %v6864_v41  ;;  %v6802_v28 = vmul.f32 %v6738_v38, %v14572_v21  ;;  %v6850_v44 = vadd.f32 -0.16666667, %v6786_v51  ;;  %v6704_v37 = vmul.f32 %v6640_v0, %v14580_v29  ;;  %v14589_v41 = vld [vmem:[#allocation48_spill] sm:$0xff]  ;;  %v14590_v51 = vld [vmem:[#allocation77_spill] sm:$0xff] }
 0x69e   : > { %v6752_v16 = vadd.f32 0.008333334, %v6688_v3  ;;  %v6562_v6 = vmul.f32 %v6498_v61, %v14582_v19  ;;  %v6578_v39 = vmul.f32 %v6514_v40, %v14583_v7  ;;  %v7040_v43 = vadd.f32 %v6976_v2, %v14586_v20  ;;  %v14591_v3 = vld [vmem:[#allocation85_spill] sm:$0xff]  ;;  %v14592_v61 = vld [vmem:[#allocation99_spill] sm:$0xff] }
 0x69f   : > { %v7056_v30 = vadd.f32 %v6992_v58, %v14587_v14  ;;  %v6866_v17 = vadd.f32 -0.16666667, %v6802_v28  ;;  %v6978_v18 = vmul.f32 %v14588_v25, %v6850_v44  ;;  %v6768_v53 = vadd.f32 0.008333334, %v6704_v37  ;;  %v14593_v28 = vld [vmem:[#allocation17_spill] sm:$0xff]  ;;  %v14594_v44 = vld [vmem:[#allocation18_spill] sm:$0xff] }
 0x6a0   : > { %v6816_v12 = vmul.f32 %v6752_v16, %v14577_v47  ;;  %v6626_v27 = vadd.f32 -0.0001984127, %v6562_v6  ;;  %v6642_v21 = vadd.f32 -0.0001984127, %v6578_v39  ;;  %v8112_v40 = vpack.c.bf16 %v14592_v61, %v14591_v3  ;;  %v14595_v39 = vld [vmem:[#allocation28_spill] sm:$0xff] }
 0x6a1   : > { %v8106_v31 = vpack.c.bf16 %v7056_v30, %v7040_v43  ;;  %v6994_v38 = vmul.f32 %v14589_v41, %v6866_v17  ;;  %v7042_v0 = vadd.f32 %v6978_v18, %v14590_v51  ;;  %v6832_v33 = vmul.f32 %v6768_v53, %v14580_v29  ;;  %v14596_v53 = vld [vmem:[#allocation36_spill] sm:$0xff] }
 0x6a2   : > { %v6880_v2 = vadd.f32 -0.16666667, %v6816_v12  ;;  %v6690_v52 = vmul.f32 %v6626_v27, %v14582_v19  ;;  %v6706_v58 = vmul.f32 %v6642_v21, %v14583_v7  ;;  %v8120_v37 = vpack.c.bf16 %v13155_v63, %v14594_v44  ;;  %v14597_v12 = vld [vmem:[#allocation39_spill] sm:$0xff] }
 0x6a3   : > { %8107 = vmatprep.subr.bf16.mxu0 %v8106_v31  ;;  %v7058_v47 = vadd.f32 %v6994_v38, %v14593_v28  ;;  %v6148_v16 = vmul.f32 -7.6471636e-13, %v13097_v35  ;;  %v6164_v6 = vmul.f32 -7.6471636e-13, %v13209_v22  ;;  %v6896_v29 = vadd.f32 -0.16666667, %v6832_v33 }
 0x6a4   : > { %8109 = vmatpush1.bf16.msra.mxu0 %v8108_v54  ;;  %v7008_v20 = vmul.f32 %v14595_v39, %v6880_v2  ;;  %v6754_v43 = vadd.f32 0.008333334, %v6690_v52  ;;  %v6770_v14 = vadd.f32 0.008333334, %v6706_v58  ;;  %v6150_v18 = vmul.f32 -7.6471636e-13, %v13115_v57 }
 0x6a5   : > { %v8114_v30 = vpack.c.bf16 %v7058_v47, %v7042_v0  ;;  %v6212_v17 = vadd.f32 1.6059044e-10, %v6148_v16  ;;  %v6228_v25 = vadd.f32 1.6059044e-10, %v6164_v6  ;;  %v7024_v63 = vmul.f32 %v14596_v53, %v6896_v29  ;;  %v14598_v38 = vld [vmem:[#allocation37_spill] sm:$0xff]  ;;  %v14599_v58 = vld [vmem:[#allocation40_spill] sm:$0xff] }
 0x6a6   : > { %v7072_v27 = vadd.f32 %v7008_v20, %v14597_v12  ;;  %v6818_v21 = vmul.f32 %v6754_v43, %v14582_v19  ;;  %v6834_v31 = vmul.f32 %v6770_v14, %v14583_v7  ;;  %v6166_v54 = vmul.f32 -7.6471636e-13, %v13239_v56  ;;  %v14600_v47 = vld [vmem:[#allocation94_spill] sm:$0xff]  ;;  %v14601_v29 = vld [vmem:[#allocation31_spill] sm:$0xff]  ;;  %v14602_v20 = vld [vmem:[#allocation41_spill] sm:$0xff] }
 0x6a7   : > { %8115 = vmatprep.subr.bf16.mxu1 %v8114_v30  ;;  %v6276_v10 = vmul.f32 %v6212_v17, %v13097_v35  ;;  %v6292_v26 = vmul.f32 %v6228_v25, %v13209_v22  ;;  %v6214_v41 = vadd.f32 1.6059044e-10, %v6150_v18  ;;  %v7088_v51 = vadd.f32 %v7024_v63, %v14598_v38 }
 0x6a8   : > { %8117 = vmatpush1.bf16.msra.mxu1 %v8116_v34  ;;  %v6882_v0 = vadd.f32 -0.16666667, %v6818_v21  ;;  %v6898_v3 = vadd.f32 -0.16666667, %v6834_v31  ;;  %v8124_v19 = vpack.c.bf16 %v13254_v8, %v13196_v55  ;;  %v6230_v33 = vadd.f32 1.6059044e-10, %v6166_v54 }
 0x6a9   : > { %v6340_v7 = vadd.f32 -2.5052108e-08, %v6276_v10  ;;  %v6356_v61 = vadd.f32 -2.5052108e-08, %v6292_v26  ;;  %v6278_v2 = vmul.f32 %v6214_v41, %v13115_v57  ;;  %v8110_v52 = vpack.c.bf16 %v7088_v51, %v7072_v27  ;;  %v14610_v55 = vld [vmem:[#allocation61_spill] sm:$0xff] }
 0x6aa   : > { %v7010_v28 = vmul.f32 %v14599_v58, %v6882_v0  ;;  %v7026_v44 = vmul.f32 %v14600_v47, %v6898_v3  ;;  %v8132_v4 = vpack.c.bf16 %v13265_v24, %v13202_v45  ;;  %v6294_v16 = vmul.f32 %v6230_v33, %v13239_v56  ;;  %v7100_v45 = vpop.permute.xlu0 %7099 }
 0x6ab   : > { %v6404_v1 = vmul.f32 %v6340_v7, %v13097_v35  ;;  %v6420_v34 = vmul.f32 %v6356_v61, %v13209_v22  ;;  %v6342_v6 = vadd.f32 -2.5052108e-08, %v6278_v2  ;;  %8111 = vmatprep.subr.bf16.mxu0 %v8110_v52  ;;  %v6180_v14 = vmul.f32 -7.6471636e-13, %v13283_v23 }
 0x6ac   : > { %v7074_v39 = vadd.f32 %v7010_v28, %v14601_v29  ;;  %v7090_v43 = vadd.f32 %v7026_v44, %v14602_v20  ;;  %v6196_v30 = vmul.f32 -7.6471636e-13, %v13415_v49  ;;  %8113 = vmatpush1.bf16.msra.mxu0 %v8112_v40  ;;  %v6358_v18 = vadd.f32 -2.5052108e-08, %v6294_v16 }
 0x6ad   : > { %v6468_v17 = vadd.f32 2.7557319e-06, %v6404_v1  ;;  %v6484_v25 = vadd.f32 2.7557319e-06, %v6420_v34  ;;  %v6406_v53 = vmul.f32 %v6342_v6, %v13115_v57  ;;  %v6244_v12 = vadd.f32 1.6059044e-10, %v6180_v14 }
 0x6ae   : > { %v8118_v63 = vpack.c.bf16 %v7090_v43, %v7074_v39  ;;  %v6260_v27 = vadd.f32 1.6059044e-10, %v6196_v30  ;;  %v6182_v21 = vmul.f32 -7.6471636e-13, %v13288_v60  ;;  %v6422_v26 = vmul.f32 %v6358_v18, %v13239_v56 }
 0x6af   : > { %v6532_v31 = vmul.f32 %v6468_v17, %v13097_v35  ;;  %v6548_v10 = vmul.f32 %v6484_v25, %v13209_v22  ;;  %v6470_v54 = vadd.f32 2.7557319e-06, %v6406_v53  ;;  %7936 = vmatmul.mubr.msk.f32.vlgmr.msra.gmra.mrb[100].mxu0 %vm2674_vm2, %v13376_v36  ;;  %v6308_v40 = vmul.f32 %v6244_v12, %v13283_v23 }
 0x6b0   : > { %8119 = vmatprep.subr.bf16.mxu1 %v8118_v63  ;;  %v6324_v41 = vmul.f32 %v6260_v27, %v13415_v49  ;;  %v6198_v38 = vmul.f32 -7.6471636e-13, %v13422_v5  ;;  %v6246_v51 = vadd.f32 1.6059044e-10, %v6182_v21  ;;  %v6486_v7 = vadd.f32 2.7557319e-06, %v6422_v26  ;;  %7595 = vmatprep.mubr.f32.mxu0 %v14549_v9 }
 0x6b1   : > { %8121 = vmatpush1.bf16.msra.mxu1 %v8120_v37  ;;  %v6596_v0 = vadd.f32 -0.0001984127, %v6532_v31  ;;  %v6612_v3 = vadd.f32 -0.0001984127, %v6548_v10  ;;  %v6534_v61 = vmul.f32 %v6470_v54, %v13115_v57  ;;  %v6372_v33 = vadd.f32 -2.5052108e-08, %v6308_v40 }
 0x6b2   : > { %v6388_v2 = vadd.f32 -2.5052108e-08, %v6324_v41  ;;  %v6262_v52 = vadd.f32 1.6059044e-10, %v6198_v38  ;;  %v6310_v58 = vmul.f32 %v6246_v51, %v13288_v60  ;;  %v6550_v44 = vmul.f32 %v6486_v7, %v13239_v56 }
 0x6b3   : > { %v6660_v28 = vmul.f32 %v6596_v0, %v13097_v35  ;;  %v6676_v47 = vmul.f32 %v6612_v3, %v13209_v22  ;;  %v6598_v1 = vadd.f32 -0.0001984127, %v6534_v61  ;;  %v6436_v37 = vmul.f32 %v6372_v33, %v13283_v23 }
 0x6b4   : > { %7937 = vmatmul.mubr.msk.f32.vlgmr.msra.gmra.mrb[100].mxu1 %vm2674_vm2, %v13376_v36  ;;  %v6452_v34 = vmul.f32 %v6388_v2, %v13415_v49  ;;  %v6326_v16 = vmul.f32 %v6262_v52, %v13422_v5  ;;  %v6374_v6 = vadd.f32 -2.5052108e-08, %v6310_v58  ;;  %v6614_v20 = vadd.f32 -0.0001984127, %v6550_v44 }
 0x6b5   : > { %v6724_v29 = vadd.f32 0.008333334, %v6660_v28  ;;  %v6740_v39 = vadd.f32 0.008333334, %v6676_v47  ;;  %v6662_v43 = vmul.f32 %v6598_v1, %v13115_v57  ;;  %7666 = vmatprep.mubr.f32.mxu1 %v14549_v9  ;;  %v6500_v14 = vadd.f32 2.7557319e-06, %v6436_v37 }
 0x6b6   : > { %v6516_v30 = vadd.f32 2.7557319e-06, %v6452_v34  ;;  %v6390_v17 = vadd.f32 -2.5052108e-08, %v6326_v16  ;;  %v6438_v25 = vmul.f32 %v6374_v6, %v13288_v60  ;;  %v6678_v63 = vmul.f32 %v6614_v20, %v13239_v56  ;;  %v14603_v47 = vld [vmem:[#allocation58_spill] sm:$0xff]  ;;  %v14605_v6 = vld [vmem:[#allocation69_spill] sm:$0xff] }
 0x6b7   : > { %v6788_v18 = vmul.f32 %v6724_v29, %v13097_v35  ;;  %v6804_v53 = vmul.f32 %v6740_v39, %v13209_v22  ;;  %v6726_v12 = vadd.f32 0.008333334, %v6662_v43  ;;  %v6564_v27 = vmul.f32 %v6500_v14, %v13283_v23  ;;  %v14604_v37 = vld [vmem:[#allocation38_spill] sm:$0xff] }
 0x6b8   : > { %v6580_v21 = vmul.f32 %v6516_v30, %v13415_v49  ;;  %v6454_v31 = vmul.f32 %v6390_v17, %v13422_v5  ;;  %v6502_v10 = vadd.f32 2.7557319e-06, %v6438_v25  ;;  %v6742_v54 = vadd.f32 0.008333334, %v6678_v63  ;;  %v14606_v30 = vld [vmem:[#allocation90_spill] sm:$0xff]  ;;  %v14608_v63 = vld [vmem:[#allocation65_spill] sm:$0xff] }
 0x6b9   : > { %v6852_v9 = vadd.f32 -0.16666667, %v6788_v18  ;;  %v6868_v26 = vadd.f32 -0.16666667, %v6804_v53  ;;  %v6790_v40 = vmul.f32 %v6726_v12, %v13115_v57  ;;  %v6628_v41 = vadd.f32 -0.0001984127, %v6564_v27 }
 0x6ba   : > { %v6644_v38 = vadd.f32 -0.0001984127, %v6580_v21  ;;  %v6518_v35 = vadd.f32 2.7557319e-06, %v6454_v31  ;;  %v6566_v22 = vmul.f32 %v6502_v10, %v13288_v60  ;;  %v6806_v3 = vmul.f32 %v6742_v54, %v13239_v56 }
 0x6bb   : > { %v6980_v51 = vmul.f32 %v13141_v62, %v6852_v9  ;;  %v6996_v0 = vmul.f32 %v13232_v11, %v6868_v26  ;;  %v6854_v7 = vadd.f32 -0.16666667, %v6790_v40  ;;  %v6692_v61 = vmul.f32 %v6628_v41, %v13283_v23 }
 0x6bc   : > { %v6708_v33 = vmul.f32 %v6644_v38, %v13415_v49  ;;  %v6582_v2 = vmul.f32 %v6518_v35, %v13422_v5  ;;  %v6630_v52 = vadd.f32 -0.0001984127, %v6566_v22  ;;  %v6870_v28 = vadd.f32 -0.16666667, %v6806_v3 }
 0x6bd   : > { %v7044_v57 = vadd.f32 %v6980_v51, %v13078_v42  ;;  %v7060_v58 = vadd.f32 %v6996_v0, %v13191_v32  ;;  %v6982_v44 = vmul.f32 %v14603_v47, %v6854_v7  ;;  %v6756_v62 = vadd.f32 0.008333334, %v6692_v61 }
 0x6be   : > { %v6772_v1 = vadd.f32 0.008333334, %v6708_v33  ;;  %v6646_v11 = vadd.f32 -0.0001984127, %v6582_v2  ;;  %v6694_v56 = vmul.f32 %v6630_v52, %v13288_v60  ;;  %v7077_v34 = vadd.f32 %v13358_v48, %v14604_v37  ;;  %v14607_v48 = vld [vmem:[#allocation44_spill] sm:$0xff] }
 0x6bf   : > { %v8122_v16 = vpack.c.bf16 %v7060_v58, %v7044_v57  ;;  %v6998_v29 = vmul.f32 %v14605_v6, %v6870_v28  ;;  %v8128_v39 = vpack.c.bf16 %v13400_v46, %v13364_v50  ;;  %v6820_v42 = vmul.f32 %v6756_v62, %v13283_v23 }
 0x6c0   : > { %v6836_v32 = vmul.f32 %v6772_v1, %v13415_v49  ;;  %v6710_v20 = vmul.f32 %v6646_v11, %v13422_v5  ;;  %v6758_v43 = vadd.f32 0.008333334, %v6694_v56  ;;  %v6964_v14 = vmul.f32 %v13415_v49, %v13392_v15 }
 0x6c1   : > { %8123 = vmatprep.subr.bf16.mxu0 %v8122_v16  ;;  %v7046_v17 = vadd.f32 %v6982_v44, %v14606_v30  ;;  %v7062_v25 = vadd.f32 %v6998_v29, %v14607_v48  ;;  %v8136_v18 = vpack.c.bf16 %v13411_v13, %v7077_v34  ;;  %v6884_v23 = vadd.f32 -0.16666667, %v6820_v42  ;;  %v14609_v13 = vld [vmem:[#allocation46_spill] sm:$0xff] }
 0x6c2   : > { %8125 = vmatpush1.bf16.msra.mxu0 %v8124_v19  ;;  %v6900_v50 = vadd.f32 -0.16666667, %v6836_v32  ;;  %v6774_v46 = vadd.f32 0.008333334, %v6710_v20  ;;  %v6822_v53 = vmul.f32 %v6758_v43, %v13288_v60  ;;  %v6950_v12 = vmul.f32 %v13288_v60, %v14608_v63 }
 0x6c3   : > { %v8130_v49 = vpack.c.bf16 %v7062_v25, %v7046_v17  ;;  %v7012_v27 = vmul.f32 %v13343_v59, %v6884_v23  ;;  %v6966_v9 = vmul.f32 %v13422_v5, %v14609_v13 }
 0x6c4   : > { %v7028_v21 = vmul.f32 %v6964_v14, %v6900_v50  ;;  %v6838_v31 = vmul.f32 %v6774_v46, %v13422_v5  ;;  %v6886_v10 = vadd.f32 -0.16666667, %v6822_v53 }
 0x6c5   : > { %8131 = vmatprep.subr.bf16.mxu1 %v8130_v49  ;;  %v7076_v8 = vadd.f32 %v7012_v27, %v14610_v55 }
 0x6c6   : > { %8133 = vmatpush1.bf16.msra.mxu1 %v8132_v4  ;;  %v7092_v60 = vadd.f32 %v7028_v21, %v13392_v15  ;;  %v6902_v19 = vadd.f32 -0.16666667, %v6838_v31  ;;  %v7014_v59 = vmul.f32 %v6950_v12, %v6886_v10 }
 0x6c8   : > { %v8126_v26 = vpack.c.bf16 %v7092_v60, %v7076_v8  ;;  %v7030_v54 = vmul.f32 %v6966_v9, %v6902_v19  ;;  %v7078_v40 = vadd.f32 %v7014_v59, %v14608_v63 }
 0x6ca   : > { %8127 = vmatprep.subr.bf16.mxu0 %v8126_v26  ;;  %v7094_v5 = vadd.f32 %v7030_v54, %v14609_v13 }
 0x6cb   : > { %8129 = vmatpush1.bf16.msra.mxu0 %v8128_v39 }
 0x6cc   : > { %v8134_v41 = vpack.c.bf16 %v7094_v5, %v7078_v40 }
 0x6ce   : > { %8135 = vmatprep.subr.bf16.mxu1 %v8134_v41  ;;  %7938 = vmatmul.mubr.msk.f32.vlgmr.msra.gmra.mrb[102].mxu0 %vm2674_vm2, %v13376_v36 }
 0x6cf   : > { %8137 = vmatpush1.bf16.msra.mxu1 %v8136_v18 }
 0x6d2   : > { %7939 = vmatmul.mubr.msk.f32.vlgmr.msra.gmra.mrb[102].mxu1 %vm2674_vm2, %v13376_v36 }
 0x73c   : > { %v7171_v24 = vpop.f32.mrb[96].mxu0 }
 0x73d   : > { %v7172_v15 = vadd.f32 %v7171_v24, %v7100_v45  ;;  %v7173_v4 = vpop.f32.mrb[97].mxu0 }
 0x73e   : > { %v7174_v38 = vadd.f32 %v7173_v4, %v7100_v45 }
 0x740   : > { %v7689_v35 = vcombine.low %v7172_v15, %v7174_v38 }
 0x742   : > { %7705 = vst [vmem:[%s13663_s11] sm:$0x77] %v7689_v35 }
 0x743   : > { %v7242_v22 = vpop.f32.mrb[96].mxu1 }
 0x744   : > { %v7243_v51 = vadd.f32 %v7242_v22, %v7100_v45  ;;  %v7244_v0 = vpop.f32.mrb[97].mxu1 }
 0x745   : > { %v7245_v36 = vadd.f32 %v7244_v0, %v7100_v45 }
 0x747   : > { %v7690_v3 = vcombine.low %v7243_v51, %v7245_v36 }
 0x749   : > { %7706 = vst [vmem:[%s13663_s11 + $0x8] sm:$0x77] %v7690_v3 }
 0x764   : > { %v7313_v7 = vpop.f32.mrb[98].mxu0 }
 0x765   : > { %v7314_v61 = vadd.f32 %v7313_v7, %v7100_v45  ;;  %v7315_v33 = vpop.f32.mrb[99].mxu0 }
 0x766   : > { %v7316_v2 = vadd.f32 %v7315_v33, %v7100_v45 }
 0x768   : > { %v7691_v52 = vcombine.low %v7314_v61, %v7316_v2 }
 0x76a   : > { %7707 = vst [vmem:[%s13663_s11 + $0x10] sm:$0x77] %v7691_v52 }
 0x76b   : > { %v7384_v57 = vpop.f32.mrb[98].mxu1 }
 0x76c   : > { %v7385_v58 = vadd.f32 %v7384_v57, %v7100_v45  ;;  %v7386_v28 = vpop.f32.mrb[99].mxu1 }
 0x76d   : > { %v7387_v47 = vadd.f32 %v7386_v28, %v7100_v45 }
 0x76f   : > { %v7692_v44 = vcombine.low %v7385_v58, %v7387_v47 }
 0x771   : > { %7708 = vst [vmem:[%s13663_s11 + $0x18] sm:$0x77] %v7692_v44 }
 0x782   : > { %v7455_v62 = vpop.f32.mrb[100].mxu0 }
 0x783   : > { %v7456_v1 = vadd.f32 %v7455_v62, %v7100_v45  ;;  %v7457_v11 = vpop.f32.mrb[101].mxu0 }
 0x784   : > { %v7458_v56 = vadd.f32 %v7457_v11, %v7100_v45 }
 0x786   : > { %v7693_v34 = vcombine.low %v7456_v1, %v7458_v56 }
 0x787   : > { %v7526_v37 = vpop.f32.mrb[100].mxu1 }
 0x788   : > { %v7527_v16 = vadd.f32 %v7526_v37, %v7100_v45  ;;  %v7528_v6 = vpop.f32.mrb[101].mxu1  ;;  %7709 = vst [vmem:[%s13663_s11 + $0x20] sm:$0x77] %v7693_v34 }
 0x789   : > { %v7529_v29 = vadd.f32 %v7528_v6, %v7100_v45 }
 0x78b   : > { %v7694_v39 = vcombine.low %v7527_v16, %v7529_v29 }
 0x78d   : > { %7710 = vst [vmem:[%s13663_s11 + $0x28] sm:$0x77] %v7694_v39 }
 0x7a1   : > { %v7597_v42 = vpop.f32.mrb[102].mxu0 }
 0x7a2   : > { %v7598_v32 = vadd.f32 %v7597_v42, %v7100_v45  ;;  %v7599_v20 = vpop.f32.mrb[103].mxu0 }
 0x7a3   : > { %v7600_v43 = vadd.f32 %v7599_v20, %v7100_v45 }
 0x7a5   : > { %v7668_v14 = vpop.f32.mrb[102].mxu1  ;;  %v7695_v30 = vcombine.low %v7598_v32, %v7600_v43 }
 0x7a6   : > { %v7669_v17 = vadd.f32 %v7668_v14, %v7100_v45  ;;  %v7670_v48 = vpop.f32.mrb[103].mxu1 }
 0x7a7   : > { %7711 = vst [vmem:[%s13663_s11 + $0x30] sm:$0x77] %v7695_v30  ;;  %v7671_v25 = vadd.f32 %v7670_v48, %v7100_v45 }
 0x7a9   : > { %v7696_v18 = vcombine.low %v7669_v17, %v7671_v25 }
 0x7ab   : > { %7712 = vst [vmem:[%s13663_s11 + $0x38] sm:$0x77] %v7696_v18 }
 0x7ac   : > { %8281 = shalt.err (!%p8278_p11)
}
 0x7ad   : > { %s8282_s17 = scalar_lea.hbm %s13677_s26, 1024  ;;  %s8286_s25 = scalar_lea.hbm %s13731_s9, 2048 }
 0x7ae   : > { %p8283_p13 = scmp.ne.s32.totalorder %s13677_s26, %s8282_s17  ;;  %p8287_p6 = scmp.lt.u32.totalorder %s13677_s26, %s13731_s9 }
 0x7af   : > { %p8288_p9 = scmp.lt.u32.totalorder %s8286_s25, %s8282_s17  ;;  %p8290_p12 = scmp.lt.u32.totalorder %s8282_s17, %s13677_s26 }
 0x7b0   : > { %p8284_p5 = pnand %p8283_p13, %p14611_p1 }
 0x7b1   : > { %p8289_p10 = por %p8288_p9, %p8287_p6 }
 0x7b2   : > { %p8285_p0 = pneg %p8284_p5 }
 0x7b3   : > { %p8291_p2 = por %p8290_p12, %p8289_p10 }
 0x7b5   : > { %p8292_p3 = pnand %p8291_p2, %p8285_p0 }
 0x7b7   : > { %8295 = shalt.err (!%p8292_p3)
}
 0x7b8   : > { %8146 = dma.vmem_to_hbm [thread:$0]  (%p14611_p1), %s13679_s18, 1024, %s13677_s26, %s7714_s28  }
 0x7b9 PF: > { %p8163_p4 = scmp.ge.s32.totalorder %s8338_s12, 2  ;;  %s7740_s15 = sand.u32 1, %s8326_s30  }
 0x7ba   : > { %p14612_p7 = scmp.ne.s32.totalorder %s13976_s20, 0  ;;  %s7741_s21 = scalar_lea.sflag [#allocation4], %s7740_s15 }
 0x7bc   : > { %p8156_p8 = pnand %p8163_p4, %p14612_p7 }
 0x7be   : > { %8321 = dma.done.wait (!%p8156_p8), %s7741_s21, 1024  }
 0x7bf   : > { %8323 = vsyncadd (!%p8156_p8), %s7741_s21, 4294966272  ;;  %s14613_s12 = sld [smem:[#allocation12_spill]]  ;;  %s14614_s24 = sld [smem:[#allocation11_spill]] }
 0x7c0   : > { %s14615_s11 = sld [smem:[#allocation13_spill]]  ;;  %s14616_s30 = smov %s8330_s10 }
 0x7c5   : > { %p21_p11 = scmp.ge.s32.totalorder %s14613_s12, 4   ;;  %s14617_s10 = smov %s14614_s24 }
 0x7c7   :  { %23 = sbr.rel (!%p21_p11) target bundleno = 5 (0x5), region = 100 }
 0x7ce   :  { %7746 = vsyncpa [#allocation3], 1 }
 0x7cf   :  { %7748 = vsyncpa [#allocation3 + $0x1], 1 }
 0x7d0   :  { %7749 = vsyncpa [#allocation6], 1 }
 0x7d1   :  { %7750 = vsyncpa [#allocation4], 1 }
 0x7d2   :  { %7752 = vsyncpa [#allocation4 + $0x1], 1 }

</bundles_post_ra>
